<compile_context>
chip_gen: v7x
topology: tpu7x:2x2x1
jax: 0.10.0
libtpu: 0.0.40
codegen_flags: <defaults>
</compile_context>

<pallas_src>
import functools
import math

import jax
import jax.numpy as jnp
from jax.experimental import pallas as pl
from jax.experimental.pallas import tpu as pltpu

EPS = 1e-15
HIDDEN = 32
NUM_CENTERS1 = 2
NUM_CENTERS2 = 16


# ----------------------------------------------------------------------------
# Pallas kernel: forward pass for a tile of Bt graphs
# ----------------------------------------------------------------------------
def gapnet_kernel(adj_ref, xm_ref, w_ref, b_ref, out_ref, *,
                  Bt, N, fin, H, C1, C2, out_ch, seg):
    f32 = jnp.float32
    bf16 = jnp.bfloat16
    HC1 = H + C1
    HC2 = H + C2

    def mm(a, b):
        return jnp.dot(a, b, preferred_element_type=f32)

    def bmm(a, b):          # (Bt,P,K) @ (Bt,K,R) -> (Bt,P,R)
        return jax.lax.dot_general(
            a, b, (((2,), (1,)), ((0,), (0,))), preferred_element_type=f32)

    def bmm_tA(a, b):       # (Bt,K,P)^T @ (Bt,K,R) -> (Bt,P,R)
        return jax.lax.dot_general(
            a, b, (((1,), (1,)), ((0,), (0,))), preferred_element_type=f32)

    def softmax(s):
        m = jnp.max(s, axis=-1, keepdims=True)
        e = jnp.exp(s - m)
        return e / jnp.sum(e, axis=-1, keepdims=True)

    def rsum(a):            # (Bt,P,Q) -> (Bt,1,1)
        return jnp.sum(jnp.sum(a, axis=-1, keepdims=True), axis=-2, keepdims=True)

    def eye(c):
        r = jax.lax.broadcasted_iota(jnp.int32, (c, c), 0)
        cc = jax.lax.broadcasted_iota(jnp.int32, (c, c), 1)
        return (r == cc).astype(f32)

    def safe(d):            # guard padded (all-zero) graphs: 0/0 -> 0, not NaN
        return jnp.where(d > 0.0, d, 1.0)

    # ---- static, lane-aligned slices of the packed weight / bias slabs ------
    w1f     = w_ref[0:fin, 0 * seg:0 * seg + HC1]      # lin1 | lin1->pool1
    wrel1f  = w_ref[0:H,   1 * seg:1 * seg + HC2]      # conv1 rel | ->pool2
    wroot1f = w_ref[0:H,   2 * seg:2 * seg + HC2]      # conv1 root | ->pool2
    wrel2   = w_ref[0:H,   3 * seg:3 * seg + H]
    wroot2  = w_ref[0:H,   4 * seg:4 * seg + H]
    w2      = w_ref[0:H,   5 * seg:5 * seg + H]
    w3      = w_ref[0:H,   6 * seg:6 * seg + out_ch]
    b1f  = b_ref[:, 0 * seg:0 * seg + HC1]
    bc1f = b_ref[:, 1 * seg:1 * seg + HC2]
    br2  = b_ref[:, 2 * seg:2 * seg + H]
    b2   = b_ref[:, 3 * seg:3 * seg + H]
    b3   = b_ref[:, 4 * seg:4 * seg + out_ch]

    adj = adj_ref[...]                        # (Bt, N, N) bf16 (exact counts)
    xm = xm_ref[...]                          # (Bt*N, fin+1) f32
    x0 = xm[:, :fin]
    mask_flat = xm[:, fin:fin + 1]            # (Bt*N, 1)

    # ---- lin1 (+ fused pool1) on the (Bt*N, .) slab --------------------------
    y0 = mm(x0, w1f) + b1f                    # (Bt*N, H+C1)
    x = y0[:, :H]                             # lin1 output
    s1 = softmax(y0[:, H:]) * mask_flat       # masked S1, (Bt*N, C1)
    s1b = s1.reshape(Bt, N, C1)

    # ---- fused adjacency contraction: A @ [x | s1 | 1] (bf16 MXU, f32 acc) ---
    # (rhs is rounded to bf16; adjacency edge counts are exact in bf16, the
    #  ones column gives the exact node degrees.)
    ones = jnp.ones((Bt, N, 1), f32)
    rhs = jnp.concatenate(
        [x.reshape(Bt, N, H), s1b, ones], axis=-1).astype(bf16)  # (Bt,N,H+C1+1)
    agg = bmm(adj, rhs)                       # (Bt, N, H+C1+1) f32
    ax = agg[..., :H]                         # A @ x        (conv1 rel input)
    as1 = agg[..., H:H + C1]                  # A @ s1
    dflat = agg[..., H + C1:H + C1 + 1]       # degree = A @ 1, (Bt, N, 1)

    # ---- dense_mincut_rewiring losses ---------------------------------------
    # TODO(synk): dense_mincut_rewiring source is unavailable; adjacency is
    # passed through unchanged and its losses use the dense_mincut_pool formulas.
    num1 = rsum(as1 * s1b)                    # trace(S^T A S)
    den1 = rsum(dflat * s1b * s1b)            # trace(S^T D S)
    mc1 = -(num1 / safe(den1))                # (Bt, 1, 1)
    ss1 = bmm_tA(s1b, s1b)                    # (Bt, C1, C1)
    fr1 = jnp.sqrt(rsum(ss1 * ss1))
    d1 = ss1 / safe(fr1) - (eye(C1) / math.sqrt(float(C1)))[None]
    o1 = jnp.sqrt(rsum(d1 * d1))

    # ---- conv1 (+ fused pool2): two accumulating matmuls, no lane concat -----
    y1 = mm(ax.reshape(Bt * N, H), wrel1f) + mm(x, wroot1f) + bc1f  # (BtN,H+C2)
    x1 = y1[:, :H]                            # conv1 output
    s2 = softmax(y1[:, H:]) * mask_flat       # masked S2, (Bt*N, C2)
    s2b = s2.reshape(Bt, N, C2)

    # ---- dense_mincut_pool ----------------------------------------------------
    xmk = (x1 * mask_flat).reshape(Bt, N, H)  # masked X
    as2 = bmm(adj, s2b.astype(bf16))          # A @ s2, (Bt, N, C2)
    # fused S^T @ [X | A S | S]  -> one batched MXU pass
    agg2 = bmm_tA(s2b, jnp.concatenate([xmk, as2, s2b], axis=-1))
    xp = agg2[..., :H]                        # pooled features (Bt, C2, H)
    out_adj = agg2[..., H:H + C2]             # S^T A S        (Bt, C2, C2)
    ss2 = agg2[..., H + C2:]                  # S^T S          (Bt, C2, C2)

    num2 = rsum(as2 * s2b)
    den2 = rsum(dflat * s2b * s2b)
    mc2 = -(num2 / safe(den2))
    fr2 = jnp.sqrt(rsum(ss2 * ss2))
    d2 = ss2 / safe(fr2) - (eye(C2) / math.sqrt(float(C2)))[None]
    o2 = jnp.sqrt(rsum(d2 * d2))

    # zero diagonal + symmetric sqrt-degree normalization
    out_adj = out_adj * (1.0 - eye(C2))[None]
    deg = jnp.sqrt(jnp.sum(out_adj, axis=-1, keepdims=True)) + EPS  # (Bt,C2,1)
    out_adj = out_adj / deg / jnp.swapaxes(deg, -1, -2)

    # ---- conv2: two accumulating matmuls -------------------------------------
    axp = bmm(out_adj, xp)                    # (Bt, C2, H)
    x2 = (mm(axp.reshape(Bt * C2, H), wrel2)
          + mm(xp.reshape(Bt * C2, H), wroot2) + br2).reshape(Bt, C2, H)

    # ---- readout: sum over clusters, lin2+relu, lin3, log_softmax ------------
    xg = jnp.sum(x2, axis=1)                  # (Bt, H)
    h = jnp.maximum(mm(xg, w2) + b2, 0.0)
    o = mm(h, w3) + b3                        # (Bt, out_ch)
    z = o - jnp.max(o, axis=-1, keepdims=True)
    logp = z - jnp.log(jnp.sum(jnp.exp(z), axis=-1, keepdims=True))

    # ---- single lane-packed store: [logp | mc1 | or1 | mc2 | or2] ------------
    packed = jnp.concatenate(
        [logp,
         mc1.reshape(Bt, 1), o1.reshape(Bt, 1),
         mc2.reshape(Bt, 1), o2.reshape(Bt, 1)], axis=-1)       # (Bt, out+4)
    out_ref[...] = packed.reshape((1, Bt, out_ch + 4))


# ----------------------------------------------------------------------------
# Glue: to_dense_batch / to_dense_adj (pure JAX scatter), weight packing,
# generation-aware tiling, pallas_call wrapper.
# ----------------------------------------------------------------------------
def to_dense(x, edge_index, batch, num_graphs, max_nodes):
    n = x.shape[0]
    counts = jnp.zeros((num_graphs,), jnp.int32).at[batch].add(1)
    offsets = jnp.concatenate(
        [jnp.zeros((1,), jnp.int32), jnp.cumsum(counts)[:-1]])
    pos = jnp.arange(n, dtype=jnp.int32) - offsets[batch]
    x_d = jnp.zeros((num_graphs, max_nodes, x.shape[1]), x.dtype
                    ).at[batch, pos].set(x)
    mask = jnp.zeros((num_graphs, max_nodes), jnp.float32
                     ).at[batch, pos].set(1.0)
    src, dst = edge_index[0], edge_index[1]
    adj = jnp.zeros((num_graphs, max_nodes, max_nodes), jnp.float32
                    ).at[batch[src], pos[src], pos[dst]].add(1.0)
    return x_d, adj, mask


def init_params(key, in_channels, out_channels, hidden=HIDDEN):
    def lin(k, fan_in, fan_out, bias=True):
        kw, kb = jax.random.split(k)
        scale = 1.0 / math.sqrt(fan_in)
        w = jax.random.uniform(kw, (fan_in, fan_out), jnp.float32,
                               -scale, scale)
        b = (jax.random.uniform(kb, (1, fan_out), jnp.float32, -scale, scale)
             if bias else None)
        return w, b

    keys = jax.random.split(key, 9)
    p = {}
    p["w_lin1"], p["b_lin1"] = lin(keys[0], in_channels, hidden)
    p["w_pool1"], p["b_pool1"] = lin(keys[1], hidden, NUM_CENTERS1)
    p["w_rel1"], p["b_rel1"] = lin(keys[2], hidden, hidden)
    p["w_root1"], _ = lin(keys[3], hidden, hidden, bias=False)
    p["w_pool2"], p["b_pool2"] = lin(keys[4], hidden, NUM_CENTERS2)
    p["w_rel2"], p["b_rel2"] = lin(keys[5], hidden, hidden)
    p["w_root2"], _ = lin(keys[6], hidden, hidden, bias=False)
    p["w_lin2"], p["b_lin2"] = lin(keys[7], hidden, hidden)
    p["w_lin3"], p["b_lin3"] = lin(keys[8], hidden, out_channels)
    return p


def _pack_weights(params):
    """Fold pool1 into lin1 and pool2 into conv1; pack all weights/biases into
    two lane-aligned (128-wide segment) slabs -> 2 DMAs instead of 16."""
    w1, b1 = params["w_lin1"], params["b_lin1"]
    wp1, bp1 = params["w_pool1"], params["b_pool1"]
    wr1, wo1, br1 = params["w_rel1"], params["w_root1"], params["b_rel1"]
    wp2, bp2 = params["w_pool2"], params["b_pool2"]
    wr2, wo2, br2 = params["w_rel2"], params["w_root2"], params["b_rel2"]
    w2, b2 = params["w_lin2"], params["b_lin2"]
    w3, b3 = params["w_lin3"], params["b_lin3"]

    fin, H = w1.shape
    C1 = wp1.shape[1]
    C2 = wp2.shape[1]
    out_ch = w3.shape[1]

    w1f = jnp.concatenate([w1, w1 @ wp1], axis=1)              # (fin, H+C1)
    b1f = jnp.concatenate([b1, b1 @ wp1 + bp1], axis=1)        # (1,   H+C1)
    wr1f = jnp.concatenate([wr1, wr1 @ wp2], axis=1)           # (H,   H+C2)
    wo1f = jnp.concatenate([wo1, wo1 @ wp2], axis=1)           # (H,   H+C2)
    bc1f = jnp.concatenate([br1, br1 @ wp2 + bp2], axis=1)     # (1,   H+C2)

    seg = int(-(-max(H + C1, H + C2, H, out_ch) // 128) * 128)
    rows = int(-(-max(fin, H) // 8) * 8)

    def wseg(w):
        r, c = w.shape
        return jnp.pad(w, ((0, rows - r), (0, seg - c)))

    def bseg(b):
        return jnp.pad(b, ((0, 0), (0, seg - b.shape[1])))

    wslab = jnp.concatenate(
        [wseg(w1f), wseg(wr1f), wseg(wo1f), wseg(wr2), wseg(wo2),
         wseg(w2), wseg(w3)], axis=1)                          # (rows, 7*seg)
    bslab = jnp.concatenate(
        [bseg(b1f), bseg(bc1f), bseg(br2), bseg(b2), bseg(b3)],
        axis=1)                                                # (1, 5*seg)

    dims = dict(fin=fin, H=H, C1=C1, C2=C2, out_ch=out_ch, seg=seg)
    return wslab, bslab, dims


def _chip_profile():
    """Best-effort TPU-generation detection; errors fall back to safe defaults."""
    try:
        kind = jax.devices()[0].device_kind.lower()
    except Exception:
        kind = ""
    if ("v5 lite" in kind) or ("v5e" in kind) or ("v5lite" in kind):
        prof = dict(mxu_rows=128, num_tc=1, vmem=128 << 20)      # v5e
    elif "v6" in kind:
        prof = dict(mxu_rows=256, num_tc=1, vmem=128 << 20)      # v6e
    elif ("v4" in kind) or ("v5p" in kind) or ("v5" in kind):
        prof = dict(mxu_rows=128, num_tc=2, vmem=128 << 20)      # megacore parts
    else:                                                        # v7x / future
        prof = dict(mxu_rows=256, num_tc=2, vmem=64 << 20)
    try:
        info = pltpu.get_tpu_info()
        vmem = getattr(info, "vmem_capacity_bytes", None)
        if vmem:
            prof["vmem"] = int(vmem)
    except Exception:
        pass
    return prof


def _pick_block_graphs(B, N, fin, prof):
    """Graphs per grid step: fill the MXU sublanes (128/256 rows), stay within
    a VMEM budget, and split across TensorCores only when each core's slab
    still fills the MXU (otherwise prefer a single grid step)."""
    per_graph = 2 * (N * N * 2 + N * (fin + 1) * 4) + 8 * N * 64 * 4
    budget = max(1 << 20, prof["vmem"] // 4)
    bt_mem = max(1, budget // per_graph)
    bt_mxu = max(1, -(-prof["mxu_rows"] // N))
    bt = min(B, bt_mem)
    if prof["num_tc"] > 1 and B >= prof["num_tc"] * bt_mxu:
        bt = min(bt, -(-B // prof["num_tc"]))      # >=1 step per TensorCore
    bt = max(bt, min(B, bt_mxu))                   # keep MXU rows filled
    return max(1, min(int(bt), int(bt_mem), B))


def _cost_estimate(B, N, fin, H, C1, C2, out_ch):
    per_graph = 2 * (
        N * fin * (H + C1)            # lin1 (+pool1 fused)
        + N * N * (H + C1 + 1)        # A @ [x | s1 | 1]
        + 2 * N * H * (H + C2)        # conv1 (+pool2 fused), rel + root
        + N * N * C2                  # A @ s2
        + N * C2 * (H + 2 * C2)       # S^T [X | AS | S]
        + C2 * C2 * H                 # A' @ xp
        + 2 * C2 * H * H              # conv2 rel + root
        + H * H + H * out_ch)         # lin2 / lin3
    bytes_accessed = B * (N * N * 2 + N * (fin + 1) * 4 + (out_ch + 4) * 4)
    transcendentals = B * (N * (C1 + C2) + out_ch + 16)
    return pl.CostEstimate(flops=int(B * per_graph),
                           transcendentals=int(transcendentals),
                           bytes_accessed=int(bytes_accessed))


def gapnet_forward(x, edge_index, batch, params, num_graphs, max_nodes,
                   block_graphs=None):
    wslab, bslab, dims = _pack_weights(params)
    fin, H = dims["fin"], dims["H"]
    C1, C2, out_ch, seg = dims["C1"], dims["C2"], dims["out_ch"], dims["seg"]

    # pad node dim to a sublane multiple (extra nodes are masked / zero-adj)
    N = int(-(-max_nodes // 8) * 8)
    x_d, adj, mask = to_dense(x, edge_index, batch, num_graphs, N)
    adj_b16 = adj.astype(jnp.bfloat16)              # integer edge counts, exact
    xm = jnp.concatenate([x_d, mask[..., None]], axis=-1)   # (B, N, fin+1)

    B = num_graphs
    prof = _chip_profile()
    Bt = (_pick_block_graphs(B, N, fin, prof)
          if block_graphs is None else int(block_graphs))
    Bp = -(-B // Bt) * Bt
    if Bp != B:
        adj_b16 = jnp.pad(adj_b16, ((0, Bp - B), (0, 0), (0, 0)))
        xm = jnp.pad(xm, ((0, Bp - B), (0, 0), (0, 0)))
    xm_flat = xm.reshape(Bp * N, fin + 1)           # pre-flattened node slab
    G = Bp // Bt
    OUTW = out_ch + 4

    kernel = functools.partial(gapnet_kernel, Bt=Bt, N=N, fin=fin, H=H,
                               C1=C1, C2=C2, out_ch=out_ch, seg=seg)

    in_specs = [
        pl.BlockSpec((Bt, N, N), lambda b: (b, 0, 0)),          # adjacency bf16
        pl.BlockSpec((Bt * N, fin + 1), lambda b: (b, 0)),      # [x | mask]
        pl.BlockSpec(wslab.shape, lambda b: (0, 0)),            # weight slab
        pl.BlockSpec(bslab.shape, lambda b: (0, 0)),            # bias slab
    ]
    out_specs = pl.BlockSpec((1, Bt, OUTW), lambda b: (b, 0, 0))
    out_shape = jax.ShapeDtypeStruct((G, Bt, OUTW), jnp.float32)

    # VMEM: double-buffered bf16 adj + f32 features + in-kernel intermediates,
    # capped below the chip's physical VMEM (64 MiB per TensorCore on v7x).
    blk_bytes = Bt * (2 * (N * N * 2 + N * (fin + 1) * 4) + 8 * N * 64 * 4)
    slab_bytes = int(wslab.size + bslab.size) * 4
    vmem_limit = int(min(prof["vmem"] * 3 // 4,
                         max(16 << 20, blk_bytes + 2 * slab_bytes + (4 << 20))))

    packed = pl.pallas_call(
        kernel,
        grid=(G,),
        in_specs=in_specs,
        out_specs=out_specs,
        out_shape=out_shape,
        compiler_params=pltpu.CompilerParams(
            dimension_semantics=("parallel",),
            vmem_limit_bytes=vmem_limit),
        cost_estimate=_cost_estimate(Bp, N, fin, H, C1, C2, out_ch),
    )(adj_b16, xm_flat, wslab, bslab)

    packed = packed.reshape(Bp, OUTW)[:B]
    log_probs = packed[:, :out_ch]                          # (B, out_channels)
    mincut_loss = jnp.mean(packed[:, out_ch + 0]) + jnp.mean(packed[:, out_ch + 2])
    ortho_loss = jnp.mean(packed[:, out_ch + 1]) + jnp.mean(packed[:, out_ch + 3])
    return log_probs, mincut_loss, ortho_loss


# ----------------------------------------------------------------------------
if __name__ == "__main__":
    key = jax.random.PRNGKey(0)
    k_x, k_p = jax.random.split(key)

    in_channels = 8
    out_channels = 4
    num_graphs = 8
    nodes_per_graph = 16
    total_nodes = num_graphs * nodes_per_graph

    # node features, graph-membership vector
    x = jax.random.normal(k_x, (total_nodes, in_channels), jnp.float32)
    batch = jnp.asarray(
        sum([[g] * nodes_per_graph for g in range(num_graphs)], []),
        jnp.int32)

    # ring graph (both directions) within each graph
    edges = []
    for g in range(num_graphs):
        base = g * nodes_per_graph
        for i in range(nodes_per_graph):
            j = (i + 1) % nodes_per_graph
            edges.append((base + i, base + j))
            edges.append((base + j, base + i))
    edge_index = jnp.asarray(list(zip(*edges)), jnp.int32)   # (2, E)

    params = init_params(k_p, in_channels, out_channels)

    log_probs, mincut_loss, ortho_loss = gapnet_forward(
        x, edge_index, batch, params, num_graphs, nodes_per_graph)

    jax.block_until_ready((log_probs, mincut_loss, ortho_loss))
    assert log_probs.shape == (num_graphs, out_channels)
    assert bool(jnp.all(jnp.isfinite(log_probs)))
    assert bool(jnp.isfinite(mincut_loss)) and bool(jnp.isfinite(ortho_loss))
    print("KERNEL_OK")
</pallas_src>

<mosaic_0001>
module attributes {stable_mosaic.version = 11 : i64} {
  func.func @gapnet_kernel(%arg0: i32, %arg1: memref<8x16x16xbf16, #tpu.memory_space<vmem>>, %arg2: memref<128x9xf32, #tpu.memory_space<vmem>>, %arg3: memref<32x896xf32, #tpu.memory_space<vmem>>, %arg4: memref<1x640xf32, #tpu.memory_space<vmem>>, %arg5: memref<1x8x8xf32, #tpu.memory_space<vmem>>) attributes {dimension_semantics = [#tpu.dimension_semantics<parallel>], iteration_bounds = array<i64: 1>, scalar_prefetch = 0 : i64, scratch_operands = 0 : i64, tpu.core_type = #tpu.core_type<tc>, window_params = [{transform_indices = @transform_0, window_bounds = array<i64: 8, 16, 16>}, {transform_indices = @transform_1, window_bounds = array<i64: 128, 9>}, {pipeline_mode = #tpu.pipeline_mode<synchronous>, transform_indices = @transform_2, window_bounds = array<i64: 32, 896>}, {pipeline_mode = #tpu.pipeline_mode<synchronous>, transform_indices = @transform_3, window_bounds = array<i64: 1, 640>}, {transform_indices = @transform_4, window_bounds = array<i64: 1, 8, 8>}]} {
    %c0 = arith.constant 0 : index
    %c0_0 = arith.constant 0 : index
    %0 = vector.load %arg3[%c0, %c0_0] : memref<32x896xf32, #tpu.memory_space<vmem>>, vector<8x34xf32>
    %c0_1 = arith.constant 0 : index
    %c128 = arith.constant 128 : index
    %1 = vector.load %arg3[%c0_1, %c128] : memref<32x896xf32, #tpu.memory_space<vmem>>, vector<32x48xf32>
    %c0_2 = arith.constant 0 : index
    %c256 = arith.constant 256 : index
    %2 = vector.load %arg3[%c0_2, %c256] : memref<32x896xf32, #tpu.memory_space<vmem>>, vector<32x48xf32>
    %c0_3 = arith.constant 0 : index
    %c384 = arith.constant 384 : index
    %3 = vector.load %arg3[%c0_3, %c384] : memref<32x896xf32, #tpu.memory_space<vmem>>, vector<32x32xf32>
    %c0_4 = arith.constant 0 : index
    %c512 = arith.constant 512 : index
    %4 = vector.load %arg3[%c0_4, %c512] : memref<32x896xf32, #tpu.memory_space<vmem>>, vector<32x32xf32>
    %c0_5 = arith.constant 0 : index
    %c640 = arith.constant 640 : index
    %5 = vector.load %arg3[%c0_5, %c640] : memref<32x896xf32, #tpu.memory_space<vmem>>, vector<32x32xf32>
    %c0_6 = arith.constant 0 : index
    %c768 = arith.constant 768 : index
    %6 = vector.load %arg3[%c0_6, %c768] : memref<32x896xf32, #tpu.memory_space<vmem>>, vector<32x4xf32>
    %c0_7 = arith.constant 0 : index
    %c0_8 = arith.constant 0 : index
    %7 = vector.load %arg4[%c0_7, %c0_8] : memref<1x640xf32, #tpu.memory_space<vmem>>, vector<1x34xf32>
    %c0_9 = arith.constant 0 : index
    %c128_10 = arith.constant 128 : index
    %8 = vector.load %arg4[%c0_9, %c128_10] : memref<1x640xf32, #tpu.memory_space<vmem>>, vector<1x48xf32>
    %c0_11 = arith.constant 0 : index
    %c256_12 = arith.constant 256 : index
    %9 = vector.load %arg4[%c0_11, %c256_12] : memref<1x640xf32, #tpu.memory_space<vmem>>, vector<1x32xf32>
    %c0_13 = arith.constant 0 : index
    %c384_14 = arith.constant 384 : index
    %10 = vector.load %arg4[%c0_13, %c384_14] : memref<1x640xf32, #tpu.memory_space<vmem>>, vector<1x32xf32>
    %c0_15 = arith.constant 0 : index
    %c512_16 = arith.constant 512 : index
    %11 = vector.load %arg4[%c0_15, %c512_16] : memref<1x640xf32, #tpu.memory_space<vmem>>, vector<1x4xf32>
    %c0_17 = arith.constant 0 : index
    %c0_18 = arith.constant 0 : index
    %c0_19 = arith.constant 0 : index
    %12 = vector.load %arg1[%c0_17, %c0_18, %c0_19] : memref<8x16x16xbf16, #tpu.memory_space<vmem>>, vector<8x16x16xbf16>
    %c0_20 = arith.constant 0 : index
    %c0_21 = arith.constant 0 : index
    %13 = vector.load %arg2[%c0_20, %c0_21] : memref<128x9xf32, #tpu.memory_space<vmem>>, vector<128x9xf32>
    %14 = vector.extract_strided_slice %13 {offsets = [0, 0], sizes = [128, 8], strides = [1, 1]} : vector<128x9xf32> to vector<128x8xf32>
    %15 = vector.extract_strided_slice %13 {offsets = [0, 8], sizes = [128, 1], strides = [1, 1]} : vector<128x9xf32> to vector<128x1xf32>
    %cst = arith.constant dense<0.000000e+00> : vector<128x34xf32>
    %16 = tpu.matmul %14, %0, %cst {dimension_numbers = #tpu.dot_dimension_numbers<[1], [0], [0], [1], [0, 0, 1, 1], [], []>} : vector<128x8xf32>, vector<8x34xf32>, vector<128x34xf32> -> vector<128x34xf32>
    %17 = vector.broadcast %7 : vector<1x34xf32> to vector<128x34xf32>
    %18 = arith.addf %16, %17 : vector<128x34xf32>
    %19 = vector.extract_strided_slice %18 {offsets = [0, 0], sizes = [128, 32], strides = [1, 1]} : vector<128x34xf32> to vector<128x32xf32>
    %20 = vector.extract_strided_slice %18 {offsets = [0, 32], sizes = [128, 2], strides = [1, 1]} : vector<128x34xf32> to vector<128x2xf32>
    %cst_22 = arith.constant dense<0xFF800000> : vector<128xf32>
    %21 = vector.multi_reduction <maximumf>, %20, %cst_22 [1] : vector<128x2xf32> to vector<128xf32>
    %22 = vector.shape_cast %21 : vector<128xf32> to vector<128x1xf32>
    %23 = vector.broadcast %22 : vector<128x1xf32> to vector<128x2xf32>
    %24 = arith.subf %20, %23 : vector<128x2xf32>
    %25 = math.exp %24 : vector<128x2xf32>
    %cst_23 = arith.constant dense<0.000000e+00> : vector<128xf32>
    %26 = vector.multi_reduction <add>, %25, %cst_23 [1] : vector<128x2xf32> to vector<128xf32>
    %27 = vector.shape_cast %26 : vector<128xf32> to vector<128x1xf32>
    %28 = vector.broadcast %27 : vector<128x1xf32> to vector<128x2xf32>
    %29 = arith.divf %25, %28 : vector<128x2xf32>
    %30 = vector.broadcast %15 : vector<128x1xf32> to vector<128x2xf32>
    %31 = arith.mulf %29, %30 : vector<128x2xf32>
    %32 = vector.shape_cast %31 : vector<128x2xf32> to vector<8x16x2xf32>
    %cst_24 = arith.constant 1.000000e+00 : f32
    %33 = vector.broadcast %cst_24 : f32 to vector<8x16x1xf32>
    %34 = vector.shape_cast %19 : vector<128x32xf32> to vector<8x16x32xf32>
    %35 = tpu.concatenate %34, %32, %33 in 2 : vector<8x16x32xf32>, vector<8x16x2xf32>, vector<8x16x1xf32> -> vector<8x16x35xf32>
    %36 = arith.truncf %35 : vector<8x16x35xf32> to vector<8x16x35xbf16>
    %cst_25 = arith.constant dense<0.000000e+00> : vector<8x16x35xf32>
    %37 = tpu.matmul %12, %36, %cst_25 {dimension_numbers = #tpu.dot_dimension_numbers<[2], [1], [1], [2], [0, 0, 0, 1, 1, 2], [0], [0]>} : vector<8x16x16xbf16>, vector<8x16x35xbf16>, vector<8x16x35xf32> -> vector<8x16x35xf32>
    %38 = vector.extract_strided_slice %37 {offsets = [0, 0, 0], sizes = [8, 16, 32], strides = [1, 1, 1]} : vector<8x16x35xf32> to vector<8x16x32xf32>
    %39 = vector.extract_strided_slice %37 {offsets = [0, 0, 32], sizes = [8, 16, 2], strides = [1, 1, 1]} : vector<8x16x35xf32> to vector<8x16x2xf32>
    %40 = vector.extract_strided_slice %37 {offsets = [0, 0, 34], sizes = [8, 16, 1], strides = [1, 1, 1]} : vector<8x16x35xf32> to vector<8x16x1xf32>
    %41 = arith.mulf %39, %32 : vector<8x16x2xf32>
    %cst_26 = arith.constant dense<0.000000e+00> : vector<8x16xf32>
    %42 = vector.multi_reduction <add>, %41, %cst_26 [2] : vector<8x16x2xf32> to vector<8x16xf32>
    %43 = vector.shape_cast %42 : vector<8x16xf32> to vector<8x16x1xf32>
    %cst_27 = arith.constant dense<0.000000e+00> : vector<8x1xf32>
    %44 = vector.multi_reduction <add>, %43, %cst_27 [1] : vector<8x16x1xf32> to vector<8x1xf32>
    %45 = vector.shape_cast %44 : vector<8x1xf32> to vector<8x1x1xf32>
    %46 = vector.broadcast %40 : vector<8x16x1xf32> to vector<8x16x2xf32>
    %47 = arith.mulf %46, %32 : vector<8x16x2xf32>
    %48 = arith.mulf %47, %32 : vector<8x16x2xf32>
    %cst_28 = arith.constant dense<0.000000e+00> : vector<8x16xf32>
    %49 = vector.multi_reduction <add>, %48, %cst_28 [2] : vector<8x16x2xf32> to vector<8x16xf32>
    %50 = vector.shape_cast %49 : vector<8x16xf32> to vector<8x16x1xf32>
    %cst_29 = arith.constant dense<0.000000e+00> : vector<8x1xf32>
    %51 = vector.multi_reduction <add>, %50, %cst_29 [1] : vector<8x16x1xf32> to vector<8x1xf32>
    %52 = vector.shape_cast %51 : vector<8x1xf32> to vector<8x1x1xf32>
    %cst_30 = arith.constant 0.000000e+00 : f32
    %53 = vector.broadcast %cst_30 : f32 to vector<8x1x1xf32>
    %54 = arith.cmpf ogt, %52, %53 : vector<8x1x1xf32>
    %cst_31 = arith.constant 1.000000e+00 : f32
    %55 = vector.broadcast %cst_31 : f32 to vector<8x1x1xf32>
    %56 = arith.select %54, %52, %55 : vector<8x1x1xi1>, vector<8x1x1xf32>
    %57 = arith.divf %45, %56 : vector<8x1x1xf32>
    %cst_32 = arith.constant 0.000000e+00 : f32
    %58 = vector.broadcast %cst_32 : f32 to vector<8x1x1xf32>
    %59 = arith.subf %58, %57 : vector<8x1x1xf32>
    %cst_33 = arith.constant dense<0.000000e+00> : vector<8x2x2xf32>
    %60 = tpu.matmul %32, %32, %cst_33 {dimension_numbers = #tpu.dot_dimension_numbers<[1], [1], [2], [2], [0, 0, 0, 2, 1, 2], [0], [0]>} : vector<8x16x2xf32>, vector<8x16x2xf32>, vector<8x2x2xf32> -> vector<8x2x2xf32>
    %61 = arith.mulf %60, %60 : vector<8x2x2xf32>
    %cst_34 = arith.constant dense<0.000000e+00> : vector<8x2xf32>
    %62 = vector.multi_reduction <add>, %61, %cst_34 [2] : vector<8x2x2xf32> to vector<8x2xf32>
    %63 = vector.shape_cast %62 : vector<8x2xf32> to vector<8x2x1xf32>
    %cst_35 = arith.constant dense<0.000000e+00> : vector<8x1xf32>
    %64 = vector.multi_reduction <add>, %63, %cst_35 [1] : vector<8x2x1xf32> to vector<8x1xf32>
    %65 = vector.shape_cast %64 : vector<8x1xf32> to vector<8x1x1xf32>
    %66 = math.sqrt %65 : vector<8x1x1xf32>
    %cst_36 = arith.constant 0.000000e+00 : f32
    %67 = vector.broadcast %cst_36 : f32 to vector<8x1x1xf32>
    %68 = arith.cmpf ogt, %66, %67 : vector<8x1x1xf32>
    %cst_37 = arith.constant 1.000000e+00 : f32
    %69 = vector.broadcast %cst_37 : f32 to vector<8x1x1xf32>
    %70 = arith.select %68, %66, %69 : vector<8x1x1xi1>, vector<8x1x1xf32>
    %71 = vector.broadcast %70 : vector<8x1x1xf32> to vector<8x2x2xf32>
    %72 = arith.divf %60, %71 : vector<8x2x2xf32>
    %73 = tpu.iota {dimensions = array<i32: 0>} : vector<2x2xi32>
    %74 = tpu.iota {dimensions = array<i32: 1>} : vector<2x2xi32>
    %75 = arith.cmpi eq, %73, %74 : vector<2x2xi32>
    %76 = arith.extui %75 : vector<2x2xi1> to vector<2x2xi32>
    %77 = arith.sitofp %76 : vector<2x2xi32> to vector<2x2xf32>
    %cst_38 = arith.constant 1.41421354 : f32
    %78 = vector.broadcast %cst_38 : f32 to vector<2x2xf32>
    %79 = arith.divf %77, %78 : vector<2x2xf32>
    %80 = vector.shape_cast %79 : vector<2x2xf32> to vector<1x2x2xf32>
    %81 = vector.broadcast %80 : vector<1x2x2xf32> to vector<8x2x2xf32>
    %82 = arith.subf %72, %81 : vector<8x2x2xf32>
    %83 = arith.mulf %82, %82 : vector<8x2x2xf32>
    %cst_39 = arith.constant dense<0.000000e+00> : vector<8x2xf32>
    %84 = vector.multi_reduction <add>, %83, %cst_39 [2] : vector<8x2x2xf32> to vector<8x2xf32>
    %85 = vector.shape_cast %84 : vector<8x2xf32> to vector<8x2x1xf32>
    %cst_40 = arith.constant dense<0.000000e+00> : vector<8x1xf32>
    %86 = vector.multi_reduction <add>, %85, %cst_40 [1] : vector<8x2x1xf32> to vector<8x1xf32>
    %87 = vector.shape_cast %86 : vector<8x1xf32> to vector<8x1x1xf32>
    %88 = math.sqrt %87 : vector<8x1x1xf32>
    %89 = vector.shape_cast %38 : vector<8x16x32xf32> to vector<128x32xf32>
    %cst_41 = arith.constant dense<0.000000e+00> : vector<128x48xf32>
    %90 = tpu.matmul %89, %1, %cst_41 {dimension_numbers = #tpu.dot_dimension_numbers<[1], [0], [0], [1], [0, 0, 1, 1], [], []>} : vector<128x32xf32>, vector<32x48xf32>, vector<128x48xf32> -> vector<128x48xf32>
    %cst_42 = arith.constant dense<0.000000e+00> : vector<128x48xf32>
    %91 = tpu.matmul %19, %2, %cst_42 {dimension_numbers = #tpu.dot_dimension_numbers<[1], [0], [0], [1], [0, 0, 1, 1], [], []>} : vector<128x32xf32>, vector<32x48xf32>, vector<128x48xf32> -> vector<128x48xf32>
    %92 = arith.addf %90, %91 : vector<128x48xf32>
    %93 = vector.broadcast %8 : vector<1x48xf32> to vector<128x48xf32>
    %94 = arith.addf %92, %93 : vector<128x48xf32>
    %95 = vector.extract_strided_slice %94 {offsets = [0, 0], sizes = [128, 32], strides = [1, 1]} : vector<128x48xf32> to vector<128x32xf32>
    %96 = vector.extract_strided_slice %94 {offsets = [0, 32], sizes = [128, 16], strides = [1, 1]} : vector<128x48xf32> to vector<128x16xf32>
    %cst_43 = arith.constant dense<0xFF800000> : vector<128xf32>
    %97 = vector.multi_reduction <maximumf>, %96, %cst_43 [1] : vector<128x16xf32> to vector<128xf32>
    %98 = vector.shape_cast %97 : vector<128xf32> to vector<128x1xf32>
    %99 = vector.broadcast %98 : vector<128x1xf32> to vector<128x16xf32>
    %100 = arith.subf %96, %99 : vector<128x16xf32>
    %101 = math.exp %100 : vector<128x16xf32>
    %cst_44 = arith.constant dense<0.000000e+00> : vector<128xf32>
    %102 = vector.multi_reduction <add>, %101, %cst_44 [1] : vector<128x16xf32> to vector<128xf32>
    %103 = vector.shape_cast %102 : vector<128xf32> to vector<128x1xf32>
    %104 = vector.broadcast %103 : vector<128x1xf32> to vector<128x16xf32>
    %105 = arith.divf %101, %104 : vector<128x16xf32>
    %106 = vector.broadcast %15 : vector<128x1xf32> to vector<128x16xf32>
    %107 = arith.mulf %105, %106 : vector<128x16xf32>
    %108 = vector.shape_cast %107 : vector<128x16xf32> to vector<8x16x16xf32>
    %109 = vector.broadcast %15 : vector<128x1xf32> to vector<128x32xf32>
    %110 = arith.mulf %95, %109 : vector<128x32xf32>
    %111 = vector.shape_cast %110 : vector<128x32xf32> to vector<8x16x32xf32>
    %112 = arith.truncf %108 : vector<8x16x16xf32> to vector<8x16x16xbf16>
    %cst_45 = arith.constant dense<0.000000e+00> : vector<8x16x16xf32>
    %113 = tpu.matmul %12, %112, %cst_45 {dimension_numbers = #tpu.dot_dimension_numbers<[2], [1], [1], [2], [0, 0, 0, 1, 1, 2], [0], [0]>} : vector<8x16x16xbf16>, vector<8x16x16xbf16>, vector<8x16x16xf32> -> vector<8x16x16xf32>
    %114 = tpu.concatenate %111, %113, %108 in 2 : vector<8x16x32xf32>, vector<8x16x16xf32>, vector<8x16x16xf32> -> vector<8x16x64xf32>
    %cst_46 = arith.constant dense<0.000000e+00> : vector<8x16x64xf32>
    %115 = tpu.matmul %108, %114, %cst_46 {dimension_numbers = #tpu.dot_dimension_numbers<[1], [1], [2], [2], [0, 0, 0, 2, 1, 2], [0], [0]>} : vector<8x16x16xf32>, vector<8x16x64xf32>, vector<8x16x64xf32> -> vector<8x16x64xf32>
    %116 = vector.extract_strided_slice %115 {offsets = [0, 0, 0], sizes = [8, 16, 32], strides = [1, 1, 1]} : vector<8x16x64xf32> to vector<8x16x32xf32>
    %117 = vector.extract_strided_slice %115 {offsets = [0, 0, 32], sizes = [8, 16, 16], strides = [1, 1, 1]} : vector<8x16x64xf32> to vector<8x16x16xf32>
    %118 = vector.extract_strided_slice %115 {offsets = [0, 0, 48], sizes = [8, 16, 16], strides = [1, 1, 1]} : vector<8x16x64xf32> to vector<8x16x16xf32>
    %119 = arith.mulf %113, %108 : vector<8x16x16xf32>
    %cst_47 = arith.constant dense<0.000000e+00> : vector<8x16xf32>
    %120 = vector.multi_reduction <add>, %119, %cst_47 [2] : vector<8x16x16xf32> to vector<8x16xf32>
    %121 = vector.shape_cast %120 : vector<8x16xf32> to vector<8x16x1xf32>
    %cst_48 = arith.constant dense<0.000000e+00> : vector<8x1xf32>
    %122 = vector.multi_reduction <add>, %121, %cst_48 [1] : vector<8x16x1xf32> to vector<8x1xf32>
    %123 = vector.shape_cast %122 : vector<8x1xf32> to vector<8x1x1xf32>
    %124 = vector.broadcast %40 : vector<8x16x1xf32> to vector<8x16x16xf32>
    %125 = arith.mulf %124, %108 : vector<8x16x16xf32>
    %126 = arith.mulf %125, %108 : vector<8x16x16xf32>
    %cst_49 = arith.constant dense<0.000000e+00> : vector<8x16xf32>
    %127 = vector.multi_reduction <add>, %126, %cst_49 [2] : vector<8x16x16xf32> to vector<8x16xf32>
    %128 = vector.shape_cast %127 : vector<8x16xf32> to vector<8x16x1xf32>
    %cst_50 = arith.constant dense<0.000000e+00> : vector<8x1xf32>
    %129 = vector.multi_reduction <add>, %128, %cst_50 [1] : vector<8x16x1xf32> to vector<8x1xf32>
    %130 = vector.shape_cast %129 : vector<8x1xf32> to vector<8x1x1xf32>
    %cst_51 = arith.constant 0.000000e+00 : f32
    %131 = vector.broadcast %cst_51 : f32 to vector<8x1x1xf32>
    %132 = arith.cmpf ogt, %130, %131 : vector<8x1x1xf32>
    %cst_52 = arith.constant 1.000000e+00 : f32
    %133 = vector.broadcast %cst_52 : f32 to vector<8x1x1xf32>
    %134 = arith.select %132, %130, %133 : vector<8x1x1xi1>, vector<8x1x1xf32>
    %135 = arith.divf %123, %134 : vector<8x1x1xf32>
    %cst_53 = arith.constant 0.000000e+00 : f32
    %136 = vector.broadcast %cst_53 : f32 to vector<8x1x1xf32>
    %137 = arith.subf %136, %135 : vector<8x1x1xf32>
    %138 = arith.mulf %118, %118 : vector<8x16x16xf32>
    %cst_54 = arith.constant dense<0.000000e+00> : vector<8x16xf32>
    %139 = vector.multi_reduction <add>, %138, %cst_54 [2] : vector<8x16x16xf32> to vector<8x16xf32>
    %140 = vector.shape_cast %139 : vector<8x16xf32> to vector<8x16x1xf32>
    %cst_55 = arith.constant dense<0.000000e+00> : vector<8x1xf32>
    %141 = vector.multi_reduction <add>, %140, %cst_55 [1] : vector<8x16x1xf32> to vector<8x1xf32>
    %142 = vector.shape_cast %141 : vector<8x1xf32> to vector<8x1x1xf32>
    %143 = math.sqrt %142 : vector<8x1x1xf32>
    %cst_56 = arith.constant 0.000000e+00 : f32
    %144 = vector.broadcast %cst_56 : f32 to vector<8x1x1xf32>
    %145 = arith.cmpf ogt, %143, %144 : vector<8x1x1xf32>
    %cst_57 = arith.constant 1.000000e+00 : f32
    %146 = vector.broadcast %cst_57 : f32 to vector<8x1x1xf32>
    %147 = arith.select %145, %143, %146 : vector<8x1x1xi1>, vector<8x1x1xf32>
    %148 = vector.broadcast %147 : vector<8x1x1xf32> to vector<8x16x16xf32>
    %149 = arith.divf %118, %148 : vector<8x16x16xf32>
    %150 = tpu.iota {dimensions = array<i32: 0>} : vector<16x16xi32>
    %151 = tpu.iota {dimensions = array<i32: 1>} : vector<16x16xi32>
    %152 = arith.cmpi eq, %150, %151 : vector<16x16xi32>
    %153 = arith.extui %152 : vector<16x16xi1> to vector<16x16xi32>
    %154 = arith.sitofp %153 : vector<16x16xi32> to vector<16x16xf32>
    %cst_58 = arith.constant 4.000000e+00 : f32
    %155 = vector.broadcast %cst_58 : f32 to vector<16x16xf32>
    %156 = arith.divf %154, %155 : vector<16x16xf32>
    %157 = vector.shape_cast %156 : vector<16x16xf32> to vector<1x16x16xf32>
    %158 = vector.broadcast %157 : vector<1x16x16xf32> to vector<8x16x16xf32>
    %159 = arith.subf %149, %158 : vector<8x16x16xf32>
    %160 = arith.mulf %159, %159 : vector<8x16x16xf32>
    %cst_59 = arith.constant dense<0.000000e+00> : vector<8x16xf32>
    %161 = vector.multi_reduction <add>, %160, %cst_59 [2] : vector<8x16x16xf32> to vector<8x16xf32>
    %162 = vector.shape_cast %161 : vector<8x16xf32> to vector<8x16x1xf32>
    %cst_60 = arith.constant dense<0.000000e+00> : vector<8x1xf32>
    %163 = vector.multi_reduction <add>, %162, %cst_60 [1] : vector<8x16x1xf32> to vector<8x1xf32>
    %164 = vector.shape_cast %163 : vector<8x1xf32> to vector<8x1x1xf32>
    %165 = math.sqrt %164 : vector<8x1x1xf32>
    %166 = tpu.iota {dimensions = array<i32: 0>} : vector<16x16xi32>
    %167 = tpu.iota {dimensions = array<i32: 1>} : vector<16x16xi32>
    %168 = arith.cmpi eq, %166, %167 : vector<16x16xi32>
    %169 = arith.extui %168 : vector<16x16xi1> to vector<16x16xi32>
    %170 = arith.sitofp %169 : vector<16x16xi32> to vector<16x16xf32>
    %cst_61 = arith.constant 1.000000e+00 : f32
    %171 = vector.broadcast %cst_61 : f32 to vector<16x16xf32>
    %172 = arith.subf %171, %170 : vector<16x16xf32>
    %173 = vector.shape_cast %172 : vector<16x16xf32> to vector<1x16x16xf32>
    %174 = vector.broadcast %173 : vector<1x16x16xf32> to vector<8x16x16xf32>
    %175 = arith.mulf %117, %174 : vector<8x16x16xf32>
    %cst_62 = arith.constant dense<0.000000e+00> : vector<8x16xf32>
    %176 = vector.multi_reduction <add>, %175, %cst_62 [2] : vector<8x16x16xf32> to vector<8x16xf32>
    %177 = vector.shape_cast %176 : vector<8x16xf32> to vector<8x16x1xf32>
    %178 = math.sqrt %177 : vector<8x16x1xf32>
    %cst_63 = arith.constant 1.000000e-15 : f32
    %179 = vector.broadcast %cst_63 : f32 to vector<8x16x1xf32>
    %180 = arith.addf %178, %179 : vector<8x16x1xf32>
    %181 = vector.broadcast %180 : vector<8x16x1xf32> to vector<8x16x16xf32>
    %182 = arith.divf %175, %181 : vector<8x16x16xf32>
    %183 = tpu.transpose %180, [0, 2, 1] : vector<8x16x1xf32> -> vector<8x1x16xf32>
    %184 = vector.broadcast %183 : vector<8x1x16xf32> to vector<8x16x16xf32>
    %185 = arith.divf %182, %184 : vector<8x16x16xf32>
    %cst_64 = arith.constant dense<0.000000e+00> : vector<8x16x32xf32>
    %186 = tpu.matmul %185, %116, %cst_64 {dimension_numbers = #tpu.dot_dimension_numbers<[2], [1], [1], [2], [0, 0, 0, 1, 1, 2], [0], [0]>} : vector<8x16x16xf32>, vector<8x16x32xf32>, vector<8x16x32xf32> -> vector<8x16x32xf32>
    %187 = vector.shape_cast %186 : vector<8x16x32xf32> to vector<128x32xf32>
    %cst_65 = arith.constant dense<0.000000e+00> : vector<128x32xf32>
    %188 = tpu.matmul %187, %3, %cst_65 {dimension_numbers = #tpu.dot_dimension_numbers<[1], [0], [0], [1], [0, 0, 1, 1], [], []>} : vector<128x32xf32>, vector<32x32xf32>, vector<128x32xf32> -> vector<128x32xf32>
    %189 = vector.shape_cast %116 : vector<8x16x32xf32> to vector<128x32xf32>
    %cst_66 = arith.constant dense<0.000000e+00> : vector<128x32xf32>
    %190 = tpu.matmul %189, %4, %cst_66 {dimension_numbers = #tpu.dot_dimension_numbers<[1], [0], [0], [1], [0, 0, 1, 1], [], []>} : vector<128x32xf32>, vector<32x32xf32>, vector<128x32xf32> -> vector<128x32xf32>
    %191 = arith.addf %188, %190 : vector<128x32xf32>
    %192 = vector.broadcast %9 : vector<1x32xf32> to vector<128x32xf32>
    %193 = arith.addf %191, %192 : vector<128x32xf32>
    %194 = vector.shape_cast %193 : vector<128x32xf32> to vector<8x16x32xf32>
    %cst_67 = arith.constant dense<0.000000e+00> : vector<8x32xf32>
    %195 = vector.multi_reduction <add>, %194, %cst_67 [1] : vector<8x16x32xf32> to vector<8x32xf32>
    %cst_68 = arith.constant dense<0.000000e+00> : vector<8x32xf32>
    %196 = tpu.matmul %195, %5, %cst_68 {dimension_numbers = #tpu.dot_dimension_numbers<[1], [0], [0], [1], [0, 0, 1, 1], [], []>} : vector<8x32xf32>, vector<32x32xf32>, vector<8x32xf32> -> vector<8x32xf32>
    %197 = vector.broadcast %10 : vector<1x32xf32> to vector<8x32xf32>
    %198 = arith.addf %196, %197 : vector<8x32xf32>
    %cst_69 = arith.constant 0.000000e+00 : f32
    %199 = vector.broadcast %cst_69 : f32 to vector<8x32xf32>
    %200 = arith.maximumf %198, %199 : vector<8x32xf32>
    %cst_70 = arith.constant dense<0.000000e+00> : vector<8x4xf32>
    %201 = tpu.matmul %200, %6, %cst_70 {dimension_numbers = #tpu.dot_dimension_numbers<[1], [0], [0], [1], [0, 0, 1, 1], [], []>} : vector<8x32xf32>, vector<32x4xf32>, vector<8x4xf32> -> vector<8x4xf32>
    %202 = vector.broadcast %11 : vector<1x4xf32> to vector<8x4xf32>
    %203 = arith.addf %201, %202 : vector<8x4xf32>
    %cst_71 = arith.constant dense<0xFF800000> : vector<8xf32>
    %204 = vector.multi_reduction <maximumf>, %203, %cst_71 [1] : vector<8x4xf32> to vector<8xf32>
    %205 = vector.shape_cast %204 : vector<8xf32> to vector<8x1xf32>
    %206 = vector.broadcast %205 : vector<8x1xf32> to vector<8x4xf32>
    %207 = arith.subf %203, %206 : vector<8x4xf32>
    %208 = math.exp %207 : vector<8x4xf32>
    %cst_72 = arith.constant dense<0.000000e+00> : vector<8xf32>
    %209 = vector.multi_reduction <add>, %208, %cst_72 [1] : vector<8x4xf32> to vector<8xf32>
    %210 = vector.shape_cast %209 : vector<8xf32> to vector<8x1xf32>
    %211 = math.log %210 : vector<8x1xf32>
    %212 = vector.broadcast %211 : vector<8x1xf32> to vector<8x4xf32>
    %213 = arith.subf %207, %212 : vector<8x4xf32>
    %214 = vector.shape_cast %59 : vector<8x1x1xf32> to vector<8x1xf32>
    %215 = vector.shape_cast %88 : vector<8x1x1xf32> to vector<8x1xf32>
    %216 = vector.shape_cast %137 : vector<8x1x1xf32> to vector<8x1xf32>
    %217 = vector.shape_cast %165 : vector<8x1x1xf32> to vector<8x1xf32>
    %218 = tpu.concatenate %213, %214, %215, %216, %217 in 1 : vector<8x4xf32>, vector<8x1xf32>, vector<8x1xf32>, vector<8x1xf32>, vector<8x1xf32> -> vector<8x8xf32>
    %219 = vector.shape_cast %218 : vector<8x8xf32> to vector<1x8x8xf32>
    %c0_73 = arith.constant 0 : index
    %c0_74 = arith.constant 0 : index
    %c0_75 = arith.constant 0 : index
    %220 = vector.load %arg5[%c0_73, %c0_74, %c0_75] : memref<1x8x8xf32, #tpu.memory_space<vmem>>, vector<1x8x8xf32>
    tpu.vector_store %arg5[%c0_73, %c0_74, %c0_75], %219 {strides = array<i32>} : memref<1x8x8xf32, #tpu.memory_space<vmem>>, vector<1x8x8xf32>,
    return
  }
  func.func @transform_0(%arg0: i32) -> (i32, i32, i32) {
    %c0_i32 = arith.constant 0 : i32
    %c0_i32_0 = arith.constant 0 : i32
    %c0_i32_1 = arith.constant 0 : i32
    return %arg0, %c0_i32, %c0_i32_0 : i32, i32, i32
  }
  func.func @transform_1(%arg0: i32) -> (i32, i32) {
    %c0_i32 = arith.constant 0 : i32
    %c0_i32_0 = arith.constant 0 : i32
    return %arg0, %c0_i32 : i32, i32
  }
  func.func @transform_2(%arg0: i32) -> (i32, i32) {
    %c0_i32 = arith.constant 0 : i32
    %c0_i32_0 = arith.constant 0 : i32
    %c0_i32_1 = arith.constant 0 : i32
    return %c0_i32, %c0_i32_0 : i32, i32
  }
  func.func @transform_3(%arg0: i32) -> (i32, i32) {
    %c0_i32 = arith.constant 0 : i32
    %c0_i32_0 = arith.constant 0 : i32
    %c0_i32_1 = arith.constant 0 : i32
    return %c0_i32, %c0_i32_0 : i32, i32
  }
  func.func @transform_4(%arg0: i32) -> (i32, i32, i32) {
    %c0_i32 = arith.constant 0 : i32
    %c0_i32_0 = arith.constant 0 : i32
    %c0_i32_1 = arith.constant 0 : i32
    return %arg0, %c0_i32, %c0_i32_0 : i32, i32, i32
  }
}

</mosaic_0001>

<bundles_post_ra>
// kernel: tpu_custom_call.1
= control target key start
LH: loop header
LB: loop body
LE: loop exit
PB: predicated region body
PF: predicated region fallthrough
CT: control target
= control target key end

     0   :  { %9 = vsyncpa [#allocation3], 0  ;;  %s12242_s0 = inlined_call_operand.vmem [shape: bf16[8,16,16], index: 0, kind: input, shape index: {}]   ;;  %s12243_s1 = inlined_call_operand.vmem [shape: f32[128,9], index: 1, kind: input, shape index: {}]   ;;  %s12244_s2 = inlined_call_operand.hbm [shape: f32[32,896], index: 2, kind: input, shape index: {}]   ;;  %s12245_s3 = inlined_call_operand.vmem [shape: f32[1,640], index: 3, kind: input, shape index: {}]   ;;  %s12246_s4 = inlined_call_operand.hbm [shape: f32[1,8,8], index: 4, kind: output, shape index: {}]  }
   0x1   :  { %10 = vsyncpa [#allocation4], 0  ;;  %s9428_s15 = smov [#allocation2]   ;;  %s9380_s19 = scalar_lea.hbm %s12244_s2, 3584 }
   0x2   :  { %s20_s16 = sshll.u32 %s9428_s15, 4  ;;  %p9381_p0 = scmp.ne.s32.totalorder %s12244_s2, %s9380_s19  ;;  %s21_s16 = int_to_ptr.vmem [resolvable:$true] %s20_s16 }
   0x3   :  { %p9384_p1 = scmp.lt.u32.totalorder %s9380_s19, %s12244_s2 }
   0x5   :  { %p9386_p2 = pnand %p9384_p1, %p9381_p0 }
   0x7   :  { %9389 = shalt.err (!%p9386_p2)
}
   0x8   :  { %s9390_s24 = scalar_lea.vmem %s21_s16, 3584  ;;  %p9395_p4 = scmp.lt.s32.totalorder %s21_s16, %s21_s16 }
   0x9   :  { %p9391_p3 = scmp.ne.s32.totalorder %s21_s16, %s9390_s24  ;;  %p9396_p5 = scmp.lt.s32.totalorder %s9390_s24, %s9390_s24 }
   0xb   :  { %p9397_p6 = por %p9396_p5, %p9395_p4 }
   0xd   :  { %p9398_p7 = pnand %p9397_p6, %p9391_p3 }
   0xf   :  { %9401 = shalt.err (!%p9398_p7)
}
  0x10   :  { %s9429_s25 = smov 896   ;;  %s9430_s26 = smov 56  }
  0x11   :  { %26 = dma.hbm_to_vmem [thread:$0]  %s12244_s2, 3584, %s21_s16, [#allocation3], %s9429_s25, %s9429_s25, %s9430_s26  }
  0x12   :  { %9424 = dma.done.wait [#allocation3], 3584  }
  0x13   :  { %9425 = vsyncadd [#allocation3], 4294963712  ;;  %v9431_v0 = vmov 8   ;;  %vm12423_vm0 = vcmask 64512   ;;  %v33_v1 = vld [vmem:[#allocation2] sm:$0xff]  ;;  %v80_v3 = vld [vmem:[%s12243_s1 + $0x8] sm:$0xff] }
  0x14   :  { %8941 = vset.pattern.permute.xlu1 %v9431_v0  ;;  %8940 = vset.pattern.permute.xlu0 %v9431_v0  ;;  %v79_v2 = vld [vmem:[%s12243_s1] sm:$0xff]  ;;  %v81_v4 = vld [vmem:[%s12243_s1 + $0x10] sm:$0xff]  ;;  %v82_v5 = vld [vmem:[%s12243_s1 + $0x18] sm:$0xff]  ;;  %vm295_vm1 = vcmask 277760   ;;  %vm456_vm2 = vcmask 15360   ;;  %vm9434_vm3 = vmmov 0  }
  0x15   :  { %8318 = vmatprep.subr.mxu0 %v33_v1  ;;  %8320 = vmatprep.mubr.msk.f32.mxu0 %vm12423_vm0, %v79_v2  ;;  %v83_v6 = vld [vmem:[%s12243_s1 + $0x20] sm:$0xff]  ;;  %v84_v7 = vld [vmem:[%s12243_s1 + $0x28] sm:$0xff]  ;;  %v85_v8 = vld [vmem:[%s12243_s1 + $0x30] sm:$0xff]  ;;  %vm617_vm4 = vcmask 261120   ;;  %vm634_vm5 = vcmask 277504   ;;  %vm664_vm6 = vcmask 130048  }
  0x16   :  { %8319 = vmatpush3.msra.mxu0 %v33_v1  ;;  %542 = vperm.xlu1 %8941, %v80_v3   ;;  %v86_v9 = vld [vmem:[%s12243_s1 + $0x38] sm:$0xff]  ;;  %v9513_v10 = vld [vmem:[%s12243_s1 + $0x40] sm:$0xff]  ;;  %v9521_v11 = vld [vmem:[%s12243_s1 + $0x48] sm:$0xff]  ;;  %vm3191_vm7 = vcmask 392448   ;;  %s9436_s27 = smov 16   ;;  %vm3976_vm9 = vcmask 392192  }
  0x17   :  { %8321 = vmatmul.mubr.msk.f32.vlgmr.msra.gmra.mrb[0].mxu0 %vm12423_vm0, %v80_v3  ;;  %538 = vperm.xlu0 %8940, %v79_v2   ;;  %v9526_v12 = vld [vmem:[%s12243_s1 + $0x50] sm:$0xff]  ;;  %v9535_v13 = vld [vmem:[%s12243_s1 + $0x58] sm:$0xff]  ;;  %v9540_v14 = vld [vmem:[%s12243_s1 + $0x60] sm:$0xff]  ;;  %s9440_s21 = smov 48  }
  0x18   :  { %8323 = vmatprep.mubr.msk.f32.mxu0 %vm12423_vm0, %v81_v4  ;;  %v9549_v15 = vld [vmem:[%s12243_s1 + $0x68] sm:$0xff]  ;;  %v9554_v16 = vld [vmem:[%s12243_s1 + $0x70] sm:$0xff]  ;;  %v9563_v17 = vld [vmem:[%s12243_s1 + $0x78] sm:$0xff]  ;;  %s9432_s1 = smov 96  }
  0x19   :  { %v7938_v18 = vld [vmem:[%s12245_s3] ss:$0 sm:$0xff] }
  0x1a   :  { %546 = vperm.xlu1 %8941, %v81_v4  }
  0x1b   :  { %8324 = vmatmul.mubr.msk.f32.gmra.mrb[2].mxu0 %vm12423_vm0, %v82_v5  ;;  %554 = vperm.xlu0 %8940, %v83_v6  }
  0x1c   :  { %8326 = vmatprep.mubr.msk.f32.mxu0 %vm12423_vm0, %v83_v6 }
  0x1e   :  { %550 = vperm.xlu1 %8941, %v82_v5  }
  0x1f   :  { %8327 = vmatmul.mubr.msk.f32.gmra.mrb[4].mxu0 %vm12423_vm0, %v84_v7  ;;  %558 = vperm.xlu0 %8940, %v84_v7  }
  0x20   :  { %8329 = vmatprep.mubr.msk.f32.mxu0 %vm12423_vm0, %v85_v8 }
  0x22   :  { %562 = vperm.xlu1 %8941, %v85_v8  }
  0x23   :  { %8330 = vmatmul.mubr.msk.f32.gmra.mrb[6].mxu0 %vm12423_vm0, %v86_v9 }
  0x24   :  { %8332 = vmatprep.mubr.msk.f32.mxu0 %vm12423_vm0, %v9513_v10 }
  0x26   :  { %566 = vperm.xlu1 %8941, %v86_v9  }
  0x27   :  { %8333 = vmatmul.mubr.msk.f32.gmra.mrb[8].mxu0 %vm12423_vm0, %v9521_v11 }
  0x28   :  { %8335 = vmatprep.mubr.msk.f32.mxu0 %vm12423_vm0, %v9526_v12 }
  0x2b   :  { %8336 = vmatmul.mubr.msk.f32.gmra.mrb[10].mxu0 %vm12423_vm0, %v9535_v13 }
  0x2c   :  { %8338 = vmatprep.mubr.msk.f32.mxu0 %vm12423_vm0, %v9540_v14 }
  0x2f   :  { %8339 = vmatmul.mubr.msk.f32.gmra.mrb[12].mxu0 %vm12423_vm0, %v9549_v15 }
  0x30   :  { %8341 = vmatprep.mubr.msk.f32.mxu0 %vm12423_vm0, %v9554_v16 }
  0x33   :  { %8342 = vmatmul.mubr.msk.f32.gmra.mrb[14].mxu0 %vm12423_vm0, %v9563_v17 }
  0x95   :  { %v9635_v3 = vpop.permute.xlu1 %542 }
  0x96   :  { %v9639_v5 = vpop.permute.xlu0 %538 }
  0x99   :  { %v9637_v4 = vpop.permute.xlu1 %546 }
  0x9a   :  { %v9643_v7 = vpop.permute.xlu0 %554 }
  0x9d   :  { %v9641_v6 = vpop.permute.xlu1 %550 }
  0x9e   :  { %v9647_v9 = vpop.permute.xlu0 %558 }
  0xa1   :  { %v9645_v8 = vpop.permute.xlu1 %562 }
  0xea   :  { %v8322_v19 = vpop.f32.mrb[0].mxu0 }
  0xeb   :  { %v9570_v20 = vadd.f32 %v8322_v19, %v7938_v18  ;;  %v216_v21 = vpop.f32.mrb[1].mxu0 }
  0xec   :  { %v9572_v22 = vadd.f32 %v7938_v18, %v216_v21 }
  0xed   :  { %v299_v23 = vsel %vm295_vm1, %v9570_v20, -inf }
  0xee   :  { %300 = vmax.xlane.f32.xlu0 %v299_v23  ;;  %v8325_v24 = vpop.f32.mrb[2].mxu0  ;;  %v296_v29 = vsel %vm295_vm1, %v9572_v22, -inf }
  0xef   :  { %v9576_v25 = vadd.f32 %v8325_v24, %v7938_v18  ;;  %v226_v26 = vpop.f32.mrb[3].mxu0 }
  0xf0   :  { %v9578_v27 = vadd.f32 %v7938_v18, %v226_v26 }
  0xf1   :  { %v305_v28 = vsel %vm295_vm1, %v9576_v25, -inf }
  0xf2   :  { %306 = vmax.xlane.f32.xlu1 %v305_v28  ;;  %297 = vmax.xlane.f32.xlu0 %v296_v29  ;;  %v8328_v30 = vpop.f32.mrb[4].mxu0  ;;  %v302_v32 = vsel %vm295_vm1, %v9578_v27, -inf }
  0xf3   :  { %v9584_v31 = vadd.f32 %v8328_v30, %v7938_v18  ;;  %v236_v33 = vpop.f32.mrb[5].mxu0 }
  0xf4   :  { %v9619_v59 = vadd.f32 %v7938_v18, %v236_v33 }
  0xf5   :  { %v311_v36 = vsel %vm295_vm1, %v9584_v31, -inf }
  0xf6   :  { %303 = vmax.xlane.f32.xlu1 %v302_v32  ;;  %v8331_v34 = vpop.f32.mrb[6].mxu0  ;;  %v308_v61 = vsel %vm295_vm1, %v9619_v59, -inf }
  0xf7   :  { %v9588_v35 = vadd.f32 %v8331_v34, %v7938_v18  ;;  %v246_v37 = vpop.f32.mrb[7].mxu0 }
  0xf8   :  { %v9621_v60 = vadd.f32 %v7938_v18, %v246_v37 }
  0xf9   :  { %v317_v40 = vsel %vm295_vm1, %v9588_v35, -inf }
  0xfa   :  { %312 = vmax.xlane.f32.xlu1 %v311_v36  ;;  %v8334_v38 = vpop.f32.mrb[8].mxu0  ;;  %v314_v62 = vsel %vm295_vm1, %v9621_v60, -inf }
  0xfb   :  { %v9592_v39 = vadd.f32 %v8334_v38, %v7938_v18  ;;  %v256_v41 = vpop.f32.mrb[9].mxu0 }
  0xfc   :  { %v9596_v42 = vadd.f32 %v7938_v18, %v256_v41 }
  0xfd   :  { %v323_v45 = vsel %vm295_vm1, %v9592_v39, -inf }
  0xfe   :  { %318 = vmax.xlane.f32.xlu1 %v317_v40  ;;  %v8337_v43 = vpop.f32.mrb[10].mxu0  ;;  %v320_v63 = vsel %vm295_vm1, %v9596_v42, -inf }
  0xff   :  { %v9598_v44 = vadd.f32 %v8337_v43, %v7938_v18  ;;  %v266_v46 = vpop.f32.mrb[11].mxu0 }
 0x100   :  { %v9602_v47 = vadd.f32 %v7938_v18, %v266_v46 }
 0x101   :  { %v329_v50 = vsel %vm295_vm1, %v9598_v44, -inf }
 0x102   :  { %324 = vmax.xlane.f32.xlu1 %v323_v45  ;;  %v8340_v48 = vpop.f32.mrb[12].mxu0  ;;  %v326_v0 = vsel %vm295_vm1, %v9602_v47, -inf }
 0x103   :  { %v9604_v49 = vadd.f32 %v8340_v48, %v7938_v18  ;;  %v276_v51 = vpop.f32.mrb[13].mxu0 }
 0x104   :  { %v9608_v52 = vadd.f32 %v7938_v18, %v276_v51 }
 0x105   :  { %v335_v55 = vsel %vm295_vm1, %v9604_v49, -inf }
 0x106   :  { %330 = vmax.xlane.f32.xlu1 %v329_v50  ;;  %v8343_v53 = vpop.f32.mrb[14].mxu0  ;;  %v332_v1 = vsel %vm295_vm1, %v9608_v52, -inf }
 0x107   :  { %v9610_v54 = vadd.f32 %v8343_v53, %v7938_v18  ;;  %v286_v56 = vpop.f32.mrb[15].mxu0 }
 0x108   :  { %570 = vperm.xlu0 %8940, %v9513_v10   ;;  %v9615_v57 = vadd.f32 %v7938_v18, %v286_v56  ;;  %v9649_v10 = vpop.permute.xlu1 %566 }
 0x109   :  { %v341_v58 = vsel %vm295_vm1, %v9610_v54, -inf  ;;  %12428 = vst [vmem:[#allocation8_spill] sm:$0xff] %v9649_v10 }
 0x10a   :  { %336 = vmax.xlane.f32.xlu1 %v335_v55  ;;  %v338_v2 = vsel %vm295_vm1, %v9615_v57, -inf }
 0x10e   :  { %342 = vmax.xlane.f32.xlu1 %v341_v58 }
 0x127   :  { %309 = vmax.xlane.f32.xlu0 %v308_v61 }
 0x12b   :  { %315 = vmax.xlane.f32.xlu0 %v314_v62 }
 0x12f   :  { %321 = vmax.xlane.f32.xlu0 %v320_v63 }
 0x133   :  { %327 = vmax.xlane.f32.xlu0 %v326_v0 }
 0x137   :  { %333 = vmax.xlane.f32.xlu0 %v332_v1 }
 0x13b   :  { %339 = vmax.xlane.f32.xlu0 %v338_v2 }
 0x17b   :  { %v301_v18 = vpop.xlane.xlu0 %300 }
 0x17c   :  { %v345_v19 = vsub.f32 %v9570_v20, %v301_v18 }
 0x17e   :  { %v362_v21 = vmul.f32 1.442695, %v345_v19 }
 0x17f   :  { %v307_v23 = vpop.xlane.xlu1 %306  ;;  %v298_v24 = vpop.xlane.xlu0 %297 }
 0x180   :  { %9032 = vpow2.f32 %v362_v21  ;;  %v347_v26 = vsub.f32 %v9576_v25, %v307_v23  ;;  %v344_v28 = vsub.f32 %v9572_v22, %v298_v24 }
 0x182   :  { %v366_v29 = vmul.f32 1.442695, %v347_v26  ;;  %v360_v30 = vmul.f32 1.442695, %v344_v28 }
 0x183   :  { %v304_v32 = vpop.xlane.xlu1 %303 }
 0x184   :  { %9034 = vpow2.f32 %v366_v29  ;;  %v346_v33 = vsub.f32 %v9578_v27, %v304_v32 }
 0x185   :  { %9036 = vpow2.f32 %v360_v30 }
 0x186   :  { %v364_v34 = vmul.f32 1.442695, %v346_v33 }
 0x187   :  { %v313_v36 = vpop.xlane.xlu1 %312  ;;  %v9701_v29 = vpop.permute.xlu0 %570 }
 0x188   :  { %9038 = vpow2.f32 %v364_v34  ;;  %v349_v37 = vsub.f32 %v9584_v31, %v313_v36 }
 0x18a   :  { %v9656_v38 = vpop.eup %9032  ;;  %v370_v40 = vmul.f32 1.442695, %v349_v37 }
 0x18b   :  { %410 = vrot.lane.b32.xlu1 %v9656_v38, %s9432_s1  ;;  %v319_v41 = vpop.xlane.xlu1 %318 }
 0x18c   :  { %9040 = vpow2.f32 %v370_v40  ;;  %v351_v43 = vsub.f32 %v9588_v35, %v319_v41 }
 0x18e   :  { %v9661_v45 = vpop.eup %9034  ;;  %v374_v46 = vmul.f32 1.442695, %v351_v43 }
 0x18f   :  { %v9663_v48 = vpop.eup %9036  ;;  %414 = vrot.lane.b32.xlu1 %v9661_v45, %s9432_s1  ;;  %v325_v50 = vpop.xlane.xlu1 %324 }
 0x190   :  { %9042 = vpow2.f32 %v374_v46  ;;  %v353_v51 = vsub.f32 %v9592_v39, %v325_v50  ;;  %408 = vrot.lane.b32.xlu0 %v9663_v48, %s9432_s1 }
 0x192   :  { %v9670_v53 = vpop.eup %9038  ;;  %v378_v55 = vmul.f32 1.442695, %v353_v51 }
 0x193   :  { %412 = vrot.lane.b32.xlu1 %v9670_v53, %s9432_s1  ;;  %v331_v56 = vpop.xlane.xlu1 %330 }
 0x194   :  { %9044 = vpow2.f32 %v378_v55  ;;  %v355_v58 = vsub.f32 %v9598_v44, %v331_v56 }
 0x196   :  { %v9675_v61 = vpop.eup %9040  ;;  %v382_v62 = vmul.f32 1.442695, %v355_v58 }
 0x197   :  { %418 = vrot.lane.b32.xlu1 %v9675_v61, %s9432_s1  ;;  %v337_v63 = vpop.xlane.xlu1 %336 }
 0x198   :  { %9046 = vpow2.f32 %v382_v62  ;;  %v357_v0 = vsub.f32 %v9604_v49, %v337_v63 }
 0x19a   :  { %v9680_v1 = vpop.eup %9042  ;;  %v386_v2 = vmul.f32 1.442695, %v357_v0 }
 0x19b   :  { %422 = vrot.lane.b32.xlu1 %v9680_v1, %s9432_s1  ;;  %v343_v18 = vpop.xlane.xlu1 %342 }
 0x19c   :  { %9048 = vpow2.f32 %v386_v2  ;;  %v359_v19 = vsub.f32 %v9610_v54, %v343_v18 }
 0x19e   :  { %v9685_v21 = vpop.eup %9044  ;;  %v390_v23 = vmul.f32 1.442695, %v359_v19 }
 0x19f   :  { %426 = vrot.lane.b32.xlu1 %v9685_v21, %s9432_s1 }
 0x1a0   :  { %9050 = vpow2.f32 %v390_v23 }
 0x1a2   :  { %v9689_v24 = vpop.eup %9046 }
 0x1a3   :  { %430 = vrot.lane.b32.xlu1 %v9689_v24, %s9432_s1 }
 0x1a6   :  { %v9693_v26 = vpop.eup %9048 }
 0x1a7   :  { %434 = vrot.lane.b32.xlu1 %v9693_v26, %s9432_s1 }
 0x1aa   :  { %v9697_v28 = vpop.eup %9050 }
 0x1ab   :  { %438 = vrot.lane.b32.xlu1 %v9697_v28, %s9432_s1 }
 0x1b4   :  { %v310_v30 = vpop.xlane.xlu0 %309 }
 0x1b5   :  { %v348_v32 = vsub.f32 %v9619_v59, %v310_v30 }
 0x1b7   :  { %v368_v33 = vmul.f32 1.442695, %v348_v32 }
 0x1b8   :  { %v316_v34 = vpop.xlane.xlu0 %315 }
 0x1b9   :  { %9052 = vpow2.f32 %v368_v33  ;;  %v350_v36 = vsub.f32 %v9621_v60, %v316_v34 }
 0x1bb   :  { %v372_v37 = vmul.f32 1.442695, %v350_v36 }
 0x1bc   :  { %v322_v40 = vpop.xlane.xlu0 %321 }
 0x1bd   :  { %9054 = vpow2.f32 %v372_v37  ;;  %v352_v41 = vsub.f32 %v9596_v42, %v322_v40 }
 0x1bf   :  { %v376_v43 = vmul.f32 1.442695, %v352_v41 }
 0x1c0   :  { %v328_v46 = vpop.xlane.xlu0 %327 }
 0x1c1   :  { %9056 = vpow2.f32 %v376_v43  ;;  %v354_v50 = vsub.f32 %v9602_v47, %v328_v46 }
 0x1c3   :  { %v9707_v51 = vpop.eup %9052  ;;  %v380_v55 = vmul.f32 1.442695, %v354_v50 }
 0x1c4   :  { %416 = vrot.lane.b32.xlu0 %v9707_v51, %s9432_s1  ;;  %v334_v56 = vpop.xlane.xlu0 %333 }
 0x1c5   :  { %9058 = vpow2.f32 %v380_v55  ;;  %v356_v58 = vsub.f32 %v9608_v52, %v334_v56  ;;  %v12249_v56 = vmov 0.0  }
 0x1c6   :  { %8344 = vmatprep.subr.bf16.mxu1 %v12249_v56  ;;  %8368 = vmatprep.subr.bf16.mxu0 %v12249_v56 }
 0x1c7   :  { %v9712_v62 = vpop.eup %9054  ;;  %v384_v63 = vmul.f32 1.442695, %v356_v58  ;;  %8346 = vmatprep.mubr.msk.bf16.mxu1 %vm9434_vm3, %v12249_v56  ;;  %8370 = vmatprep.mubr.msk.bf16.mxu0 %vm9434_vm3, %v12249_v56 }
 0x1c8   :  { %420 = vrot.lane.b32.xlu0 %v9712_v62, %s9432_s1  ;;  %v340_v0 = vpop.xlane.xlu0 %339 }
 0x1c9   :  { %9060 = vpow2.f32 %v384_v63  ;;  %v358_v2 = vsub.f32 %v9615_v57, %v340_v0 }
 0x1cb   :  { %v9717_v18 = vpop.eup %9056  ;;  %v388_v19 = vmul.f32 1.442695, %v358_v2 }
 0x1cc   :  { %424 = vrot.lane.b32.xlu0 %v9717_v18, %s9432_s1 }
 0x1cd   :  { %9062 = vpow2.f32 %v388_v19 }
 0x1cf   :  { %v9721_v23 = vpop.eup %9058 }
 0x1d0   :  { %428 = vrot.lane.b32.xlu0 %v9721_v23, %s9432_s1 }
 0x1d3   :  { %v9725_v30 = vpop.eup %9060 }
 0x1d4   :  { %432 = vrot.lane.b32.xlu0 %v9725_v30, %s9432_s1 }
 0x1d7   :  { %v9729_v32 = vpop.eup %9062 }
 0x1d8   :  { %436 = vrot.lane.b32.xlu0 %v9729_v32, %s9432_s1 }
 0x1fd   :  { %v411_v33 = vpop.permute.xlu1 %410 }
 0x1fe   :  { %v460_v34 = vsel %vm456_vm2, %v411_v33, 0.0 }
 0x1ff   :  { %461 = vadd.xlane.f32.xlu1 %v460_v34 }
 0x201   :  { %v415_v36 = vpop.permute.xlu1 %414 }
 0x202   :  { %v409_v37 = vpop.permute.xlu0 %408  ;;  %v466_v43 = vsel %vm456_vm2, %v415_v36, 0.0 }
 0x203   :  { %v457_v40 = vsel %vm456_vm2, %v409_v37, 0.0 }
 0x204   :  { %458 = vadd.xlane.f32.xlu0 %v457_v40 }
 0x205   :  { %v413_v41 = vpop.permute.xlu1 %412 }
 0x206   :  { %v463_v55 = vsel %vm456_vm2, %v413_v41, 0.0 }
 0x208   :  { %467 = vadd.xlane.f32.xlu0 %v466_v43 }
 0x209   :  { %v419_v46 = vpop.permute.xlu1 %418 }
 0x20a   :  { %v472_v50 = vsel %vm456_vm2, %v419_v46, 0.0 }
 0x20b   :  { %473 = vadd.xlane.f32.xlu1 %v472_v50 }
 0x20c   :  { %464 = vadd.xlane.f32.xlu0 %v463_v55 }
 0x21c   :  { %578 = vperm.xlu1 %8941, %v9526_v12   ;;  %v423_v12 = vpop.permute.xlu1 %422 }
 0x21d   :  { %v478_v50 = vsel %vm456_vm2, %v423_v12, 0.0 }
 0x220   :  { %582 = vperm.xlu1 %8941, %v9535_v13   ;;  %v427_v0 = vpop.permute.xlu1 %426 }
 0x224   :  { %586 = vperm.xlu1 %8941, %v9540_v14   ;;  %v431_v19 = vpop.permute.xlu1 %430 }
 0x225   :  { %v490_v37 = vsel %vm456_vm2, %v431_v19, 0.0 }
 0x228   :  { %v435_v36 = vpop.permute.xlu1 %434 }
 0x22c   :  { %v439_v43 = vpop.permute.xlu1 %438 }
 0x22d   :  { %v502_v46 = vsel %vm456_vm2, %v439_v43, 0.0 }
 0x236   :  { %v417_v58 = vpop.permute.xlu0 %416 }
 0x237   :  { %v469_v63 = vsel %vm456_vm2, %v417_v58, 0.0  ;;  %v496_v58 = vsel %vm456_vm2, %v435_v36, 0.0 }
 0x238   :  { %470 = vadd.xlane.f32.xlu0 %v469_v63 }
 0x23a   :  { %v421_v13 = vpop.permute.xlu0 %420 }
 0x23b   :  { %v475_v2 = vsel %vm456_vm2, %v421_v13, 0.0 }
 0x23e   :  { %v425_v14 = vpop.permute.xlu0 %424 }
 0x23f   :  { %v481_v34 = vsel %vm456_vm2, %v425_v14, 0.0 }
 0x242   :  { %v429_v33 = vpop.permute.xlu0 %428 }
 0x243   :  { %v487_v55 = vsel %vm456_vm2, %v429_v33, 0.0 }
 0x246   :  { %v433_v40 = vpop.permute.xlu0 %432 }
 0x247   :  { %v493_v41 = vsel %vm456_vm2, %v433_v40, 0.0 }
 0x248   :  { %476 = vadd.xlane.f32.xlu1 %v475_v2 }
 0x24a   :  { %v437_v63 = vpop.permute.xlu0 %436 }
 0x24b   :  { %v499_v13 = vsel %vm456_vm2, %v437_v63, 0.0 }
 0x24c   :  { %482 = vadd.xlane.f32.xlu1 %v481_v34 }
 0x24e   :  { %574 = vperm.xlu0 %8940, %v9521_v11   ;;  %v484_v11 = vsel %vm456_vm2, %v427_v0, 0.0 }
 0x250   :  { %491 = vadd.xlane.f32.xlu1 %v490_v37 }
 0x254   :  { %494 = vadd.xlane.f32.xlu1 %v493_v41 }
 0x258   :  { %503 = vadd.xlane.f32.xlu1 %v502_v46 }
 0x269   :  { %594 = vperm.xlu1 %8941, %v9554_v16  }
 0x26d   :  { %479 = vadd.xlane.f32.xlu0 %v478_v50  ;;  %598 = vperm.xlu1 %8941, %v9563_v17  }
 0x271   :  { %485 = vadd.xlane.f32.xlu0 %v484_v11 }
 0x275   :  { %488 = vadd.xlane.f32.xlu0 %v487_v55 }
 0x279   :  { %497 = vadd.xlane.f32.xlu0 %v496_v58 }
 0x27d   :  { %500 = vadd.xlane.f32.xlu0 %v499_v13 }
 0x28c   :  { %v462_v14 = vpop.xlane.xlu1 %461 }
 0x28d   :  { %9064 = vrcp.f32 %v462_v14 }
 0x291   :  { %v459_v16 = vpop.xlane.xlu0 %458 }
 0x292   :  { %9066 = vrcp.f32 %v459_v16 }
 0x293   :  { %590 = vperm.xlu0 %8940, %v9549_v15  }
 0x295   :  { %v468_v17 = vpop.xlane.xlu0 %467 }
 0x296   :  { %9068 = vrcp.f32 %v468_v17 }
 0x297   :  { %v9065_v12 = vpop.eup %9064 }
 0x298   :  { %v508_v0 = vmul.f32 %v9065_v12, %v9656_v38  ;;  %v474_v2 = vpop.xlane.xlu1 %473 }
 0x299   :  { %9070 = vrcp.f32 %v474_v2  ;;  %v465_v19 = vpop.xlane.xlu0 %464 }
 0x29a   :  { %9072 = vrcp.f32 %v465_v19  ;;  %v9764_v33 = vmul.f32 %v9635_v3, %v508_v0  ;;  %v9025_v0 = vld [vmem:[%s12242_s0 + $0x8] sm:$0xff]  }
 0x29c   :  { %12429 = vst [vmem:[#allocation9_spill] sm:$0xff] %v9764_v33  ;;  %v9067_v34 = vpop.eup %9066  ;;  %1560 = vrot.lane.b32.xlu1 %v9764_v33, %s9432_s1  ;;  %v619_v38 = vsel %vm617_vm4, %v9570_v20, %v9764_v33  ;;  %v9818_v2 = vpop.permute.xlu1 %578  ;;  %v38_v33 = vld [vmem:[#allocation2 + $0x10] sm:$0xff] }
 0x29d   :  { %v506_v36 = vmul.f32 %v9067_v34, %v9663_v48  ;;  %v636_v43 = vsel %vm634_vm5, %v619_v38, 1.0 }
 0x29f   :  { %v9770_v15 = vmul.f32 %v9639_v5, %v506_v36 }
 0x2a0   :  { %v9069_v37 = vpop.eup %9068  ;;  %v9820_v34 = vpop.permute.xlu1 %582 }
 0x2a1   :  { %12430 = vst [vmem:[#allocation10_spill] sm:$0xff] %v9770_v15  ;;  %v512_v40 = vmul.f32 %v9069_v37, %v9661_v45  ;;  %1558 = vrot.lane.b32.xlu1 %v9770_v15, %s9432_s1  ;;  %v618_v41 = vsel %vm617_vm4, %v9572_v22, %v9770_v15  ;;  %v9024_v45 = vld [vmem:[%s12242_s0] sm:$0xff]  }
 0x2a2   :  { %v635_v48 = vsel %vm634_vm5, %v618_v41, 1.0 }
 0x2a3   :  { %v9071_v46 = vpop.eup %9070  ;;  %v9784_v50 = vmul.f32 %v9641_v6, %v512_v40  ;;  %v651_v11 = vpack.c.bf16 %v636_v43, %v635_v48 }
 0x2a4   :  { %v9073_v55 = vpop.eup %9072  ;;  %v516_v58 = vmul.f32 %v9071_v46, %v9675_v61  ;;  %v9822_v38 = vpop.permute.xlu1 %586 }
 0x2a5   :  { %12431 = vst [vmem:[#allocation11_spill] sm:$0xff] %v9784_v50  ;;  %v510_v63 = vmul.f32 %v9073_v55, %v9670_v53  ;;  %8345 = vmatpush3.bf16.msra.mxu1 %v651_v11  ;;  %v621_v61 = vsel %vm617_vm4, %v9576_v25, %v9784_v50  ;;  %v9026_v55 = vld [vmem:[%s12242_s0 + $0x10] sm:$0xff]  }
 0x2a6   :  { %v9792_v13 = vmul.f32 %v9647_v9, %v516_v58  ;;  %8350 = vmatprep.subr.bf16.mxu1 %v12249_v56  ;;  %v638_v17 = vsel %vm634_vm5, %v621_v61, 1.0 }
 0x2a7   :  { %v9796_v14 = vmul.f32 %v9637_v4, %v510_v63 }
 0x2a8   :  { %12432 = vst [vmem:[#allocation12_spill] sm:$0xff] %v9792_v13  ;;  %8347 = vmatmul.mubr.msk.bf16.vlgmr.msra.gmra.mrb[0].mxu1 %vm664_vm6, %v9024_v45  ;;  %1786 = vrot.lane.b32.xlu0 %v9792_v13, %s9432_s1  ;;  %v623_v41 = vsel %vm617_vm4, %v9584_v31, %v9792_v13 }
 0x2a9   :  { %12433 = vst [vmem:[#allocation13_spill] sm:$0xff] %v9796_v14  ;;  %v620_v53 = vsel %vm617_vm4, %v9578_v27, %v9796_v14  ;;  %8352 = vmatprep.mubr.msk.bf16.mxu1 %vm9434_vm3, %v12249_v56  ;;  %v640_v11 = vsel %vm634_vm5, %v623_v41, 1.0 }
 0x2aa   :  { %v637_v16 = vsel %vm634_vm5, %v620_v53, 1.0 }
 0x2ab   :  { %v652_v12 = vpack.c.bf16 %v638_v17, %v637_v16 }
 0x2ad   :  { %8351 = vmatpush3.bf16.msra.mxu1 %v652_v12 }
 0x2ae   :  { %8356 = vmatprep.subr.bf16.mxu1 %v12249_v56 }
 0x2b0   :  { %8353 = vmatmul.mubr.msk.bf16.vlgmr.msra.gmra.mrb[4].mxu1 %vm664_vm6, %v9025_v0 }
 0x2b1   :  { %8358 = vmatprep.mubr.msk.bf16.mxu1 %vm9434_vm3, %v12249_v56 }
 0x2c5   :  { %v471_v19 = vpop.xlane.xlu0 %470 }
 0x2c6   :  { %9074 = vrcp.f32 %v471_v19 }
 0x2cd   :  { %v9857_v19 = vpop.permute.xlu0 %574 }
 0x2d0   :  { %v9075_v36 = vpop.eup %9074 }
 0x2d1   :  { %v514_v37 = vmul.f32 %v9075_v36, %v9707_v51 }
 0x2d3   :  { %v9826_v40 = vmul.f32 %v9643_v7, %v514_v37 }
 0x2d5   :  { %12434 = vst [vmem:[#allocation14_spill] sm:$0xff] %v9826_v40  ;;  %v477_v48 = vpop.xlane.xlu1 %476  ;;  %1784 = vrot.lane.b32.xlu1 %v9826_v40, %s9432_s1  ;;  %v622_v43 = vsel %vm617_vm4, %v9619_v59, %v9826_v40 }
 0x2d6   :  { %v639_v46 = vsel %vm634_vm5, %v622_v43, 1.0 }
 0x2d7   :  { %v653_v51 = vpack.c.bf16 %v640_v11, %v639_v46 }
 0x2d9   :  { %v483_v58 = vpop.xlane.xlu1 %482  ;;  %8357 = vmatpush3.bf16.msra.mxu1 %v653_v51 }
 0x2da   :  { %9076 = vrcp.f32 %v483_v58  ;;  %8362 = vmatprep.subr.bf16.mxu1 %v12249_v56 }
 0x2dc   :  { %8359 = vmatmul.mubr.msk.bf16.vlgmr.msra.gmra.mrb[8].mxu1 %vm664_vm6, %v9026_v55 }
 0x2dd   :  { %v492_v45 = vpop.xlane.xlu1 %491  ;;  %8364 = vmatprep.mubr.msk.bf16.mxu1 %vm9434_vm3, %v12249_v56 }
 0x2e1   :  { %v495_v63 = vpop.xlane.xlu1 %494 }
 0x2e2   :  { %9078 = vrcp.f32 %v495_v63 }
 0x2e3   :  { %9080 = vrcp.f32 %v477_v48 }
 0x2e4   :  { %v9077_v61 = vpop.eup %9076  ;;  %9082 = vrcp.f32 %v492_v45 }
 0x2e5   :  { %v522_v53 = vmul.f32 %v9077_v61, %v9717_v18  ;;  %v504_v41 = vpop.xlane.xlu1 %503 }
 0x2e7   :  { %v9847_v16 = vmul.f32 %v9701_v29, %v522_v53 }
 0x2e9   :  { %12435 = vst [vmem:[#allocation15_spill] sm:$0xff] %v9847_v16  ;;  %2010 = vrot.lane.b32.xlu1 %v9847_v16, %s9432_s1  ;;  %v9871_v61 = vpop.permute.xlu1 %594 }
 0x2ea   :  { %12439 = vst [vmem:[#allocation19_spill] sm:$0xff] %v9871_v61 }
 0x2ec   :  { %v9079_v17 = vpop.eup %9078 }
 0x2ed   :  { %v530_v12 = vmul.f32 %v9079_v17, %v9725_v30  ;;  %v9081_v36 = vpop.eup %9080 }
 0x2ee   :  { %v518_v43 = vmul.f32 %v9081_v36, %v9712_v62  ;;  %v9083_v46 = vpop.eup %9082 }
 0x2ef   :  { %v9853_v0 = vmul.f32 %v9822_v38, %v530_v12  ;;  %v528_v58 = vmul.f32 %v9083_v46, %v9689_v24 }
 0x2f0   :  { %v9861_v11 = vmul.f32 %v9645_v8, %v518_v43 }
 0x2f1   :  { %12436 = vst [vmem:[#allocation16_spill] sm:$0xff] %v9853_v0  ;;  %2236 = vrot.lane.b32.xlu1 %v9853_v0, %s9432_s1  ;;  %v9880_v36 = vmul.f32 %v9820_v34, %v528_v58 }
 0x2f2   :  { %12437 = vst [vmem:[#allocation17_spill] sm:$0xff] %v9861_v11  ;;  %v624_v62 = vsel %vm617_vm4, %v9621_v60, %v9861_v11 }
 0x2f3   :  { %v641_v24 = vsel %vm634_vm5, %v624_v62, 1.0  ;;  %12440 = vst [vmem:[#allocation20_spill] sm:$0xff] %v9880_v36 }
 0x2fa   :  { %v480_v18 = vpop.xlane.xlu0 %479 }
 0x2fb   :  { %9084 = vrcp.f32 %v480_v18 }
 0x2fe   :  { %v486_v37 = vpop.xlane.xlu0 %485 }
 0x2ff   :  { %9086 = vrcp.f32 %v486_v37 }
 0x300   :  { %9088 = vrcp.f32 %v504_v41 }
 0x302   :  { %v489_v30 = vpop.xlane.xlu0 %488 }
 0x303   :  { %9090 = vrcp.f32 %v489_v30  ;;  %v9027_v30 = vld [vmem:[%s12242_s0 + $0x18] sm:$0xff]  }
 0x305   :  { %v9085_v51 = vpop.eup %9084 }
 0x306   :  { %v520_v48 = vmul.f32 %v9085_v51, %v9680_v1  ;;  %v498_v55 = vpop.xlane.xlu0 %497 }
 0x307   :  { %9092 = vrcp.f32 %v498_v55 }
 0x308   :  { %v9866_v45 = vmul.f32 %v9649_v10, %v520_v48  ;;  %v9897_v48 = vpop.permute.xlu1 %598 }
 0x309   :  { %v9087_v63 = vpop.eup %9086  ;;  %12442 = vst [vmem:[#allocation22_spill] sm:$0xff] %v9897_v48 }
 0x30a   :  { %12438 = vst [vmem:[#allocation18_spill] sm:$0xff] %v9866_v45  ;;  %v524_v53 = vmul.f32 %v9087_v63, %v9685_v21  ;;  %v501_v17 = vpop.xlane.xlu0 %500  ;;  %v625_v1 = vsel %vm617_vm4, %v9588_v35, %v9866_v45  ;;  %v9089_v18 = vpop.eup %9088  ;;  %v626_v21 = vsel %vm617_vm4, %v9596_v42, %v9847_v16 }
 0x30b   :  { %9094 = vrcp.f32 %v501_v17  ;;  %v642_v12 = vsel %vm634_vm5, %v625_v1, 1.0  ;;  %v643_v55 = vsel %vm634_vm5, %v626_v21, 1.0  ;;  %v536_v62 = vmul.f32 %v9089_v18, %v9697_v28  ;;  %v9028_v1 = vld [vmem:[%s12242_s0 + $0x20] sm:$0xff]  }
 0x30c   :  { %v654_v37 = vpack.c.bf16 %v642_v12, %v641_v24  ;;  %v9883_v41 = vmul.f32 %v9857_v19, %v524_v53  ;;  %v629_v53 = vsel %vm617_vm4, %v9598_v44, %v9880_v36 }
 0x30d   :  { %v9091_v43 = vpop.eup %9090  ;;  %v646_v21 = vsel %vm634_vm5, %v629_v53, 1.0 }
 0x30e   :  { %12441 = vst [vmem:[#allocation21_spill] sm:$0xff] %v9883_v41  ;;  %v526_v46 = vmul.f32 %v9091_v43, %v9721_v23  ;;  %8363 = vmatpush3.bf16.msra.mxu1 %v654_v37  ;;  %2012 = vrot.lane.b32.xlu0 %v9883_v41, %s9432_s1  ;;  %v627_v51 = vsel %vm617_vm4, %v9592_v39, %v9883_v41  ;;  %v1561_v18 = vpop.permute.xlu1 %1560 }
 0x30f   :  { %v644_v58 = vsel %vm634_vm5, %v627_v51, 1.0  ;;  %8374 = vmatprep.subr.bf16.mxu1 %v12249_v56  ;;  %v9925_v43 = vmul.f32 %v9897_v48, %v536_v62 }
 0x310   :  { %v9904_v23 = vmul.f32 %v9818_v2, %v526_v46  ;;  %v655_v63 = vpack.c.bf16 %v644_v58, %v643_v55  ;;  %v630_v46 = vsel %vm617_vm4, %v9608_v52, %v9853_v0  ;;  %v9029_v55 = vld [vmem:[%s12242_s0 + $0x28] sm:$0xff]  }
 0x311   :  { %v9093_v17 = vpop.eup %9092  ;;  %8365 = vmatmul.mubr.msk.bf16.vlgmr.msra.gmra.mrb[12].mxu1 %vm664_vm6, %v9027_v30  ;;  %12444 = vst [vmem:[#allocation24_spill] sm:$0xff] %v9925_v43 }
 0x312   :  { %12443 = vst [vmem:[#allocation23_spill] sm:$0xff] %v9904_v23  ;;  %8369 = vmatpush3.bf16.msra.mxu0 %v655_v63  ;;  %v532_v24 = vmul.f32 %v9093_v17, %v9693_v26  ;;  %v9914_v12 = vpop.permute.xlu0 %590  ;;  %v628_v28 = vsel %vm617_vm4, %v9602_v47, %v9904_v23  ;;  %8376 = vmatprep.mubr.msk.bf16.mxu1 %vm9434_vm3, %v12249_v56  ;;  %v647_v63 = vsel %vm634_vm5, %v630_v46, 1.0 }
 0x313   :  { %v645_v37 = vsel %vm634_vm5, %v628_v28, 1.0  ;;  %8380 = vmatprep.subr.bf16.mxu0 %v12249_v56  ;;  %v9030_v28 = vld [vmem:[%s12242_s0 + $0x30] sm:$0xff]  }
 0x314   :  { %v9928_v26 = vmul.f32 %v9914_v12, %v532_v24  ;;  %v656_v30 = vpack.c.bf16 %v646_v21, %v645_v37  ;;  %v1559_v24 = vpop.permute.xlu1 %1558  ;;  %v12247_v21 = vmov 0.0|0.0  }
 0x315   :  { %v9095_v51 = vpop.eup %9094  ;;  %8371 = vmatmul.mubr.msk.bf16.vlgmr.msra.gmra.mrb[16].mxu0 %vm664_vm6, %v9028_v1  ;;  %v633_v1 = vsel %vm617_vm4, %v9610_v54, %v9925_v43 }
 0x316   :  { %12445 = vst [vmem:[#allocation25_spill] sm:$0xff] %v9928_v26  ;;  %v534_v58 = vmul.f32 %v9095_v51, %v9729_v32  ;;  %8375 = vmatpush3.bf16.msra.mxu1 %v656_v30  ;;  %2238 = vrot.lane.b32.xlu0 %v9928_v26, %s9432_s1  ;;  %v631_v62 = vsel %vm617_vm4, %v9604_v49, %v9928_v26  ;;  %v650_v46 = vsel %vm634_vm5, %v633_v1, 1.0 }
 0x317   :  { %v648_v53 = vsel %vm634_vm5, %v631_v62, 1.0  ;;  %8382 = vmatprep.mubr.msk.bf16.mxu0 %vm9434_vm3, %v12249_v56  ;;  %8386 = vmatprep.subr.bf16.mxu1 %v12249_v56 }
 0x318   :  { %v9949_v17 = vmul.f32 %v9871_v61, %v534_v58  ;;  %v657_v32 = vpack.c.bf16 %v648_v53, %v647_v63  ;;  %v9031_v58 = vld [vmem:[%s12242_s0 + $0x38] sm:$0xff]   ;;  %v35_v61 = vld [vmem:[#allocation2 + $0x40] sm:$0xff] }
 0x319   :  { %8377 = vmatmul.mubr.msk.bf16.vlgmr.msra.gmra.mrb[16].mxu1 %vm664_vm6, %v9029_v55  ;;  %v8759_v55 = vpack.c.bf16 %v1561_v18, %v1559_v24 }
 0x31a   :  { %12446 = vst [vmem:[#allocation26_spill] sm:$0xff] %v9949_v17  ;;  %1564 = vxpose.xlu1.b32.start [1/2] (short) (narrow) %v1559_v24, 8  ;;  %8381 = vmatpush3.bf16.msra.mxu0 %v657_v32  ;;  %v632_v37 = vsel %vm617_vm4, %v9615_v57, %v9949_v17 }
 0x31b   :  { %8758 = vmatprep.subr.bf16.mxu0 %v12247_v21  ;;  %v649_v30 = vsel %vm634_vm5, %v632_v37, 1.0  ;;  %8388 = vmatprep.mubr.msk.bf16.mxu1 %vm9434_vm3, %v12249_v56 }
 0x31c   :  { %v658_v51 = vpack.c.bf16 %v650_v46, %v649_v30 }
 0x31d   :  { %8383 = vmatmul.mubr.msk.bf16.vlgmr.msra.gmra.mrb[20].mxu0 %vm664_vm6, %v9030_v28 }
 0x31e   :  { %1565 = vxpose.xlu1.b32.end [2/2] (short) (narrow) %v1561_v18, 8  ;;  %8387 = vmatpush3.bf16.msra.mxu1 %v658_v51  ;;  %v1787_v18 = vpop.permute.xlu0 %1786 }
 0x31f   :  { %8760 = vmatpush3.bf16.msra.mxu0 %v8759_v55  ;;  %8396 = vmatprep.mubr.msk.f32.mxu0 %vm9434_vm3, %v12249_v56 }
 0x320   :  { %8764 = vmatprep.subr.bf16.mxu0 %v12247_v21  ;;  %8761 = vmatprep.subr.bf16.mxu1 %v12247_v21 }
 0x321   :  { %8389 = vmatmul.mubr.msk.bf16.vlgmr.msra.gmra.mrb[20].mxu1 %vm664_vm6, %v9031_v58 }
 0x322   :  { %8403 = vmatprep.mubr.msk.f32.mxu1 %vm9434_vm3, %v12249_v56 }
 0x33c   :  { %1673 = vrot.lane.b32.xlu1 %v9784_v50, %s9432_s1 }
 0x347   :  { %v1785_v62 = vpop.permute.xlu1 %1784 }
 0x348   :  { %1790 = vxpose.xlu0.b32.start [1/2] (short) (narrow) %v1785_v62, 8  ;;  %v8765_v21 = vpack.c.bf16 %v1787_v18, %v1785_v62 }
 0x34c   :  { %1791 = vxpose.xlu0.b32.end [2/2] (short) (narrow) %v1787_v18, 8 }
 0x35b   :  { %v2011_v63 = vpop.permute.xlu1 %2010 }
 0x35c   :  { %2016 = vxpose.xlu0.b32.start [1/2] (short) (narrow) %v2011_v63, 8 }
 0x363   :  { %v2237_v30 = vpop.permute.xlu1 %2236 }
 0x37b   :  { %v9979_v53 = vpop.f32.mrb[0].mxu1 }
 0x37c   :  { %12447 = vst [vmem:[#allocation27_spill] sm:$0xff] %v9979_v53  ;;  %v8348_v32 = vpop.f32.mrb[1].mxu1 }
 0x37d   :  { %v9981_v1 = vpop.f32.mrb[2].mxu1  ;;  %v12451_v32 = vmov 0.0  }
 0x37e   :  { %12448 = vst [vmem:[#allocation28_spill] sm:$0xff] %v9981_v1  ;;  %v8349_v24 = vpop.f32.mrb[3].mxu1 }
 0x37f   :  { %v12452_v24 = vmov 0.0|0.0  }
 0x380   :  { %v2013_v28 = vpop.permute.xlu0 %2012 }
 0x381   :  { %2017 = vxpose.xlu0.b32.end [2/2] (short) (narrow) %v2013_v28, 8 }
 0x383   :  { %v9983_v37 = vpop.f32.mrb[4].mxu1 }
 0x384   :  { %12449 = vst [vmem:[#allocation29_spill] sm:$0xff] %v9983_v37  ;;  %v8354_v46 = vpop.f32.mrb[5].mxu1 }
 0x385   :  { %v9985_v51 = vpop.f32.mrb[6].mxu1  ;;  %2242 = vxpose.xlu0.b32.start [1/2] (short) (narrow) %v2237_v30, 8 }
 0x386   :  { %12450 = vst [vmem:[#allocation30_spill] sm:$0xff] %v9985_v51  ;;  %v8355_v55 = vpop.f32.mrb[7].mxu1 }
 0x388   :  { %v2239_v58 = vpop.permute.xlu0 %2238 }
 0x389   :  { %2243 = vxpose.xlu0.b32.end [2/2] (short) (narrow) %v2239_v58, 8  ;;  %v8777_v10 = vpack.c.bf16 %v2239_v58, %v2237_v30  ;;  %v36_v30 = vld [vmem:[#allocation2 + $0x78] sm:$0xff] }
 0x39a   :  { %v1580_v56 = vpop.trf.xlu1 }
 0x39b   :  { %8397 = vmatmul.mubr.msk.f32.vlgmr.msra.gmra.mrb[24].mxu0 %vm664_vm6, %v1580_v56  ;;  %v8771_v56 = vpack.c.bf16 %v2013_v28, %v2011_v63 }
 0x39c   :  { %8766 = vmatpush3.bf16.msra.mxu0 %v8765_v21  ;;  %8410 = vmatprep.mubr.msk.f32.mxu0 %vm9434_vm3, %v12451_v32 }
 0x39d   :  { %8770 = vmatprep.subr.bf16.mxu0 %v12452_v24 }
 0x3af   :  { %v9991_v26 = vpop.f32.mrb[8].mxu1 }
 0x3b0   :  { %12453 = vst [vmem:[#allocation31_spill] sm:$0xff] %v9991_v26  ;;  %v8360_v0 = vpop.f32.mrb[9].mxu1 }
 0x3b1   :  { %v9993_v46 = vpop.f32.mrb[10].mxu1 }
 0x3b2   :  { %12454 = vst [vmem:[#allocation32_spill] sm:$0xff] %v9993_v46  ;;  %1671 = vrot.lane.b32.xlu0 %v9796_v14, %s9432_s1  ;;  %v8361_v55 = vpop.f32.mrb[11].mxu1 }
 0x3b6   :  { %1897 = vrot.lane.b32.xlu0 %v9861_v11, %s9432_s1 }
 0x3ba   :  { %1899 = vrot.lane.b32.xlu0 %v9866_v45, %s9432_s1 }
 0x3be   :  { %2125 = vrot.lane.b32.xlu0 %v9880_v36, %s9432_s1 }
 0x3c8   :  { %v1806_v21 = vpop.trf.xlu0 }
 0x3c9   :  { %8411 = vmatmul.mubr.msk.f32.vlgmr.msra.gmra.mrb[26].mxu0 %vm664_vm6, %v1806_v21 }
 0x3ca   :  { %8772 = vmatpush3.bf16.msra.mxu0 %v8771_v56  ;;  %8424 = vmatprep.mubr.msk.f32.mxu0 %vm9434_vm3, %v12451_v32 }
 0x3cb   :  { %8776 = vmatprep.subr.bf16.mxu0 %v12452_v24 }
 0x3e4   :  { %v10007_v0 = vpop.f32.mrb[12].mxu1 }
 0x3e5   :  { %12455 = vst [vmem:[#allocation33_spill] sm:$0xff] %v10007_v0  ;;  %v8366_v62 = vpop.f32.mrb[13].mxu1 }
 0x3e6   :  { %v10009_v18 = vpop.f32.mrb[14].mxu1 }
 0x3e7   :  { %12456 = vst [vmem:[#allocation34_spill] sm:$0xff] %v10009_v18  ;;  %v8367_v55 = vpop.f32.mrb[15].mxu1 }
 0x3e8   :  { %v10011_v41 = vpop.f32.mrb[16].mxu0 }
 0x3e9   :  { %12457 = vst [vmem:[#allocation35_spill] sm:$0xff] %v10011_v41  ;;  %v8372_v16 = vpop.f32.mrb[17].mxu0 }
 0x3ea   :  { %v10013_v36 = vpop.f32.mrb[18].mxu0 }
 0x3eb   :  { %12458 = vst [vmem:[#allocation36_spill] sm:$0xff] %v10013_v36  ;;  %v8373_v63 = vpop.f32.mrb[19].mxu0 }
 0x3ec   :  { %v10015_v28 = vpop.f32.mrb[16].mxu1  ;;  %v39_v63 = vld [vmem:[#allocation2 + $0x48] sm:$0xff] }
 0x3ed   :  { %12459 = vst [vmem:[#allocation37_spill] sm:$0xff] %v10015_v28  ;;  %v8378_v56 = vpop.f32.mrb[17].mxu1  ;;  %v8782_v15 = vpack.c.bf16 %v39_v63, %v38_v33 }
 0x3ee   :  { %v10017_v21 = vpop.f32.mrb[18].mxu1 }
 0x3ef   :  { %12460 = vst [vmem:[#allocation38_spill] sm:$0xff] %v10017_v21  ;;  %v8379_v45 = vpop.f32.mrb[19].mxu1 }
 0x3f0   :  { %v10019_v11 = vpop.f32.mrb[20].mxu0  ;;  %v41_v45 = vld [vmem:[#allocation2 + $0xb8] sm:$0xff] }
 0x3f1   :  { %12461 = vst [vmem:[#allocation39_spill] sm:$0xff] %v10019_v11  ;;  %v8384_v13 = vpop.f32.mrb[21].mxu0 }
 0x3f2   :  { %v10021_v40 = vpop.f32.mrb[22].mxu0  ;;  %v40_v13 = vld [vmem:[#allocation2 + $0x80] sm:$0xff] }
 0x3f3   :  { %12462 = vst [vmem:[#allocation40_spill] sm:$0xff] %v10021_v40  ;;  %v8385_v62 = vpop.f32.mrb[23].mxu0 }
 0x3f4   :  { %v10023_v50 = vpop.f32.mrb[20].mxu1  ;;  %v8786_v62 = vpack.c.bf16 %v41_v45, %v40_v13 }
 0x3f5   :  { %12463 = vst [vmem:[#allocation41_spill] sm:$0xff] %v10023_v50  ;;  %v8390_v55 = vpop.f32.mrb[21].mxu1 }
 0x3f6   :  { %v10025_v14 = vpop.f32.mrb[22].mxu1  ;;  %v34_v55 = vld [vmem:[#allocation2 + $0x8] sm:$0xff] }
 0x3f7   :  { %12464 = vst [vmem:[#allocation42_spill] sm:$0xff] %v10025_v14  ;;  %v8391_v16 = vpop.f32.mrb[23].mxu1  ;;  %v8790_v33 = vpack.c.bf16 %v35_v61, %v34_v55 }
 0x3fd   :  { %v2032_v56 = vpop.trf.xlu0 }
 0x3fe   :  { %8425 = vmatmul.mubr.msk.f32.vlgmr.msra.gmra.mrb[28].mxu0 %vm664_vm6, %v2032_v56 }
 0x3ff   :  { %8778 = vmatpush3.bf16.msra.mxu0 %v8777_v10  ;;  %8438 = vmatprep.mubr.msk.f32.mxu0 %vm9434_vm3, %v12451_v32  ;;  %v37_v10 = vld [vmem:[#allocation2 + $0xb0] sm:$0xff] }
 0x400   :  { %8783 = vmatprep.subr.bf16.mxu0 %v8782_v15  ;;  %v8794_v58 = vpack.c.bf16 %v37_v10, %v36_v30 }
 0x405   :  { %v2258_v48 = vpop.trf.xlu0 }
 0x406   :  { %8439 = vmatmul.mubr.msk.f32.vlgmr.msra.gmra.mrb[30].mxu0 %vm664_vm6, %v2258_v48 }
 0x407   :  { %8785 = vmatpush3.bf16.msra.mxu0 %v8782_v15  ;;  %8456 = vmatprep.mubr.msk.f32.mxu0 %vm617_vm4, %v9572_v22 }
 0x408   :  { %8787 = vmatprep.subr.bf16.mxu0 %v8786_v62 }
 0x40b   :  { %8789 = vmatpush3.bf16.msra.mxu0 %v8786_v62 }
 0x40c   :  { %8791 = vmatprep.subr.bf16.mxu0 %v8790_v33 }
 0x40e   :  { %8457 = vmatmul.mubr.msk.f32.vlgmr.msra.gmra.mrb[32].mxu0 %vm617_vm4, %v9570_v20  ;;  %v1674_v20 = vpop.permute.xlu1 %1673 }
 0x40f   :  { %8459 = vmatprep.mubr.msk.f32.mxu0 %vm617_vm4, %v9578_v27  ;;  %8793 = vmatpush3.bf16.msra.mxu0 %v8790_v33 }
 0x410   :  { %8795 = vmatprep.subr.bf16.mxu0 %v8794_v58 }
 0x412   :  { %8460 = vmatmul.mubr.msk.f32.gmra.mrb[34].mxu0 %vm617_vm4, %v9576_v25 }
 0x413   :  { %8462 = vmatprep.mubr.msk.f32.mxu0 %vm617_vm4, %v9619_v59  ;;  %8797 = vmatpush3.bf16.msra.mxu0 %v8794_v58 }
 0x416   :  { %8463 = vmatmul.mubr.msk.f32.gmra.mrb[36].mxu0 %vm617_vm4, %v9584_v31 }
 0x417   :  { %8465 = vmatprep.mubr.msk.f32.mxu0 %vm617_vm4, %v9621_v60  ;;  %v8012_v60 = vld [vmem:[%s12245_s3 + $0x1] ss:$0 sm:$0xff] }
 0x41a   :  { %8466 = vmatmul.mubr.msk.f32.gmra.mrb[38].mxu0 %vm617_vm4, %v9588_v35 }
 0x41b   :  { %8468 = vmatprep.mubr.msk.f32.mxu0 %vm617_vm4, %v9596_v42 }
 0x41e   :  { %8469 = vmatmul.mubr.msk.f32.gmra.mrb[40].mxu0 %vm617_vm4, %v9592_v39 }
 0x41f   :  { %8471 = vmatprep.mubr.msk.f32.mxu0 %vm617_vm4, %v9602_v47 }
 0x422   :  { %8472 = vmatmul.mubr.msk.f32.gmra.mrb[42].mxu0 %vm617_vm4, %v9598_v44 }
 0x423   :  { %8474 = vmatprep.mubr.msk.f32.mxu0 %vm617_vm4, %v9608_v52 }
 0x424   :  { %v1672_v22 = vpop.permute.xlu0 %1671 }
 0x425   :  { %v8762_v25 = vpack.c.bf16 %v1674_v20, %v1672_v22  ;;  %1677 = vxpose.xlu1.b32.start [1/2] (short) (narrow) %v1672_v22, 8 }
 0x426   :  { %8475 = vmatmul.mubr.msk.f32.gmra.mrb[44].mxu0 %vm617_vm4, %v9604_v49 }
 0x427   :  { %8477 = vmatprep.mubr.msk.f32.mxu0 %vm617_vm4, %v9615_v57  ;;  %8763 = vmatpush3.bf16.msra.mxu1 %v8762_v25 }
 0x428   :  { %8767 = vmatprep.subr.bf16.mxu1 %v12452_v24  ;;  %v10102_v35 = vpop.permute.xlu0 %1897 }
 0x429   :  { %1678 = vxpose.xlu1.b32.end [2/2] (short) (narrow) %v1674_v20, 8 }
 0x42a   :  { %8478 = vmatmul.mubr.msk.f32.gmra.mrb[46].mxu0 %vm617_vm4, %v9610_v54 }
 0x42b   :  { %8488 = vmatprep.mubr.msk.f32.mxu0 %vm617_vm4, %v9979_v53 }
 0x42c   :  { %v10106_v44 = vpop.permute.xlu0 %1899 }
 0x42d   :  { %v8768_v47 = vpack.c.bf16 %v10106_v44, %v10102_v35 }
 0x42e   :  { %8489 = vmatmul.mubr.msk.f32.vlgmr.msra.gmra.mrb[32].mxu0 %vm617_vm4, %v9981_v1 }
 0x42f   :  { %8491 = vmatprep.mubr.msk.f32.mxu0 %vm617_vm4, %v9983_v37 }
 0x432   :  { %8492 = vmatmul.mubr.msk.f32.gmra.mrb[34].mxu0 %vm617_vm4, %v9985_v51 }
 0x433   :  { %8494 = vmatprep.mubr.msk.f32.mxu0 %vm617_vm4, %v9991_v26 }
 0x436   :  { %8495 = vmatmul.mubr.msk.f32.gmra.mrb[36].mxu0 %vm617_vm4, %v9993_v46 }
 0x437   :  { %8497 = vmatprep.mubr.msk.f32.mxu0 %vm617_vm4, %v10007_v0 }
 0x43a   :  { %8498 = vmatmul.mubr.msk.f32.gmra.mrb[38].mxu0 %vm617_vm4, %v10009_v18 }
 0x43b   :  { %8500 = vmatprep.mubr.msk.f32.mxu0 %vm617_vm4, %v10011_v41 }
 0x43e   :  { %8501 = vmatmul.mubr.msk.f32.gmra.mrb[40].mxu0 %vm617_vm4, %v10013_v36 }
 0x43f   :  { %8503 = vmatprep.mubr.msk.f32.mxu0 %vm617_vm4, %v10015_v28 }
 0x442   :  { %8504 = vmatmul.mubr.msk.f32.gmra.mrb[42].mxu0 %vm617_vm4, %v10017_v21 }
 0x443   :  { %8506 = vmatprep.mubr.msk.f32.mxu0 %vm617_vm4, %v10019_v11 }
 0x446   :  { %8507 = vmatmul.mubr.msk.f32.gmra.mrb[44].mxu0 %vm617_vm4, %v10021_v40 }
 0x447   :  { %2123 = vrot.lane.b32.xlu1 %v9904_v23, %s9432_s1  ;;  %8509 = vmatprep.mubr.msk.f32.mxu0 %vm617_vm4, %v10023_v50 }
 0x44a   :  { %8510 = vmatmul.mubr.msk.f32.gmra.mrb[46].mxu0 %vm617_vm4, %v10025_v14 }
 0x44b   :  { %2349 = vrot.lane.b32.xlu1 %v9949_v17, %s9432_s1 }
 0x46e   :  { %v10100_v27 = vpop.f32.mrb[24].mxu0 }
 0x46f   :  { %12465 = vst [vmem:[#allocation43_spill] sm:$0xff] %v10100_v27  ;;  %v8398_v31 = vpop.f32.mrb[25].mxu0 }
 0x49c   :  { %v10104_v39 = vpop.f32.mrb[26].mxu0 }
 0x49d   :  { %12466 = vst [vmem:[#allocation44_spill] sm:$0xff] %v10104_v39  ;;  %v8412_v42 = vpop.f32.mrb[27].mxu0 }
 0x4a5   :  { %v1693_v49 = vpop.trf.xlu1 }
 0x4a6   :  { %8404 = vmatmul.mubr.msk.f32.vlgmr.msra.gmra.mrb[24].mxu1 %vm664_vm6, %v1693_v49 }
 0x4a7   :  { %8769 = vmatpush3.bf16.msra.mxu1 %v8768_v47  ;;  %8417 = vmatprep.mubr.msk.f32.mxu1 %vm9434_vm3, %v12451_v32 }
 0x4a8   :  { %8773 = vmatprep.subr.bf16.mxu1 %v12452_v24 }
 0x4d1   :  { %v10114_v52 = vpop.f32.mrb[28].mxu0 }
 0x4d2   :  { %12467 = vst [vmem:[#allocation45_spill] sm:$0xff] %v10114_v52  ;;  %v8426_v54 = vpop.f32.mrb[29].mxu0 }
 0x4d9   :  { %v10116_v57 = vpop.f32.mrb[30].mxu0 }
 0x4da   :  { %12468 = vst [vmem:[#allocation46_spill] sm:$0xff] %v10116_v57  ;;  %v8440_v59 = vpop.f32.mrb[31].mxu0 }
 0x501   :  { %v8490_v15 = vpop.f32.mrb[32].mxu0 }
 0x502   :  { %v10121_v61 = vadd.f32 %v8490_v15, %v8012_v60  ;;  %v3090_v48 = vpop.f32.mrb[33].mxu0 }
 0x503   :  { %v10123_v16 = vadd.f32 %v8012_v60, %v3090_v48 }
 0x504   :  { %v3195_v63 = vsel %vm3191_vm7, %v10121_v61, -inf }
 0x505   :  { %3196 = vmax.xlane.f32.xlu0 %v3195_v63  ;;  %v8493_v56 = vpop.f32.mrb[34].mxu0  ;;  %v3192_v13 = vsel %vm3191_vm7, %v10123_v16, -inf }
 0x506   :  { %v10129_v45 = vadd.f32 %v8493_v56, %v8012_v60  ;;  %v3100_v62 = vpop.f32.mrb[35].mxu0  ;;  %3193 = vmax.xlane.f32.xlu1 %v3192_v13 }
 0x507   :  { %v10133_v33 = vadd.f32 %v8012_v60, %v3100_v62 }
 0x508   :  { %v3201_v55 = vsel %vm3191_vm7, %v10129_v45, -inf }
 0x509   :  { %v8496_v30 = vpop.f32.mrb[36].mxu0  ;;  %v3198_v22 = vsel %vm3191_vm7, %v10133_v33, -inf }
 0x50a   :  { %v3110_v10 = vpop.f32.mrb[37].mxu0  ;;  %3202 = vmax.xlane.f32.xlu1 %v3201_v55  ;;  %v10135_v58 = vadd.f32 %v8496_v30, %v8012_v60 }
 0x50b   :  { %v10139_v31 = vadd.f32 %v8012_v60, %v3110_v10 }
 0x50c   :  { %v3207_v47 = vsel %vm3191_vm7, %v10135_v58, -inf }
 0x50d   :  { %v8499_v20 = vpop.f32.mrb[38].mxu0  ;;  %v3204_v15 = vsel %vm3191_vm7, %v10139_v31, -inf }
 0x50e   :  { %v3120_v25 = vpop.f32.mrb[39].mxu0  ;;  %3199 = vmax.xlane.f32.xlu1 %v3198_v22  ;;  %v10143_v54 = vadd.f32 %v8499_v20, %v8012_v60 }
 0x50f   :  { %v10171_v57 = vadd.f32 %v8012_v60, %v3120_v25 }
 0x510   :  { %v3213_v13 = vsel %vm3191_vm7, %v10143_v54, -inf }
 0x511   :  { %v8502_v42 = vpop.f32.mrb[40].mxu0 }
 0x512   :  { %v3130_v49 = vpop.f32.mrb[41].mxu0  ;;  %3208 = vmax.xlane.f32.xlu1 %v3207_v47  ;;  %v10147_v63 = vadd.f32 %v8502_v42, %v8012_v60 }
 0x514   :  { %v3219_v20 = vsel %vm3191_vm7, %v10147_v63, -inf }
 0x515   :  { %v8505_v59 = vpop.f32.mrb[42].mxu0 }
 0x516   :  { %v3140_v48 = vpop.f32.mrb[43].mxu0  ;;  %3205 = vmax.xlane.f32.xlu1 %v3204_v15  ;;  %v10155_v30 = vadd.f32 %v8505_v59, %v8012_v60 }
 0x518   :  { %v3225_v15 = vsel %vm3191_vm7, %v10155_v30, -inf }
 0x519   :  { %v8508_v56 = vpop.f32.mrb[44].mxu0 }
 0x51a   :  { %v3150_v62 = vpop.f32.mrb[45].mxu0  ;;  %3214 = vmax.xlane.f32.xlu1 %v3213_v13  ;;  %v10161_v47 = vadd.f32 %v8508_v56, %v8012_v60  ;;  %v3210_v56 = vsel %vm3191_vm7, %v10171_v57, -inf }
 0x51b   :  { %v10151_v55 = vadd.f32 %v8012_v60, %v3150_v62  ;;  %2351 = vrot.lane.b32.xlu0 %v9925_v43, %s9432_s1 }
 0x51c   :  { %v3231_v59 = vsel %vm3191_vm7, %v10161_v47, -inf }
 0x51d   :  { %v8511_v10 = vpop.f32.mrb[46].mxu0  ;;  %v3228_v25 = vsel %vm3191_vm7, %v10151_v55, -inf }
 0x51e   :  { %v3160_v22 = vpop.f32.mrb[47].mxu0  ;;  %3220 = vmax.xlane.f32.xlu1 %v3219_v20  ;;  %v10165_v13 = vadd.f32 %v8511_v10, %v8012_v60  ;;  %v10173_v20 = vadd.f32 %v8012_v60, %v3130_v49 }
 0x51f   :  { %v10159_v42 = vadd.f32 %v8012_v60, %v3160_v22  ;;  %v10177_v22 = vadd.f32 %v8012_v60, %v3140_v48  ;;  %v10189_v60 = vpop.permute.xlu0 %2125 }
 0x520   :  { %12470 = vst [vmem:[#allocation48_spill] sm:$0xff] %v10165_v13  ;;  %v3237_v62 = vsel %vm3191_vm7, %v10165_v13, -inf  ;;  %v3216_v10 = vsel %vm3191_vm7, %v10173_v20, -inf }
 0x521   :  { %12469 = vst [vmem:[#allocation47_spill] sm:$0xff] %v10159_v42  ;;  %v3234_v49 = vsel %vm3191_vm7, %v10159_v42, -inf }
 0x522   :  { %3226 = vmax.xlane.f32.xlu1 %v3225_v15  ;;  %v3222_v15 = vsel %vm3191_vm7, %v10177_v22, -inf }
 0x526   :  { %3232 = vmax.xlane.f32.xlu1 %v3231_v59  ;;  %v10187_v59 = vpop.permute.xlu1 %2123 }
 0x52a   :  { %3238 = vmax.xlane.f32.xlu1 %v3237_v62  ;;  %v10191_v48 = vpop.permute.xlu1 %2349 }
 0x53a   :  { %3211 = vmax.xlane.f32.xlu0 %v3210_v56 }
 0x53e   :  { %3217 = vmax.xlane.f32.xlu0 %v3216_v10 }
 0x542   :  { %3223 = vmax.xlane.f32.xlu0 %v3222_v15 }
 0x546   :  { %3229 = vmax.xlane.f32.xlu0 %v3228_v25 }
 0x54a   :  { %3235 = vmax.xlane.f32.xlu0 %v3234_v49 }
 0x592   :  { %v3197_v62 = vpop.xlane.xlu0 %3196 }
 0x593   :  { %v3241_v56 = vsub.f32 %v10121_v61, %v3197_v62  ;;  %v3194_v10 = vpop.xlane.xlu1 %3193 }
 0x594   :  { %v3240_v15 = vsub.f32 %v10123_v16, %v3194_v10 }
 0x595   :  { %v3258_v52 = vmul.f32 1.442695, %v3241_v56 }
 0x596   :  { %v3256_v39 = vmul.f32 1.442695, %v3240_v15 }
 0x597   :  { %9096 = vpow2.f32 %v3258_v52  ;;  %v3203_v25 = vpop.xlane.xlu1 %3202 }
 0x598   :  { %9098 = vpow2.f32 %v3256_v39  ;;  %v3243_v27 = vsub.f32 %v10129_v45, %v3203_v25 }
 0x59a   :  { %v3262_v49 = vmul.f32 1.442695, %v3243_v27 }
 0x59b   :  { %v3200_v14 = vpop.xlane.xlu1 %3199 }
 0x59c   :  { %9100 = vpow2.f32 %v3262_v49  ;;  %v3242_v43 = vsub.f32 %v10133_v33, %v3200_v14 }
 0x59e   :  { %v3260_v50 = vmul.f32 1.442695, %v3242_v43 }
 0x59f   :  { %v3209_v17 = vpop.xlane.xlu1 %3208 }
 0x5a0   :  { %9102 = vpow2.f32 %v3260_v50  ;;  %v3245_v62 = vsub.f32 %v10135_v58, %v3209_v17 }
 0x5a1   :  { %v10198_v40 = vpop.eup %9096 }
 0x5a2   :  { %v10200_v10 = vpop.eup %9098  ;;  %v3266_v56 = vmul.f32 1.442695, %v3245_v62  ;;  %3306 = vrot.lane.b32.xlu1 %v10198_v40, %s9432_s1 }
 0x5a3   :  { %3304 = vrot.lane.b32.xlu0 %v10200_v10, %s9432_s1  ;;  %v3206_v27 = vpop.xlane.xlu1 %3205 }
 0x5a4   :  { %9104 = vpow2.f32 %v3266_v56  ;;  %v3244_v14 = vsub.f32 %v10139_v31, %v3206_v27 }
 0x5a6   :  { %v10207_v43 = vpop.eup %9100  ;;  %v3264_v50 = vmul.f32 1.442695, %v3244_v14 }
 0x5a7   :  { %3310 = vrot.lane.b32.xlu0 %v10207_v43, %s9432_s1  ;;  %v3215_v17 = vpop.xlane.xlu1 %3214 }
 0x5a8   :  { %9106 = vpow2.f32 %v3264_v50  ;;  %v3247_v39 = vsub.f32 %v10143_v54, %v3215_v17 }
 0x5aa   :  { %v10212_v52 = vpop.eup %9102  ;;  %v3270_v15 = vmul.f32 1.442695, %v3247_v39 }
 0x5ab   :  { %v3221_v25 = vpop.xlane.xlu1 %3220  ;;  %3308 = vrot.lane.b32.xlu1 %v10212_v52, %s9432_s1 }
 0x5ac   :  { %9108 = vpow2.f32 %v3270_v15  ;;  %v3249_v49 = vsub.f32 %v10147_v63, %v3221_v25 }
 0x5ae   :  { %v10217_v62 = vpop.eup %9104  ;;  %v3274_v56 = vmul.f32 1.442695, %v3249_v49 }
 0x5af   :  { %3314 = vrot.lane.b32.xlu0 %v10217_v62, %s9432_s1  ;;  %v3227_v27 = vpop.xlane.xlu1 %3226 }
 0x5b0   :  { %9110 = vpow2.f32 %v3274_v56  ;;  %v3251_v14 = vsub.f32 %v10155_v30, %v3227_v27 }
 0x5b2   :  { %v10222_v50 = vpop.eup %9106  ;;  %v3278_v17 = vmul.f32 1.442695, %v3251_v14 }
 0x5b3   :  { %v3233_v39 = vpop.xlane.xlu1 %3232  ;;  %3312 = vrot.lane.b32.xlu1 %v10222_v50, %s9432_s1 }
 0x5b4   :  { %9112 = vpow2.f32 %v3278_v17  ;;  %v3253_v15 = vsub.f32 %v10161_v47, %v3233_v39 }
 0x5b6   :  { %v10227_v25 = vpop.eup %9108  ;;  %v3282_v49 = vmul.f32 1.442695, %v3253_v15  ;;  %v10242_v15 = vpop.permute.xlu0 %2351 }
 0x5b7   :  { %3318 = vrot.lane.b32.xlu0 %v10227_v25, %s9432_s1  ;;  %v3239_v11 = vpop.xlane.xlu1 %3238 }
 0x5b8   :  { %9114 = vpow2.f32 %v3282_v49  ;;  %v3255_v56 = vsub.f32 %v10165_v13, %v3239_v11 }
 0x5ba   :  { %v10232_v27 = vpop.eup %9110  ;;  %v3286_v14 = vmul.f32 1.442695, %v3255_v56 }
 0x5bb   :  { %3322 = vrot.lane.b32.xlu0 %v10232_v27, %s9432_s1 }
 0x5bc   :  { %9116 = vpow2.f32 %v3286_v14 }
 0x5be   :  { %v10236_v17 = vpop.eup %9112 }
 0x5bf   :  { %3326 = vrot.lane.b32.xlu0 %v10236_v17, %s9432_s1 }
 0x5c2   :  { %v10240_v39 = vpop.eup %9114 }
 0x5c3   :  { %3330 = vrot.lane.b32.xlu0 %v10240_v39, %s9432_s1 }
 0x5c6   :  { %v10246_v11 = vpop.eup %9116 }
 0x5c7   :  { %3334 = vrot.lane.b32.xlu0 %v10246_v11, %s9432_s1  ;;  %v3212_v49 = vpop.xlane.xlu0 %3211 }
 0x5c8   :  { %v3246_v56 = vsub.f32 %v10171_v57, %v3212_v49 }
 0x5ca   :  { %v3268_v14 = vmul.f32 1.442695, %v3246_v56 }
 0x5cb   :  { %v3218_v21 = vpop.xlane.xlu0 %3217 }
 0x5cc   :  { %9118 = vpow2.f32 %v3268_v14  ;;  %v3248_v28 = vsub.f32 %v10173_v20, %v3218_v21 }
 0x5ce   :  { %v3272_v23 = vmul.f32 1.442695, %v3248_v28  ;;  %v10259_v28 = vpop.f32.mrb[24].mxu1 }
 0x5cf   :  { %v3224_v36 = vpop.xlane.xlu0 %3223  ;;  %12471 = vst [vmem:[#allocation49_spill] sm:$0xff] %v10259_v28 }
 0x5d0   :  { %9120 = vpow2.f32 %v3272_v23  ;;  %v3250_v41 = vsub.f32 %v10177_v22, %v3224_v36 }
 0x5d2   :  { %v3276_v18 = vmul.f32 1.442695, %v3250_v41  ;;  %v8405_v41 = vpop.f32.mrb[25].mxu1 }
 0x5d3   :  { %v3230_v0 = vpop.xlane.xlu0 %3229 }
 0x5d4   :  { %9122 = vpow2.f32 %v3276_v18  ;;  %v3252_v46 = vsub.f32 %v10151_v55, %v3230_v0 }
 0x5d6   :  { %v10254_v26 = vpop.eup %9118  ;;  %v3280_v51 = vmul.f32 1.442695, %v3252_v46 }
 0x5d7   :  { %3316 = vrot.lane.b32.xlu1 %v10254_v26, %s9432_s1  ;;  %v3236_v49 = vpop.xlane.xlu0 %3235 }
 0x5d8   :  { %9124 = vpow2.f32 %v3280_v51  ;;  %v3254_v21 = vsub.f32 %v10159_v42, %v3236_v49 }
 0x5da   :  { %v10261_v23 = vpop.eup %9120  ;;  %v3284_v36 = vmul.f32 1.442695, %v3254_v21 }
 0x5db   :  { %3320 = vrot.lane.b32.xlu1 %v10261_v23, %s9432_s1 }
 0x5dc   :  { %9126 = vpow2.f32 %v3284_v36 }
 0x5de   :  { %v10265_v0 = vpop.eup %9122 }
 0x5df   :  { %3324 = vrot.lane.b32.xlu1 %v10265_v0, %s9432_s1 }
 0x5e2   :  { %v10269_v46 = vpop.eup %9124 }
 0x5e3   :  { %3328 = vrot.lane.b32.xlu1 %v10269_v46, %s9432_s1 }
 0x5e6   :  { %v10273_v51 = vpop.eup %9126 }
 0x5e7   :  { %3332 = vrot.lane.b32.xlu1 %v10273_v51, %s9432_s1 }
 0x614   :  { %v3307_v18 = vpop.permute.xlu1 %3306 }
 0x615   :  { %v3305_v56 = vpop.permute.xlu0 %3304  ;;  %v3355_v14 = vsel %vm664_vm6, %v3307_v18, 0.0 }
 0x616   :  { %3356 = vadd.xlane.f32.xlu0 %v3355_v14  ;;  %v3352_v49 = vsel %vm664_vm6, %v3305_v56, 0.0 }
 0x617   :  { %3353 = vadd.xlane.f32.xlu1 %v3352_v49 }
 0x619   :  { %v3311_v21 = vpop.permute.xlu0 %3310 }
 0x61a   :  { %v3361_v36 = vsel %vm664_vm6, %v3311_v21, 0.0 }
 0x61b   :  { %3362 = vadd.xlane.f32.xlu1 %v3361_v36 }
 0x61d   :  { %v3309_v41 = vpop.permute.xlu1 %3308 }
 0x61e   :  { %v3358_v28 = vsel %vm664_vm6, %v3309_v41, 0.0 }
 0x61f   :  { %3359 = vadd.xlane.f32.xlu0 %v3358_v28 }
 0x621   :  { %v3315_v37 = vpop.permute.xlu0 %3314 }
 0x622   :  { %v3367_v1 = vsel %vm664_vm6, %v3315_v37, 0.0 }
 0x623   :  { %3368 = vadd.xlane.f32.xlu1 %v3367_v1 }
 0x625   :  { %v3313_v53 = vpop.permute.xlu1 %3312 }
 0x626   :  { %v3364_v42 = vsel %vm664_vm6, %v3313_v53, 0.0 }
 0x627   :  { %3365 = vadd.xlane.f32.xlu0 %v3364_v42 }
 0x629   :  { %v3319_v18 = vpop.permute.xlu0 %3318 }
 0x62a   :  { %v3373_v56 = vsel %vm664_vm6, %v3319_v18, 0.0 }
 0x62b   :  { %3374 = vadd.xlane.f32.xlu1 %v3373_v56 }
 0x62d   :  { %v3323_v14 = vpop.permute.xlu0 %3322 }
 0x62e   :  { %v3379_v49 = vsel %vm664_vm6, %v3323_v14, 0.0 }
 0x62f   :  { %3380 = vadd.xlane.f32.xlu1 %v3379_v49 }
 0x631   :  { %v3327_v21 = vpop.permute.xlu0 %3326 }
 0x632   :  { %v3385_v36 = vsel %vm664_vm6, %v3327_v21, 0.0 }
 0x633   :  { %3386 = vadd.xlane.f32.xlu1 %v3385_v36 }
 0x635   :  { %v3331_v42 = vpop.permute.xlu0 %3330 }
 0x636   :  { %v3391_v49 = vsel %vm664_vm6, %v3331_v42, 0.0 }
 0x639   :  { %v3335_v21 = vpop.permute.xlu0 %3334 }
 0x649   :  { %v3317_v28 = vpop.permute.xlu1 %3316 }
 0x64a   :  { %v3370_v37 = vsel %vm664_vm6, %v3317_v28, 0.0 }
 0x64b   :  { %3371 = vadd.xlane.f32.xlu0 %v3370_v37  ;;  %v3397_v37 = vsel %vm664_vm6, %v3335_v21, 0.0 }
 0x64d   :  { %v3321_v1 = vpop.permute.xlu1 %3320 }
 0x64e   :  { %v3376_v53 = vsel %vm664_vm6, %v3321_v1, 0.0 }
 0x64f   :  { %3377 = vadd.xlane.f32.xlu0 %v3376_v53 }
 0x651   :  { %v3325_v41 = vpop.permute.xlu1 %3324 }
 0x652   :  { %v3382_v18 = vsel %vm664_vm6, %v3325_v41, 0.0 }
 0x653   :  { %3383 = vadd.xlane.f32.xlu1 %v3382_v18 }
 0x655   :  { %v3329_v56 = vpop.permute.xlu1 %3328 }
 0x656   :  { %v3388_v14 = vsel %vm664_vm6, %v3329_v56, 0.0 }
 0x657   :  { %3389 = vadd.xlane.f32.xlu0 %v3388_v14  ;;  %3392 = vadd.xlane.f32.xlu1 %v3391_v49 }
 0x659   :  { %v3333_v36 = vpop.permute.xlu1 %3332 }
 0x65a   :  { %v3394_v28 = vsel %vm664_vm6, %v3333_v36, 0.0 }
 0x65b   :  { %3395 = vadd.xlane.f32.xlu1 %v3394_v28  ;;  %3398 = vadd.xlane.f32.xlu0 %v3397_v37 }
 0x6a3   :  { %v3357_v1 = vpop.xlane.xlu0 %3356 }
 0x6a4   :  { %9128 = vrcp.f32 %v3357_v1  ;;  %v3354_v53 = vpop.xlane.xlu1 %3353 }
 0x6a5   :  { %9130 = vrcp.f32 %v3354_v53 }
 0x6a8   :  { %v3363_v41 = vpop.xlane.xlu1 %3362 }
 0x6a9   :  { %9132 = vrcp.f32 %v3363_v41 }
 0x6ac   :  { %v3360_v18 = vpop.xlane.xlu0 %3359 }
 0x6ad   :  { %9134 = vrcp.f32 %v3360_v18 }
 0x6ae   :  { %v9129_v56 = vpop.eup %9128 }
 0x6af   :  { %v9131_v42 = vpop.eup %9130  ;;  %v3403_v14 = vmul.f32 %v9129_v56, %v10198_v40 }
 0x6b0   :  { %v3401_v49 = vmul.f32 %v9131_v42, %v10200_v10  ;;  %v3369_v56 = vpop.xlane.xlu1 %3368 }
 0x6b1   :  { %v10296_v36 = vmul.f32 %v3403_v14, %v9635_v3 }
 0x6b2   :  { %v10299_v21 = vmul.f32 %v3401_v49, %v9639_v5 }
 0x6b3   :  { %12472 = vst [vmem:[#allocation50_spill] sm:$0xff] %v10296_v36  ;;  %v9133_v28 = vpop.eup %9132 }
 0x6b4   :  { %12473 = vst [vmem:[#allocation51_spill] sm:$0xff] %v10299_v21  ;;  %v3464_v37 = vpack.c.bf16 %v10296_v36, %v10299_v21  ;;  %v3407_v1 = vmul.f32 %v9133_v28, %v10207_v43  ;;  %v3366_v14 = vpop.xlane.xlu0 %3365 }
 0x6b5   :  { %9136 = vrcp.f32 %v3366_v14 }
 0x6b6   :  { %3473 = vrot.lane.b32.xlu0 %v3464_v37, %s9432_s1  ;;  %v10307_v40 = vmul.f32 %v3407_v1, %v9641_v6  ;;  %9138 = vrcp.f32 %v3369_v56 }
 0x6b7   :  { %v9135_v53 = vpop.eup %9134 }
 0x6b8   :  { %v3405_v41 = vmul.f32 %v9135_v53, %v10212_v52  ;;  %12474 = vst [vmem:[#allocation52_spill] sm:$0xff] %v10307_v40  ;;  %v3375_v43 = vpop.xlane.xlu1 %3374 }
 0x6ba   :  { %v10310_v10 = vmul.f32 %v3405_v41, %v9637_v4 }
 0x6bc   :  { %12475 = vst [vmem:[#allocation53_spill] sm:$0xff] %v10310_v10  ;;  %v3465_v18 = vpack.c.bf16 %v10307_v40, %v10310_v10  ;;  %v3381_v42 = vpop.xlane.xlu1 %3380 }
 0x6be   :  { %3518 = vrot.lane.b32.xlu1 %v3465_v18, %s9432_s1 }
 0x6bf   :  { %v9137_v1 = vpop.eup %9136 }
 0x6c0   :  { %v3387_v49 = vpop.xlane.xlu1 %3386  ;;  %v9139_v53 = vpop.eup %9138  ;;  %v3409_v18 = vmul.f32 %v9137_v1, %v10222_v50 }
 0x6c1   :  { %v3411_v56 = vmul.f32 %v9139_v53, %v10217_v62 }
 0x6d4   :  { %1903 = vxpose.xlu0.b32.start [1/2] (short) (narrow) %v10102_v35, 8 }
 0x6d8   :  { %1904 = vxpose.xlu0.b32.end [2/2] (short) (narrow) %v10106_v44, 8  ;;  %v3372_v52 = vpop.xlane.xlu0 %3371 }
 0x6dc   :  { %v3378_v37 = vpop.xlane.xlu0 %3377 }
 0x6dd   :  { %9140 = vrcp.f32 %v3378_v37 }
 0x6de   :  { %9142 = vrcp.f32 %v3381_v42 }
 0x6e0   :  { %v3384_v28 = vpop.xlane.xlu1 %3383 }
 0x6e1   :  { %9144 = vrcp.f32 %v3384_v28 }
 0x6e2   :  { %9146 = vrcp.f32 %v3387_v49  ;;  %v10324_v49 = vmul.f32 %v3409_v18, %v9643_v7 }
 0x6e4   :  { %v3393_v35 = vpop.xlane.xlu1 %3392  ;;  %v3390_v44 = vpop.xlane.xlu0 %3389  ;;  %12476 = vst [vmem:[#allocation54_spill] sm:$0xff] %v10324_v49 }
 0x6e5   :  { %9148 = vrcp.f32 %v3393_v35 }
 0x6e6   :  { %9150 = vrcp.f32 %v3390_v44  ;;  %v10328_v44 = vmul.f32 %v3411_v56, %v9647_v9 }
 0x6e7   :  { %2129 = vxpose.xlu1.b32.start [1/2] (short) (narrow) %v10187_v59, 8  ;;  %v9141_v13 = vpop.eup %9140  ;;  %9152 = vrcp.f32 %v3372_v52 }
 0x6e8   :  { %v3396_v41 = vpop.xlane.xlu1 %3395  ;;  %v3399_v14 = vpop.xlane.xlu0 %3398  ;;  %v3417_v37 = vmul.f32 %v9141_v13, %v10261_v23  ;;  %12477 = vst [vmem:[#allocation55_spill] sm:$0xff] %v10328_v44  ;;  %v3466_v53 = vpack.c.bf16 %v10328_v44, %v10324_v49 }
 0x6e9   :  { %9154 = vrcp.f32 %v3396_v41  ;;  %v9143_v42 = vpop.eup %9142 }
 0x6ea   :  { %9156 = vrcp.f32 %v3399_v14  ;;  %v3419_v50 = vmul.f32 %v9143_v42, %v10232_v27  ;;  %v10333_v62 = vmul.f32 %v3417_v37, %v9701_v29 }
 0x6eb   :  { %2130 = vxpose.xlu1.b32.end [2/2] (short) (narrow) %v10189_v60, 8  ;;  %v9145_v28 = vpop.eup %9144  ;;  %9158 = vrcp.f32 %v3375_v43 }
 0x6ec   :  { %v9147_v35 = vpop.eup %9146  ;;  %v3421_v52 = vmul.f32 %v9145_v28, %v10265_v0  ;;  %12478 = vst [vmem:[#allocation56_spill] sm:$0xff] %v10333_v62  ;;  %v10339_v13 = vmul.f32 %v3419_v50, %v9857_v19 }
 0x6ed   :  { %v3423_v18 = vmul.f32 %v9147_v35, %v10236_v17 }
 0x6ee   :  { %12479 = vst [vmem:[#allocation57_spill] sm:$0xff] %v10339_v13  ;;  %v10343_v27 = vmul.f32 %v3421_v52, %v9818_v2  ;;  %v3468_v56 = vpack.c.bf16 %v10339_v13, %v10333_v62 }
 0x6ef   :  { %2355 = vxpose.xlu1.b32.start [1/2] (short) (narrow) %v10191_v48, 8  ;;  %v9149_v1 = vpop.eup %9148  ;;  %v10350_v17 = vmul.f32 %v3423_v18, %v9820_v34  ;;  %v12487_v18 = vld [vmem:[#allocation22_spill] sm:$0xff] }
 0x6f0   :  { %v9151_v41 = vpop.eup %9150  ;;  %12480 = vst [vmem:[#allocation58_spill] sm:$0xff] %v10343_v27  ;;  %v3427_v43 = vmul.f32 %v9149_v1, %v10240_v39 }
 0x6f1   :  { %v9153_v23 = vpop.eup %9152  ;;  %v3425_v14 = vmul.f32 %v9151_v41, %v10269_v46  ;;  %12481 = vst [vmem:[#allocation59_spill] sm:$0xff] %v10350_v17  ;;  %v3469_v35 = vpack.c.bf16 %v10350_v17, %v10343_v27 }
 0x6f2   :  { %v3413_v37 = vmul.f32 %v9153_v23, %v10254_v26  ;;  %v10357_v50 = vmul.f32 %v3427_v43, %v9914_v12  ;;  %v12485_v26 = vld [vmem:[#allocation19_spill] sm:$0xff] }
 0x6f3   :  { %2356 = vxpose.xlu1.b32.end [2/2] (short) (narrow) %v10242_v15, 8  ;;  %v9155_v0 = vpop.eup %9154  ;;  %v10360_v39 = vmul.f32 %v3425_v14, %v9822_v38  ;;  %v12489_v14 = vld [vmem:[#allocation8_spill] sm:$0xff] }
 0x6f4   :  { %v9157_v42 = vpop.eup %9156  ;;  %12482 = vst [vmem:[#allocation60_spill] sm:$0xff] %v10357_v50  ;;  %v3429_v46 = vmul.f32 %v9155_v0, %v10273_v51  ;;  %v8942_v0 = vpack.i.bf16 %v10296_v36, %v10299_v21 }
 0x6f5   :  { %v9159_v28 = vpop.eup %9158  ;;  %12483 = vst [vmem:[#allocation61_spill] sm:$0xff] %v10360_v39  ;;  %v3431_v52 = vmul.f32 %v9157_v42, %v10246_v11  ;;  %v3470_v43 = vpack.c.bf16 %v10357_v50, %v10360_v39  ;;  %v8952_v42 = vpack.i.bf16 %v10328_v44, %v10324_v49 }
 0x6f6   :  { %v3415_v1 = vmul.f32 %v9159_v28, %v10227_v25  ;;  %v10370_v41 = vmul.f32 %v3429_v46, %v12485_v26  ;;  %v8972_v46 = vpack.i.bf16 %v10357_v50, %v10360_v39 }
 0x6f7   :  { %v10373_v23 = vmul.f32 %v3431_v52, %v12487_v18 }
 0x6f8   :  { %12486 = vst [vmem:[#allocation19_spill] sm:$0xff] %v10370_v41  ;;  %v10378_v51 = vmul.f32 %v3415_v1, %v12489_v14 }
 0x6f9   :  { %12488 = vst [vmem:[#allocation22_spill] sm:$0xff] %v10373_v23  ;;  %v3471_v11 = vpack.c.bf16 %v10373_v23, %v10370_v41  ;;  %v8977_v52 = vpack.i.bf16 %v10373_v23, %v10370_v41 }
 0x6fa   :  { %12490 = vst [vmem:[#allocation8_spill] sm:$0xff] %v10378_v51 }
 0x701   :  { %3563 = vrot.lane.b32.xlu0 %v3466_v53, %s9432_s1  ;;  %v10367_v53 = vmul.f32 %v3413_v37, %v9645_v8  ;;  %v8962_v37 = vpack.i.bf16 %v10339_v13, %v10333_v62 }
 0x703   :  { %12484 = vst [vmem:[#allocation62_spill] sm:$0xff] %v10367_v53  ;;  %v3467_v25 = vpack.c.bf16 %v10378_v51, %v10367_v53  ;;  %v8957_v28 = vpack.i.bf16 %v10378_v51, %v10367_v53 }
 0x705   :  { %3653 = vrot.lane.b32.xlu0 %v3468_v56, %s9432_s1  ;;  %v8947_v56 = vpack.i.bf16 %v10307_v40, %v10310_v10 }
 0x709   :  { %3698 = vrot.lane.b32.xlu0 %v3469_v35, %s9432_s1  ;;  %v8967_v35 = vpack.i.bf16 %v10350_v17, %v10343_v27 }
 0x70d   :  { %3743 = vrot.lane.b32.xlu0 %v3470_v43, %s9432_s1  ;;  %v8774_v43 = vpack.c.bf16 %v10189_v60, %v10187_v59 }
 0x711   :  { %3608 = vrot.lane.b32.xlu1 %v3467_v25, %s9432_s1  ;;  %3788 = vrot.lane.b32.xlu0 %v3471_v11, %s9432_s1 }
 0x715   :  { %3993 = vrot.lane.b32.xlu1 %v10299_v21, %s9432_s1  ;;  %3995 = vrot.lane.b32.xlu0 %v10296_v36, %s9432_s1 }
 0x719   :  { %4112 = vrot.lane.b32.xlu1 %v10310_v10, %s9432_s1  ;;  %4114 = vrot.lane.b32.xlu0 %v10307_v40, %s9432_s1 }
 0x71d   :  { %4231 = vrot.lane.b32.xlu1 %v10324_v49, %s9432_s1  ;;  %4233 = vrot.lane.b32.xlu0 %v10328_v44, %s9432_s1 }
 0x721   :  { %4350 = vrot.lane.b32.xlu1 %v10367_v53, %s9432_s1  ;;  %4352 = vrot.lane.b32.xlu0 %v10378_v51, %s9432_s1 }
 0x725   :  { %4469 = vrot.lane.b32.xlu1 %v10333_v62, %s9432_s1  ;;  %4471 = vrot.lane.b32.xlu0 %v10339_v13, %s9432_s1 }
 0x728   :  { %v3474_v1 = vpop.permute.xlu0 %3473 }
 0x729   :  { %4588 = vrot.lane.b32.xlu1 %v10343_v27, %s9432_s1  ;;  %4590 = vrot.lane.b32.xlu0 %v10350_v17, %s9432_s1 }
 0x72d   :  { %4707 = vrot.lane.b32.xlu1 %v10360_v39, %s9432_s1  ;;  %4709 = vrot.lane.b32.xlu0 %v10357_v50, %s9432_s1  ;;  %v9379_v39 = vld [vmem:[%s12242_s0 + $0x38] sm:$0xff]  }
 0x730   :  { %v3519_v11 = vpop.permute.xlu1 %3518 }
 0x731   :  { %4826 = vrot.lane.b32.xlu1 %v10370_v41, %s9432_s1  ;;  %4828 = vrot.lane.b32.xlu0 %v10373_v23, %s9432_s1 }
 0x735   :  { %8943 = vrot.lane.b32.xlu0 %v8942_v0, %s9436_s27  ;;  %v8780_v0 = vpack.c.bf16 %v10242_v15, %v10191_v48  ;;  %v9372_v48 = vld [vmem:[%s12242_s0] sm:$0xff]  }
 0x739   :  { %8948 = vrot.lane.b32.xlu0 %v8947_v56, %s9436_s27 }
 0x73d   :  { %8953 = vrot.lane.b32.xlu0 %v8952_v42, %s9436_s27 }
 0x741   :  { %8958 = vrot.lane.b32.xlu0 %v8957_v28, %s9436_s27  ;;  %v9373_v28 = vld [vmem:[%s12242_s0 + $0x8] sm:$0xff]  }
 0x745   :  { %8963 = vrot.lane.b32.xlu0 %v8962_v37, %s9436_s27 }
 0x749   :  { %8968 = vrot.lane.b32.xlu0 %v8967_v35, %s9436_s27 }
 0x74d   :  { %8973 = vrot.lane.b32.xlu0 %v8972_v46, %s9436_s27 }
 0x751   :  { %8978 = vrot.lane.b32.xlu0 %v8977_v52, %s9436_s27  ;;  %v9374_v52 = vld [vmem:[%s12242_s0 + $0x10] sm:$0xff]  }
 0x754   :  { %v1919_v25 = vpop.trf.xlu0 }
 0x755   :  { %8418 = vmatmul.mubr.msk.f32.vlgmr.msra.gmra.mrb[26].mxu1 %vm664_vm6, %v1919_v25 }
 0x756   :  { %8775 = vmatpush3.bf16.msra.mxu1 %v8774_v43  ;;  %8431 = vmatprep.mubr.msk.f32.mxu1 %vm9434_vm3, %v12451_v32 }
 0x757   :  { %8779 = vmatprep.subr.bf16.mxu1 %v12452_v24 }
 0x767   :  { %v2145_v56 = vpop.trf.xlu1 }
 0x768   :  { %8432 = vmatmul.mubr.msk.f32.vlgmr.msra.gmra.mrb[28].mxu1 %vm664_vm6, %v2145_v56 }
 0x769   :  { %8781 = vmatpush3.bf16.msra.mxu1 %v8780_v0  ;;  %8445 = vmatprep.mubr.msk.f32.mxu1 %vm9434_vm3, %v12451_v32  ;;  %v9375_v0 = vld [vmem:[%s12242_s0 + $0x18] sm:$0xff]  }
 0x76a   :  { %8512 = vmatprep.subr.bf16.mxu1 %v12451_v32 }
 0x76f   :  { %v2371_v59 = vpop.trf.xlu1 }
 0x770   :  { %8446 = vmatmul.mubr.msk.f32.vlgmr.msra.gmra.mrb[30].mxu1 %vm664_vm6, %v2371_v59 }
 0x771   :  { %8513 = vmatpush3.bf16.msra.mxu1 %v3474_v1  ;;  %8514 = vmatprep.mubr.msk.bf16.mxu1 %vm9434_vm3, %v12451_v32 }
 0x772   :  { %8518 = vmatprep.subr.bf16.mxu1 %v12451_v32 }
 0x773   :  { %v3564_v60 = vpop.permute.xlu0 %3563 }
 0x774   :  { %8515 = vmatmul.mubr.msk.bf16.vlgmr.msra.gmra.mrb[32].mxu1 %vm664_vm6, %v9372_v48  ;;  %v9376_v48 = vld [vmem:[%s12242_s0 + $0x20] sm:$0xff]  }
 0x775   :  { %8519 = vmatpush3.bf16.msra.mxu1 %v3519_v11  ;;  %8520 = vmatprep.mubr.msk.bf16.mxu1 %vm9434_vm3, %v12451_v32 }
 0x776   :  { %8524 = vmatprep.subr.bf16.mxu1 %v12451_v32 }
 0x777   :  { %v3654_v15 = vpop.permute.xlu0 %3653 }
 0x77b   :  { %v3699_v42 = vpop.permute.xlu0 %3698 }
 0x77c   :  { %8521 = vmatmul.mubr.msk.bf16.vlgmr.msra.gmra.mrb[36].mxu1 %vm664_vm6, %v9373_v28 }
 0x77d   :  { %8525 = vmatpush3.bf16.msra.mxu1 %v3564_v60  ;;  %8526 = vmatprep.mubr.msk.bf16.mxu1 %vm9434_vm3, %v12451_v32 }
 0x77e   :  { %8530 = vmatprep.subr.bf16.mxu1 %v12451_v32 }
 0x77f   :  { %v3744_v37 = vpop.permute.xlu0 %3743 }
 0x783   :  { %v3609_v35 = vpop.permute.xlu1 %3608  ;;  %v3789_v46 = vpop.permute.xlu0 %3788 }
 0x784   :  { %8527 = vmatmul.mubr.msk.bf16.vlgmr.msra.gmra.mrb[40].mxu1 %vm664_vm6, %v9374_v52  ;;  %v9377_v52 = vld [vmem:[%s12242_s0 + $0x28] sm:$0xff]  }
 0x785   :  { %8531 = vmatpush3.bf16.msra.mxu1 %v3609_v35  ;;  %8532 = vmatprep.mubr.msk.bf16.mxu1 %vm9434_vm3, %v12451_v32 }
 0x786   :  { %8536 = vmatprep.subr.bf16.mxu1 %v12451_v32 }
 0x787   :  { %v10472_v1 = vpop.permute.xlu1 %3993  ;;  %v10474_v43 = vpop.permute.xlu0 %3995 }
 0x788   :  { %12491 = vst [vmem:[#allocation63_spill] sm:$0xff] %v10472_v1  ;;  %12492 = vst [vmem:[#allocation64_spill] sm:$0xff] %v10474_v43  ;;  %3999 = vxpose.xlu1.b32.start [1/2] (short) (narrow) %v10472_v1, 16 }
 0x78b   :  { %v10477_v25 = vpop.permute.xlu1 %4112  ;;  %v10479_v11 = vpop.permute.xlu0 %4114 }
 0x78c   :  { %12493 = vst [vmem:[#allocation65_spill] sm:$0xff] %v10477_v25  ;;  %12494 = vst [vmem:[#allocation66_spill] sm:$0xff] %v10479_v11  ;;  %4118 = vxpose.xlu0.b32.start [1/2] (short) (narrow) %v10477_v25, 16  ;;  %8533 = vmatmul.mubr.msk.bf16.vlgmr.msra.gmra.mrb[44].mxu1 %vm664_vm6, %v9375_v0 }
 0x78d   :  { %8537 = vmatpush3.bf16.msra.mxu1 %v3654_v15  ;;  %4000 = vxpose.xlu1.b32.end [2/2] (short) (narrow) %v10474_v43, 16 }
 0x78e   :  { %8538 = vmatprep.mubr.msk.bf16.mxu1 %vm9434_vm3, %v12451_v32  ;;  %8542 = vmatprep.subr.bf16.mxu1 %v12451_v32 }
 0x78f   :  { %v10490_v56 = vpop.permute.xlu1 %4231  ;;  %v10492_v59 = vpop.permute.xlu0 %4233 }
 0x790   :  { %12495 = vst [vmem:[#allocation67_spill] sm:$0xff] %v10490_v56  ;;  %12496 = vst [vmem:[#allocation68_spill] sm:$0xff] %v10492_v59  ;;  %4119 = vxpose.xlu0.b32.end [2/2] (short) (narrow) %v10479_v11, 16 }
 0x793   :  { %v10495_v60 = vpop.permute.xlu1 %4350  ;;  %v10504_v15 = vpop.permute.xlu0 %4352 }
 0x794   :  { %12497 = vst [vmem:[#allocation69_spill] sm:$0xff] %v10495_v60  ;;  %8539 = vmatmul.mubr.msk.bf16.vlgmr.msra.gmra.mrb[48].mxu1 %vm664_vm6, %v9376_v48  ;;  %4237 = vxpose.xlu0.b32.start [1/2] (short) (narrow) %v10490_v56, 16  ;;  %12498 = vst [vmem:[#allocation70_spill] sm:$0xff] %v10504_v15  ;;  %v9378_v48 = vld [vmem:[%s12242_s0 + $0x30] sm:$0xff]   ;;  %s9437_s0 = smov 32  }
 0x795   :  { %8543 = vmatpush3.bf16.msra.mxu1 %v3699_v42  ;;  %8544 = vmatprep.mubr.msk.bf16.mxu1 %vm9434_vm3, %v12451_v32 }
 0x796   :  { %8548 = vmatprep.subr.bf16.mxu1 %v12451_v32 }
 0x797   :  { %v10507_v28 = vpop.permute.xlu1 %4469  ;;  %v10511_v35 = vpop.permute.xlu0 %4471 }
 0x798   :  { %12499 = vst [vmem:[#allocation71_spill] sm:$0xff] %v10507_v28  ;;  %4475 = vxpose.xlu1.b32.start [1/2] (short) (narrow) %v10507_v28, 16  ;;  %4238 = vxpose.xlu0.b32.end [2/2] (short) (narrow) %v10492_v59, 16  ;;  %12500 = vst [vmem:[#allocation72_spill] sm:$0xff] %v10511_v35 }
 0x79b   :  { %v10522_v42 = vpop.permute.xlu1 %4588  ;;  %v10525_v0 = vpop.permute.xlu0 %4590 }
 0x79c   :  { %8545 = vmatmul.mubr.msk.bf16.vlgmr.msra.gmra.mrb[52].mxu1 %vm664_vm6, %v9377_v52  ;;  %4356 = vxpose.xlu0.b32.start [1/2] (short) (narrow) %v10495_v60, 16  ;;  %12501 = vst [vmem:[#allocation73_spill] sm:$0xff] %v10522_v42  ;;  %12502 = vst [vmem:[#allocation74_spill] sm:$0xff] %v10525_v0 }
 0x79d   :  { %8549 = vmatpush3.bf16.msra.mxu1 %v3744_v37  ;;  %4476 = vxpose.xlu1.b32.end [2/2] (short) (narrow) %v10511_v35, 16 }
 0x79e   :  { %8550 = vmatprep.mubr.msk.bf16.mxu1 %vm9434_vm3, %v12451_v32  ;;  %8554 = vmatprep.subr.bf16.mxu1 %v12451_v32 }
 0x79f   :  { %v10532_v37 = vpop.permute.xlu1 %4707  ;;  %v10537_v52 = vpop.permute.xlu0 %4709 }
 0x7a0   :  { %4357 = vxpose.xlu0.b32.end [2/2] (short) (narrow) %v10504_v15, 16  ;;  %12503 = vst [vmem:[#allocation75_spill] sm:$0xff] %v10532_v37  ;;  %12504 = vst [vmem:[#allocation76_spill] sm:$0xff] %v10537_v52 }
 0x7a3   :  { %v10539_v41 = vpop.permute.xlu1 %4826 }
 0x7a4   :  { %8551 = vmatmul.mubr.msk.bf16.vlgmr.msra.gmra.mrb[56].mxu1 %vm664_vm6, %v9378_v48  ;;  %4594 = vxpose.xlu0.b32.start [1/2] (short) (narrow) %v10522_v42, 16  ;;  %12505 = vst [vmem:[#allocation77_spill] sm:$0xff] %v10539_v41  ;;  %v10546_v48 = vpop.permute.xlu0 %4828 }
 0x7a5   :  { %8555 = vmatpush3.bf16.msra.mxu1 %v3789_v46  ;;  %8556 = vmatprep.mubr.msk.bf16.mxu1 %vm9434_vm3, %v12451_v32  ;;  %12506 = vst [vmem:[#allocation78_spill] sm:$0xff] %v10546_v48 }
 0x7a8   :  { %4595 = vxpose.xlu0.b32.end [2/2] (short) (narrow) %v10525_v0, 16  ;;  %v10549_v46 = vpop.permute.xlu0 %8943 }
 0x7ac   :  { %8557 = vmatmul.mubr.msk.bf16.vlgmr.msra.gmra.mrb[60].mxu1 %vm664_vm6, %v9379_v39  ;;  %4832 = vxpose.xlu0.b32.start [1/2] (short) (narrow) %v10539_v41, 16  ;;  %v10551_v23 = vpop.permute.xlu0 %8948 }
 0x7b0   :  { %4833 = vxpose.xlu0.b32.end [2/2] (short) (narrow) %v10546_v48, 16  ;;  %v10555_v62 = vpop.permute.xlu0 %8953 }
 0x7b4   :  { %v10558_v53 = vpop.permute.xlu0 %8958 }
 0x7b8   :  { %v10560_v39 = vpop.permute.xlu0 %8963 }
 0x7bc   :  { %v10564_v51 = vpop.permute.xlu0 %8968 }
 0x7c0   :  { %v10568_v10 = vpop.permute.xlu0 %8973 }
 0x7c4   :  { %v10576_v48 = vpop.permute.xlu0 %8978 }
 0x809   :  { %v4015_v17 = vpop.trf.xlu1 }
 0x80a   :  { %8564 = vmatprep.mubr.msk.f32.mxu1 %vm664_vm6, %v4015_v17 }
 0x80c   :  { %v4134_v42 = vpop.trf.xlu0 }
 0x80d   :  { %8571 = vmatprep.mubr.msk.f32.mxu0 %vm664_vm6, %v4134_v42 }
 0x828   :  { %v10553_v27 = vpop.f32.mrb[26].mxu1 }
 0x829   :  { %12507 = vst [vmem:[#allocation79_spill] sm:$0xff] %v10553_v27  ;;  %v8419_v50 = vpop.f32.mrb[27].mxu1 }
 0x83b   :  { %v10562_v13 = vpop.f32.mrb[28].mxu1 }
 0x83c   :  { %12508 = vst [vmem:[#allocation80_spill] sm:$0xff] %v10562_v13  ;;  %v8433_v49 = vpop.f32.mrb[29].mxu1 }
 0x843   :  { %v10566_v40 = vpop.f32.mrb[30].mxu1 }
 0x844   :  { %12509 = vst [vmem:[#allocation81_spill] sm:$0xff] %v10566_v40  ;;  %v8447_v44 = vpop.f32.mrb[31].mxu1 }
 0x847   :  { %v10570_v50 = vpop.f32.mrb[32].mxu1 }
 0x848   :  { %12510 = vst [vmem:[#allocation82_spill] sm:$0xff] %v10570_v50  ;;  %v8516_v36 = vpop.f32.mrb[33].mxu1 }
 0x849   :  { %v10572_v21 = vpop.f32.mrb[34].mxu1 }
 0x84a   :  { %12511 = vst [vmem:[#allocation83_spill] sm:$0xff] %v10572_v21  ;;  %v8982_v17 = vpack.i.bf16 %v10572_v21, %v10570_v50  ;;  %v8517_v41 = vpop.f32.mrb[35].mxu1 }
 0x84c   :  { %8983 = vrot.lane.b32.xlu1 %v8982_v17, %s9437_s0 }
 0x84f   :  { %v10579_v49 = vpop.f32.mrb[36].mxu1 }
 0x850   :  { %12512 = vst [vmem:[#allocation84_spill] sm:$0xff] %v10579_v49  ;;  %v8522_v44 = vpop.f32.mrb[37].mxu1 }
 0x851   :  { %v10582_v0 = vpop.f32.mrb[38].mxu1 }
 0x852   :  { %12513 = vst [vmem:[#allocation85_spill] sm:$0xff] %v10582_v0  ;;  %v8987_v36 = vpack.i.bf16 %v10582_v0, %v10579_v49  ;;  %v8523_v28 = vpop.f32.mrb[39].mxu1  ;;  %v8945_v49 = vunpack.i.l.bf16 %v10549_v46 }
 0x854   :  { %8988 = vrot.lane.b32.xlu1 %v8987_v36, %s9437_s0 }
 0x857   :  { %v10587_v41 = vpop.f32.mrb[40].mxu1 }
 0x858   :  { %12514 = vst [vmem:[#allocation86_spill] sm:$0xff] %v10587_v41  ;;  %v8528_v35 = vpop.f32.mrb[41].mxu1 }
 0x859   :  { %v10589_v60 = vpop.f32.mrb[42].mxu1 }
 0x85a   :  { %12515 = vst [vmem:[#allocation87_spill] sm:$0xff] %v10589_v60  ;;  %v8992_v17 = vpack.i.bf16 %v10589_v60, %v10587_v41  ;;  %v8529_v15 = vpop.f32.mrb[43].mxu1 }
 0x85c   :  { %8993 = vrot.lane.b32.xlu1 %v8992_v17, %s9437_s0 }
 0x85f   :  { %v10594_v42 = vpop.f32.mrb[44].mxu1 }
 0x860   :  { %12516 = vst [vmem:[#allocation88_spill] sm:$0xff] %v10594_v42  ;;  %v8534_v44 = vpop.f32.mrb[45].mxu1 }
 0x861   :  { %v10596_v56 = vpop.f32.mrb[46].mxu1 }
 0x862   :  { %12517 = vst [vmem:[#allocation89_spill] sm:$0xff] %v10596_v56  ;;  %v8997_v28 = vpack.i.bf16 %v10596_v56, %v10594_v42  ;;  %v8535_v36 = vpop.f32.mrb[47].mxu1 }
 0x864   :  { %8998 = vrot.lane.b32.xlu1 %v8997_v28, %s9437_s0 }
 0x867   :  { %v10601_v35 = vpop.f32.mrb[48].mxu1 }
 0x868   :  { %12518 = vst [vmem:[#allocation90_spill] sm:$0xff] %v10601_v35  ;;  %v8540_v59 = vpop.f32.mrb[49].mxu1 }
 0x869   :  { %v10603_v25 = vpop.f32.mrb[50].mxu1 }
 0x86a   :  { %12519 = vst [vmem:[#allocation91_spill] sm:$0xff] %v10603_v25  ;;  %v9002_v15 = vpack.i.bf16 %v10603_v25, %v10601_v35  ;;  %v8541_v17 = vpop.f32.mrb[51].mxu1 }
 0x86c   :  { %9003 = vrot.lane.b32.xlu1 %v9002_v15, %s9437_s0 }
 0x86f   :  { %v10608_v44 = vpop.f32.mrb[52].mxu1 }
 0x870   :  { %12520 = vst [vmem:[#allocation92_spill] sm:$0xff] %v10608_v44  ;;  %v8546_v41 = vpop.f32.mrb[53].mxu1 }
 0x871   :  { %v10610_v60 = vpop.f32.mrb[54].mxu1 }
 0x872   :  { %12521 = vst [vmem:[#allocation93_spill] sm:$0xff] %v10610_v60  ;;  %v9007_v36 = vpack.i.bf16 %v10610_v60, %v10608_v44  ;;  %v8547_v28 = vpop.f32.mrb[55].mxu1  ;;  %v8946_v60 = vunpack.i.h.bf16 %v10549_v46  ;;  %v8951_v46 = vunpack.i.h.bf16 %v10551_v23 }
 0x874   :  { %9008 = vrot.lane.b32.xlu1 %v9007_v36, %s9437_s0 }
 0x877   :  { %v10615_v59 = vpop.f32.mrb[56].mxu1 }
 0x878   :  { %12522 = vst [vmem:[#allocation94_spill] sm:$0xff] %v10615_v59  ;;  %v8552_v42 = vpop.f32.mrb[57].mxu1 }
 0x879   :  { %v10617_v56 = vpop.f32.mrb[58].mxu1  ;;  %v4016_v42 = vpop.trf.xlu1 }
 0x87a   :  { %12523 = vst [vmem:[#allocation95_spill] sm:$0xff] %v10617_v56  ;;  %v9012_v17 = vpack.i.bf16 %v10617_v56, %v10615_v59  ;;  %v8553_v15 = vpop.f32.mrb[59].mxu1  ;;  %v2638_v59 = vlaneseq }
 0x87c   :  { %9013 = vrot.lane.b32.xlu1 %v9012_v17, %s9437_s0  ;;  %v10633_v17 = vshrl.u32 %v2638_v59, 7  ;;  %v2641_v56 = vand.u32 127, %v2638_v59 }
 0x87d   :  { %v10631_v15 = vpop.trf.xlu1 }
 0x87e   :  { %vm2642_vm10 = vcmp.eq.s32.totalorder %v10633_v17, %v2641_v56 }
 0x87f   :  { %v10622_v41 = vpop.f32.mrb[60].mxu1 }
 0x880   :  { %12524 = vst [vmem:[#allocation96_spill] sm:$0xff] %v10622_v41  ;;  %v8558_v35 = vpop.f32.mrb[61].mxu1 }
 0x881   :  { %v10624_v25 = vpop.f32.mrb[62].mxu1  ;;  %v5585_v35 = vadd.s32 8, %v10633_v17  ;;  %v10636_v44 = vpop.trf.xlu1 }
 0x882   :  { %12525 = vst [vmem:[#allocation97_spill] sm:$0xff] %v10624_v25  ;;  %v9017_v28 = vpack.i.bf16 %v10624_v25, %v10622_v41  ;;  %v8559_v36 = vpop.f32.mrb[63].mxu1  ;;  %v3449_v41 = vmul.f32 %v10121_v61, %v9635_v3 }
 0x883   :  { %vm5586_vm8 = vcmp.eq.s32.totalorder %v5585_v35, %v2641_v56  ;;  %v4135_v35 = vpop.trf.xlu0 }
 0x884   :  { %9018 = vrot.lane.b32.xlu1 %v9017_v28, %s9437_s0  ;;  %v10639_v36 = vsel %vm5586_vm8, 1.0, %v12451_v32 }
 0x885   :  { %12526 = vst [vmem:[#allocation98_spill] sm:$0xff] %v10639_v36  ;;  %v5857_v28 = vsub.f32 1.0, %v10639_v36 }
 0x887   :  { %5862 = vrot.lane.b32.xlu0 %v5857_v28, %s9437_s0  ;;  %v4253_v0 = vpop.trf.xlu0 }
 0x8ad   :  { %4713 = vxpose.xlu1.b32.start [1/2] (short) (narrow) %v10532_v37, 16  ;;  %v3448_v37 = vmul.f32 %v10123_v16, %v9639_v5  ;;  %v3451_v16 = vmul.f32 %v10129_v45, %v9641_v6 }
 0x8b1   :  { %4714 = vxpose.xlu1.b32.end [2/2] (short) (narrow) %v10537_v52, 16 }
 0x8be   :  { %v8984_v25 = vpop.permute.xlu1 %8983 }
 0x8bf   :  { %v8986_v59 = vunpack.i.h.bf16 %v8984_v25  ;;  %v8985_v52 = vunpack.i.l.bf16 %v8984_v25  ;;  %v3450_v25 = vmul.f32 %v10133_v33, %v9637_v4  ;;  %v4254_v33 = vpop.trf.xlu0 }
 0x8c1   :  { %v3960_v11 = vsel %vm617_vm4, %v3448_v37, %v8985_v52  ;;  %v3961_v36 = vsel %vm617_vm4, %v3449_v41, %v8986_v59  ;;  %v3452_v59 = vmul.f32 %v10139_v31, %v9643_v7 }
 0x8c2   :  { %v3977_v28 = vsel %vm3976_vm9, %v3960_v11, %v8945_v49  ;;  %v3978_v3 = vsel %vm3976_vm9, %v3961_v36, %v8946_v60  ;;  %v8950_v11 = vunpack.i.l.bf16 %v10551_v23  ;;  %v10661_v60 = vsel %vm2642_vm10, 1.0, %v12451_v32 }
 0x8c3   :  { %v8798_v61 = vpack.c.bf16 %v3978_v3, %v3977_v28  ;;  %12527 = vst [vmem:[#allocation99_spill] sm:$0xff] %v10661_v60  ;;  %v5856_v41 = vsub.f32 1.0, %v10661_v60  ;;  %v3453_v36 = vmul.f32 %v10135_v58, %v9647_v9  ;;  %v8956_v3 = vunpack.i.h.bf16 %v10555_v62 }
 0x8c5   :  { %8799 = vmatprep.subr.bf16.mxu1 %v8798_v61 }
 0x8c6   :  { %v8989_v5 = vpop.permute.xlu1 %8988  ;;  %8801 = vmatpush3.bf16.msra.mxu1 %v8798_v61 }
 0x8c7   :  { %v8991_v37 = vunpack.i.h.bf16 %v8989_v5  ;;  %v8990_v52 = vunpack.i.l.bf16 %v8989_v5 }
 0x8c9   :  { %v3962_v49 = vsel %vm617_vm4, %v3450_v25, %v8990_v52  ;;  %v3963_v56 = vsel %vm617_vm4, %v3451_v16, %v8991_v37  ;;  %8565 = vmatmul.mubr.msk.f32.vlgmr.msra.gmra.mrb[64].mxu1 %vm664_vm6, %v4016_v42  ;;  %v4372_v16 = vpop.trf.xlu0  ;;  %v3454_v25 = vmul.f32 %v10171_v57, %v9645_v8 }
 0x8ca   :  { %v3979_v6 = vsel %vm3976_vm9, %v3962_v49, %v8950_v11  ;;  %v3980_v45 = vsel %vm3976_vm9, %v3963_v56, %v8951_v46  ;;  %8578 = vmatprep.mubr.msk.f32.mxu1 %vm664_vm6, %v4253_v0  ;;  %v8955_v0 = vunpack.i.l.bf16 %v10555_v62  ;;  %v3455_v62 = vmul.f32 %v10143_v54, %v12489_v14 }
 0x8cb   :  { %v8802_v4 = vpack.c.bf16 %v3980_v45, %v3979_v6  ;;  %v8960_v46 = vunpack.i.l.bf16 %v10558_v53  ;;  %v3456_v14 = vmul.f32 %v10173_v20, %v9701_v29  ;;  %v3459_v20 = vmul.f32 %v10155_v30, %v9820_v34 }
 0x8cd   :  { %8803 = vmatprep.subr.bf16.mxu0 %v8802_v4  ;;  %v4373_v57 = vpop.trf.xlu0 }
 0x8ce   :  { %v8994_v23 = vpop.permute.xlu1 %8993  ;;  %8805 = vmatpush3.bf16.msra.mxu0 %v8802_v4 }
 0x8cf   :  { %v8996_v42 = vunpack.i.h.bf16 %v8994_v23  ;;  %v8995_v28 = vunpack.i.l.bf16 %v8994_v23  ;;  %5860 = vrot.lane.b32.xlu1 %v5856_v41, %s9437_s0  ;;  %v8965_v41 = vunpack.i.l.bf16 %v10560_v39 }
 0x8d1   :  { %v3964_v61 = vsel %vm617_vm4, %v3452_v59, %v8995_v28  ;;  %v3965_v5 = vsel %vm617_vm4, %v3453_v36, %v8996_v42  ;;  %8572 = vmatmul.mubr.msk.f32.vlgmr.msra.gmra.mrb[48].mxu0 %vm664_vm6, %v4135_v35  ;;  %v8961_v35 = vunpack.i.h.bf16 %v10558_v53  ;;  %v3457_v53 = vmul.f32 %v10147_v63, %v9857_v19  ;;  %v4610_v36 = vpop.trf.xlu0 }
 0x8d2   :  { %v3981_v9 = vsel %vm3976_vm9, %v3964_v61, %v8955_v0  ;;  %v3982_v58 = vsel %vm3976_vm9, %v3965_v5, %v8956_v3  ;;  %8585 = vmatprep.mubr.msk.f32.mxu0 %vm664_vm6, %v4372_v16  ;;  %v8971_v3 = vunpack.i.h.bf16 %v10564_v51  ;;  %v8970_v0 = vunpack.i.l.bf16 %v10564_v51 }
 0x8d3   :  { %v8806_v7 = vpack.c.bf16 %v3982_v58, %v3981_v9  ;;  %v3461_v9 = vmul.f32 %v10161_v47, %v9914_v12  ;;  %v3460_v51 = vmul.f32 %v10151_v55, %v9822_v38  ;;  %v12528_v47 = vld [vmem:[#allocation48_spill] sm:$0xff] }
 0x8d5   :  { %8807 = vmatprep.subr.bf16.mxu1 %v8806_v7 }
 0x8d6   :  { %v8999_v31 = vpop.permute.xlu1 %8998  ;;  %8809 = vmatpush3.bf16.msra.mxu1 %v8806_v7  ;;  %v8976_v7 = vunpack.i.h.bf16 %v10568_v10 }
 0x8d7   :  { %v9001_v37 = vunpack.i.h.bf16 %v8999_v31  ;;  %v9000_v52 = vunpack.i.l.bf16 %v8999_v31  ;;  %v8975_v31 = vunpack.i.l.bf16 %v10568_v10  ;;  %v3463_v10 = vmul.f32 %v12528_v47, %v12487_v18 }
 0x8d9   :  { %v3966_v11 = vsel %vm617_vm4, %v3454_v25, %v9000_v52  ;;  %v3967_v49 = vsel %vm617_vm4, %v3455_v62, %v9001_v37  ;;  %8579 = vmatmul.mubr.msk.f32.vlgmr.msra.gmra.mrb[66].mxu1 %vm664_vm6, %v4254_v33  ;;  %v8966_v33 = vunpack.i.h.bf16 %v10560_v39  ;;  %v3458_v39 = vmul.f32 %v10177_v22, %v9818_v2  ;;  %v4611_v2 = vpop.trf.xlu0 }
 0x8da   :  { %v3983_v56 = vsel %vm3976_vm9, %v3966_v11, %v8960_v46  ;;  %v3984_v6 = vsel %vm3976_vm9, %v3967_v49, %v8961_v35  ;;  %8592 = vmatprep.mubr.msk.f32.mxu1 %vm664_vm6, %v10631_v15  ;;  %v12529_v35 = vld [vmem:[#allocation47_spill] sm:$0xff] }
 0x8db   :  { %v8810_v8 = vpack.c.bf16 %v3984_v6, %v3983_v56  ;;  %v3462_v46 = vmul.f32 %v12529_v35, %v12485_v26  ;;  %v8981_v56 = vunpack.i.h.bf16 %v10576_v48  ;;  %v8980_v6 = vunpack.i.l.bf16 %v10576_v48 }
 0x8dd   :  { %8811 = vmatprep.subr.bf16.mxu0 %v8810_v8  ;;  %v4848_v37 = vpop.trf.xlu0 }
 0x8de   :  { %v9004_v54 = vpop.permute.xlu1 %9003  ;;  %8813 = vmatpush3.bf16.msra.mxu0 %v8810_v8 }
 0x8df   :  { %v9006_v45 = vunpack.i.h.bf16 %v9004_v54  ;;  %v9005_v4 = vunpack.i.l.bf16 %v9004_v54 }
 0x8e1   :  { %8586 = vmatmul.mubr.msk.f32.vlgmr.msra.gmra.mrb[50].mxu0 %vm664_vm6, %v4373_v57  ;;  %v3968_v15 = vsel %vm617_vm4, %v3456_v14, %v9005_v4  ;;  %v3969_v23 = vsel %vm617_vm4, %v3457_v53, %v9006_v45  ;;  %v4849_v18 = vpop.trf.xlu0 }
 0x8e2   :  { %v3985_v59 = vsel %vm3976_vm9, %v3968_v15, %v8965_v41  ;;  %v3986_v19 = vsel %vm3976_vm9, %v3969_v23, %v8966_v33  ;;  %8599 = vmatprep.mubr.msk.f32.mxu0 %vm664_vm6, %v4610_v36 }
 0x8e3   :  { %v8814_v29 = vpack.c.bf16 %v3986_v19, %v3985_v59 }
 0x8e5   :  { %8815 = vmatprep.subr.bf16.mxu1 %v8814_v29 }
 0x8e6   :  { %v9009_v63 = vpop.permute.xlu1 %9008  ;;  %8817 = vmatpush3.bf16.msra.mxu1 %v8814_v29 }
 0x8e7   :  { %v9011_v42 = vunpack.i.h.bf16 %v9009_v63  ;;  %v9010_v28 = vunpack.i.l.bf16 %v9009_v63 }
 0x8e9   :  { %8593 = vmatmul.mubr.msk.f32.vlgmr.msra.gmra.mrb[68].mxu1 %vm664_vm6, %v10636_v44  ;;  %v3970_v61 = vsel %vm617_vm4, %v3458_v39, %v9010_v28  ;;  %v3971_v5 = vsel %vm617_vm4, %v3459_v20, %v9011_v42 }
 0x8ea   :  { %v3987_v16 = vsel %vm3976_vm9, %v3970_v61, %v8970_v0  ;;  %v3988_v34 = vsel %vm3976_vm9, %v3971_v5, %v8971_v3 }
 0x8eb   :  { %v8818_v30 = vpack.c.bf16 %v3988_v34, %v3987_v16 }
 0x8ed   :  { %8819 = vmatprep.subr.bf16.mxu0 %v8818_v30 }
 0x8ee   :  { %v9014_v22 = vpop.permute.xlu1 %9013  ;;  %8821 = vmatpush3.bf16.msra.mxu0 %v8818_v30 }
 0x8ef   :  { %v9016_v44 = vunpack.i.h.bf16 %v9014_v22  ;;  %v9015_v58 = vunpack.i.l.bf16 %v9014_v22 }
 0x8f1   :  { %8600 = vmatmul.mubr.msk.f32.vlgmr.msra.gmra.mrb[52].mxu0 %vm664_vm6, %v4611_v2  ;;  %v3972_v62 = vsel %vm617_vm4, %v3460_v51, %v9015_v58  ;;  %v3973_v25 = vsel %vm617_vm4, %v3461_v9, %v9016_v44 }
 0x8f2   :  { %v3989_v52 = vsel %vm3976_vm9, %v3972_v62, %v8975_v31  ;;  %v3990_v12 = vsel %vm3976_vm9, %v3973_v25, %v8976_v7  ;;  %8613 = vmatprep.mubr.msk.f32.mxu0 %vm664_vm6, %v4848_v37 }
 0x8f3   :  { %v8822_v38 = vpack.c.bf16 %v3990_v12, %v3989_v52 }
 0x8f5   :  { %8823 = vmatprep.subr.bf16.mxu1 %v8822_v38 }
 0x8f6   :  { %v9019_v55 = vpop.permute.xlu1 %9018  ;;  %8825 = vmatpush3.bf16.msra.mxu1 %v8822_v38 }
 0x8f7   :  { %v9021_v11 = vunpack.i.h.bf16 %v9019_v55  ;;  %v9020_v49 = vunpack.i.l.bf16 %v9019_v55 }
 0x8f9   :  { %v3974_v8 = vsel %vm617_vm4, %v3462_v46, %v9020_v49  ;;  %v3975_v57 = vsel %vm617_vm4, %v3463_v10, %v9021_v11  ;;  %v5863_v48 = vpop.permute.xlu0 %5862 }
 0x8fa   :  { %v3991_v54 = vsel %vm3976_vm9, %v3974_v8, %v8980_v6  ;;  %v3992_v53 = vsel %vm3976_vm9, %v3975_v57, %v8981_v56 }
 0x8fb   :  { %v8826_v14 = vpack.c.bf16 %v3992_v53, %v3991_v54 }
 0x8fd   :  { %8827 = vmatprep.subr.bf16.mxu0 %v8826_v14 }
 0x8fe   :  { %8829 = vmatpush3.bf16.msra.mxu0 %v8826_v14 }
 0x901   :  { %8614 = vmatmul.mubr.msk.f32.vlgmr.msra.gmra.mrb[54].mxu0 %vm664_vm6, %v4849_v18 }
 0x92d   :  { %v4729_v26 = vpop.trf.xlu1 }
 0x92e   :  { %8606 = vmatprep.mubr.msk.f32.mxu1 %vm664_vm6, %v4729_v26 }
 0x931   :  { %v4730_v45 = vpop.trf.xlu1 }
 0x932   :  { %8607 = vmatmul.mubr.msk.f32.vlgmr.msra.gmra.mrb[70].mxu1 %vm664_vm6, %v4730_v45 }
 0x941   :  { %v5861_v33 = vpop.permute.xlu1 %5860 }
 0x99c   :  { %v10745_v4 = vpop.f32.mrb[64].mxu1 }
 0x99d   :  { %v10748_v41 = vmul.f32 %v10745_v4, %v5863_v48  ;;  %v10750_v15 = vpop.f32.mrb[65].mxu1 }
 0x99e   :  { %v8830_v23 = vpack.c.bf16 %v10745_v4, %v10750_v15  ;;  %v10757_v36 = vmul.f32 %v5861_v33, %v10750_v15 }
 0x99f   :  { %5900 = vrot.lane.b32.xlu1 %v10748_v41, %s9432_s1 }
 0x9a0   :  { %8831 = vmatprep.subr.bf16.mxu1 %v8830_v23 }
 0x9a1   :  { %8833 = vmatpush3.bf16.msra.mxu1 %v8830_v23 }
 0x9a3   :  { %5898 = vrot.lane.b32.xlu1 %v10757_v36, %s9432_s1 }
 0x9a4   :  { %v10761_v59 = vpop.f32.mrb[48].mxu0 }
 0x9a5   :  { %v10764_v19 = vmul.f32 %v10761_v59, %v5863_v48  ;;  %v10766_v29 = vpop.f32.mrb[49].mxu0 }
 0x9a6   :  { %v8834_v63 = vpack.c.bf16 %v10761_v59, %v10766_v29  ;;  %v10773_v20 = vmul.f32 %v5861_v33, %v10766_v29 }
 0x9a7   :  { %5904 = vrot.lane.b32.xlu1 %v10764_v19, %s9432_s1 }
 0x9a8   :  { %8835 = vmatprep.subr.bf16.mxu0 %v8834_v63 }
 0x9a9   :  { %8837 = vmatpush3.bf16.msra.mxu0 %v8834_v63 }
 0x9ab   :  { %5902 = vrot.lane.b32.xlu1 %v10773_v20, %s9432_s1 }
 0x9ac   :  { %v10777_v39 = vpop.f32.mrb[66].mxu1 }
 0x9ad   :  { %12530 = vst [vmem:[#allocation48_spill] sm:$0xff] %v10777_v39  ;;  %v10779_v42 = vpop.f32.mrb[67].mxu1  ;;  %v10782_v28 = vmul.f32 %v10777_v39, %v5863_v48 }
 0x9ae   :  { %12531 = vst [vmem:[#allocation47_spill] sm:$0xff] %v10779_v42  ;;  %v10785_v3 = vmul.f32 %v5861_v33, %v10779_v42  ;;  %v10789_v0 = vpack.c.bf16 %v10777_v39, %v10779_v42 }
 0x9af   :  { %5908 = vrot.lane.b32.xlu0 %v10782_v28, %s9432_s1 }
 0x9b0   :  { %5906 = vrot.lane.b32.xlu1 %v10785_v3, %s9432_s1  ;;  %8839 = vmatprep.subr.bf16.mxu1 %v10789_v0 }
 0x9b4   :  { %v10796_v61 = vpop.f32.mrb[50].mxu0 }
 0x9b5   :  { %12532 = vst [vmem:[#allocation100_spill] sm:$0xff] %v10796_v61  ;;  %v10798_v5 = vpop.f32.mrb[51].mxu0  ;;  %v10801_v16 = vmul.f32 %v10796_v61, %v5863_v48 }
 0x9b6   :  { %12533 = vst [vmem:[#allocation101_spill] sm:$0xff] %v10798_v5  ;;  %v10804_v34 = vmul.f32 %v5861_v33, %v10798_v5  ;;  %v10808_v30 = vpack.c.bf16 %v10796_v61, %v10798_v5 }
 0x9b7   :  { %5912 = vrot.lane.b32.xlu0 %v10801_v16, %s9432_s1 }
 0x9b8   :  { %5910 = vrot.lane.b32.xlu1 %v10804_v34, %s9432_s1  ;;  %8843 = vmatprep.subr.bf16.mxu0 %v10808_v30 }
 0x9bc   :  { %v10815_v2 = vpop.f32.mrb[68].mxu1 }
 0x9bd   :  { %12534 = vst [vmem:[#allocation102_spill] sm:$0xff] %v10815_v2  ;;  %v10817_v22 = vpop.f32.mrb[69].mxu1  ;;  %v10820_v9 = vmul.f32 %v10815_v2, %v5863_v48 }
 0x9be   :  { %12535 = vst [vmem:[#allocation103_spill] sm:$0xff] %v10817_v22  ;;  %v10823_v51 = vmul.f32 %v5861_v33, %v10817_v22  ;;  %v10827_v44 = vpack.c.bf16 %v10815_v2, %v10817_v22 }
 0x9bf   :  { %5916 = vrot.lane.b32.xlu0 %v10820_v9, %s9432_s1 }
 0x9c0   :  { %5914 = vrot.lane.b32.xlu1 %v10823_v51, %s9432_s1 }
 0x9c4   :  { %v10833_v58 = vpop.f32.mrb[52].mxu0 }
 0x9c5   :  { %12536 = vst [vmem:[#allocation104_spill] sm:$0xff] %v10833_v58  ;;  %v10835_v7 = vpop.f32.mrb[53].mxu0  ;;  %v10838_v31 = vmul.f32 %v10833_v58, %v5863_v48 }
 0x9c6   :  { %12537 = vst [vmem:[#allocation105_spill] sm:$0xff] %v10835_v7  ;;  %v10841_v62 = vmul.f32 %v5861_v33, %v10835_v7  ;;  %v10845_v25 = vpack.c.bf16 %v10833_v58, %v10835_v7 }
 0x9c7   :  { %5920 = vrot.lane.b32.xlu0 %v10838_v31, %s9432_s1 }
 0x9c8   :  { %5918 = vrot.lane.b32.xlu1 %v10841_v62, %s9432_s1 }
 0x9d4   :  { %v10851_v37 = vpop.f32.mrb[54].mxu0 }
 0x9d5   :  { %12538 = vst [vmem:[#allocation106_spill] sm:$0xff] %v10851_v37  ;;  %v10853_v52 = vpop.f32.mrb[55].mxu0  ;;  %v10878_v46 = vmul.f32 %v10851_v37, %v5863_v48 }
 0x9d6   :  { %12539 = vst [vmem:[#allocation107_spill] sm:$0xff] %v10853_v52  ;;  %v10857_v12 = vpack.c.bf16 %v10851_v37, %v10853_v52  ;;  %v10881_v11 = vmul.f32 %v5861_v33, %v10853_v52 }
 0xa05   :  { %v10859_v38 = vpop.f32.mrb[70].mxu1 }
 0xa06   :  { %12540 = vst [vmem:[#allocation108_spill] sm:$0xff] %v10859_v38  ;;  %v10861_v55 = vpop.f32.mrb[71].mxu1  ;;  %v10864_v47 = vmul.f32 %v10859_v38, %v5863_v48 }
 0xa07   :  { %12541 = vst [vmem:[#allocation109_spill] sm:$0xff] %v10861_v55  ;;  %v10867_v10 = vmul.f32 %v5861_v33, %v10861_v55  ;;  %v10871_v35 = vpack.c.bf16 %v10859_v38, %v10861_v55 }
 0xa08   :  { %5924 = vrot.lane.b32.xlu0 %v10864_v47, %s9432_s1 }
 0xa09   :  { %5922 = vrot.lane.b32.xlu1 %v10867_v10, %s9432_s1 }
 0xa0c   :  { %5928 = vrot.lane.b32.xlu0 %v10878_v46, %s9432_s1 }
 0xa0d   :  { %5926 = vrot.lane.b32.xlu1 %v10881_v11, %s9432_s1 }
 0xa11   :  { %v5901_v49 = vpop.permute.xlu1 %5900 }
 0xa12   :  { %v5949_v54 = vsel %vm664_vm6, %v5901_v49, 0.0 }
 0xa15   :  { %v5899_v56 = vpop.permute.xlu1 %5898 }
 0xa16   :  { %v5946_v26 = vsel %vm664_vm6, %v5899_v56, 0.0 }
 0xa19   :  { %v5905_v6 = vpop.permute.xlu1 %5904 }
 0xa1a   :  { %v5955_v48 = vsel %vm664_vm6, %v5905_v6, 0.0 }
 0xa1d   :  { %v5903_v8 = vpop.permute.xlu1 %5902 }
 0xa1e   :  { %v5952_v53 = vsel %vm664_vm6, %v5903_v8, 0.0 }
 0xa21   :  { %v5909_v14 = vpop.permute.xlu0 %5908 }
 0xa22   :  { %v5907_v57 = vpop.permute.xlu1 %5906  ;;  %v5961_v49 = vsel %vm664_vm6, %v5909_v14, 0.0 }
 0xa23   :  { %v5958_v45 = vsel %vm664_vm6, %v5907_v57, 0.0 }
 0xa29   :  { %v5913_v33 = vpop.permute.xlu0 %5912 }
 0xa2a   :  { %v5911_v18 = vpop.permute.xlu1 %5910 }
 0xa2b   :  { %5950 = vadd.xlane.f32.xlu0 %v5949_v54  ;;  %v5964_v63 = vsel %vm664_vm6, %v5911_v18, 0.0 }
 0xa2f   :  { %5953 = vadd.xlane.f32.xlu0 %v5952_v53  ;;  %v5967_v53 = vsel %vm664_vm6, %v5913_v33, 0.0 }
 0xa31   :  { %5947 = vadd.xlane.f32.xlu1 %v5946_v26  ;;  %v5917_v54 = vpop.permute.xlu0 %5916 }
 0xa32   :  { %v5915_v23 = vpop.permute.xlu1 %5914  ;;  %v5973_v6 = vsel %vm664_vm6, %v5917_v54, 0.0 }
 0xa33   :  { %5959 = vadd.xlane.f32.xlu0 %v5958_v45  ;;  %v5970_v8 = vsel %vm664_vm6, %v5915_v23, 0.0 }
 0xa35   :  { %5956 = vadd.xlane.f32.xlu1 %v5955_v48 }
 0xa37   :  { %5965 = vadd.xlane.f32.xlu0 %v5964_v63 }
 0xa39   :  { %5962 = vadd.xlane.f32.xlu1 %v5961_v49  ;;  %v5921_v26 = vpop.permute.xlu0 %5920 }
 0xa3a   :  { %v5919_v56 = vpop.permute.xlu1 %5918  ;;  %v5979_v18 = vsel %vm664_vm6, %v5921_v26, 0.0 }
 0xa3b   :  { %5971 = vadd.xlane.f32.xlu0 %v5970_v8  ;;  %v5976_v57 = vsel %vm664_vm6, %v5919_v56, 0.0 }
 0xa3d   :  { %5968 = vadd.xlane.f32.xlu1 %v5967_v53 }
 0xa3f   :  { %5977 = vadd.xlane.f32.xlu0 %v5976_v57 }
 0xa41   :  { %5974 = vadd.xlane.f32.xlu1 %v5973_v6 }
 0xa45   :  { %5980 = vadd.xlane.f32.xlu1 %v5979_v18 }
 0xa7a   :  { %v5925_v14 = vpop.permute.xlu0 %5924 }
 0xa7b   :  { %v5923_v45 = vpop.permute.xlu1 %5922  ;;  %v5985_v48 = vsel %vm664_vm6, %v5925_v14, 0.0 }
 0xa7c   :  { %5986 = vadd.xlane.f32.xlu1 %v5985_v48  ;;  %v5982_v23 = vsel %vm664_vm6, %v5923_v45, 0.0 }
 0xa7d   :  { %5983 = vadd.xlane.f32.xlu0 %v5982_v23 }
 0xa7e   :  { %v5929_v33 = vpop.permute.xlu0 %5928 }
 0xa7f   :  { %v5927_v63 = vpop.permute.xlu1 %5926  ;;  %v5991_v49 = vsel %vm664_vm6, %v5929_v33, 0.0 }
 0xa80   :  { %5992 = vadd.xlane.f32.xlu1 %v5991_v49  ;;  %v5988_v8 = vsel %vm664_vm6, %v5927_v63, 0.0 }
 0xa81   :  { %5989 = vadd.xlane.f32.xlu0 %v5988_v8 }
 0xab8   :  { %v5951_v54 = vpop.xlane.xlu0 %5950 }
 0xab9   :  { %9160 = vrsqrt.f32 %v5951_v54  ;;  %vm6003_vm13 = vcmp.eq.f32.partialorder %v5951_v54, inf  ;;  %v6006_v60 = vand.u32 2147483648, %v5951_v54  ;;  %vm6005_vm1 = vcmp.eq.f32.partialorder %v5951_v54, 0.0 }
 0xabc   :  { %v5954_v56 = vpop.xlane.xlu0 %5953 }
 0xabd   :  { %9162 = vrsqrt.f32 %v5954_v56  ;;  %vm6010_vm11 = vcmp.eq.f32.partialorder %v5954_v56, inf  ;;  %v6013_v48 = vand.u32 2147483648, %v5954_v56  ;;  %vm6012_vm12 = vcmp.eq.f32.partialorder %v5954_v56, 0.0 }
 0xabe   :  { %v5948_v53 = vpop.xlane.xlu1 %5947 }
 0xabf   :  { %9164 = vrsqrt.f32 %v5948_v53  ;;  %vm5996_vm14 = vcmp.eq.f32.partialorder %v5948_v53, inf  ;;  %v5999_v8 = vand.u32 2147483648, %v5948_v53  ;;  %vm5998_vm15 = vcmp.eq.f32.partialorder %v5948_v53, 0.0 }
 0xac0   :  { %v10903_v57 = vpop.xlane.xlu0 %5959 }
 0xac1   :  { %9166 = vrsqrt.f32 %v10903_v57  ;;  %vm6024_vm7 = vcmp.eq.f32.partialorder %v10903_v57, inf  ;;  %vm6026_vm9 = vcmp.eq.f32.partialorder %v10903_v57, 0.0 }
 0xac2   :  { %v5957_v6 = vpop.xlane.xlu1 %5956 }
 0xac3   :  { %9168 = vrsqrt.f32 %v5957_v6  ;;  %v9161_v18 = vpop.eup %9160  ;;  %vm6017_vm5 = vcmp.eq.f32.partialorder %v5957_v6, inf  ;;  %v6020_v58 = vand.u32 2147483648, %v5957_v6  ;;  %vm6019_vm8 = vcmp.eq.f32.partialorder %v5957_v6, 0.0 }
 0xac4   :  { %v10906_v26 = vpop.xlane.xlu0 %5965  ;;  %v6002_v23 = vmul.f32 %v9161_v18, %v5951_v54 }
 0xac5   :  { %9170 = vrsqrt.f32 %v10906_v26 }
 0xac6   :  { %v10909_v14 = vpop.xlane.xlu1 %5962  ;;  %v6004_v27 = vsel %vm6003_vm13, %v5951_v54, %v6002_v23 }
 0xac7   :  { %v9163_v45 = vpop.eup %9162  ;;  %9172 = vrsqrt.f32 %v10909_v14  ;;  %vm6031_vm10 = vcmp.eq.f32.partialorder %v10909_v14, inf }
 0xac8   :  { %v6009_v33 = vmul.f32 %v9163_v45, %v5954_v56  ;;  %v10912_v63 = vpop.xlane.xlu0 %5971 }
 0xac9   :  { %v9165_v49 = vpop.eup %9164  ;;  %9174 = vrsqrt.f32 %v10912_v63  ;;  %vm6054_vm13 = vcmp.eq.f32.partialorder %v10912_v63, 0.0 }
 0xaca   :  { %v5995_v1 = vmul.f32 %v9165_v49, %v5948_v53  ;;  %v10915_v50 = vpop.xlane.xlu1 %5968  ;;  %v6011_v43 = vsel %vm6010_vm11, %v5954_v56, %v6009_v33  ;;  %vm6033_vm11 = vcmp.eq.f32.partialorder %v10909_v14, 0.0 }
 0xacb   :  { %v9167_v21 = vpop.eup %9166  ;;  %9176 = vrsqrt.f32 %v10915_v50  ;;  %v6014_v18 = vsel %vm6012_vm12, %v6013_v48, %v6011_v43  ;;  %vm6052_vm12 = vcmp.eq.f32.partialorder %v10912_v63, inf }
 0xacc   :  { %v10918_v45 = vpop.xlane.xlu0 %5977  ;;  %v10920_v40 = vadd.f32 1e-15, %v6014_v18  ;;  %v5997_v13 = vsel %vm5996_vm14, %v5948_v53, %v5995_v1  ;;  %v6023_v32 = vmul.f32 %v9167_v21, %v10903_v57  ;;  %v6007_v21 = vsel %vm6005_vm1, %v6006_v60, %v6004_v27 }
 0xacd   :  { %v9169_v49 = vpop.eup %9168  ;;  %v6000_v56 = vsel %vm5998_vm15, %v5999_v8, %v5997_v13  ;;  %9178 = vrsqrt.f32 %v10918_v45  ;;  %v6027_v1 = vand.u32 2147483648, %v10903_v57  ;;  %v10941_v54 = vadd.f32 1e-15, %v6007_v21 }
 0xace   :  { %v6016_v33 = vmul.f32 %v9169_v49, %v5957_v6  ;;  %v10926_v43 = vpop.xlane.xlu1 %5974  ;;  %6186 = vxpose.xlu1.b32.start [1/2] (short) (narrow) %v10920_v40, 8  ;;  %v10929_v48 = vadd.f32 1e-15, %v6000_v56  ;;  %v6025_v23 = vsel %vm6024_vm7, %v10903_v57, %v6023_v32  ;;  %vm6038_vm14 = vcmp.eq.f32.partialorder %v10906_v26, inf }
 0xacf   :  { %9180 = vrsqrt.f32 %v10926_v43  ;;  %v9171_v53 = vpop.eup %9170  ;;  %v6028_v32 = vsel %vm6026_vm9, %v6027_v1, %v6025_v23  ;;  %vm6040_vm15 = vcmp.eq.f32.partialorder %v10906_v26, 0.0  ;;  %vm6045_vm1 = vcmp.eq.f32.partialorder %v10915_v50, inf }
 0xad0   :  { %6154 = vxpose.xlu0.b32.start [1/2] (short) (narrow) %v10929_v48, 8  ;;  %v6018_v13 = vsel %vm6017_vm5, %v5957_v6, %v6016_v33  ;;  %v6034_v6 = vand.u32 2147483648, %v10909_v14  ;;  %v6037_v21 = vmul.f32 %v9171_v53, %v10906_v26  ;;  %v10959_v1 = vadd.f32 1e-15, %v6028_v32 }
 0xad1   :  { %v9173_v8 = vpop.eup %9172  ;;  %v6021_v18 = vsel %vm6019_vm8, %v6020_v58, %v6018_v13  ;;  %v6055_v58 = vand.u32 2147483648, %v10912_v63  ;;  %vm6047_vm5 = vcmp.eq.f32.partialorder %v10915_v50, 0.0  ;;  %vm6059_vm7 = vcmp.eq.f32.partialorder %v10926_v43, inf }
 0xad2   :  { %v10939_v49 = vpop.xlane.xlu1 %5980  ;;  %v10943_v27 = vadd.f32 1e-15, %v6021_v18  ;;  %v6030_v60 = vmul.f32 %v9173_v8, %v10909_v14  ;;  %v6039_v53 = vsel %vm6038_vm14, %v10906_v26, %v6037_v21  ;;  %vm6061_vm8 = vcmp.eq.f32.partialorder %v10926_v43, 0.0 }
 0xad3   :  { %v9175_v56 = vpop.eup %9174  ;;  %9182 = vrsqrt.f32 %v10939_v49  ;;  %vm6066_vm9 = vcmp.eq.f32.partialorder %v10918_v45, inf }
 0xad4   :  { %6155 = vxpose.xlu0.b32.end [2/2] (short) (narrow) %v10941_v54, 8  ;;  %6187 = vxpose.xlu1.b32.end [2/2] (short) (narrow) %v10943_v27, 8  ;;  %v6051_v57 = vmul.f32 %v9175_v56, %v10912_v63  ;;  %v6032_v33 = vsel %vm6031_vm10, %v10909_v14, %v6030_v60  ;;  %v6041_v56 = vand.u32 2147483648, %v10906_v26  ;;  %v6048_v26 = vand.u32 2147483648, %v10915_v50 }
 0xad5   :  { %v9177_v13 = vpop.eup %9176  ;;  %v6035_v18 = vsel %vm6033_vm11, %v6034_v6, %v6032_v33  ;;  %vm6068_vm10 = vcmp.eq.f32.partialorder %v10918_v45, 0.0  ;;  %vm6073_vm11 = vcmp.eq.f32.partialorder %v10939_v49, inf }
 0xad6   :  { %v6053_v23 = vsel %vm6052_vm12, %v10912_v63, %v6051_v57  ;;  %v6044_v60 = vmul.f32 %v9177_v13, %v10915_v50  ;;  %v10973_v14 = vadd.f32 1e-15, %v6035_v18  ;;  %v6042_v6 = vsel %vm6040_vm15, %v6041_v56, %v6039_v53 }
 0xad7   :  { %v6056_v8 = vsel %vm6054_vm13, %v6055_v58, %v6053_v23  ;;  %v9179_v7 = vpop.eup %9178  ;;  %v6062_v58 = vand.u32 2147483648, %v10926_v43  ;;  %v6069_v53 = vand.u32 2147483648, %v10918_v45  ;;  %vm6075_vm12 = vcmp.eq.f32.partialorder %v10939_v49, 0.0 }
 0xad8   :  { %6218 = vxpose.xlu0.b32.start [1/2] (short) (narrow) %v10959_v1, 8  ;;  %v10966_v2 = vadd.f32 1e-15, %v6056_v8  ;;  %v6046_v33 = vsel %vm6045_vm1, %v10915_v50, %v6044_v60  ;;  %v6065_v21 = vmul.f32 %v9179_v7, %v10918_v45  ;;  %v10986_v8 = vadd.f32 1e-15, %v6042_v6 }
 0xad9   :  { %v9181_v32 = vpop.eup %9180  ;;  %v6049_v56 = vsel %vm6047_vm5, %v6048_v26, %v6046_v33 }
 0xada   :  { %6282 = vxpose.xlu1.b32.start [1/2] (short) (narrow) %v10966_v2, 8  ;;  %v6058_v63 = vmul.f32 %v9181_v32, %v10926_v43  ;;  %v10997_v7 = vadd.f32 1e-15, %v6049_v56  ;;  %v6076_v32 = vand.u32 2147483648, %v10939_v49 }
 0xadc   :  { %6219 = vxpose.xlu0.b32.end [2/2] (short) (narrow) %v10973_v14, 8  ;;  %v6060_v57 = vsel %vm6059_vm7, %v10926_v43, %v6058_v63  ;;  %v6067_v43 = vsel %vm6066_vm9, %v10918_v45, %v6065_v21 }
 0xadd   :  { %v9183_v13 = vpop.eup %9182  ;;  %v6063_v23 = vsel %vm6061_vm8, %v6062_v58, %v6060_v57  ;;  %v6070_v60 = vsel %vm6068_vm10, %v6069_v53, %v6067_v43  ;;  %vm2468_vm10 = vcmask 9216  }
 0xade   :  { %v10988_v18 = vadd.f32 1e-15, %v6063_v23  ;;  %v6072_v50 = vmul.f32 %v9183_v13, %v10939_v49  ;;  %v11003_v6 = vadd.f32 1e-15, %v6070_v60 }
 0xae0   :  { %6250 = vxpose.xlu0.b32.start [1/2] (short) (narrow) %v10986_v8, 8  ;;  %6283 = vxpose.xlu1.b32.end [2/2] (short) (narrow) %v10988_v18, 8  ;;  %v6074_v63 = vsel %vm6073_vm11, %v10939_v49, %v6072_v50  ;;  %vm7674_vm11 = vcmask 1042434  }
 0xae1   :  { %v6077_v58 = vsel %vm6075_vm12, %v6076_v32, %v6074_v63  ;;  %vm7676_vm12 = vcmask 1043459  }
 0xae2   :  { %v11006_v45 = vadd.f32 1e-15, %v6077_v58 }
 0xae4   :  { %6251 = vxpose.xlu0.b32.end [2/2] (short) (narrow) %v10997_v7, 8 }
 0xae8   :  { %6314 = vxpose.xlu0.b32.start [1/2] (short) (narrow) %v11003_v6, 8 }
 0xaec   :  { %6315 = vxpose.xlu0.b32.end [2/2] (short) (narrow) %v11006_v45, 8 }
 0xb09   :  { %v5987_v26 = vpop.xlane.xlu1 %5986 }
 0xb0a   :  { %9184 = vrsqrt.f32 %v5987_v26  ;;  %v5984_v57 = vpop.xlane.xlu0 %5983  ;;  %vm6087_vm14 = vcmp.eq.f32.partialorder %v5987_v26, inf  ;;  %v6090_v58 = vand.u32 2147483648, %v5987_v26  ;;  %vm6089_vm1 = vcmp.eq.f32.partialorder %v5987_v26, 0.0 }
 0xb0b   :  { %9186 = vrsqrt.f32 %v5984_v57  ;;  %vm6080_vm13 = vcmp.eq.f32.partialorder %v5984_v57, inf  ;;  %v6083_v53 = vand.u32 2147483648, %v5984_v57  ;;  %vm6082_vm15 = vcmp.eq.f32.partialorder %v5984_v57, 0.0 }
 0xb0d   :  { %v5993_v33 = vpop.xlane.xlu1 %5992 }
 0xb0e   :  { %9188 = vrsqrt.f32 %v5993_v33  ;;  %v5990_v21 = vpop.xlane.xlu0 %5989  ;;  %vm6101_vm7 = vcmp.eq.f32.partialorder %v5993_v33, inf  ;;  %vm6103_vm9 = vcmp.eq.f32.partialorder %v5993_v33, 0.0 }
 0xb0f   :  { %9190 = vrsqrt.f32 %v5990_v21  ;;  %vm6094_vm5 = vcmp.eq.f32.partialorder %v5990_v21, inf  ;;  %v6097_v39 = vand.u32 2147483648, %v5990_v21  ;;  %vm6096_vm8 = vcmp.eq.f32.partialorder %v5990_v21, 0.0 }
 0xb10   :  { %9192 = vrcp.f32 %v10941_v54 }
 0xb11   :  { %9194 = vrcp.f32 %v10929_v48 }
 0xb12   :  { %9196 = vrcp.f32 %v10920_v40 }
 0xb13   :  { %9198 = vrcp.f32 %v10943_v27 }
 0xb14   :  { %v9185_v13 = vpop.eup %9184 }
 0xb15   :  { %v9187_v23 = vpop.eup %9186  ;;  %v6086_v49 = vmul.f32 %v9185_v13, %v5987_v26 }
 0xb16   :  { %v6079_v56 = vmul.f32 %v9187_v23, %v5984_v57 }
 0xb17   :  { %v6088_v60 = vsel %vm6087_vm14, %v5987_v26, %v6086_v49  ;;  %vm12427_vm14 = vcmask 1045509  }
 0xb18   :  { %v9189_v43 = vpop.eup %9188  ;;  %v6081_v50 = vsel %vm6080_vm13, %v5984_v57, %v6079_v56  ;;  %v6091_v42 = vsel %vm6089_vm1, %v6090_v58, %v6088_v60  ;;  %v6104_v57 = vand.u32 2147483648, %v5993_v33  ;;  %vm7678_vm13 = vcmask 1044484  }
 0xb19   :  { %v9191_v32 = vpop.eup %9190  ;;  %v6084_v63 = vsel %vm6082_vm15, %v6083_v53, %v6081_v50  ;;  %v6100_v22 = vmul.f32 %v9189_v43, %v5993_v33  ;;  %v11014_v53 = vadd.f32 1e-15, %v6091_v42  ;;  %vm12426_vm15 = vcmask 1046534  }
 0xb1a   :  { %v11009_v61 = vadd.f32 1e-15, %v6084_v63  ;;  %v6093_v5 = vmul.f32 %v9191_v32, %v5990_v21  ;;  %vm12425_vm1 = vcmask 1047559  }
 0xb1b   :  { %v6102_v23 = vsel %vm6101_vm7, %v5993_v33, %v6100_v22 }
 0xb1c   :  { %6346 = vxpose.xlu1.b32.start [1/2] (short) (narrow) %v11009_v61, 8  ;;  %v6095_v13 = vsel %vm6094_vm5, %v5990_v21, %v6093_v5  ;;  %v6105_v43 = vsel %vm6103_vm9, %v6104_v57, %v6102_v23  ;;  %v6412_v5 = vsub.s32 0, %v10633_v17 }
 0xb1d   :  { %v6098_v56 = vsel %vm6096_vm8, %v6097_v39, %v6095_v13  ;;  %v11018_v26 = vadd.f32 1e-15, %v6105_v43 }
 0xb1e   :  { %v11012_v49 = vadd.f32 1e-15, %v6098_v56 }
 0xb20   :  { %6378 = vxpose.xlu0.b32.start [1/2] (short) (narrow) %v11012_v49, 8  ;;  %6347 = vxpose.xlu1.b32.end [2/2] (short) (narrow) %v11014_v53, 8 }
 0xb24   :  { %6379 = vxpose.xlu0.b32.end [2/2] (short) (narrow) %v11018_v26, 8 }
 0xb50   :  { %v6170_v21 = vpop.trf.xlu0  ;;  %v6202_v22 = vpop.trf.xlu1 }
 0xb51   :  { %v6413_v39 = vrot.slane %v6170_v21, %v6412_v5  ;;  %v6417_v50 = vrot.slane %v6202_v22, %v6412_v5 }
 0xb53   :  { %6450 = vrot.lane.b32.xlu1 %v6413_v39, %s9437_s0  ;;  %6452 = vrot.lane.b32.xlu0 %v6417_v50, %s9437_s0  ;;  %v9193_v39 = vpop.eup %9192 }
 0xb54   :  { %v6125_v48 = vmul.f32 %v9193_v39, %v10748_v41 }
 0xb58   :  { %v6234_v42 = vpop.trf.xlu0 }
 0xb59   :  { %v6421_v33 = vrot.slane %v6234_v42, %v6412_v5 }
 0xb5b   :  { %6454 = vrot.lane.b32.xlu1 %v6421_v33, %s9437_s0 }
 0xb5c   :  { %v6298_v32 = vpop.trf.xlu1 }
 0xb5d   :  { %v6429_v58 = vrot.slane %v6298_v32, %v6412_v5 }
 0xb60   :  { %v6266_v60 = vpop.trf.xlu0 }
 0xb61   :  { %v6425_v63 = vrot.slane %v6266_v60, %v6412_v5 }
 0xb63   :  { %6456 = vrot.lane.b32.xlu1 %v6425_v63, %s9437_s0 }
 0xb67   :  { %6458 = vrot.lane.b32.xlu1 %v6429_v58, %s9437_s0 }
 0xb68   :  { %v6330_v17 = vpop.trf.xlu0 }
 0xb69   :  { %v6433_v13 = vrot.slane %v6330_v17, %v6412_v5 }
 0xb6b   :  { %6460 = vrot.lane.b32.xlu1 %v6433_v13, %s9437_s0 }
 0xb9c   :  { %v6362_v23 = vpop.trf.xlu1 }
 0xb9d   :  { %v6437_v56 = vrot.slane %v6362_v23, %v6412_v5 }
 0xb9f   :  { %6462 = vrot.lane.b32.xlu1 %v6437_v56, %s9437_s0 }
 0xba0   :  { %v6394_v57 = vpop.trf.xlu0 }
 0xba1   :  { %v6441_v43 = vrot.slane %v6394_v57, %v6412_v5  ;;  %v9195_v5 = vpop.eup %9194 }
 0xba2   :  { %v9197_v42 = vpop.eup %9196  ;;  %v6123_v40 = vmul.f32 %v9195_v5, %v10757_v36 }
 0xba3   :  { %6464 = vrot.lane.b32.xlu0 %v6441_v43, %s9437_s0  ;;  %v9199_v54 = vpop.eup %9198  ;;  %v6127_v36 = vmul.f32 %v9197_v42, %v10773_v20 }
 0xba4   :  { %v6129_v41 = vmul.f32 %v9199_v54, %v10764_v19 }
 0xbc5   :  { %v6451_v21 = vpop.permute.xlu1 %6450  ;;  %v6453_v22 = vpop.permute.xlu0 %6452 }
 0xbc6   :  { %9200 = vrcp.f32 %v6451_v21 }
 0xbc7   :  { %9202 = vrcp.f32 %v10959_v1 }
 0xbc8   :  { %9204 = vrcp.f32 %v6453_v22 }
 0xbc9   :  { %9206 = vrcp.f32 %v10973_v14 }
 0xbcd   :  { %v6455_v50 = vpop.permute.xlu1 %6454 }
 0xbce   :  { %9208 = vrcp.f32 %v6455_v50 }
 0xbcf   :  { %9210 = vrcp.f32 %v10986_v8 }
 0xbd0   :  { %v9201_v33 = vpop.eup %9200  ;;  %9212 = vrcp.f32 %v10997_v7 }
 0xbd1   :  { %v9203_v27 = vpop.eup %9202  ;;  %v6476_v1 = vmul.f32 %v9201_v33, %v6125_v48  ;;  %v6475_v60 = vmul.f32 %v9201_v33, %v6123_v40  ;;  %9214 = vrcp.f32 %v10966_v2 }
 0xbd2   :  { %v9205_v32 = vpop.eup %9204  ;;  %9216 = vrcp.f32 %v10988_v18  ;;  %v6131_v17 = vmul.f32 %v9203_v27, %v10785_v3 }
 0xbd3   :  { %v9207_v14 = vpop.eup %9206  ;;  %6502 = vrot.lane.b32.xlu0 %v6476_v1, %s9432_s1  ;;  %6500 = vrot.lane.b32.xlu1 %v6475_v60, %s9432_s1  ;;  %v6479_v63 = vmul.f32 %v9205_v32, %v6129_v41  ;;  %v6478_v7 = vmul.f32 %v9205_v32, %v6127_v36 }
 0xbd4   :  { %v6133_v58 = vmul.f32 %v9207_v14, %v10782_v28 }
 0xbd5   :  { %v6457_v8 = vpop.permute.xlu1 %6456 }
 0xbd6   :  { %9218 = vrcp.f32 %v6457_v8 }
 0xbd7   :  { %9220 = vrcp.f32 %v11003_v6  ;;  %6587 = vrot.lane.b32.xlu0 %v6479_v63, %s9432_s1  ;;  %6585 = vrot.lane.b32.xlu1 %v6478_v7, %s9432_s1 }
 0xbd8   :  { %v9209_v13 = vpop.eup %9208  ;;  %9222 = vrcp.f32 %v11006_v45 }
 0xbd9   :  { %v6459_v19 = vpop.permute.xlu1 %6458  ;;  %v6482_v20 = vmul.f32 %v9209_v13, %v6133_v58  ;;  %v6481_v2 = vmul.f32 %v9209_v13, %v6131_v17  ;;  %v9211_v18 = vpop.eup %9210  ;;  %v12544_v58 = vld [vmem:[#allocation9_spill] sm:$0xff]  ;;  %v12545_v17 = vld [vmem:[#allocation28_spill] sm:$0xff] }
 0xbda   :  { %9224 = vrcp.f32 %v6459_v19  ;;  %v9213_v23 = vpop.eup %9212  ;;  %v6135_v57 = vmul.f32 %v9211_v18, %v10804_v34  ;;  %v1053_v13 = vmul.f32 %v12545_v17, %v12544_v58  ;;  %v12547_v19 = vld [vmem:[#allocation29_spill] sm:$0xff] }
 0xbdb   :  { %6672 = vrot.lane.b32.xlu0 %v6482_v20, %s9432_s1  ;;  %6670 = vrot.lane.b32.xlu1 %v6481_v2, %s9432_s1  ;;  %v9215_v3 = vpop.eup %9214  ;;  %v6137_v56 = vmul.f32 %v9213_v23, %v10801_v16  ;;  %v12548_v20 = vld [vmem:[#allocation11_spill] sm:$0xff]  ;;  %v12549_v2 = vld [vmem:[#allocation30_spill] sm:$0xff] }
 0xbdc   :  { %v9217_v6 = vpop.eup %9216  ;;  %v6139_v50 = vmul.f32 %v9215_v3, %v10823_v51  ;;  %v1055_v18 = vmul.f32 %v12549_v2, %v12548_v20  ;;  %v12550_v23 = vld [vmem:[#allocation14_spill] sm:$0xff] }
 0xbdd   :  { %v6461_v28 = vpop.permute.xlu1 %6460  ;;  %v6141_v5 = vmul.f32 %v9217_v6, %v10820_v9  ;;  %v12552_v6 = vld [vmem:[#allocation12_spill] sm:$0xff] }
 0xbde   :  { %9226 = vrcp.f32 %v6461_v28  ;;  %v12551_v28 = vld [vmem:[#allocation31_spill] sm:$0xff] }
 0xbdf   :  { %9228 = vrcp.f32 %v11014_v53  ;;  %v1056_v3 = vmul.f32 %v12551_v28, %v12550_v23 }
 0xbe0   :  { %v9219_v43 = vpop.eup %9218  ;;  %9230 = vrcp.f32 %v11009_v61 }
 0xbe1   :  { %v6485_v45 = vmul.f32 %v9219_v43, %v6137_v56  ;;  %v6484_v21 = vmul.f32 %v9219_v43, %v6135_v57  ;;  %v9221_v22 = vpop.eup %9220  ;;  %9232 = vrcp.f32 %v11018_v26  ;;  %v12553_v56 = vld [vmem:[#allocation32_spill] sm:$0xff]  ;;  %v12554_v43 = vld [vmem:[#allocation17_spill] sm:$0xff] }
 0xbe2   :  { %v9223_v39 = vpop.eup %9222  ;;  %v6143_v34 = vmul.f32 %v9221_v22, %v10841_v62  ;;  %9234 = vrcp.f32 %v11012_v49  ;;  %v1057_v57 = vmul.f32 %v12553_v56, %v12552_v6  ;;  %v12556_v22 = vld [vmem:[#allocation18_spill] sm:$0xff] }
 0xbe3   :  { %6757 = vrot.lane.b32.xlu0 %v6485_v45, %s9432_s1  ;;  %6755 = vrot.lane.b32.xlu1 %v6484_v21, %s9432_s1  ;;  %v6145_v16 = vmul.f32 %v9223_v39, %v10838_v31  ;;  %v12555_v45 = vld [vmem:[#allocation33_spill] sm:$0xff]  ;;  %v12557_v39 = vld [vmem:[#allocation34_spill] sm:$0xff] }
 0xbe4   :  { %v9225_v42 = vpop.eup %9224  ;;  %v1058_v21 = vmul.f32 %v12555_v45, %v12554_v43 }
 0xbe5   :  { %v6488_v54 = vmul.f32 %v9225_v42, %v6141_v5  ;;  %v6487_v48 = vmul.f32 %v9225_v42, %v6139_v50  ;;  %v1059_v5 = vmul.f32 %v12557_v39, %v12556_v22  ;;  %v12558_v50 = vld [vmem:[#allocation15_spill] sm:$0xff] }
 0xbe6   :  { %v12559_v42 = vld [vmem:[#allocation35_spill] sm:$0xff] }
 0xbe7   :  { %6842 = vrot.lane.b32.xlu0 %v6488_v54, %s9432_s1  ;;  %6840 = vrot.lane.b32.xlu1 %v6487_v48, %s9432_s1  ;;  %v1060_v54 = vmul.f32 %v12559_v42, %v12558_v50  ;;  %v12560_v48 = vld [vmem:[#allocation21_spill] sm:$0xff] }
 0xbe8   :  { %v9227_v40 = vpop.eup %9226 }
 0xbe9   :  { %v6491_v33 = vmul.f32 %v9227_v40, %v6145_v16  ;;  %v6490_v27 = vmul.f32 %v9227_v40, %v6143_v34  ;;  %v9229_v31 = vpop.eup %9228  ;;  %v12561_v16 = vld [vmem:[#allocation36_spill] sm:$0xff]  ;;  %v12562_v40 = vld [vmem:[#allocation23_spill] sm:$0xff] }
 0xbea   :  { %v9231_v62 = vpop.eup %9230  ;;  %v6149_v32 = vmul.f32 %v9229_v31, %v10864_v47  ;;  %v12542_v47 = vld [vmem:[#allocation10_spill] sm:$0xff]  ;;  %v1061_v34 = vmul.f32 %v12561_v16, %v12560_v48 }
 0xbeb   :  { %6927 = vrot.lane.b32.xlu0 %v6491_v33, %s9432_s1  ;;  %6925 = vrot.lane.b32.xlu1 %v6490_v27, %s9432_s1  ;;  %v9233_v1 = vpop.eup %9232  ;;  %v6147_v14 = vmul.f32 %v9231_v62, %v10867_v10  ;;  %v12543_v10 = vld [vmem:[#allocation27_spill] sm:$0xff]  ;;  %v12563_v33 = vld [vmem:[#allocation37_spill] sm:$0xff]  ;;  %v9438_v62 = vmov 34  }
 0xbec   :  { %v9235_v60 = vpop.eup %9234  ;;  %v6153_v61 = vmul.f32 %v9233_v1, %v10878_v46  ;;  %v1052_v7 = vmul.f32 %v12543_v10, %v12542_v47  ;;  %v12546_v46 = vld [vmem:[#allocation13_spill] sm:$0xff]  ;;  %v1062_v27 = vmul.f32 %v12563_v33, %v12562_v40  ;;  %9023 = vset.pattern.permute.xlu1 %v9438_v62  ;;  %9022 = vset.pattern.permute.xlu0 %v9438_v62  ;;  %v12566_v1 = vld [vmem:[#allocation16_spill] sm:$0xff] }
 0xbed   :  { %v6151_v49 = vmul.f32 %v9235_v60, %v10881_v11  ;;  %v1054_v11 = vmul.f32 %v12547_v19, %v12546_v46  ;;  %v12567_v60 = vld [vmem:[#allocation39_spill] sm:$0xff]  ;;  %v49_v62 = vld [vmem:[#allocation2 + $0xc8] sm:$0xff] }
 0xc11   :  { %v6463_v9 = vpop.permute.xlu1 %6462 }
 0xc12   :  { %9236 = vrcp.f32 %v6463_v9  ;;  %v12564_v9 = vld [vmem:[#allocation20_spill] sm:$0xff] }
 0xc15   :  { %v6465_v51 = vpop.permute.xlu0 %6464 }
 0xc16   :  { %9238 = vrcp.f32 %v6465_v51  ;;  %v12565_v51 = vld [vmem:[#allocation38_spill] sm:$0xff] }
 0xc17   :  { %v1063_v31 = vmul.f32 %v12565_v51, %v12564_v9 }
 0xc1c   :  { %v9237_v41 = vpop.eup %9236 }
 0xc1d   :  { %v6494_v53 = vmul.f32 %v9237_v41, %v6149_v32  ;;  %v6493_v36 = vmul.f32 %v9237_v41, %v6147_v14  ;;  %v1064_v32 = vmul.f32 %v12567_v60, %v12566_v1  ;;  %v12568_v14 = vld [vmem:[#allocation25_spill] sm:$0xff]  ;;  %v12569_v41 = vld [vmem:[#allocation40_spill] sm:$0xff] }
 0xc1f   :  { %7012 = vrot.lane.b32.xlu0 %v6494_v53, %s9432_s1  ;;  %7010 = vrot.lane.b32.xlu1 %v6493_v36, %s9432_s1  ;;  %v1065_v53 = vmul.f32 %v12569_v41, %v12568_v14  ;;  %v12570_v36 = vld [vmem:[#allocation26_spill] sm:$0xff] }
 0xc20   :  { %v9239_v26 = vpop.eup %9238 }
 0xc21   :  { %v6497_v8 = vmul.f32 %v9239_v26, %v6153_v61  ;;  %v6496_v63 = vmul.f32 %v9239_v26, %v6151_v49  ;;  %v12571_v61 = vld [vmem:[#allocation41_spill] sm:$0xff]  ;;  %v12572_v26 = vld [vmem:[#allocation24_spill] sm:$0xff] }
 0xc22   :  { %v1066_v49 = vmul.f32 %v12571_v61, %v12570_v36 }
 0xc23   :  { %7097 = vrot.lane.b32.xlu0 %v6497_v8, %s9432_s1  ;;  %7095 = vrot.lane.b32.xlu1 %v6496_v63, %s9432_s1  ;;  %v12573_v8 = vld [vmem:[#allocation42_spill] sm:$0xff] }
 0xc24   :  { %v1067_v63 = vmul.f32 %v12573_v8, %v12572_v26 }
 0xc27   :  { %1086 = vrot.lane.b32.xlu0 %v1053_v13, %s9432_s1  ;;  %1084 = vrot.lane.b32.xlu1 %v1052_v7, %s9432_s1 }
 0xc2b   :  { %1090 = vrot.lane.b32.xlu0 %v1055_v18, %s9432_s1  ;;  %1088 = vrot.lane.b32.xlu1 %v1054_v11, %s9432_s1 }
 0xc2f   :  { %1094 = vrot.lane.b32.xlu0 %v1057_v57, %s9432_s1  ;;  %1092 = vrot.lane.b32.xlu1 %v1056_v3, %s9432_s1 }
 0xc33   :  { %1098 = vrot.lane.b32.xlu0 %v1059_v5, %s9432_s1  ;;  %1096 = vrot.lane.b32.xlu1 %v1058_v21, %s9432_s1  ;;  %v46_v5 = vld [vmem:[#allocation2 + $0x20] sm:$0xff] }
 0xc37   :  { %1102 = vrot.lane.b32.xlu0 %v1061_v34, %s9432_s1  ;;  %1100 = vrot.lane.b32.xlu1 %v1060_v54, %s9432_s1  ;;  %v47_v54 = vld [vmem:[#allocation2 + $0x58] sm:$0xff] }
 0xc3b   :  { %1106 = vrot.lane.b32.xlu0 %v1063_v31, %s9432_s1  ;;  %1104 = vrot.lane.b32.xlu1 %v1062_v27, %s9432_s1  ;;  %v8862_v27 = vpack.c.bf16 %v47_v54, %v46_v5 }
 0xc3f   :  { %1110 = vrot.lane.b32.xlu0 %v1065_v53, %s9432_s1  ;;  %1108 = vrot.lane.b32.xlu1 %v1064_v32, %s9432_s1 }
 0xc43   :  { %1114 = vrot.lane.b32.xlu0 %v1067_v63, %s9432_s1  ;;  %1112 = vrot.lane.b32.xlu1 %v1066_v49, %s9432_s1  ;;  %v43_v63 = vld [vmem:[#allocation2 + $0x50] sm:$0xff] }
 0xc45   :  { %v6503_v7 = vpop.permute.xlu0 %6502  ;;  %v6501_v13 = vpop.permute.xlu1 %6500 }
 0xc46   :  { %8620 = vmatprep.mubr.msk.f32.mxu1 %vm664_vm6, %v6501_v13 }
 0xc47   :  { %8621 = vmatmul.mubr.msk.f32.vlgmr.msra.gmra.mrb[72].mxu1 %vm664_vm6, %v6503_v7 }
 0xc48   :  { %8841 = vmatpush3.bf16.msra.mxu1 %v10789_v0 }
 0xc49   :  { %8847 = vmatprep.subr.bf16.mxu1 %v10827_v44  ;;  %v6588_v11 = vpop.permute.xlu0 %6587  ;;  %v6586_v18 = vpop.permute.xlu1 %6585 }
 0xc4a   :  { %8627 = vmatprep.mubr.msk.f32.mxu0 %vm664_vm6, %v6586_v18  ;;  %v45_v18 = vld [vmem:[#allocation2 + $0xc0] sm:$0xff] }
 0xc4b   :  { %8628 = vmatmul.mubr.msk.f32.vlgmr.msra.gmra.mrb[56].mxu0 %vm664_vm6, %v6588_v11  ;;  %v44_v11 = vld [vmem:[#allocation2 + $0x88] sm:$0xff] }
 0xc4c   :  { %8845 = vmatpush3.bf16.msra.mxu0 %v10808_v30  ;;  %v8874_v5 = vpack.c.bf16 %v45_v18, %v44_v11 }
 0xc4d   :  { %8851 = vmatprep.subr.bf16.mxu0 %v10845_v25  ;;  %v6673_v3 = vpop.permute.xlu0 %6672  ;;  %v6671_v57 = vpop.permute.xlu1 %6670 }
 0xc4e   :  { %8634 = vmatprep.mubr.msk.f32.mxu1 %vm664_vm6, %v6671_v57 }
 0xc4f   :  { %8635 = vmatmul.mubr.msk.f32.vlgmr.msra.gmra.mrb[74].mxu1 %vm664_vm6, %v6673_v3 }
 0xc50   :  { %8849 = vmatpush3.bf16.msra.mxu1 %v10827_v44 }
 0xc51   :  { %8855 = vmatprep.subr.bf16.mxu1 %v10871_v35 }
 0xc55   :  { %v6758_v0 = vpop.permute.xlu0 %6757  ;;  %v6756_v21 = vpop.permute.xlu1 %6755 }
 0xc56   :  { %8641 = vmatprep.mubr.msk.f32.mxu0 %vm664_vm6, %v6756_v21 }
 0xc57   :  { %8642 = vmatmul.mubr.msk.f32.vlgmr.msra.gmra.mrb[58].mxu0 %vm664_vm6, %v6758_v0 }
 0xc58   :  { %8853 = vmatpush3.bf16.msra.mxu0 %v10845_v25  ;;  %v48_v25 = vld [vmem:[#allocation2 + $0x90] sm:$0xff] }
 0xc59   :  { %8859 = vmatprep.subr.bf16.mxu0 %v10857_v12  ;;  %v6843_v30 = vpop.permute.xlu0 %6842  ;;  %v6841_v34 = vpop.permute.xlu1 %6840  ;;  %v8866_v49 = vpack.c.bf16 %v49_v62, %v48_v25 }
 0xc5a   :  { %8648 = vmatprep.mubr.msk.f32.mxu1 %vm664_vm6, %v6841_v34 }
 0xc5b   :  { %8649 = vmatmul.mubr.msk.f32.vlgmr.msra.gmra.mrb[76].mxu1 %vm664_vm6, %v6843_v30 }
 0xc5c   :  { %8857 = vmatpush3.bf16.msra.mxu1 %v10871_v35  ;;  %v42_v35 = vld [vmem:[#allocation2 + $0x18] sm:$0xff] }
 0xc5d   :  { %v6928_v44 = vpop.permute.xlu0 %6927  ;;  %v6926_v31 = vpop.permute.xlu1 %6925  ;;  %8890 = vmatprep.subr.bf16.mxu1 %v8862_v27 }
 0xc5e   :  { %8655 = vmatprep.mubr.msk.f32.mxu0 %vm664_vm6, %v6926_v31 }
 0xc5f   :  { %8656 = vmatmul.mubr.msk.f32.vlgmr.msra.gmra.mrb[60].mxu0 %vm664_vm6, %v6928_v44 }
 0xc60   :  { %8861 = vmatpush3.bf16.msra.mxu0 %v10857_v12  ;;  %v8870_v12 = vpack.c.bf16 %v43_v63, %v42_v35 }
 0xc61   :  { %8863 = vmatprep.subr.bf16.mxu0 %v8862_v27 }
 0xc91   :  { %v7013_v32 = vpop.permute.xlu0 %7012  ;;  %v7011_v53 = vpop.permute.xlu1 %7010 }
 0xc92   :  { %8662 = vmatprep.mubr.msk.f32.mxu1 %vm664_vm6, %v7011_v53 }
 0xc93   :  { %8663 = vmatmul.mubr.msk.f32.vlgmr.msra.gmra.mrb[78].mxu1 %vm664_vm6, %v7013_v32  ;;  %v12574_v32 = vld [vmem:[#allocation47_spill] sm:$0xff] }
 0xc94   :  { %8892 = vmatpush3.bf16.msra.mxu1 %v8862_v27  ;;  %8698 = vmatprep.mubr.msk.f32.mxu1 %vm617_vm4, %v10861_v55 }
 0xc95   :  { %v7098_v7 = vpop.permute.xlu0 %7097  ;;  %v7096_v13 = vpop.permute.xlu1 %7095  ;;  %8891 = vmatprep.subr.bf16.mxu1 %v8866_v49 }
 0xc96   :  { %8669 = vmatprep.mubr.msk.f32.mxu0 %vm664_vm6, %v7096_v13  ;;  %v12576_v13 = vld [vmem:[#allocation101_spill] sm:$0xff] }
 0xc97   :  { %8670 = vmatmul.mubr.msk.f32.vlgmr.msra.gmra.mrb[62].mxu0 %vm664_vm6, %v7098_v7  ;;  %v12575_v7 = vld [vmem:[#allocation48_spill] sm:$0xff] }
 0xc98   :  { %8865 = vmatpush3.bf16.msra.mxu0 %v8862_v27  ;;  %8893 = vmatpush3.bf16.msra.mxu1 %v8866_v49 }
 0xc99   :  { %8680 = vmatprep.mubr.msk.f32.mxu0 %vm617_vm4, %v10750_v15  ;;  %v1087_v3 = vpop.permute.xlu0 %1086  ;;  %v1085_v57 = vpop.permute.xlu1 %1084  ;;  %8867 = vmatprep.subr.bf16.mxu0 %v8866_v49 }
 0xc9a   :  { %v1135_v0 = vsel %vm456_vm2, %v1087_v3, 0.0  ;;  %v1132_v21 = vsel %vm456_vm2, %v1085_v57, 0.0  ;;  %8871 = vmatprep.subr.bf16.mxu1 %v8870_v12  ;;  %v12577_v57 = vld [vmem:[#allocation100_spill] sm:$0xff] }
 0xc9b   :  { %8699 = vmatmul.mubr.msk.f32.vlgmr.msra.gmra.mrb[80].mxu1 %vm617_vm4, %v10859_v38  ;;  %1136 = vadd.xlane.f32.xlu0 %v1135_v0  ;;  %v12578_v0 = vld [vmem:[#allocation103_spill] sm:$0xff] }
 0xc9c   :  { %8869 = vmatpush3.bf16.msra.mxu0 %v8866_v49  ;;  %8701 = vmatprep.mubr.msk.f32.mxu1 %vm617_vm4, %v10853_v52  ;;  %v12605_v52 = vld [vmem:[#allocation46_spill] sm:$0xff] }
 0xc9d   :  { %1133 = vadd.xlane.f32.xlu1 %v1132_v21  ;;  %v1091_v54 = vpop.permute.xlu0 %1090  ;;  %v1089_v30 = vpop.permute.xlu1 %1088  ;;  %8873 = vmatpush3.bf16.msra.mxu1 %v8870_v12 }
 0xc9e   :  { %v1141_v34 = vsel %vm456_vm2, %v1091_v54, 0.0  ;;  %v1138_v27 = vsel %vm456_vm2, %v1089_v30, 0.0  ;;  %8875 = vmatprep.subr.bf16.mxu1 %v8874_v5  ;;  %8878 = vmatprep.subr.bf16.mxu0 %v12452_v24 }
 0xc9f   :  { %8681 = vmatmul.mubr.msk.f32.vlgmr.msra.gmra.mrb[64].mxu0 %vm617_vm4, %v10745_v4  ;;  %8702 = vmatmul.mubr.msk.f32.gmra.mrb[82].mxu1 %vm617_vm4, %v10851_v37  ;;  %v2466_v37 = vmul.f32 %v12605_v52, %v12605_v52 }
 0xca0   :  { %8683 = vmatprep.mubr.msk.f32.mxu0 %vm617_vm4, %v10766_v29  ;;  %1139 = vadd.xlane.f32.xlu0 %v1138_v27  ;;  %v12580_v27 = vld [vmem:[#allocation105_spill] sm:$0xff] }
 0xca1   :  { %1142 = vadd.xlane.f32.xlu1 %v1141_v34  ;;  %v1095_v44 = vpop.permute.xlu0 %1094  ;;  %v1093_v31 = vpop.permute.xlu1 %1092  ;;  %8877 = vmatpush3.bf16.msra.mxu1 %v8874_v5  ;;  %v12579_v34 = vld [vmem:[#allocation102_spill] sm:$0xff] }
 0xca2   :  { %v1147_v25 = vsel %vm456_vm2, %v1095_v44, 0.0  ;;  %v1144_v62 = vsel %vm456_vm2, %v1093_v31, 0.0 }
 0xca3   :  { %8684 = vmatmul.mubr.msk.f32.gmra.mrb[66].mxu0 %vm617_vm4, %v10761_v59 }
 0xca4   :  { %8686 = vmatprep.mubr.msk.f32.mxu0 %vm617_vm4, %v12574_v32  ;;  %1145 = vadd.xlane.f32.xlu0 %v1144_v62 }
 0xca5   :  { %1148 = vadd.xlane.f32.xlu1 %v1147_v25  ;;  %v1099_v53 = vpop.permute.xlu0 %1098  ;;  %v1097_v49 = vpop.permute.xlu1 %1096 }
 0xca6   :  { %v1153_v35 = vsel %vm456_vm2, %v1099_v53, 0.0  ;;  %v1150_v63 = vsel %vm456_vm2, %v1097_v49, 0.0  ;;  %v12581_v53 = vld [vmem:[#allocation104_spill] sm:$0xff]  ;;  %v12582_v49 = vmov 0.0  }
 0xca7   :  { %8687 = vmatmul.mubr.msk.f32.gmra.mrb[68].mxu0 %vm617_vm4, %v12575_v7 }
 0xca8   :  { %8689 = vmatprep.mubr.msk.f32.mxu0 %vm617_vm4, %v12576_v13  ;;  %1151 = vadd.xlane.f32.xlu0 %v1150_v63 }
 0xca9   :  { %1154 = vadd.xlane.f32.xlu1 %v1153_v35  ;;  %v1103_v12 = vpop.permute.xlu0 %1102  ;;  %v1101_v11 = vpop.permute.xlu1 %1100 }
 0xcaa   :  { %v1159_v18 = vsel %vm456_vm2, %v1103_v12, 0.0  ;;  %v1156_v3 = vsel %vm456_vm2, %v1101_v11, 0.0 }
 0xcab   :  { %8690 = vmatmul.mubr.msk.f32.gmra.mrb[70].mxu0 %vm617_vm4, %v12577_v57 }
 0xcac   :  { %8692 = vmatprep.mubr.msk.f32.mxu0 %vm617_vm4, %v12578_v0  ;;  %1157 = vadd.xlane.f32.xlu0 %v1156_v3  ;;  %v2487_v0 = vsel %vm2468_vm10, %v2466_v37, 0.0 }
 0xcad   :  { %1160 = vadd.xlane.f32.xlu1 %v1159_v18  ;;  %v1107_v21 = vpop.permute.xlu0 %1106  ;;  %v1105_v5 = vpop.permute.xlu1 %1104 }
 0xcae   :  { %v1165_v54 = vsel %vm456_vm2, %v1107_v21, 0.0  ;;  %v1162_v30 = vsel %vm456_vm2, %v1105_v5, 0.0 }
 0xcaf   :  { %8693 = vmatmul.mubr.msk.f32.gmra.mrb[72].mxu0 %vm617_vm4, %v12579_v34 }
 0xcb0   :  { %8695 = vmatprep.mubr.msk.f32.mxu0 %vm617_vm4, %v12580_v27  ;;  %1163 = vadd.xlane.f32.xlu0 %v1162_v30 }
 0xcb1   :  { %1166 = vadd.xlane.f32.xlu1 %v1165_v54  ;;  %v1111_v44 = vpop.permute.xlu0 %1110  ;;  %v1109_v31 = vpop.permute.xlu1 %1108 }
 0xcb2   :  { %v1171_v25 = vsel %vm456_vm2, %v1111_v44, 0.0  ;;  %v1168_v62 = vsel %vm456_vm2, %v1109_v31, 0.0 }
 0xcb3   :  { %8696 = vmatmul.mubr.msk.f32.gmra.mrb[74].mxu0 %vm617_vm4, %v12581_v53 }
 0xcb4   :  { %1169 = vadd.xlane.f32.xlu0 %v1168_v62  ;;  %8744 = vmatprep.mubr.msk.f32.mxu0 %vm9434_vm3, %v12582_v49 }
 0xcb5   :  { %1172 = vadd.xlane.f32.xlu1 %v1171_v25  ;;  %v1115_v35 = vpop.permute.xlu0 %1114  ;;  %v1113_v63 = vpop.permute.xlu1 %1112 }
 0xcb6   :  { %v1177_v12 = vsel %vm456_vm2, %v1115_v35, 0.0  ;;  %v1174_v11 = vsel %vm456_vm2, %v1113_v63, 0.0 }
 0xcb8   :  { %1175 = vadd.xlane.f32.xlu0 %v1174_v11 }
 0xcb9   :  { %1178 = vadd.xlane.f32.xlu1 %v1177_v12 }
 0xcca   :  { %1243 = vperm.xlu1 %9023, %v12545_v17  }
 0xcce   :  { %1248 = vperm.xlu1 %9023, %v12547_v19   ;;  %1238 = vperm.xlu0 %9022, %v12543_v10  }
 0xcd2   :  { %1253 = vperm.xlu1 %9023, %v12549_v2   ;;  %1283 = vperm.xlu0 %9022, %v12561_v16  }
 0xcd6   :  { %1258 = vperm.xlu1 %9023, %v12551_v28   ;;  %1293 = vperm.xlu0 %9022, %v12565_v51  }
 0xcda   :  { %1263 = vperm.xlu1 %9023, %v12553_v56   ;;  %1303 = vperm.xlu0 %9022, %v12569_v41  }
 0xcde   :  { %1268 = vperm.xlu1 %9023, %v12555_v45   ;;  %1313 = vperm.xlu0 %9022, %v12573_v8  }
 0xce2   :  { %1273 = vperm.xlu1 %9023, %v12557_v39  }
 0xce6   :  { %1278 = vperm.xlu1 %9023, %v12559_v42  }
 0xcea   :  { %1288 = vperm.xlu1 %9023, %v12563_v33  }
 0xcee   :  { %1298 = vperm.xlu1 %9023, %v12567_v60  }
 0xcf2   :  { %1308 = vperm.xlu1 %9023, %v12571_v61  }
 0xd1a   :  { %v8622_v10 = vpop.f32.mrb[72].mxu1 }
 0xd1b   :  { %v6574_v17 = vpop.f32.mrb[73].mxu1 }
 0xd1c   :  { %8712 = vmatprep.mubr.msk.f32.mxu1 %vm617_vm4, %v6574_v17 }
 0xd1d   :  { %8713 = vmatmul.mubr.msk.f32.vlgmr.msra.gmra.mrb[84].mxu1 %vm617_vm4, %v8622_v10 }
 0xd1e   :  { %v8629_v19 = vpop.f32.mrb[56].mxu0 }
 0xd1f   :  { %v6659_v2 = vpop.f32.mrb[57].mxu0 }
 0xd20   :  { %8715 = vmatprep.mubr.msk.f32.mxu1 %vm617_vm4, %v6659_v2 }
 0xd21   :  { %8716 = vmatmul.mubr.msk.f32.gmra.mrb[86].mxu1 %vm617_vm4, %v8629_v19 }
 0xd22   :  { %v8636_v28 = vpop.f32.mrb[74].mxu1 }
 0xd23   :  { %v6744_v56 = vpop.f32.mrb[75].mxu1 }
 0xd24   :  { %8718 = vmatprep.mubr.msk.f32.mxu1 %vm617_vm4, %v6744_v56 }
 0xd25   :  { %8719 = vmatmul.mubr.msk.f32.gmra.mrb[88].mxu1 %vm617_vm4, %v8636_v28 }
 0xd28   :  { %v11225_v45 = vpop.xlane.xlu0 %1136 }
 0xd29   :  { %12583 = vst [vmem:[#allocation10_spill] sm:$0xff] %v11225_v45 }
 0xd2a   :  { %v11227_v39 = vpop.xlane.xlu1 %1133  ;;  %v8643_v42 = vpop.f32.mrb[58].mxu0 }
 0xd2b   :  { %12584 = vst [vmem:[#allocation27_spill] sm:$0xff] %v11227_v39  ;;  %v6829_v16 = vpop.f32.mrb[59].mxu0 }
 0xd2c   :  { %8721 = vmatprep.mubr.msk.f32.mxu1 %vm617_vm4, %v6829_v16 }
 0xd2d   :  { %v11230_v33 = vpop.xlane.xlu0 %1139  ;;  %8722 = vmatmul.mubr.msk.f32.gmra.mrb[90].mxu1 %vm617_vm4, %v8643_v42 }
 0xd2e   :  { %12585 = vst [vmem:[#allocation9_spill] sm:$0xff] %v11230_v33  ;;  %v11233_v51 = vpop.xlane.xlu1 %1142  ;;  %v8650_v60 = vpop.f32.mrb[76].mxu1 }
 0xd2f   :  { %12586 = vst [vmem:[#allocation28_spill] sm:$0xff] %v11233_v51  ;;  %v6914_v41 = vpop.f32.mrb[77].mxu1  ;;  %v12603_v51 = vld [vmem:[#allocation45_spill] sm:$0xff] }
 0xd30   :  { %8724 = vmatprep.mubr.msk.f32.mxu1 %vm617_vm4, %v6914_v41 }
 0xd31   :  { %v11236_v61 = vpop.xlane.xlu0 %1145  ;;  %8725 = vmatmul.mubr.msk.f32.gmra.mrb[92].mxu1 %vm617_vm4, %v8650_v60 }
 0xd32   :  { %12587 = vst [vmem:[#allocation13_spill] sm:$0xff] %v11236_v61  ;;  %v11239_v8 = vpop.xlane.xlu1 %1148  ;;  %v8657_v18 = vpop.f32.mrb[60].mxu0 }
 0xd33   :  { %12588 = vst [vmem:[#allocation29_spill] sm:$0xff] %v11239_v8  ;;  %v6999_v3 = vpop.f32.mrb[61].mxu0 }
 0xd34   :  { %8727 = vmatprep.mubr.msk.f32.mxu1 %vm617_vm4, %v6999_v3 }
 0xd35   :  { %v11242_v21 = vpop.xlane.xlu0 %1151  ;;  %8728 = vmatmul.mubr.msk.f32.gmra.mrb[94].mxu1 %vm617_vm4, %v8657_v18 }
 0xd36   :  { %12589 = vst [vmem:[#allocation11_spill] sm:$0xff] %v11242_v21  ;;  %v11245_v5 = vpop.xlane.xlu1 %1154 }
 0xd37   :  { %12590 = vst [vmem:[#allocation30_spill] sm:$0xff] %v11245_v5  ;;  %v51_v5 = vld [vmem:[#allocation2 + $0x60] sm:$0xff] }
 0xd39   :  { %v11247_v54 = vpop.xlane.xlu0 %1157 }
 0xd3a   :  { %12591 = vst [vmem:[#allocation14_spill] sm:$0xff] %v11247_v54  ;;  %v11249_v30 = vpop.xlane.xlu1 %1160  ;;  %v50_v54 = vld [vmem:[#allocation2 + $0x28] sm:$0xff] }
 0xd3b   :  { %12592 = vst [vmem:[#allocation31_spill] sm:$0xff] %v11249_v30  ;;  %v8879_v8 = vpack.c.bf16 %v51_v5, %v50_v54 }
 0xd3d   :  { %v11251_v44 = vpop.xlane.xlu0 %1163  ;;  %8880 = vmatpush3.bf16.msra.mxu0 %v8879_v8 }
 0xd3e   :  { %12593 = vst [vmem:[#allocation12_spill] sm:$0xff] %v11251_v44  ;;  %v11253_v31 = vpop.xlane.xlu1 %1166  ;;  %8881 = vmatprep.subr.bf16.mxu0 %v12452_v24 }
 0xd3f   :  { %12594 = vst [vmem:[#allocation32_spill] sm:$0xff] %v11253_v31 }
 0xd41   :  { %v11257_v62 = vpop.xlane.xlu0 %1169 }
 0xd42   :  { %v11255_v25 = vpop.xlane.xlu1 %1172  ;;  %12596 = vst [vmem:[#allocation33_spill] sm:$0xff] %v11257_v62 }
 0xd43   :  { %12595 = vst [vmem:[#allocation17_spill] sm:$0xff] %v11255_v25 }
 0xd45   :  { %v11261_v63 = vpop.xlane.xlu0 %1175 }
 0xd46   :  { %v11259_v35 = vpop.xlane.xlu1 %1178  ;;  %12598 = vst [vmem:[#allocation34_spill] sm:$0xff] %v11261_v63 }
 0xd47   :  { %12597 = vst [vmem:[#allocation18_spill] sm:$0xff] %v11259_v35 }
 0xd4a   :  { %v11263_v12 = vpop.permute.xlu1 %1243 }
 0xd4b   :  { %v1317_v11 = vmul.f32 %v11263_v12, %v12544_v58 }
 0xd4d   :  { %v1333_v10 = vmul.f32 %v1317_v11, %v12544_v58  ;;  %v11268_v17 = vpop.permute.xlu0 %1238 }
 0xd4e   :  { %v1316_v19 = vmul.f32 %v11268_v17, %v12542_v47  ;;  %v11272_v2 = vpop.permute.xlu1 %1248 }
 0xd4f   :  { %1366 = vrot.lane.b32.xlu0 %v1333_v10, %s9432_s1  ;;  %v1318_v56 = vmul.f32 %v11272_v2, %v12546_v46 }
 0xd50   :  { %v1332_v28 = vmul.f32 %v1316_v19, %v12542_v47 }
 0xd51   :  { %v1334_v16 = vmul.f32 %v1318_v56, %v12546_v46  ;;  %v11297_v46 = vpop.permute.xlu0 %1283 }
 0xd52   :  { %v11278_v42 = vpop.permute.xlu1 %1253  ;;  %1364 = vrot.lane.b32.xlu1 %v1332_v28, %s9432_s1 }
 0xd53   :  { %v1319_v58 = vmul.f32 %v11278_v42, %v12548_v20 }
 0xd55   :  { %v1335_v60 = vmul.f32 %v1319_v58, %v12548_v20  ;;  %v11306_v28 = vpop.permute.xlu0 %1293 }
 0xd56   :  { %v11285_v41 = vpop.permute.xlu1 %1258  ;;  %1368 = vrot.lane.b32.xlu1 %v1334_v16, %s9432_s1 }
 0xd57   :  { %v1320_v47 = vmul.f32 %v11285_v41, %v12550_v23  ;;  %1370 = vrot.lane.b32.xlu0 %v1335_v60, %s9432_s1 }
 0xd59   :  { %v1336_v18 = vmul.f32 %v1320_v47, %v12550_v23 }
 0xd5a   :  { %v11292_v3 = vpop.permute.xlu1 %1263 }
 0xd5b   :  { %v1321_v11 = vmul.f32 %v11292_v3, %v12552_v6  ;;  %1372 = vrot.lane.b32.xlu1 %v1336_v18, %s9432_s1 }
 0xd5d   :  { %v1337_v20 = vmul.f32 %v1321_v11, %v12552_v6  ;;  %v1325_v6 = vmul.f32 %v11297_v46, %v12560_v48  ;;  %v11321_v11 = vpop.permute.xlu0 %1303 }
 0xd5e   :  { %v11300_v10 = vpop.permute.xlu1 %1268 }
 0xd5f   :  { %v1322_v19 = vmul.f32 %v11300_v10, %v12554_v43  ;;  %1374 = vrot.lane.b32.xlu0 %v1337_v20, %s9432_s1  ;;  %v1341_v20 = vmul.f32 %v1325_v6, %v12560_v48 }
 0xd61   :  { %v1338_v23 = vmul.f32 %v1322_v19, %v12554_v43  ;;  %v1327_v19 = vmul.f32 %v11306_v28, %v12564_v9 }
 0xd62   :  { %v11308_v56 = vpop.permute.xlu1 %1273 }
 0xd63   :  { %v1323_v58 = vmul.f32 %v11308_v56, %v12556_v22  ;;  %1376 = vrot.lane.b32.xlu1 %v1338_v23, %s9432_s1  ;;  %v1343_v48 = vmul.f32 %v1327_v19, %v12564_v9 }
 0xd65   :  { %v1339_v16 = vmul.f32 %v1323_v58, %v12556_v22 }
 0xd66   :  { %v11316_v60 = vpop.permute.xlu1 %1278  ;;  %v8664_v47 = vpop.f32.mrb[78].mxu1 }
 0xd67   :  { %v1324_v43 = vmul.f32 %v11316_v60, %v12558_v50  ;;  %1378 = vrot.lane.b32.xlu0 %v1339_v16, %s9432_s1  ;;  %v7084_v18 = vpop.f32.mrb[79].mxu1 }
 0xd68   :  { %8730 = vmatprep.mubr.msk.f32.mxu1 %vm617_vm4, %v7084_v18 }
 0xd69   :  { %v1340_v22 = vmul.f32 %v1324_v43, %v12558_v50  ;;  %8731 = vmatmul.mubr.msk.f32.gmra.mrb[80].mxu1 %vm617_vm4, %v8664_v47  ;;  %v1329_v50 = vmul.f32 %v11321_v11, %v12568_v14  ;;  %v11341_v47 = vpop.permute.xlu0 %1313 }
 0xd6a   :  { %v11329_v23 = vpop.permute.xlu1 %1288  ;;  %v8671_v58 = vpop.f32.mrb[62].mxu0  ;;  %v1331_v19 = vmul.f32 %v11341_v47, %v12572_v26 }
 0xd6b   :  { %v1326_v16 = vmul.f32 %v11329_v23, %v12562_v40  ;;  %1382 = vrot.lane.b32.xlu0 %v1341_v20, %s9432_s1  ;;  %1380 = vrot.lane.b32.xlu1 %v1340_v22, %s9432_s1  ;;  %v7169_v18 = vpop.f32.mrb[63].mxu0  ;;  %v1345_v9 = vmul.f32 %v1329_v50, %v12568_v14 }
 0xd6c   :  { %8733 = vmatprep.mubr.msk.f32.mxu1 %vm617_vm4, %v7169_v18  ;;  %v1347_v14 = vmul.f32 %v1331_v19, %v12572_v26 }
 0xd6d   :  { %v1342_v6 = vmul.f32 %v1326_v16, %v12562_v40  ;;  %8734 = vmatmul.mubr.msk.f32.gmra.mrb[82].mxu1 %vm617_vm4, %v8671_v58 }
 0xd6e   :  { %v11343_v43 = vpop.permute.xlu1 %1298 }
 0xd6f   :  { %v1328_v20 = vmul.f32 %v11343_v43, %v12566_v1  ;;  %1386 = vrot.lane.b32.xlu0 %v1343_v48, %s9432_s1  ;;  %1384 = vrot.lane.b32.xlu1 %v1342_v6, %s9432_s1 }
 0xd71   :  { %v1344_v40 = vmul.f32 %v1328_v20, %v12566_v1 }
 0xd72   :  { %v11353_v22 = vpop.permute.xlu1 %1308  ;;  %v11355_v58 = vpop.f32.mrb[64].mxu0 }
 0xd73   :  { %v1330_v16 = vmul.f32 %v11353_v22, %v12570_v36  ;;  %1390 = vrot.lane.b32.xlu0 %v1345_v9, %s9432_s1  ;;  %1388 = vrot.lane.b32.xlu1 %v1344_v40, %s9432_s1  ;;  %v11361_v18 = vpop.f32.mrb[65].mxu0 }
 0xd75   :  { %v1346_v48 = vmul.f32 %v1330_v16, %v12570_v36 }
 0xd76   :  { %v11365_v50 = vpop.f32.mrb[66].mxu0 }
 0xd77   :  { %1394 = vrot.lane.b32.xlu0 %v1347_v14, %s9432_s1  ;;  %1392 = vrot.lane.b32.xlu1 %v1346_v48, %s9432_s1  ;;  %v11369_v1 = vpop.f32.mrb[67].mxu0 }
 0xd7a   :  { %v11371_v6 = vpop.f32.mrb[68].mxu0 }
 0xd7b   :  { %v11373_v20 = vpop.f32.mrb[69].mxu0 }
 0xd7e   :  { %v11375_v9 = vpop.f32.mrb[70].mxu0 }
 0xd7f   :  { %v11377_v40 = vpop.f32.mrb[71].mxu0 }
 0xd82   :  { %v11379_v35 = vpop.f32.mrb[72].mxu0 }
 0xd83   :  { %v11381_v26 = vpop.f32.mrb[73].mxu0 }
 0xd86   :  { %v11383_v36 = vpop.f32.mrb[74].mxu0 }
 0xd87   :  { %v11385_v19 = vpop.f32.mrb[75].mxu0 }
 0xdc1   :  { %v1367_v16 = vpop.permute.xlu0 %1366 }
 0xdc2   :  { %v1415_v14 = vsel %vm456_vm2, %v1367_v16, 0.0 }
 0xdc3   :  { %1416 = vadd.xlane.f32.xlu0 %v1415_v14  ;;  %v53_v14 = vld [vmem:[#allocation2 + $0xd0] sm:$0xff] }
 0xdc4   :  { %v1365_v48 = vpop.permute.xlu1 %1364 }
 0xdc5   :  { %v1412_v63 = vsel %vm456_vm2, %v1365_v48, 0.0 }
 0xdc6   :  { %1413 = vadd.xlane.f32.xlu1 %v1412_v63  ;;  %v52_v63 = vld [vmem:[#allocation2 + $0x98] sm:$0xff] }
 0xdc7   :  { %v8882_v48 = vpack.c.bf16 %v53_v14, %v52_v63 }
 0xdc8   :  { %v1369_v25 = vpop.permute.xlu1 %1368 }
 0xdc9   :  { %v1418_v62 = vsel %vm456_vm2, %v1369_v25, 0.0  ;;  %v1371_v31 = vpop.permute.xlu0 %1370  ;;  %8883 = vmatpush3.bf16.msra.mxu0 %v8882_v48 }
 0xdca   :  { %1419 = vadd.xlane.f32.xlu0 %v1418_v62  ;;  %v1421_v30 = vsel %vm456_vm2, %v1371_v31, 0.0  ;;  %8884 = vmatprep.subr.bf16.mxu0 %v12452_v24 }
 0xdcd   :  { %v1373_v44 = vpop.permute.xlu1 %1372 }
 0xdce   :  { %1422 = vadd.xlane.f32.xlu0 %v1421_v30  ;;  %v1424_v21 = vsel %vm456_vm2, %v1373_v44, 0.0 }
 0xdcf   :  { %1425 = vadd.xlane.f32.xlu1 %v1424_v21 }
 0xdd1   :  { %v1375_v16 = vpop.permute.xlu0 %1374 }
 0xdd2   :  { %v1427_v25 = vsel %vm456_vm2, %v1375_v16, 0.0 }
 0xdd3   :  { %1428 = vadd.xlane.f32.xlu0 %v1427_v25 }
 0xdd5   :  { %v1377_v62 = vpop.permute.xlu1 %1376 }
 0xdd6   :  { %v1430_v30 = vsel %vm456_vm2, %v1377_v62, 0.0 }
 0xdd7   :  { %1431 = vadd.xlane.f32.xlu1 %v1430_v30 }
 0xdd9   :  { %v1379_v44 = vpop.permute.xlu0 %1378 }
 0xdda   :  { %v1433_v21 = vsel %vm456_vm2, %v1379_v44, 0.0 }
 0xddb   :  { %1434 = vadd.xlane.f32.xlu0 %v1433_v21 }
 0xddd   :  { %v1383_v8 = vpop.permute.xlu0 %1382  ;;  %v1381_v5 = vpop.permute.xlu1 %1380 }
 0xdde   :  { %v1439_v54 = vsel %vm456_vm2, %v1383_v8, 0.0  ;;  %v1436_v31 = vsel %vm456_vm2, %v1381_v5, 0.0  ;;  %v12599_v5 = vld [vmem:[#allocation43_spill] sm:$0xff] }
 0xddf   :  { %1440 = vadd.xlane.f32.xlu0 %v1439_v54  ;;  %1437 = vadd.xlane.f32.xlu1 %v1436_v31  ;;  %v2460_v54 = vmul.f32 %v12599_v5, %v12599_v5  ;;  %v12600_v31 = vld [vmem:[#allocation49_spill] sm:$0xff] }
 0xde1   :  { %v1387_v16 = vpop.permute.xlu0 %1386  ;;  %v1385_v63 = vpop.permute.xlu1 %1384  ;;  %v2469_v61 = vsel %vm2468_vm10, %v2460_v54, 0.0 }
 0xde2   :  { %v1445_v14 = vsel %vm456_vm2, %v1387_v16, 0.0  ;;  %v1442_v25 = vsel %vm456_vm2, %v1385_v63, 0.0  ;;  %v2461_v16 = vmul.f32 %v12600_v31, %v12600_v31 }
 0xde3   :  { %1446 = vadd.xlane.f32.xlu0 %v1445_v14  ;;  %1443 = vadd.xlane.f32.xlu1 %v1442_v25  ;;  %v12601_v25 = vld [vmem:[#allocation44_spill] sm:$0xff] }
 0xde5   :  { %v1391_v48 = vpop.permute.xlu0 %1390  ;;  %v1389_v62 = vpop.permute.xlu1 %1388 }
 0xde6   :  { %v1451_v30 = vsel %vm456_vm2, %v1391_v48, 0.0  ;;  %v1448_v44 = vsel %vm456_vm2, %v1389_v62, 0.0  ;;  %v2462_v48 = vmul.f32 %v12601_v25, %v12601_v25  ;;  %v12602_v62 = vld [vmem:[#allocation79_spill] sm:$0xff] }
 0xde7   :  { %1452 = vadd.xlane.f32.xlu0 %v1451_v30  ;;  %1449 = vadd.xlane.f32.xlu1 %v1448_v44  ;;  %v2463_v30 = vmul.f32 %v12602_v62, %v12602_v62  ;;  %v2472_v44 = vsel %vm2468_vm10, %v2461_v16, 0.0 }
 0xde8   :  { %v2475_v54 = vsel %vm2468_vm10, %v2462_v48, 0.0 }
 0xde9   :  { %v1395_v21 = vpop.permute.xlu0 %1394  ;;  %v1393_v8 = vpop.permute.xlu1 %1392  ;;  %v2478_v16 = vsel %vm2468_vm10, %v2463_v30, 0.0 }
 0xdea   :  { %v1457_v63 = vsel %vm456_vm2, %v1395_v21, 0.0  ;;  %v1454_v14 = vsel %vm456_vm2, %v1393_v8, 0.0  ;;  %v2464_v21 = vmul.f32 %v12603_v51, %v12603_v51  ;;  %v11420_v8 = vld [vmem:[%s12245_s3 + $0x2] ss:$0 sm:$0xff]  ;;  %vm7672_vm2 = vcmask 1041409  }
 0xdeb   :  { %1458 = vadd.xlane.f32.xlu0 %v1457_v63  ;;  %1455 = vadd.xlane.f32.xlu1 %v1454_v14  ;;  %v12604_v14 = vld [vmem:[#allocation80_spill] sm:$0xff] }
 0xdec   :  { %v2465_v33 = vmul.f32 %v12604_v14, %v12604_v14  ;;  %v2481_v27 = vsel %vm2468_vm10, %v2464_v21, 0.0 }
 0xdef   :  { %2473 = vadd.xlane.f32.xlu0 %v2472_v44  ;;  %2470 = vadd.xlane.f32.xlu1 %v2469_v61 }
 0xdf0   :  { %v8714_v63 = vpop.f32.mrb[84].mxu1 }
 0xdf1   :  { %v7491_v45 = vadd.f32 %v8714_v63, %v11355_v58  ;;  %v7485_v39 = vpop.f32.mrb[85].mxu1  ;;  %v12606_v58 = vld [vmem:[#allocation81_spill] sm:$0xff] }
 0xdf2   :  { %v7486_v61 = vadd.f32 %v7485_v39, %v11361_v18  ;;  %v2467_v63 = vmul.f32 %v12606_v58, %v12606_v58  ;;  %v2484_v18 = vsel %vm2468_vm10, %v2465_v33, 0.0 }
 0xdf3   :  { %2479 = vadd.xlane.f32.xlu0 %v2478_v16  ;;  %2476 = vadd.xlane.f32.xlu1 %v2475_v54  ;;  %v7571_v44 = vadd.f32 %v11420_v8, %v7491_v45 }
 0xdf4   :  { %v7570_v55 = vadd.f32 %v11420_v8, %v7486_v61  ;;  %v8717_v38 = vpop.f32.mrb[86].mxu1 }
 0xdf5   :  { %v7587_v30 = vsel %vm617_vm4, %v7571_v44, 0.0  ;;  %v7501_v48 = vadd.f32 %v8717_v38, %v11365_v50  ;;  %v7495_v39 = vpop.f32.mrb[87].mxu1 }
 0xdf6   :  { %v7586_v45 = vsel %vm617_vm4, %v7570_v55, 0.0  ;;  %v7496_v16 = vadd.f32 %v7495_v39, %v11369_v1  ;;  %v2490_v55 = vsel %vm2468_vm10, %v2467_v63, 0.0 }
 0xdf7   :  { %2485 = vadd.xlane.f32.xlu0 %v2484_v18  ;;  %2482 = vadd.xlane.f32.xlu1 %v2481_v27  ;;  %v7588_v54 = vadd.f32 %v7587_v30, %v7586_v45  ;;  %v7573_v61 = vadd.f32 %v11420_v8, %v7501_v48 }
 0xdf8   :  { %v7572_v21 = vadd.f32 %v11420_v8, %v7496_v16  ;;  %v8720_v53 = vpop.f32.mrb[88].mxu1 }
 0xdf9   :  { %v7589_v44 = vrot.slane %v7588_v54, 4  ;;  %v7596_v38 = vsel %vm617_vm4, %v7573_v61, 0.0  ;;  %v7511_v50 = vadd.f32 %v8720_v53, %v11371_v6  ;;  %v7505_v33 = vpop.f32.mrb[89].mxu1 }
 0xdfa   :  { %v7595_v1 = vsel %vm617_vm4, %v7572_v21, 0.0  ;;  %v7506_v27 = vadd.f32 %v7505_v33, %v11373_v20 }
 0xdfb   :  { %2491 = vadd.xlane.f32.xlu0 %v2490_v55  ;;  %2488 = vadd.xlane.f32.xlu1 %v2487_v0  ;;  %v7590_v30 = vadd.f32 %v7589_v44, %v7588_v54  ;;  %v7597_v48 = vadd.f32 %v7596_v38, %v7595_v1  ;;  %v7575_v39 = vadd.f32 %v11420_v8, %v7511_v50 }
 0xdfc   :  { %v7574_v37 = vadd.f32 %v11420_v8, %v7506_v27 }
 0xdfd   :  { %v7591_v18 = vrot.slane %v7590_v30, 2  ;;  %v7598_v45 = vrot.slane %v7597_v48, 4  ;;  %v7605_v16 = vsel %vm617_vm4, %v7575_v39, 0.0 }
 0xdfe   :  { %v7604_v53 = vsel %vm617_vm4, %v7574_v37, 0.0 }
 0xdff   :  { %v7592_v6 = vadd.f32 %v7591_v18, %v7590_v30  ;;  %v7599_v63 = vadd.f32 %v7598_v45, %v7597_v48  ;;  %v7606_v61 = vadd.f32 %v7605_v16, %v7604_v53 }
 0xe00   :  { %v8723_v21 = vpop.f32.mrb[90].mxu1 }
 0xe01   :  { %v7521_v20 = vadd.f32 %v8723_v21, %v11375_v9  ;;  %v7515_v33 = vpop.f32.mrb[91].mxu1  ;;  %v7600_v0 = vrot.slane %v7599_v63, 2  ;;  %v7607_v54 = vrot.slane %v7606_v61, 4  ;;  %v7593_v50 = vrot.slane %v7592_v6, 1 }
 0xe02   :  { %v7516_v44 = vadd.f32 %v7515_v33, %v11377_v40 }
 0xe03   :  { %v7577_v38 = vadd.f32 %v11420_v8, %v7521_v20  ;;  %v7601_v55 = vadd.f32 %v7600_v0, %v7599_v63  ;;  %v7608_v1 = vadd.f32 %v7607_v54, %v7606_v61  ;;  %v7594_v63 = vadd.f32 %v7593_v50, %v7592_v6 }
 0xe04   :  { %v7576_v27 = vadd.f32 %v11420_v8, %v7516_v44  ;;  %v8726_v39 = vpop.f32.mrb[92].mxu1 }
 0xe05   :  { %v7614_v30 = vsel %vm617_vm4, %v7577_v38, 0.0  ;;  %v7531_v48 = vadd.f32 %v8726_v39, %v11379_v35  ;;  %v7525_v37 = vpop.f32.mrb[93].mxu1  ;;  %v7602_v18 = vrot.slane %v7601_v55, 1  ;;  %v7609_v9 = vrot.slane %v7608_v1, 2 }
 0xe06   :  { %v7613_v45 = vsel %vm617_vm4, %v7576_v27, 0.0  ;;  %v7526_v16 = vadd.f32 %v7525_v37, %v11381_v26 }
 0xe07   :  { %v7615_v40 = vadd.f32 %v7614_v30, %v7613_v45  ;;  %v7579_v53 = vadd.f32 %v11420_v8, %v7531_v48  ;;  %v7603_v61 = vadd.f32 %v7602_v18, %v7601_v55  ;;  %v7610_v21 = vadd.f32 %v7609_v9, %v7608_v1 }
 0xe08   :  { %v7578_v20 = vadd.f32 %v11420_v8, %v7526_v16  ;;  %v8729_v33 = vpop.f32.mrb[94].mxu1 }
 0xe09   :  { %v7616_v0 = vrot.slane %v7615_v40, 4  ;;  %v7623_v35 = vsel %vm617_vm4, %v7579_v53, 0.0  ;;  %v7541_v54 = vadd.f32 %v8729_v33, %v11383_v36  ;;  %v7535_v44 = vpop.f32.mrb[95].mxu1  ;;  %v7673_v38 = vsel %vm7672_vm2, %v7603_v61, %v7594_v63 }
 0xe0a   :  { %v7611_v27 = vrot.slane %v7610_v21, 1  ;;  %v7622_v26 = vsel %vm617_vm4, %v7578_v20, 0.0  ;;  %v7536_v39 = vadd.f32 %v7535_v44, %v11385_v19 }
 0xe0b   :  { %v7617_v6 = vadd.f32 %v7616_v0, %v7615_v40  ;;  %v7624_v50 = vadd.f32 %v7623_v35, %v7622_v26  ;;  %v7581_v55 = vadd.f32 %v11420_v8, %v7541_v54 }
 0xe0c   :  { %v7612_v1 = vadd.f32 %v7611_v27, %v7610_v21  ;;  %v7580_v30 = vadd.f32 %v11420_v8, %v7536_v39 }
 0xe0d   :  { %v7618_v48 = vrot.slane %v7617_v6, 2  ;;  %v7625_v37 = vrot.slane %v7624_v50, 4  ;;  %v7632_v36 = vsel %vm617_vm4, %v7581_v55, 0.0 }
 0xe0e   :  { %v7675_v18 = vsel %vm7674_vm11, %v7612_v1, %v7673_v38  ;;  %v7631_v9 = vsel %vm617_vm4, %v7580_v30, 0.0 }
 0xe0f   :  { %v7619_v45 = vadd.f32 %v7618_v48, %v7617_v6  ;;  %v7626_v16 = vadd.f32 %v7625_v37, %v7624_v50  ;;  %v7633_v53 = vadd.f32 %v7632_v36, %v7631_v9 }
 0xe11   :  { %v7620_v19 = vrot.slane %v7619_v45, 1  ;;  %v7627_v63 = vrot.slane %v7626_v16, 2  ;;  %v7634_v40 = vrot.slane %v7633_v53, 4 }
 0xe13   :  { %v7621_v61 = vadd.f32 %v7620_v19, %v7619_v45  ;;  %v7628_v20 = vadd.f32 %v7627_v63, %v7626_v16  ;;  %v7635_v21 = vadd.f32 %v7634_v40, %v7633_v53 }
 0xe15   :  { %v7677_v33 = vsel %vm7676_vm12, %v7621_v61, %v7675_v18  ;;  %v7629_v0 = vrot.slane %v7628_v20, 1  ;;  %v7636_v35 = vrot.slane %v7635_v21, 2 }
 0xe17   :  { %v7630_v54 = vadd.f32 %v7629_v0, %v7628_v20  ;;  %v7637_v44 = vadd.f32 %v7636_v35, %v7635_v21 }
 0xe19   :  { %v7638_v38 = vrot.slane %v7637_v44, 1  ;;  %v7679_v27 = vsel %vm7678_vm13, %v7630_v54, %v7677_v33 }
 0xe1b   :  { %v7639_v26 = vadd.f32 %v7638_v38, %v7637_v44 }
 0xe1d   :  { %v7681_v39 = vsel %vm12427_vm14, %v7639_v26, %v7679_v27 }
 0xe3c   :  { %v8732_v6 = vpop.f32.mrb[80].mxu1 }
 0xe3d   :  { %v7583_v50 = vadd.f32 %v8732_v6, %v11420_v8  ;;  %v7545_v55 = vpop.f32.mrb[81].mxu1 }
 0xe3e   :  { %v7582_v1 = vadd.f32 %v11420_v8, %v7545_v55 }
 0xe3f   :  { %v7641_v30 = vsel %vm617_vm4, %v7583_v50, 0.0 }
 0xe40   :  { %v7640_v48 = vsel %vm617_vm4, %v7582_v1, 0.0  ;;  %v8735_v37 = vpop.f32.mrb[82].mxu1 }
 0xe41   :  { %v7642_v36 = vadd.f32 %v7641_v30, %v7640_v48  ;;  %v7585_v18 = vadd.f32 %v8735_v37, %v11420_v8  ;;  %v7555_v9 = vpop.f32.mrb[83].mxu1 }
 0xe42   :  { %v7584_v45 = vadd.f32 %v11420_v8, %v7555_v9 }
 0xe43   :  { %v7643_v16 = vrot.slane %v7642_v36, 4  ;;  %v7650_v53 = vsel %vm617_vm4, %v7585_v18, 0.0 }
 0xe44   :  { %v7649_v19 = vsel %vm617_vm4, %v7584_v45, 0.0 }
 0xe45   :  { %v7644_v63 = vadd.f32 %v7643_v16, %v7642_v36  ;;  %v7651_v40 = vadd.f32 %v7650_v53, %v7649_v19 }
 0xe47   :  { %v7645_v61 = vrot.slane %v7644_v63, 2  ;;  %v7652_v20 = vrot.slane %v7651_v40, 4 }
 0xe49   :  { %v7646_v21 = vadd.f32 %v7645_v61, %v7644_v63  ;;  %v7653_v33 = vadd.f32 %v7652_v20, %v7651_v40 }
 0xe4b   :  { %v7647_v0 = vrot.slane %v7646_v21, 1  ;;  %v7654_v35 = vrot.slane %v7653_v33, 2 }
 0xe4d   :  { %v7648_v54 = vadd.f32 %v7647_v0, %v7646_v21  ;;  %v7655_v44 = vadd.f32 %v7654_v35, %v7653_v33 }
 0xe4f   :  { %v7656_v38 = vrot.slane %v7655_v44, 1  ;;  %v7683_v27 = vsel %vm12426_vm15, %v7648_v54, %v7681_v39 }
 0xe50   :  { %v11485_v6 = vpop.xlane.xlu0 %1416 }
 0xe51   :  { %v7657_v8 = vadd.f32 %v7656_v38, %v7655_v44 }
 0xe53   :  { %v7685_v26 = vsel %vm12425_vm1, %v7657_v8, %v7683_v27  ;;  %v11494_v1 = vpop.xlane.xlu1 %1413 }
 0xe54   :  { %8745 = vmatmul.mubr.msk.f32.vlgmr.msra.gmra.mrb[76].mxu0 %vm617_vm4, %v7685_v26 }
 0xe55   :  { %8755 = vmatprep.mubr.msk.f32.mxu0 %vm9434_vm3, %v12582_v49  ;;  %vm12424_vm3 = vcmask 1041408  }
 0xe57   :  { %v11490_v50 = vpop.xlane.xlu0 %1419 }
 0xe5b   :  { %v11492_v55 = vpop.xlane.xlu0 %1422 }
 0xe5c   :  { %v11496_v30 = vpop.xlane.xlu1 %1425 }
 0xe5d   :  { %12607 = vst [vmem:[#allocation15_spill] sm:$0xff] %v11496_v30 }
 0xe60   :  { %v11498_v39 = vpop.xlane.xlu0 %1428 }
 0xe61   :  { %12608 = vst [vmem:[#allocation35_spill] sm:$0xff] %v11498_v39 }
 0xe64   :  { %v11500_v48 = vpop.xlane.xlu1 %1431 }
 0xe65   :  { %12609 = vst [vmem:[#allocation21_spill] sm:$0xff] %v11500_v48 }
 0xe68   :  { %v11502_v37 = vpop.xlane.xlu0 %1434 }
 0xe69   :  { %12610 = vst [vmem:[#allocation36_spill] sm:$0xff] %v11502_v37 }
 0xe6c   :  { %v11504_v36 = vpop.xlane.xlu0 %1440  ;;  %v11506_v18 = vpop.xlane.xlu1 %1437 }
 0xe6d   :  { %12611 = vst [vmem:[#allocation23_spill] sm:$0xff] %v11504_v36  ;;  %12612 = vst [vmem:[#allocation37_spill] sm:$0xff] %v11506_v18 }
 0xe70   :  { %v11508_v9 = vpop.xlane.xlu0 %1446  ;;  %v11510_v49 = vpop.xlane.xlu1 %1443 }
 0xe71   :  { %12613 = vst [vmem:[#allocation20_spill] sm:$0xff] %v11508_v9  ;;  %12614 = vst [vmem:[#allocation38_spill] sm:$0xff] %v11510_v49 }
 0xe74   :  { %v11512_v45 = vpop.xlane.xlu0 %1452  ;;  %v11514_v16 = vpop.xlane.xlu1 %1449 }
 0xe75   :  { %12615 = vst [vmem:[#allocation16_spill] sm:$0xff] %v11512_v45  ;;  %12616 = vst [vmem:[#allocation39_spill] sm:$0xff] %v11514_v16 }
 0xe78   :  { %v11516_v53 = vpop.xlane.xlu0 %1458  ;;  %v11518_v19 = vpop.xlane.xlu1 %1455 }
 0xe79   :  { %12617 = vst [vmem:[#allocation25_spill] sm:$0xff] %v11516_v53  ;;  %12618 = vst [vmem:[#allocation40_spill] sm:$0xff] %v11518_v19 }
 0xe7c   :  { %v2474_v63 = vpop.xlane.xlu0 %2473  ;;  %v2471_v40 = vpop.xlane.xlu1 %2470 }
 0xe7d   :  { %v2501_v61 = vsel %vm12424_vm3, %v2474_v63, 0.0  ;;  %v2494_v20 = vsel %vm12424_vm3, %v2471_v40, 0.0 }
 0xe7e   :  { %v2502_v21 = vrot.slane %v2501_v61, 4  ;;  %v2495_v33 = vrot.slane %v2494_v20, 4 }
 0xe80   :  { %v2503_v0 = vadd.f32 %v2502_v21, %v2501_v61  ;;  %v2480_v35 = vpop.xlane.xlu0 %2479  ;;  %v2477_v54 = vpop.xlane.xlu1 %2476  ;;  %v2496_v44 = vadd.f32 %v2495_v33, %v2494_v20 }
 0xe81   :  { %v2515_v38 = vsel %vm12424_vm3, %v2480_v35, 0.0  ;;  %v2508_v53 = vsel %vm12424_vm3, %v2477_v54, 0.0 }
 0xe82   :  { %v2504_v27 = vrot.slane %v2503_v0, 2  ;;  %v2516_v8 = vrot.slane %v2515_v38, 4  ;;  %v2497_v26 = vrot.slane %v2496_v44, 2  ;;  %v2509_v49 = vrot.slane %v2508_v53, 4 }
 0xe84   :  { %v2505_v19 = vadd.f32 %v2504_v27, %v2503_v0  ;;  %v2486_v45 = vpop.xlane.xlu0 %2485  ;;  %v2483_v16 = vpop.xlane.xlu1 %2482  ;;  %v2498_v9 = vadd.f32 %v2497_v26, %v2496_v44  ;;  %v2517_v63 = vadd.f32 %v2516_v8, %v2515_v38  ;;  %v2510_v18 = vadd.f32 %v2509_v49, %v2508_v53 }
 0xe85   :  { %v2529_v36 = vsel %vm12424_vm3, %v2486_v45, 0.0  ;;  %v2522_v35 = vsel %vm12424_vm3, %v2483_v16, 0.0 }
 0xe86   :  { %v2506_v40 = vrot.slane %v2505_v19, 1  ;;  %v2499_v61 = vrot.slane %v2498_v9, 1  ;;  %v2518_v21 = vrot.slane %v2517_v63, 2  ;;  %v2530_v20 = vrot.slane %v2529_v36, 4 }
 0xe87   :  { %v2511_v0 = vrot.slane %v2510_v18, 2  ;;  %v2523_v39 = vrot.slane %v2522_v35, 4 }
 0xe88   :  { %v2507_v33 = vadd.f32 %v2506_v40, %v2505_v19  ;;  %v2492_v37 = vpop.xlane.xlu0 %2491  ;;  %v11526_v48 = vadd.f32 %v2499_v61, %v2498_v9  ;;  %v2519_v54 = vadd.f32 %v2518_v21, %v2517_v63  ;;  %v2531_v27 = vadd.f32 %v2530_v20, %v2529_v36  ;;  %v2489_v44 = vpop.xlane.xlu1 %2488 }
 0xe89   :  { %v2512_v8 = vadd.f32 %v2511_v0, %v2510_v18  ;;  %v2543_v45 = vsel %vm12424_vm3, %v2492_v37, 0.0  ;;  %v2524_v53 = vadd.f32 %v2523_v39, %v2522_v35  ;;  %v2536_v9 = vsel %vm12424_vm3, %v2489_v44, 0.0 }
 0xe8a   :  { %9240 = vrsqrt.f32 %v2507_v33  ;;  %v2520_v38 = vrot.slane %v2519_v54, 1  ;;  %v2532_v49 = vrot.slane %v2531_v27, 2  ;;  %v2544_v19 = vrot.slane %v2543_v45, 4 }
 0xe8b   :  { %9242 = vrsqrt.f32 %v11526_v48  ;;  %v2513_v16 = vrot.slane %v2512_v8, 1  ;;  %v2525_v63 = vrot.slane %v2524_v53, 2  ;;  %v2537_v36 = vrot.slane %v2536_v9, 4 }
 0xe8c   :  { %v2521_v26 = vadd.f32 %v2520_v38, %v2519_v54  ;;  %v2533_v40 = vadd.f32 %v2532_v49, %v2531_v27  ;;  %v2545_v61 = vadd.f32 %v2544_v19, %v2543_v45  ;;  %vm2559_vm5 = vcmp.eq.f32.partialorder %v2507_v33, inf }
 0xe8d   :  { %v11531_v21 = vadd.f32 %v2513_v16, %v2512_v8  ;;  %v2526_v18 = vadd.f32 %v2525_v63, %v2524_v53  ;;  %v2538_v37 = vadd.f32 %v2537_v36, %v2536_v9  ;;  %v12619_v8 = vld [vmem:[#allocation99_spill] sm:$0xff]  ;;  %vm2561_vm7 = vcmp.eq.f32.partialorder %v2507_v33, 0.0 }
 0xe8e   :  { %9244 = vrsqrt.f32 %v2521_v26  ;;  %v2534_v20 = vrot.slane %v2533_v40, 1  ;;  %v2546_v0 = vrot.slane %v2545_v61, 2  ;;  %v11540_v49 = vmul.f32 0.70710677, %v12619_v8 }
 0xe8f   :  { %9246 = vrsqrt.f32 %v11531_v21  ;;  %v2527_v39 = vrot.slane %v2526_v18, 1  ;;  %v2539_v54 = vrot.slane %v2538_v37, 2  ;;  %v2562_v63 = vand.u32 2147483648, %v2507_v33 }
 0xe90   :  { %v11534_v30 = vadd.f32 %v2534_v20, %v2533_v40  ;;  %v2547_v35 = vadd.f32 %v2546_v0, %v2545_v61  ;;  %vm2552_vm8 = vcmp.eq.f32.partialorder %v11526_v48, inf  ;;  %vm2554_vm9 = vcmp.eq.f32.partialorder %v11526_v48, 0.0 }
 0xe91   :  { %v11537_v27 = vadd.f32 %v2527_v39, %v2526_v18  ;;  %v2540_v38 = vadd.f32 %v2539_v54, %v2538_v37  ;;  %v2555_v20 = vand.u32 2147483648, %v11526_v48  ;;  %vm2573_vm0 = vcmp.eq.f32.partialorder %v2521_v26, inf }
 0xe92   :  { %9248 = vrsqrt.f32 %v11534_v30  ;;  %v2548_v44 = vrot.slane %v2547_v35, 1  ;;  %vm2575_vm3 = vcmp.eq.f32.partialorder %v2521_v26, 0.0  ;;  %vm2566_vm14 = vcmp.eq.f32.partialorder %v11531_v21, inf }
 0xe93   :  { %9250 = vrsqrt.f32 %v11537_v27  ;;  %v2541_v9 = vrot.slane %v2540_v38, 1 }
 0xe94   :  { %v9241_v45 = vpop.eup %9240  ;;  %v11543_v16 = vadd.f32 %v2548_v44, %v2547_v35 }
 0xe95   :  { %v9243_v53 = vpop.eup %9242  ;;  %v2558_v19 = vmul.f32 %v9241_v45, %v2507_v33  ;;  %v11549_v61 = vadd.f32 %v2541_v9, %v2540_v38  ;;  %v2576_v45 = vand.u32 2147483648, %v2521_v26  ;;  %v55_v38 = vld [vmem:[#allocation2 + $0x68] sm:$0xff] }
 0xe96   :  { %v2551_v40 = vmul.f32 %v9243_v53, %v11526_v48  ;;  %9252 = vrsqrt.f32 %v11543_v16 }
 0xe97   :  { %v2560_v36 = vsel %vm2559_vm5, %v2507_v33, %v2558_v19  ;;  %9254 = vrsqrt.f32 %v11549_v61  ;;  %v54_v33 = vld [vmem:[#allocation2 + $0x30] sm:$0xff]  ;;  %vm2568_vm5 = vcmp.eq.f32.partialorder %v11531_v21, 0.0 }
 0xe98   :  { %v9245_v18 = vpop.eup %9244  ;;  %v2563_v0 = vsel %vm2561_vm7, %v2562_v63, %v2560_v36  ;;  %v2553_v37 = vsel %vm2552_vm8, %v11526_v48, %v2551_v40  ;;  %v2569_v40 = vand.u32 2147483648, %v11531_v21  ;;  %vm2587_vm7 = vcmp.eq.f32.partialorder %v11534_v30, inf }
 0xe99   :  { %v2572_v39 = vmul.f32 %v9245_v18, %v2521_v26  ;;  %vm2607_vm1 = vcmp.gt.f32.partialorder %v2563_v0, 0.0  ;;  %v2556_v35 = vsel %vm2554_vm9, %v2555_v20, %v2553_v37  ;;  %v9247_v54 = vpop.eup %9246  ;;  %v8885_v20 = vpack.c.bf16 %v55_v38, %v54_v33 }
 0xe9a   :  { %v2615_v44 = vsel %vm2607_vm1, %v2563_v0, 1.0  ;;  %vm2606_vm15 = vcmp.gt.f32.partialorder %v2556_v35, 0.0  ;;  %v2565_v53 = vmul.f32 %v9247_v54, %v11531_v21  ;;  %v2583_v33 = vand.u32 2147483648, %v11537_v27 }
 0xe9b   :  { %9256 = vrcp.f32 %v2615_v44  ;;  %v2614_v19 = vsel %vm2606_vm15, %v2556_v35, 1.0  ;;  %v2574_v48 = vsel %vm2573_vm0, %v2521_v26, %v2572_v39  ;;  %vm2589_vm0 = vcmp.eq.f32.partialorder %v11534_v30, 0.0  ;;  %8886 = vmatpush3.bf16.msra.mxu0 %v8885_v20 }
 0xe9c   :  { %9258 = vrcp.f32 %v2614_v19  ;;  %v2577_v9 = vsel %vm2575_vm3, %v2576_v45, %v2574_v48  ;;  %v9249_v63 = vpop.eup %9248  ;;  %v2567_v36 = vsel %vm2566_vm14, %v11531_v21, %v2565_v53  ;;  %v2590_v26 = vand.u32 2147483648, %v11534_v30  ;;  %8887 = vmatprep.subr.bf16.mxu0 %v12452_v24 }
 0xe9d   :  { %vm2609_vm1 = vcmp.gt.f32.partialorder %v2577_v9, 0.0  ;;  %v2586_v18 = vmul.f32 %v9249_v63, %v11534_v30  ;;  %v2570_v37 = vsel %vm2568_vm5, %v2569_v40, %v2567_v36  ;;  %v9251_v39 = vpop.eup %9250  ;;  %vm2580_vm3 = vcmp.eq.f32.partialorder %v11537_v27, inf }
 0xe9e   :  { %v2617_v0 = vsel %vm2609_vm1, %v2577_v9, 1.0  ;;  %vm2608_vm15 = vcmp.gt.f32.partialorder %v2570_v37, 0.0  ;;  %v2579_v35 = vmul.f32 %v9251_v39, %v11537_v27  ;;  %vm2582_vm14 = vcmp.eq.f32.partialorder %v11537_v27, 0.0 }
 0xe9f   :  { %9260 = vrcp.f32 %v2617_v0  ;;  %v2616_v21 = vsel %vm2608_vm15, %v2570_v37, 1.0  ;;  %v2588_v54 = vsel %vm2587_vm7, %v11534_v30, %v2586_v18  ;;  %vm2601_vm8 = vcmp.eq.f32.partialorder %v11543_v16, inf }
 0xea0   :  { %v9253_v44 = vpop.eup %9252  ;;  %9262 = vrcp.f32 %v2616_v21  ;;  %v2591_v45 = vsel %vm2589_vm0, %v2590_v26, %v2588_v54  ;;  %v2581_v53 = vsel %vm2580_vm3, %v11537_v27, %v2579_v35  ;;  %vm2603_vm5 = vcmp.eq.f32.partialorder %v11543_v16, 0.0 }
 0xea1   :  { %v2600_v38 = vmul.f32 %v9253_v44, %v11543_v16  ;;  %vm2611_vm9 = vcmp.gt.f32.partialorder %v2591_v45, 0.0  ;;  %v9255_v19 = vpop.eup %9254  ;;  %v2584_v48 = vsel %vm2582_vm14, %v2583_v33, %v2581_v53  ;;  %v2604_v9 = vand.u32 2147483648, %v11543_v16  ;;  %v57_v33 = vld [vmem:[#allocation2 + $0xd8] sm:$0xff] }
 0xea2   :  { %v2619_v30 = vsel %vm2611_vm9, %v2591_v45, 1.0  ;;  %vm2594_vm1 = vcmp.eq.f32.partialorder %v11549_v61, inf  ;;  %v2593_v24 = vmul.f32 %v9255_v19, %v11549_v61  ;;  %vm2610_vm7 = vcmp.gt.f32.partialorder %v2584_v48, 0.0  ;;  %v56_v45 = vld [vmem:[#allocation2 + $0xa0] sm:$0xff] }
 0xea3   :  { %9264 = vrcp.f32 %v2619_v30  ;;  %v2602_v40 = vsel %vm2601_vm8, %v11543_v16, %v2600_v38  ;;  %v2618_v36 = vsel %vm2610_vm7, %v2584_v48, 1.0  ;;  %vm2596_vm0 = vcmp.eq.f32.partialorder %v11549_v61, 0.0 }
 0xea4   :  { %v2605_v20 = vsel %vm2603_vm5, %v2604_v9, %v2602_v40  ;;  %v2597_v27 = vand.u32 2147483648, %v11549_v61  ;;  %9266 = vrcp.f32 %v2618_v36  ;;  %v2595_v37 = vsel %vm2594_vm1, %v11549_v61, %v2593_v24 }
 0xea5   :  { %v9257_v63 = vpop.eup %9256  ;;  %vm2613_vm15 = vcmp.gt.f32.partialorder %v2605_v20, 0.0  ;;  %v8888_v53 = vpack.c.bf16 %v57_v33, %v56_v45 }
 0xea6   :  { %v9259_v18 = vpop.eup %9258  ;;  %v2625_v0 = vmul.f32 %v9257_v63, %v12600_v31  ;;  %v2621_v26 = vsel %vm2613_vm15, %v2605_v20, 1.0  ;;  %v2598_v35 = vsel %vm2596_vm0, %v2597_v27, %v2595_v37  ;;  %vm12681_vm0 = vcmask 1045509  }
 0xea7   :  { %v2623_v39 = vmul.f32 %v9259_v18, %v12599_v5  ;;  %9268 = vrcp.f32 %v2621_v26  ;;  %vm2612_vm3 = vcmp.gt.f32.partialorder %v2598_v35, 0.0  ;;  %8889 = vmatpush3.bf16.msra.mxu0 %v8888_v53  ;;  %vm12682_vm15 = vcmask 1046534  }
 0xea8   :  { %v2648_v16 = vsub.f32 %v2625_v0, %v11540_v49  ;;  %v2620_v44 = vsel %vm2612_vm3, %v2598_v35, 1.0  ;;  %vm12683_vm3 = vcmask 1047559  }
 0xea9   :  { %v9261_v21 = vpop.eup %9260  ;;  %v2647_v54 = vsub.f32 %v2623_v39, %v11540_v49  ;;  %9270 = vrcp.f32 %v2620_v44 }
 0xeaa   :  { %v2656_v38 = vmul.f32 %v2648_v16, %v2648_v16  ;;  %v2629_v31 = vmul.f32 %v9261_v21, %v12602_v62  ;;  %v9263_v61 = vpop.eup %9262 }
 0xeab   :  { %v2655_v19 = vmul.f32 %v2647_v54, %v2647_v54  ;;  %v2627_v48 = vmul.f32 %v9263_v61, %v12601_v25 }
 0xeac   :  { %v2666_v5 = vsel %vm2468_vm10, %v2656_v38, 0.0  ;;  %v2650_v30 = vsub.f32 %v2629_v31, %v11540_v49  ;;  %v12620_v38 = vld [vmem:[#allocation83_spill] sm:$0xff]  ;;  %v12621_v31 = vld [vmem:[#allocation64_spill] sm:$0xff] }
 0xead   :  { %2667 = vadd.xlane.f32.xlu0 %v2666_v5  ;;  %v2663_v9 = vsel %vm2468_vm10, %v2655_v19, 0.0  ;;  %v9265_v24 = vpop.eup %9264  ;;  %v2649_v63 = vsub.f32 %v2627_v48, %v11540_v49  ;;  %v4946_v53 = vmul.f32 %v12621_v31, %v12620_v38  ;;  %v12622_v19 = vld [vmem:[#allocation82_spill] sm:$0xff]  ;;  %v12623_v5 = vld [vmem:[#allocation63_spill] sm:$0xff]  ;;  %v12637_v38 = vld [vmem:[#allocation72_spill] sm:$0xff] }
 0xeae   :  { %2664 = vadd.xlane.f32.xlu1 %v2663_v9  ;;  %v2658_v40 = vmul.f32 %v2650_v30, %v2650_v30  ;;  %v2633_v62 = vmul.f32 %v9265_v24, %v12604_v14  ;;  %v9267_v36 = vpop.eup %9266  ;;  %v4945_v30 = vmul.f32 %v12623_v5, %v12622_v19  ;;  %v12625_v9 = vld [vmem:[#allocation66_spill] sm:$0xff] }
 0xeaf   :  { %v2657_v27 = vmul.f32 %v2649_v63, %v2649_v63  ;;  %v2631_v25 = vmul.f32 %v9267_v36, %v12603_v51  ;;  %v12627_v63 = vld [vmem:[#allocation65_spill] sm:$0xff] }
 0xeb0   :  { %v2672_v20 = vsel %vm2468_vm10, %v2658_v40, 0.0  ;;  %v2652_v18 = vsub.f32 %v2633_v62, %v11540_v49  ;;  %v4964_v40 = vsel %vm664_vm6, %v4946_v53, 0.0  ;;  %v4961_v36 = vsel %vm664_vm6, %v4945_v30, 0.0  ;;  %v12640_v30 = vld [vmem:[#allocation93_spill] sm:$0xff] }
 0xeb1   :  { %2673 = vadd.xlane.f32.xlu0 %v2672_v20  ;;  %v9269_v0 = vpop.eup %9268  ;;  %v2669_v37 = vsel %vm2468_vm10, %v2657_v27, 0.0  ;;  %v2651_v26 = vsub.f32 %v2631_v25, %v11540_v49  ;;  %v12628_v20 = vld [vmem:[#allocation87_spill] sm:$0xff]  ;;  %v12629_v27 = vld [vmem:[#allocation68_spill] sm:$0xff] }
 0xeb2   :  { %2670 = vadd.xlane.f32.xlu1 %v2669_v37  ;;  %v2660_v39 = vmul.f32 %v2652_v18, %v2652_v18  ;;  %v2637_v35 = vmul.f32 %v9269_v0, %v12606_v58  ;;  %v4950_v18 = vmul.f32 %v12629_v27, %v12628_v20  ;;  %v12630_v0 = vld [vmem:[#allocation86_spill] sm:$0xff]  ;;  %v12631_v37 = vld [vmem:[#allocation67_spill] sm:$0xff] }
 0xeb3   :  { %v9271_v16 = vpop.eup %9270  ;;  %v2659_v21 = vmul.f32 %v2651_v26, %v2651_v26 }
 0xeb4   :  { %v2678_v14 = vsel %vm2468_vm10, %v2660_v39, 0.0  ;;  %v2654_v54 = vsub.f32 %v2637_v35, %v11540_v49  ;;  %v2635_v44 = vmul.f32 %v9271_v16, %v12605_v52  ;;  %v12624_v52 = vld [vmem:[#allocation85_spill] sm:$0xff]  ;;  %v4949_v39 = vmul.f32 %v12631_v37, %v12630_v0  ;;  %v12633_v16 = vld [vmem:[#allocation70_spill] sm:$0xff] }
 0xeb5   :  { %2679 = vadd.xlane.f32.xlu0 %v2678_v14  ;;  %v2675_v51 = vsel %vm2468_vm10, %v2659_v21, 0.0  ;;  %v4948_v24 = vmul.f32 %v12625_v9, %v12624_v52  ;;  %v12632_v35 = vld [vmem:[#allocation89_spill] sm:$0xff]  ;;  %v4976_v21 = vsel %vm664_vm6, %v4950_v18, 0.0  ;;  %v12646_v18 = vld [vmem:[#allocation94_spill] sm:$0xff] }
 0xeb6   :  { %v2662_v45 = vmul.f32 %v2654_v54, %v2654_v54  ;;  %v2653_v33 = vsub.f32 %v2635_v44, %v11540_v49  ;;  %2676 = vadd.xlane.f32.xlu1 %v2675_v51  ;;  %v12626_v49 = vld [vmem:[#allocation84_spill] sm:$0xff]  ;;  %v4952_v14 = vmul.f32 %v12633_v16, %v12632_v35  ;;  %v12635_v44 = vld [vmem:[#allocation69_spill] sm:$0xff] }
 0xeb7   :  { %v4947_v62 = vmul.f32 %v12627_v63, %v12626_v49  ;;  %v4970_v25 = vsel %vm664_vm6, %v4948_v24, 0.0  ;;  %v12634_v54 = vld [vmem:[#allocation88_spill] sm:$0xff] }
 0xeb8   :  { %v2684_v58 = vsel %vm2468_vm10, %v2662_v45, 0.0  ;;  %v2661_v61 = vmul.f32 %v2653_v33, %v2653_v33  ;;  %v4951_v51 = vmul.f32 %v12635_v44, %v12634_v54  ;;  %v4973_v45 = vsel %vm664_vm6, %v4949_v39, 0.0  ;;  %v12636_v33 = vld [vmem:[#allocation91_spill] sm:$0xff]  ;;  %v12642_v24 = vld [vmem:[#allocation92_spill] sm:$0xff]  ;;  %v12648_v39 = vld [vmem:[#allocation97_spill] sm:$0xff] }
 0xeb9   :  { %2685 = vadd.xlane.f32.xlu0 %v2684_v58  ;;  %v4967_v26 = vsel %vm664_vm6, %v4947_v62, 0.0  ;;  %v4954_v31 = vmul.f32 %v12637_v38, %v12636_v33  ;;  %v4982_v53 = vsel %vm664_vm6, %v4952_v14, 0.0  ;;  %v12638_v58 = vld [vmem:[#allocation90_spill] sm:$0xff]  ;;  %v12644_v62 = vld [vmem:[#allocation95_spill] sm:$0xff]  ;;  %v12650_v14 = vld [vmem:[#allocation96_spill] sm:$0xff] }
 0xeba   :  { %v2681_v48 = vsel %vm2468_vm10, %v2661_v61, 0.0  ;;  %v12639_v61 = vld [vmem:[#allocation71_spill] sm:$0xff]  ;;  %v4979_v5 = vsel %vm664_vm6, %v4951_v51, 0.0 }
 0xebb   :  { %2682 = vadd.xlane.f32.xlu1 %v2681_v48  ;;  %v4953_v19 = vmul.f32 %v12639_v61, %v12638_v58  ;;  %v12641_v48 = vld [vmem:[#allocation74_spill] sm:$0xff]  ;;  %v4988_v9 = vsel %vm664_vm6, %v4954_v31, 0.0  ;;  %v12652_v33 = vld [vmem:[#allocation51_spill] sm:$0xff]  ;;  %v12654_v61 = vld [vmem:[#allocation53_spill] sm:$0xff] }
 0xebc   :  { %v4956_v52 = vmul.f32 %v12641_v48, %v12640_v30  ;;  %v5065_v38 = vmul.f32 %v12652_v33, %v11268_v17  ;;  %v12653_v31 = vld [vmem:[#allocation50_spill] sm:$0xff]  ;;  %v12655_v30 = vld [vmem:[#allocation55_spill] sm:$0xff] }
 0xebd   :  { %4965 = vadd.xlane.f32.xlu0 %v4964_v40  ;;  %v12643_v40 = vld [vmem:[#allocation73_spill] sm:$0xff]  ;;  %v4985_v63 = vsel %vm664_vm6, %v4953_v19, 0.0  ;;  %v5067_v19 = vmul.f32 %v12654_v61, %v11272_v2  ;;  %v5070_v48 = vmul.f32 %v12655_v30, %v11292_v3  ;;  %v12657_v2 = vld [vmem:[#allocation8_spill] sm:$0xff] }
 0xebe   :  { %v4955_v49 = vmul.f32 %v12643_v40, %v12642_v24  ;;  %v4994_v27 = vsel %vm664_vm6, %v4956_v52, 0.0  ;;  %v5081_v58 = vmul.f32 %v5065_v38, %v12652_v33  ;;  %v5072_v24 = vmul.f32 %v12657_v2, %v11308_v56  ;;  %v12661_v56 = vld [vmem:[#allocation59_spill] sm:$0xff] }
 0xebf   :  { %4962 = vadd.xlane.f32.xlu1 %v4961_v36  ;;  %v12645_v36 = vld [vmem:[#allocation76_spill] sm:$0xff]  ;;  %v5083_v52 = vmul.f32 %v5067_v19, %v12654_v61 }
 0xec0   :  { %v4958_v20 = vmul.f32 %v12645_v36, %v12644_v62  ;;  %v4991_v37 = vsel %vm664_vm6, %v4955_v49, 0.0  ;;  %v12658_v49 = vld [vmem:[#allocation54_spill] sm:$0xff]  ;;  %v5088_v62 = vmul.f32 %v5072_v24, %v12657_v2 }
 0xec1   :  { %4971 = vadd.xlane.f32.xlu0 %v4970_v25  ;;  %v12647_v25 = vld [vmem:[#allocation75_spill] sm:$0xff] }
 0xec2   :  { %v4957_v0 = vmul.f32 %v12647_v25, %v12646_v18  ;;  %v5000_v16 = vsel %vm664_vm6, %v4958_v20, 0.0  ;;  %v12660_v20 = vld [vmem:[#allocation62_spill] sm:$0xff]  ;;  %v5076_v18 = vmul.f32 %v12661_v56, %v11306_v28 }
 0xec3   :  { %4968 = vadd.xlane.f32.xlu1 %v4967_v26  ;;  %v12649_v26 = vld [vmem:[#allocation78_spill] sm:$0xff] }
 0xec4   :  { %v4960_v35 = vmul.f32 %v12649_v26, %v12648_v39  ;;  %v4997_v44 = vsel %vm664_vm6, %v4957_v0, 0.0 }
 0xec5   :  { %4977 = vadd.xlane.f32.xlu0 %v4976_v21  ;;  %v12651_v21 = vld [vmem:[#allocation77_spill] sm:$0xff] }
 0xec6   :  { %v4959_v54 = vmul.f32 %v12651_v21, %v12650_v14  ;;  %v5006_v51 = vsel %vm664_vm6, %v4960_v35, 0.0  ;;  %v12664_v35 = vld [vmem:[#allocation58_spill] sm:$0xff] }
 0xec7   :  { %4974 = vadd.xlane.f32.xlu1 %v4973_v45 }
 0xec8   :  { %v5003_v45 = vsel %vm664_vm6, %v4959_v54, 0.0  ;;  %v12666_v54 = vld [vmem:[#allocation61_spill] sm:$0xff] }
 0xec9   :  { %4983 = vadd.xlane.f32.xlu0 %v4982_v53  ;;  %v5066_v53 = vmul.f32 %v12653_v31, %v11263_v12  ;;  %v5086_v12 = vmul.f32 %v5070_v48, %v12655_v30 }
 0xecb   :  { %4980 = vadd.xlane.f32.xlu1 %v4979_v5  ;;  %v5082_v5 = vmul.f32 %v5066_v53, %v12653_v31 }
 0xecd   :  { %4989 = vadd.xlane.f32.xlu0 %v4988_v9  ;;  %v12656_v9 = vld [vmem:[#allocation52_spill] sm:$0xff] }
 0xece   :  { %v5068_v17 = vmul.f32 %v12656_v9, %v11278_v42  ;;  %v12659_v42 = vld [vmem:[#allocation57_spill] sm:$0xff] }
 0xecf   :  { %4986 = vadd.xlane.f32.xlu1 %v4985_v63  ;;  %v5069_v63 = vmul.f32 %v12658_v49, %v11285_v41  ;;  %v5074_v3 = vmul.f32 %v12659_v42, %v11297_v46  ;;  %v12662_v46 = vld [vmem:[#allocation56_spill] sm:$0xff] }
 0xed0   :  { %v5084_v40 = vmul.f32 %v5068_v17, %v12656_v9  ;;  %v5073_v0 = vmul.f32 %v12662_v46, %v11316_v60  ;;  %v12665_v60 = vld [vmem:[#allocation22_spill] sm:$0xff] }
 0xed1   :  { %4995 = vadd.xlane.f32.xlu0 %v4994_v27  ;;  %v5085_v36 = vmul.f32 %v5069_v63, %v12658_v49  ;;  %v5071_v27 = vmul.f32 %v12660_v20, %v11300_v10  ;;  %v5090_v41 = vmul.f32 %v5074_v3, %v12659_v42  ;;  %v5092_v10 = vmul.f32 %v5076_v18, %v12661_v56 }
 0xed2   :  { %v5089_v26 = vmul.f32 %v5073_v0, %v12662_v46  ;;  %v5080_v14 = vmul.f32 %v12665_v60, %v11341_v47 }
 0xed3   :  { %4992 = vadd.xlane.f32.xlu1 %v4991_v37  ;;  %v5087_v25 = vmul.f32 %v5071_v27, %v12660_v20  ;;  %v12663_v37 = vld [vmem:[#allocation60_spill] sm:$0xff] }
 0xed4   :  { %v5078_v39 = vmul.f32 %v12663_v37, %v11321_v11  ;;  %v5096_v11 = vmul.f32 %v5080_v14, %v12665_v60 }
 0xed5   :  { %5001 = vadd.xlane.f32.xlu0 %v5000_v16  ;;  %v5075_v16 = vmul.f32 %v12664_v35, %v11329_v23 }
 0xed6   :  { %v5094_v28 = vmul.f32 %v5078_v39, %v12663_v37 }
 0xed7   :  { %4998 = vadd.xlane.f32.xlu1 %v4997_v44  ;;  %v5091_v21 = vmul.f32 %v5075_v16, %v12664_v35  ;;  %v5077_v44 = vmul.f32 %v12666_v54, %v11343_v43  ;;  %v8087_v43 = vld [vmem:[%s12245_s3 + $0x3] ss:$0 sm:$0xff] }
 0xed9   :  { %5007 = vadd.xlane.f32.xlu0 %v5006_v51  ;;  %v5093_v23 = vmul.f32 %v5077_v44, %v12666_v54  ;;  %v12667_v51 = vld [vmem:[#allocation19_spill] sm:$0xff] }
 0xedb   :  { %5004 = vadd.xlane.f32.xlu1 %v5003_v45  ;;  %v5079_v45 = vmul.f32 %v12667_v51, %v11353_v22 }
 0xedd   :  { %v5095_v47 = vmul.f32 %v5079_v45, %v12667_v51 }
 0xeec   :  { %5113 = vrot.lane.b32.xlu1 %v5081_v58, %s9432_s1 }
 0xeef   :  { %5115 = vrot.lane.b32.xlu0 %v5082_v5, %s9432_s1 }
 0xef0   :  { %5117 = vrot.lane.b32.xlu1 %v5083_v52, %s9432_s1 }
 0xef3   :  { %5123 = vrot.lane.b32.xlu0 %v5086_v12, %s9432_s1 }
 0xef4   :  { %5119 = vrot.lane.b32.xlu1 %v5084_v40, %s9432_s1 }
 0xef7   :  { %5127 = vrot.lane.b32.xlu0 %v5088_v62, %s9432_s1 }
 0xef8   :  { %5121 = vrot.lane.b32.xlu1 %v5085_v36, %s9432_s1 }
 0xefb   :  { %5131 = vrot.lane.b32.xlu0 %v5090_v41, %s9432_s1 }
 0xefc   :  { %5125 = vrot.lane.b32.xlu1 %v5087_v25, %s9432_s1 }
 0xeff   :  { %5135 = vrot.lane.b32.xlu0 %v5092_v10, %s9432_s1 }
 0xf00   :  { %5129 = vrot.lane.b32.xlu1 %v5089_v26, %s9432_s1 }
 0xf03   :  { %5139 = vrot.lane.b32.xlu0 %v5094_v28, %s9432_s1 }
 0xf04   :  { %5133 = vrot.lane.b32.xlu1 %v5091_v21, %s9432_s1 }
 0xf07   :  { %5143 = vrot.lane.b32.xlu0 %v5096_v11, %s9432_s1 }
 0xf08   :  { %5137 = vrot.lane.b32.xlu1 %v5093_v23, %s9432_s1 }
 0xf0c   :  { %5141 = vrot.lane.b32.xlu1 %v5095_v47, %s9432_s1  ;;  %s9439_s1 = smov 80  }
 0xf27   :  { %v7754_v33 = vpop.f32.mrb[76].mxu0 }
 0xf28   :  { %v7755_v38 = vadd.f32 %v8087_v43, %v7754_v33  ;;  %v8746_v31 = vpop.f32.mrb[77].mxu0 }
 0xf2a   :  { %v7758_v53 = vmax.f32 %v7755_v38, 0.0 }
 0xf2c   :  { %8756 = vmatmul.mubr.msk.f32.vlgmr.msra.gmra.mrb[78].mxu0 %vm617_vm4, %v7758_v53 }
 0xf3a   :  { %v11722_v58 = vpop.xlane.xlu0 %2667 }
 0xf3b   :  { %v11724_v22 = vpop.xlane.xlu1 %2664 }
 0xf3e   :  { %v11726_v61 = vpop.xlane.xlu0 %2673 }
 0xf3f   :  { %12668 = vst [vmem:[#allocation26_spill] sm:$0xff] %v11726_v61  ;;  %v11728_v19 = vpop.xlane.xlu1 %2670 }
 0xf40   :  { %12669 = vst [vmem:[#allocation41_spill] sm:$0xff] %v11728_v19 }
 0xf42   :  { %v11730_v5 = vpop.xlane.xlu0 %2679 }
 0xf43   :  { %12670 = vst [vmem:[#allocation24_spill] sm:$0xff] %v11730_v5  ;;  %v11732_v30 = vpop.xlane.xlu1 %2676 }
 0xf44   :  { %12671 = vst [vmem:[#allocation42_spill] sm:$0xff] %v11732_v30 }
 0xf46   :  { %v11734_v48 = vpop.xlane.xlu0 %2685 }
 0xf47   :  { %12672 = vst [vmem:[#allocation47_spill] sm:$0xff] %v11734_v48 }
 0xf48   :  { %v11736_v52 = vpop.xlane.xlu1 %2682 }
 0xf49   :  { %12673 = vst [vmem:[#allocation48_spill] sm:$0xff] %v11736_v52 }
 0xf4a   :  { %v11738_v9 = vpop.xlane.xlu0 %4965 }
 0xf4c   :  { %v11740_v17 = vpop.xlane.xlu1 %4962 }
 0xf4e   :  { %v11742_v12 = vpop.xlane.xlu0 %4971 }
 0xf50   :  { %v11744_v2 = vpop.xlane.xlu1 %4968 }
 0xf52   :  { %v11746_v24 = vpop.xlane.xlu0 %4977 }
 0xf54   :  { %v11748_v40 = vpop.xlane.xlu1 %4974 }
 0xf56   :  { %v11750_v49 = vpop.xlane.xlu0 %4983 }
 0xf58   :  { %v11752_v63 = vpop.xlane.xlu1 %4980 }
 0xf5a   :  { %v11754_v42 = vpop.xlane.xlu0 %4989 }
 0xf5c   :  { %v11756_v3 = vpop.xlane.xlu1 %4986 }
 0xf5e   :  { %v11758_v62 = vpop.xlane.xlu0 %4995 }
 0xf60   :  { %v11760_v36 = vpop.xlane.xlu1 %4992 }
 0xf62   :  { %v11762_v20 = vpop.xlane.xlu0 %5001 }
 0xf64   :  { %v11764_v27 = vpop.xlane.xlu1 %4998 }
 0xf66   :  { %v11766_v41 = vpop.xlane.xlu0 %5007 }
 0xf68   :  { %v11768_v56 = vpop.xlane.xlu1 %5004 }
 0xf6a   :  { %v5116_v18 = vpop.permute.xlu0 %5115 }
 0xf6b   :  { %v5164_v25 = vsel %vm664_vm6, %v5116_v18, 0.0 }
 0xf6c   :  { %v5114_v46 = vpop.permute.xlu1 %5113  ;;  %5165 = vadd.xlane.f32.xlu0 %v5164_v25 }
 0xf6d   :  { %v5161_v0 = vsel %vm664_vm6, %v5114_v46, 0.0 }
 0xf6e   :  { %5162 = vadd.xlane.f32.xlu1 %v5161_v0  ;;  %v5124_v10 = vpop.permute.xlu0 %5123 }
 0xf6f   :  { %v5176_v14 = vsel %vm664_vm6, %v5124_v10, 0.0 }
 0xf70   :  { %v5118_v37 = vpop.permute.xlu1 %5117 }
 0xf71   :  { %v5167_v39 = vsel %vm664_vm6, %v5118_v37, 0.0 }
 0xf72   :  { %5168 = vadd.xlane.f32.xlu0 %v5167_v39  ;;  %v5128_v26 = vpop.permute.xlu0 %5127  ;;  %v5305_v39 = vmul.f32 %v10750_v15, %v10750_v15 }
 0xf73   :  { %v5182_v44 = vsel %vm664_vm6, %v5128_v26, 0.0  ;;  %v5307_v26 = vmul.f32 %v10766_v29, %v10766_v29 }
 0xf74   :  { %v5120_v35 = vpop.permute.xlu1 %5119 }
 0xf75   :  { %v5170_v16 = vsel %vm664_vm6, %v5120_v35, 0.0  ;;  %v5306_v35 = vmul.f32 %v10745_v4, %v10745_v4 }
 0xf76   :  { %5171 = vadd.xlane.f32.xlu0 %v5170_v16  ;;  %v5132_v28 = vpop.permute.xlu0 %5131  ;;  %v5308_v16 = vmul.f32 %v10761_v59, %v10761_v59 }
 0xf77   :  { %v5188_v45 = vsel %vm664_vm6, %v5132_v28, 0.0  ;;  %v5310_v28 = vmul.f32 %v12575_v7, %v12575_v7 }
 0xf78   :  { %v5122_v60 = vpop.permute.xlu1 %5121 }
 0xf79   :  { %v5173_v21 = vsel %vm664_vm6, %v5122_v60, 0.0  ;;  %v5309_v60 = vmul.f32 %v12574_v32, %v12574_v32 }
 0xf7a   :  { %5177 = vadd.xlane.f32.xlu0 %v5176_v14  ;;  %5174 = vadd.xlane.f32.xlu1 %v5173_v21  ;;  %v5136_v23 = vpop.permute.xlu0 %5135  ;;  %v5312_v14 = vmul.f32 %v12577_v57, %v12577_v57  ;;  %v5311_v21 = vmul.f32 %v12576_v13, %v12576_v13 }
 0xf7b   :  { %v5194_v38 = vsel %vm664_vm6, %v5136_v23, 0.0  ;;  %v12675_v23 = vld [vmem:[#allocation104_spill] sm:$0xff] }
 0xf7c   :  { %v5126_v54 = vpop.permute.xlu1 %5125 }
 0xf7d   :  { %v5179_v11 = vsel %vm664_vm6, %v5126_v54, 0.0  ;;  %v5314_v54 = vmul.f32 %v12579_v34, %v12579_v34 }
 0xf7e   :  { %5183 = vadd.xlane.f32.xlu0 %v5182_v44  ;;  %5180 = vadd.xlane.f32.xlu1 %v5179_v11  ;;  %v5140_v43 = vpop.permute.xlu0 %5139  ;;  %v12674_v44 = vld [vmem:[#allocation103_spill] sm:$0xff] }
 0xf7f   :  { %v5200_v18 = vsel %vm664_vm6, %v5140_v43, 0.0  ;;  %v5313_v11 = vmul.f32 %v12674_v44, %v12674_v44  ;;  %v12677_v43 = vld [vmem:[#allocation108_spill] sm:$0xff] }
 0xf80   :  { %v5130_v51 = vpop.permute.xlu1 %5129 }
 0xf81   :  { %v5185_v47 = vsel %vm664_vm6, %v5130_v51, 0.0  ;;  %v5316_v51 = vmul.f32 %v12675_v23, %v12675_v23 }
 0xf82   :  { %5189 = vadd.xlane.f32.xlu0 %v5188_v45  ;;  %5186 = vadd.xlane.f32.xlu1 %v5185_v47  ;;  %v5144_v46 = vpop.permute.xlu0 %5143  ;;  %v12676_v45 = vld [vmem:[#allocation105_spill] sm:$0xff] }
 0xf83   :  { %v5206_v10 = vsel %vm664_vm6, %v5144_v46, 0.0  ;;  %v5315_v47 = vmul.f32 %v12676_v45, %v12676_v45 }
 0xf84   :  { %v5134_v33 = vpop.permute.xlu1 %5133 }
 0xf85   :  { %v5191_v31 = vsel %vm664_vm6, %v5134_v33, 0.0  ;;  %v5318_v33 = vmul.f32 %v12677_v43, %v12677_v43 }
 0xf86   :  { %5195 = vadd.xlane.f32.xlu0 %v5194_v38  ;;  %5192 = vadd.xlane.f32.xlu1 %v5191_v31  ;;  %v12678_v38 = vld [vmem:[#allocation109_spill] sm:$0xff] }
 0xf87   :  { %v5317_v31 = vmul.f32 %v12678_v38, %v12678_v38 }
 0xf88   :  { %v5138_v53 = vpop.permute.xlu1 %5137 }
 0xf89   :  { %v5197_v25 = vsel %vm664_vm6, %v5138_v53, 0.0  ;;  %v12679_v53 = vld [vmem:[#allocation106_spill] sm:$0xff] }
 0xf8a   :  { %5201 = vadd.xlane.f32.xlu0 %v5200_v18  ;;  %5198 = vadd.xlane.f32.xlu1 %v5197_v25  ;;  %v5320_v18 = vmul.f32 %v12679_v53, %v12679_v53  ;;  %v12680_v25 = vld [vmem:[#allocation107_spill] sm:$0xff] }
 0xf8b   :  { %v5319_v46 = vmul.f32 %v12680_v25, %v12680_v25 }
 0xf8c   :  { %v5142_v0 = vpop.permute.xlu1 %5141 }
 0xf8d   :  { %v5203_v37 = vsel %vm664_vm6, %v5142_v0, 0.0 }
 0xf8e   :  { %5207 = vadd.xlane.f32.xlu0 %v5206_v10  ;;  %5204 = vadd.xlane.f32.xlu1 %v5203_v37  ;;  %v5009_v10 = vadd.f32 %v11738_v9, %v11740_v17 }
 0xf9f   :  { %5337 = vrot.lane.b32.xlu1 %v5305_v39, %s9439_s1 }
 0xfa3   :  { %5341 = vrot.lane.b32.xlu1 %v5307_v26, %s9439_s1 }
 0xfa4   :  { %5339 = vrot.lane.b32.xlu0 %v5306_v35, %s9439_s1 }
 0xfa7   :  { %5343 = vrot.lane.b32.xlu1 %v5308_v16, %s9439_s1 }
 0xfa8   :  { %5347 = vrot.lane.b32.xlu0 %v5310_v28, %s9439_s1  ;;  %v5010_v28 = vrot.slane %v5009_v10, 4 }
 0xfab   :  { %5345 = vrot.lane.b32.xlu1 %v5309_v60, %s9439_s1  ;;  %v5016_v60 = vadd.f32 %v11742_v12, %v11744_v2 }
 0xfac   :  { %5351 = vrot.lane.b32.xlu0 %v5312_v14, %s9439_s1 }
 0xfaf   :  { %5349 = vrot.lane.b32.xlu1 %v5311_v21, %s9439_s1 }
 0xfb0   :  { %5355 = vrot.lane.b32.xlu0 %v5314_v54, %s9439_s1  ;;  %v5023_v54 = vadd.f32 %v11746_v24, %v11748_v40 }
 0xfb3   :  { %5353 = vrot.lane.b32.xlu1 %v5313_v11, %s9439_s1 }
 0xfb4   :  { %5359 = vrot.lane.b32.xlu0 %v5316_v51, %s9439_s1  ;;  %v5011_v51 = vadd.f32 %v5010_v28, %v5009_v10 }
 0xfb7   :  { %5357 = vrot.lane.b32.xlu1 %v5315_v47, %s9439_s1  ;;  %v5017_v47 = vrot.slane %v5016_v60, 4 }
 0xfb8   :  { %5363 = vrot.lane.b32.xlu0 %v5318_v33, %s9439_s1 }
 0xfbb   :  { %5361 = vrot.lane.b32.xlu1 %v5317_v31, %s9439_s1  ;;  %v5024_v31 = vrot.slane %v5023_v54, 4 }
 0xfbc   :  { %5367 = vrot.lane.b32.xlu0 %v5320_v18, %s9439_s1 }
 0xfbd   :  { %v5025_v24 = vadd.f32 %v5024_v31, %v5023_v54 }
 0xfbf   :  { %5365 = vrot.lane.b32.xlu1 %v5319_v46, %s9439_s1  ;;  %v5026_v30 = vrot.slane %v5025_v24, 2 }
 0xff9   :  { %v5166_v0 = vpop.xlane.xlu0 %5165 }
 0xffb   :  { %v5163_v37 = vpop.xlane.xlu1 %5162 }
 0xffc   :  { %v5209_v39 = vadd.f32 %v5166_v0, %v5163_v37  ;;  %v5012_v0 = vrot.slane %v5011_v51, 2  ;;  %v5018_v37 = vadd.f32 %v5017_v47, %v5016_v60 }
 0xffe   :  { %v5210_v35 = vrot.slane %v5209_v39, 4  ;;  %v5013_v28 = vadd.f32 %v5012_v0, %v5011_v51 }
 0xfff   :  { %v11836_v26 = vpop.f32.mrb[78].mxu0  ;;  %v5169_v14 = vpop.xlane.xlu0 %5168 }
0x1000   :  { %v8757_v16 = vpop.f32.mrb[79].mxu0  ;;  %v5211_v21 = vadd.f32 %v5210_v35, %v5209_v39  ;;  %v5014_v54 = vrot.slane %v5013_v28, 1 }
0x1001   :  { %v5030_v16 = vadd.f32 %v11750_v49, %v11752_v63  ;;  %v5037_v49 = vadd.f32 %v11754_v42, %v11756_v3 }
0x1002   :  { %v5212_v11 = vrot.slane %v5211_v21, 2  ;;  %v5015_v42 = vadd.f32 %v5014_v54, %v5013_v28 }
0x1003   :  { %v5172_v33 = vpop.xlane.xlu0 %5171 }
0x1004   :  { %v5213_v9 = vadd.f32 %v5212_v11, %v5211_v21  ;;  %v5216_v17 = vadd.f32 %v5172_v33, %v5169_v14  ;;  %v5019_v21 = vrot.slane %v5018_v37, 2  ;;  %v5031_v14 = vrot.slane %v5030_v16, 4 }
0x1006   :  { %v5214_v18 = vrot.slane %v5213_v9, 1  ;;  %v5217_v46 = vrot.slane %v5216_v17, 4  ;;  %v5020_v31 = vadd.f32 %v5019_v21, %v5018_v37 }
0x1007   :  { %v5178_v12 = vpop.xlane.xlu0 %5177  ;;  %v5175_v2 = vpop.xlane.xlu1 %5174 }
0x1008   :  { %v5215_v39 = vadd.f32 %v5214_v18, %v5213_v9  ;;  %v5218_v35 = vadd.f32 %v5217_v46, %v5216_v17  ;;  %v5223_v48 = vadd.f32 %v5178_v12, %v5175_v2  ;;  %v5032_v18 = vadd.f32 %v5031_v14, %v5030_v16 }
0x1009   :  { %v5021_v3 = vrot.slane %v5020_v31, 1 }
0x100a   :  { %vm5265_vm4 = vcmp.gt.f32.partialorder %v5215_v39, 0.0  ;;  %v5219_v40 = vrot.slane %v5218_v35, 2  ;;  %v5224_v10 = vrot.slane %v5223_v48, 4 }
0x100b   :  { %v5184_v11 = vpop.xlane.xlu0 %5183  ;;  %v5181_v33 = vpop.xlane.xlu1 %5180  ;;  %v5273_v52 = vsel %vm5265_vm4, %v5215_v39, 1.0 }
0x100c   :  { %v5220_v5 = vadd.f32 %v5219_v40, %v5218_v35  ;;  %v5225_v60 = vadd.f32 %v5224_v10, %v5223_v48  ;;  %v5230_v47 = vadd.f32 %v5184_v11, %v5181_v33  ;;  %9272 = vrcp.f32 %v5273_v52 }
0x100d   :  { %v5027_v35 = vadd.f32 %v5026_v30, %v5025_v24  ;;  %v5038_v48 = vrot.slane %v5037_v49, 4  ;;  %v5033_v33 = vrot.slane %v5032_v18, 2  ;;  %v5044_v30 = vadd.f32 %v11758_v62, %v11760_v36 }
0x100e   :  { %v5221_v63 = vrot.slane %v5220_v5, 1  ;;  %v5226_v9 = vrot.slane %v5225_v60, 2  ;;  %v5231_v17 = vrot.slane %v5230_v47, 4 }
0x100f   :  { %v5190_v51 = vpop.xlane.xlu0 %5189  ;;  %v5187_v46 = vpop.xlane.xlu1 %5186  ;;  %v5039_v14 = vadd.f32 %v5038_v48, %v5037_v49 }
0x1010   :  { %v5222_v0 = vadd.f32 %v5221_v63, %v5220_v5  ;;  %v5227_v12 = vadd.f32 %v5226_v9, %v5225_v60  ;;  %v5232_v2 = vadd.f32 %v5231_v17, %v5230_v47  ;;  %v5237_v39 = vadd.f32 %v5190_v51, %v5187_v46 }
0x1011   :  { %v5028_v5 = vrot.slane %v5027_v35, 1  ;;  %v5051_v60 = vadd.f32 %v11762_v20, %v11764_v27  ;;  %v5022_v63 = vadd.f32 %v5021_v3, %v5020_v31  ;;  %v5034_v9 = vadd.f32 %v5033_v33, %v5032_v18 }
0x1012   :  { %vm5266_vm10 = vcmp.gt.f32.partialorder %v5222_v0, 0.0  ;;  %v5228_v40 = vrot.slane %v5227_v12, 1  ;;  %v5233_v10 = vrot.slane %v5232_v2, 2  ;;  %v5238_v11 = vrot.slane %v5237_v39, 4 }
0x1013   :  { %v5274_v61 = vsel %vm5266_vm10, %v5222_v0, 1.0  ;;  %v5196_v19 = vpop.xlane.xlu0 %5195  ;;  %v5193_v37 = vpop.xlane.xlu1 %5192  ;;  %v5040_v62 = vrot.slane %v5039_v14, 2  ;;  %v5035_v48 = vrot.slane %v5034_v9, 1  ;;  %v5058_v31 = vadd.f32 %v11766_v41, %v11768_v56 }
0x1014   :  { %9274 = vrcp.f32 %v5274_v61  ;;  %v5229_v52 = vadd.f32 %v5228_v40, %v5227_v12  ;;  %v5234_v16 = vadd.f32 %v5233_v10, %v5232_v2  ;;  %v5239_v21 = vadd.f32 %v5238_v11, %v5237_v39 }
0x1015   :  { %v5244_v24 = vadd.f32 %v5196_v19, %v5193_v37  ;;  %v5029_v2 = vadd.f32 %v5028_v5, %v5027_v35  ;;  %v5045_v19 = vrot.slane %v5044_v30, 4  ;;  %v5052_v39 = vrot.slane %v5051_v60, 4 }
0x1016   :  { %vm5267_vm14 = vcmp.gt.f32.partialorder %v5229_v52, 0.0  ;;  %v5235_v28 = vrot.slane %v5234_v16, 1  ;;  %v5240_v47 = vrot.slane %v5239_v21, 2  ;;  %v9273_v12 = vpop.eup %9272  ;;  %v5041_v35 = vadd.f32 %v5040_v62, %v5039_v14 }
0x1017   :  { %v5275_v17 = vsel %vm5267_vm14, %v5229_v52, 1.0  ;;  %v5245_v54 = vrot.slane %v5244_v24, 4  ;;  %v5202_v61 = vpop.xlane.xlu0 %5201  ;;  %v5199_v51 = vpop.xlane.xlu1 %5198  ;;  %v5046_v52 = vadd.f32 %v5045_v19, %v5044_v30  ;;  %v5036_v62 = vadd.f32 %v5035_v48, %v5034_v9 }
0x1018   :  { %9276 = vrcp.f32 %v5275_v17  ;;  %v5236_v46 = vadd.f32 %v5235_v28, %v5234_v16  ;;  %v5241_v0 = vadd.f32 %v5240_v47, %v5239_v21  ;;  %v5251_v49 = vadd.f32 %v5202_v61, %v5199_v51 }
0x1019   :  { %v5246_v36 = vadd.f32 %v5245_v54, %v5244_v24  ;;  %v5282_v16 = vmul.f32 %v9273_v12, %v5015_v42  ;;  %v5053_v24 = vadd.f32 %v5052_v39, %v5051_v60  ;;  %v5059_v17 = vrot.slane %v5058_v31, 4 }
0x101a   :  { %vm5268_vm8 = vcmp.gt.f32.partialorder %v5236_v46, 0.0  ;;  %v5242_v20 = vrot.slane %v5241_v0, 1  ;;  %v5252_v27 = vrot.slane %v5251_v49, 4  ;;  %v5047_v19 = vrot.slane %v5046_v52, 2 }
0x101b   :  { %v5276_v18 = vsel %vm5268_vm8, %v5236_v46, 1.0  ;;  %v5247_v40 = vrot.slane %v5246_v36, 2  ;;  %v5208_v10 = vpop.xlane.xlu0 %5207  ;;  %v5205_v11 = vpop.xlane.xlu1 %5204  ;;  %v5297_v14 = vsub.f32 0.0, %v5282_v16  ;;  %v5042_v39 = vrot.slane %v5041_v35, 1 }
0x101c   :  { %9278 = vrcp.f32 %v5276_v18  ;;  %v5243_v3 = vadd.f32 %v5242_v20, %v5241_v0  ;;  %v5253_v33 = vadd.f32 %v5252_v27, %v5251_v49  ;;  %v5258_v37 = vadd.f32 %v5208_v10, %v5205_v11 }
0x101d   :  { %v5248_v21 = vadd.f32 %v5247_v40, %v5246_v36  ;;  %v5054_v10 = vrot.slane %v5053_v24, 2 }
0x101e   :  { %v9275_v5 = vpop.eup %9274  ;;  %vm5269_vm9 = vcmp.gt.f32.partialorder %v5243_v3, 0.0  ;;  %v5254_v28 = vrot.slane %v5253_v33, 2  ;;  %v5259_v47 = vrot.slane %v5258_v37, 4 }
0x101f   :  { %v5284_v54 = vmul.f32 %v9275_v5, %v5022_v63  ;;  %v5277_v41 = vsel %vm5269_vm9, %v5243_v3, 1.0  ;;  %v5249_v56 = vrot.slane %v5248_v21, 1  ;;  %v5340_v61 = vpop.permute.xlu0 %5339  ;;  %v5338_v51 = vpop.permute.xlu1 %5337 }
0x1020   :  { %9280 = vrcp.f32 %v5277_v41  ;;  %v5255_v46 = vadd.f32 %v5254_v28, %v5253_v33  ;;  %v5260_v0 = vadd.f32 %v5259_v47, %v5258_v37  ;;  %v5388_v49 = vsel %vm664_vm6, %v5340_v61, 0.0 }
0x1021   :  { %v5298_v30 = vsub.f32 0.0, %v5284_v54  ;;  %v5250_v42 = vadd.f32 %v5249_v56, %v5248_v21  ;;  %v5385_v12 = vsel %vm664_vm6, %v5338_v51, 0.0  ;;  %5389 = vadd.xlane.f32.xlu0 %v5388_v49  ;;  %v5060_v37 = vadd.f32 %v5059_v17, %v5058_v31 }
0x1022   :  { %v9277_v60 = vpop.eup %9276  ;;  %v5256_v36 = vrot.slane %v5255_v46, 1  ;;  %v5261_v63 = vrot.slane %v5260_v0, 2  ;;  %5386 = vadd.xlane.f32.xlu1 %v5385_v12  ;;  %v5048_v21 = vadd.f32 %v5047_v19, %v5046_v52  ;;  %v5043_v31 = vadd.f32 %v5042_v39, %v5041_v35 }
0x1023   :  { %v5286_v20 = vmul.f32 %v9277_v60, %v5029_v2  ;;  %vm5270_vm5 = vcmp.gt.f32.partialorder %v5250_v42, 0.0  ;;  %v5348_v27 = vpop.permute.xlu0 %5347  ;;  %v5342_v18 = vpop.permute.xlu1 %5341  ;;  %v7891_v40 = vsel %vm7672_vm2, %v5298_v30, %v5297_v14  ;;  %v5055_v17 = vadd.f32 %v5054_v10, %v5053_v24 }
0x1024   :  { %v5278_v11 = vsel %vm5270_vm5, %v5250_v42, 1.0  ;;  %v5257_v3 = vadd.f32 %v5256_v36, %v5255_v46  ;;  %v5262_v33 = vadd.f32 %v5261_v63, %v5260_v0  ;;  %v5391_v9 = vsel %vm664_vm6, %v5342_v18, 0.0 }
0x1025   :  { %v5299_v16 = vsub.f32 0.0, %v5286_v20  ;;  %9282 = vrcp.f32 %v5278_v11  ;;  %5392 = vadd.xlane.f32.xlu0 %v5391_v9  ;;  %v5061_v51 = vrot.slane %v5060_v37, 2  ;;  %v5049_v49 = vrot.slane %v5048_v21, 1 }
0x1026   :  { %v9279_v48 = vpop.eup %9278  ;;  %vm5271_vm1 = vcmp.gt.f32.partialorder %v5257_v3, 0.0  ;;  %v5263_v5 = vrot.slane %v5262_v33, 1  ;;  %v5400_v35 = vsel %vm664_vm6, %v5348_v27, 0.0 }
0x1027   :  { %v5288_v2 = vmul.f32 %v9279_v48, %v5036_v62  ;;  %v5279_v28 = vsel %vm5271_vm1, %v5257_v3, 1.0  ;;  %v5352_v47 = vpop.permute.xlu0 %5351  ;;  %v5344_v54 = vpop.permute.xlu1 %5343  ;;  %v7892_v41 = vsel %vm7674_vm11, %v5299_v16, %v7891_v40  ;;  %v5056_v62 = vrot.slane %v5055_v17, 1 }
0x1028   :  { %9284 = vrcp.f32 %v5279_v28  ;;  %v5264_v56 = vadd.f32 %v5263_v5, %v5262_v33  ;;  %v5394_v61 = vsel %vm664_vm6, %v5344_v54, 0.0  ;;  %v5062_v19 = vadd.f32 %v5061_v51, %v5060_v37 }
0x1029   :  { %v5300_v46 = vsub.f32 0.0, %v5288_v2  ;;  %5395 = vadd.xlane.f32.xlu0 %v5394_v61  ;;  %v5050_v36 = vadd.f32 %v5049_v49, %v5048_v21  ;;  %v5057_v10 = vadd.f32 %v5056_v62, %v5055_v17  ;;  %v5406_v3 = vsel %vm664_vm6, %v5352_v47, 0.0  ;;  %v12684_v62 = vld [vmem:[#allocation98_spill] sm:$0xff] }
0x102a   :  { %v9281_v0 = vpop.eup %9280  ;;  %vm5272_vm7 = vcmp.gt.f32.partialorder %v5264_v56, 0.0  ;;  %v5063_v11 = vrot.slane %v5062_v19, 1 }
0x102b   :  { %v5290_v52 = vmul.f32 %v9281_v0, %v5043_v31  ;;  %v5280_v14 = vsel %vm5272_vm7, %v5264_v56, 1.0  ;;  %v5346_v30 = vpop.permute.xlu1 %5345  ;;  %v7893_v42 = vsel %vm7676_vm12, %v5300_v46, %v7892_v41  ;;  %v5356_v12 = vpop.permute.xlu0 %5355 }
0x102c   :  { %9286 = vrcp.f32 %v5280_v14  ;;  %v5397_v60 = vsel %vm664_vm6, %v5346_v30, 0.0  ;;  %v5064_v5 = vadd.f32 %v5063_v11, %v5062_v19  ;;  %v5412_v2 = vsel %vm664_vm6, %v5356_v12, 0.0 }
0x102d   :  { %5398 = vadd.xlane.f32.xlu1 %v5397_v60  ;;  %v5301_v24 = vsub.f32 0.0, %v5290_v52  ;;  %5401 = vadd.xlane.f32.xlu0 %v5400_v35  ;;  %v5590_v60 = vmul.f32 0.25, %v12619_v8  ;;  %v5591_v19 = vmul.f32 0.25, %v12684_v62 }
0x102f   :  { %v9283_v63 = vpop.eup %9282  ;;  %v5350_v39 = vpop.permute.xlu1 %5349  ;;  %v7894_v20 = vsel %vm7678_vm13, %v5301_v24, %v7893_v42 }
0x1030   :  { %v5403_v18 = vsel %vm664_vm6, %v5350_v39, 0.0  ;;  %v5292_v40 = vmul.f32 %v9283_v63, %v5050_v36  ;;  %v5360_v37 = vpop.permute.xlu0 %5359 }
0x1031   :  { %5404 = vadd.xlane.f32.xlu1 %v5403_v18  ;;  %5407 = vadd.xlane.f32.xlu0 %v5406_v3  ;;  %v5418_v17 = vsel %vm664_vm6, %v5360_v37, 0.0 }
0x1032   :  { %v9285_v33 = vpop.eup %9284  ;;  %v5302_v27 = vsub.f32 0.0, %v5292_v40 }
0x1033   :  { %v5354_v16 = vpop.permute.xlu1 %5353  ;;  %v5294_v9 = vmul.f32 %v9285_v33, %v5057_v10 }
0x1034   :  { %v5409_v48 = vsel %vm664_vm6, %v5354_v16, 0.0  ;;  %v7895_v21 = vsel %vm12681_vm0, %v5302_v27, %v7894_v20  ;;  %v5364_v61 = vpop.permute.xlu0 %5363 }
0x1035   :  { %5410 = vadd.xlane.f32.xlu1 %v5409_v48  ;;  %v5303_v28 = vsub.f32 0.0, %v5294_v9  ;;  %5413 = vadd.xlane.f32.xlu0 %v5412_v2  ;;  %v5424_v52 = vsel %vm664_vm6, %v5364_v61, 0.0 }
0x1036   :  { %v9287_v54 = vpop.eup %9286 }
0x1037   :  { %v5358_v41 = vpop.permute.xlu1 %5357  ;;  %v5296_v47 = vmul.f32 %v9287_v54, %v5064_v5  ;;  %v7896_v56 = vsel %vm12682_vm15, %v5303_v28, %v7895_v21 }
0x1038   :  { %v5415_v31 = vsel %vm664_vm6, %v5358_v41, 0.0  ;;  %v5368_v14 = vpop.permute.xlu0 %5367 }
0x1039   :  { %5416 = vadd.xlane.f32.xlu1 %v5415_v31  ;;  %v5304_v51 = vsub.f32 0.0, %v5296_v47  ;;  %5419 = vadd.xlane.f32.xlu0 %v5418_v17  ;;  %v5430_v12 = vsel %vm664_vm6, %v5368_v14, 0.0 }
0x103b   :  { %v5362_v46 = vpop.permute.xlu1 %5361  ;;  %v11871_v0 = vsel %vm12683_vm3, %v5304_v51, %v7896_v56 }
0x103c   :  { %v5421_v49 = vsel %vm664_vm6, %v5362_v46, 0.0 }
0x103d   :  { %5422 = vadd.xlane.f32.xlu1 %v5421_v49  ;;  %5425 = vadd.xlane.f32.xlu0 %v5424_v52 }
0x103f   :  { %v5366_v30 = vpop.permute.xlu1 %5365 }
0x1040   :  { %v5427_v42 = vsel %vm664_vm6, %v5366_v30, 0.0 }
0x1041   :  { %5428 = vadd.xlane.f32.xlu1 %v5427_v42  ;;  %5431 = vadd.xlane.f32.xlu0 %v5430_v12 }
0x1052   :  { %5594 = vrot.lane.b32.xlu1 %v5590_v60, %s9440_s21 }
0x1057   :  { %5596 = vrot.lane.b32.xlu0 %v5591_v19, %s9440_s21 }
0x10ae   :  { %v5390_v35 = vpop.xlane.xlu0 %5389 }
0x10af   :  { %v5387_v24 = vpop.xlane.xlu1 %5386 }
0x10b0   :  { %v5433_v36 = vadd.f32 %v5390_v35, %v5387_v24 }
0x10b2   :  { %v5434_v63 = vrot.slane %v5433_v36, 4  ;;  %v5393_v39 = vpop.xlane.xlu0 %5392 }
0x10b4   :  { %v5435_v20 = vadd.f32 %v5434_v63, %v5433_v36 }
0x10b6   :  { %v5436_v18 = vrot.slane %v5435_v20, 2  ;;  %v5396_v40 = vpop.xlane.xlu0 %5395 }
0x10b7   :  { %v5440_v11 = vadd.f32 %v5396_v40, %v5393_v39 }
0x10b8   :  { %v5437_v10 = vadd.f32 %v5436_v18, %v5435_v20 }
0x10b9   :  { %v5441_v33 = vrot.slane %v5440_v11, 4 }
0x10ba   :  { %v5438_v3 = vrot.slane %v5437_v10, 1  ;;  %v5399_v37 = vpop.xlane.xlu1 %5398  ;;  %v5402_v27 = vpop.xlane.xlu0 %5401 }
0x10bb   :  { %v5442_v16 = vadd.f32 %v5441_v33, %v5440_v11  ;;  %v5447_v9 = vadd.f32 %v5402_v27, %v5399_v37 }
0x10bc   :  { %v5439_v8 = vadd.f32 %v5438_v3, %v5437_v10 }
0x10bd   :  { %v5443_v48 = vrot.slane %v5442_v16, 2  ;;  %v5448_v5 = vrot.slane %v5447_v9, 4 }
0x10be   :  { %9288 = vrsqrt.f32 %v5439_v8  ;;  %v5405_v21 = vpop.xlane.xlu1 %5404  ;;  %v5408_v2 = vpop.xlane.xlu0 %5407  ;;  %vm5491_vm4 = vcmp.eq.f32.partialorder %v5439_v8, inf  ;;  %v5494_v40 = vand.u32 2147483648, %v5439_v8  ;;  %vm5493_vm10 = vcmp.eq.f32.partialorder %v5439_v8, 0.0 }
0x10bf   :  { %v5444_v28 = vadd.f32 %v5443_v48, %v5442_v16  ;;  %v5454_v54 = vadd.f32 %v5408_v2, %v5405_v21  ;;  %v5449_v41 = vadd.f32 %v5448_v5, %v5447_v9 }
0x10c1   :  { %v5445_v47 = vrot.slane %v5444_v28, 1  ;;  %v5455_v56 = vrot.slane %v5454_v54, 4  ;;  %v5450_v31 = vrot.slane %v5449_v41, 2 }
0x10c2   :  { %v5411_v61 = vpop.xlane.xlu1 %5410  ;;  %v5414_v17 = vpop.xlane.xlu0 %5413 }
0x10c3   :  { %v5446_v51 = vadd.f32 %v5445_v47, %v5444_v28  ;;  %v5456_v46 = vadd.f32 %v5455_v56, %v5454_v54  ;;  %v5461_v49 = vadd.f32 %v5414_v17, %v5411_v61  ;;  %v5451_v52 = vadd.f32 %v5450_v31, %v5449_v41 }
0x10c5   :  { %9290 = vrsqrt.f32 %v5446_v51  ;;  %v5457_v14 = vrot.slane %v5456_v46, 2  ;;  %v5452_v42 = vrot.slane %v5451_v52, 1  ;;  %v5462_v12 = vrot.slane %v5461_v49, 4 }
0x10c6   :  { %v5417_v30 = vpop.xlane.xlu1 %5416  ;;  %v5420_v60 = vpop.xlane.xlu0 %5419  ;;  %vm5498_vm8 = vcmp.eq.f32.partialorder %v5446_v51, inf  ;;  %vm5500_vm9 = vcmp.eq.f32.partialorder %v5446_v51, 0.0 }
0x10c7   :  { %v5458_v19 = vadd.f32 %v5457_v14, %v5456_v46  ;;  %v5468_v35 = vadd.f32 %v5420_v60, %v5417_v30  ;;  %v11879_v36 = vadd.f32 %v5452_v42, %v5451_v52  ;;  %v5463_v63 = vadd.f32 %v5462_v12, %v5461_v49 }
0x10c8   :  { %v9289_v62 = vpop.eup %9288  ;;  %v5501_v49 = vand.u32 2147483648, %v5446_v51 }
0x10c9   :  { %v5490_v24 = vmul.f32 %v9289_v62, %v5439_v8  ;;  %v5459_v39 = vrot.slane %v5458_v19, 1  ;;  %v5469_v20 = vrot.slane %v5468_v35, 4  ;;  %9292 = vrsqrt.f32 %v11879_v36 }
0x10ca   :  { %v5423_v18 = vpop.xlane.xlu1 %5422  ;;  %v5464_v10 = vrot.slane %v5463_v63, 2  ;;  %v5426_v11 = vpop.xlane.xlu0 %5425  ;;  %vm5505_vm5 = vcmp.eq.f32.partialorder %v11879_v36, inf  ;;  %vm5507_vm7 = vcmp.eq.f32.partialorder %v11879_v36, 0.0 }
0x10cb   :  { %v11882_v3 = vadd.f32 %v5459_v39, %v5458_v19  ;;  %v5470_v33 = vadd.f32 %v5469_v20, %v5468_v35  ;;  %v5475_v37 = vadd.f32 %v5426_v11, %v5423_v18  ;;  %v5492_v27 = vsel %vm5491_vm4, %v5439_v8, %v5490_v24 }
0x10cc   :  { %v5465_v16 = vadd.f32 %v5464_v10, %v5463_v63  ;;  %v5495_v9 = vsel %vm5493_vm10, %v5494_v40, %v5492_v27  ;;  %v5508_v39 = vand.u32 2147483648, %v11879_v36 }
0x10cd   :  { %9294 = vrsqrt.f32 %v11882_v3  ;;  %v5471_v48 = vrot.slane %v5470_v33, 2  ;;  %v5476_v2 = vrot.slane %v5475_v37, 4  ;;  %vm5545_vm14 = vcmp.gt.f32.partialorder %v5495_v9, 0.0 }
0x10ce   :  { %v5429_v21 = vpop.xlane.xlu1 %5428  ;;  %v5466_v5 = vrot.slane %v5465_v16, 1  ;;  %v5432_v28 = vpop.xlane.xlu0 %5431  ;;  %v5553_v56 = vsel %vm5545_vm14, %v5495_v9, 1.0  ;;  %vm5512_vm0 = vcmp.eq.f32.partialorder %v11882_v3, inf  ;;  %vm5514_vm15 = vcmp.eq.f32.partialorder %v11882_v3, 0.0 }
0x10cf   :  { %v9291_v54 = vpop.eup %9290  ;;  %v5472_v41 = vadd.f32 %v5471_v48, %v5470_v33  ;;  %v5482_v47 = vadd.f32 %v5432_v28, %v5429_v21  ;;  %v5477_v17 = vadd.f32 %v5476_v2, %v5475_v37  ;;  %9296 = vrcp.f32 %v5553_v56 }
0x10d0   :  { %v5497_v61 = vmul.f32 %v9291_v54, %v5446_v51  ;;  %v11885_v31 = vadd.f32 %v5466_v5, %v5465_v16  ;;  %v5515_v37 = vand.u32 2147483648, %v11882_v3 }
0x10d1   :  { %v5473_v8 = vrot.slane %v5472_v41, 1  ;;  %v5483_v46 = vrot.slane %v5482_v47, 4  ;;  %v5478_v52 = vrot.slane %v5477_v17, 2 }
0x10d2   :  { %9298 = vrsqrt.f32 %v11885_v31  ;;  %v5499_v42 = vsel %vm5498_vm8, %v5446_v51, %v5497_v61  ;;  %v11902_v16 = vpop.permute.xlu1 %5594  ;;  %vm5519_vm4 = vcmp.eq.f32.partialorder %v11885_v31, inf  ;;  %v5522_v56 = vand.u32 2147483648, %v11885_v31 }
0x10d3   :  { %v11888_v14 = vadd.f32 %v5473_v8, %v5472_v41  ;;  %v5484_v30 = vadd.f32 %v5483_v46, %v5482_v47  ;;  %v9293_v12 = vpop.eup %9292  ;;  %v5479_v60 = vadd.f32 %v5478_v52, %v5477_v17  ;;  %v5502_v62 = vsel %vm5500_vm9, %v5501_v49, %v5499_v42 }
0x10d4   :  { %v5504_v19 = vmul.f32 %v9293_v12, %v11879_v36  ;;  %vm5546_vm1 = vcmp.gt.f32.partialorder %v5502_v62, 0.0  ;;  %vm5521_vm14 = vcmp.eq.f32.partialorder %v11885_v31, 0.0 }
0x10d5   :  { %9300 = vrsqrt.f32 %v11888_v14  ;;  %v5480_v35 = vrot.slane %v5479_v60, 1  ;;  %v5485_v24 = vrot.slane %v5484_v30, 2  ;;  %v5554_v20 = vsel %vm5546_vm1, %v5502_v62, 1.0 }
0x10d6   :  { %v5506_v18 = vsel %vm5505_vm5, %v11879_v36, %v5504_v19  ;;  %9302 = vrcp.f32 %v5554_v20  ;;  %v11905_v36 = vpop.permute.xlu0 %5596  ;;  %vm5526_vm8 = vcmp.eq.f32.partialorder %v11888_v14, inf  ;;  %v5529_v49 = vand.u32 2147483648, %v11888_v14 }
0x10d7   :  { %v9295_v63 = vpop.eup %9294  ;;  %v11897_v40 = vadd.f32 %v5480_v35, %v5479_v60  ;;  %v5486_v10 = vadd.f32 %v5485_v24, %v5484_v30  ;;  %v5509_v11 = vsel %vm5507_vm7, %v5508_v39, %v5506_v18  ;;  %vm5528_vm5 = vcmp.eq.f32.partialorder %v11888_v14, 0.0 }
0x10d8   :  { %v5511_v51 = vmul.f32 %v9295_v63, %v11882_v3  ;;  %vm5547_vm3 = vcmp.gt.f32.partialorder %v5509_v11, 0.0 }
0x10d9   :  { %v9297_v33 = vpop.eup %9296  ;;  %9304 = vrsqrt.f32 %v11897_v40  ;;  %v5487_v27 = vrot.slane %v5486_v10, 1  ;;  %v5555_v28 = vsel %vm5547_vm3, %v5509_v11, 1.0  ;;  %vm5533_vm7 = vcmp.eq.f32.partialorder %v11897_v40, inf }
0x10da   :  { %v5562_v9 = vmul.f32 %v9297_v33, %v10750_v15  ;;  %v5563_v48 = vmul.f32 %v9297_v33, %v10745_v4  ;;  %v5513_v21 = vsel %vm5512_vm0, %v11882_v3, %v5511_v51  ;;  %9306 = vrcp.f32 %v5555_v28 }
0x10db   :  { %v11910_v2 = vadd.f32 %v5487_v27, %v5486_v10  ;;  %v5516_v54 = vsel %vm5514_vm15, %v5515_v37, %v5513_v21  ;;  %vm5535_vm0 = vcmp.eq.f32.partialorder %v11897_v40, 0.0 }
0x10dc   :  { %v9299_v5 = vpop.eup %9298  ;;  %v5600_v47 = vsub.f32 %v5562_v9, %v11902_v16  ;;  %v5601_v4 = vsub.f32 %v5563_v48, %v11905_v36  ;;  %vm5548_vm10 = vcmp.gt.f32.partialorder %v5516_v54, 0.0 }
0x10dd   :  { %v5518_v41 = vmul.f32 %v9299_v5, %v11885_v31  ;;  %9308 = vrsqrt.f32 %v11910_v2  ;;  %v5556_v61 = vsel %vm5548_vm10, %v5516_v54, 1.0  ;;  %vm5540_vm15 = vcmp.eq.f32.partialorder %v11910_v2, inf }
0x10de   :  { %v5616_v3 = vmul.f32 %v5600_v47, %v5600_v47  ;;  %9310 = vrcp.f32 %v5556_v61  ;;  %v5617_v30 = vmul.f32 %v5601_v4, %v5601_v4  ;;  %v5543_v27 = vand.u32 2147483648, %v11910_v2 }
0x10df   :  { %v9301_v15 = vpop.eup %9300  ;;  %v5520_v17 = vsel %vm5519_vm4, %v11885_v31, %v5518_v41  ;;  %vm5542_vm4 = vcmp.eq.f32.partialorder %v11910_v2, 0.0 }
0x10e0   :  { %v5525_v8 = vmul.f32 %v9301_v15, %v11888_v14  ;;  %v5523_v46 = vsel %vm5521_vm14, %v5522_v56, %v5520_v17  ;;  %5648 = vrot.lane.b32.xlu1 %v5616_v3, %s9439_s1  ;;  %v9303_v52 = vpop.eup %9302  ;;  %vm7838_vm14 = vcmask 31744  }
0x10e1   :  { %vm5549_vm9 = vcmp.gt.f32.partialorder %v5523_v46, 0.0  ;;  %v5566_v31 = vmul.f32 %v9303_v52, %v10761_v59  ;;  %v5565_v60 = vmul.f32 %v9303_v52, %v10766_v29 }
0x10e2   :  { %v5557_v42 = vsel %vm5549_vm9, %v5523_v46, 1.0  ;;  %v5527_v12 = vsel %vm5526_vm8, %v11888_v14, %v5525_v8  ;;  %v5536_v14 = vand.u32 2147483648, %v11897_v40 }
0x10e3   :  { %9312 = vrcp.f32 %v5557_v42  ;;  %v5530_v62 = vsel %vm5528_vm5, %v5529_v49, %v5527_v12  ;;  %v9305_v19 = vpop.eup %9304  ;;  %v5603_v24 = vsub.f32 %v5566_v31, %v11905_v36  ;;  %v5602_v63 = vsub.f32 %v5565_v60, %v11902_v16 }
0x10e4   :  { %vm5550_vm1 = vcmp.gt.f32.partialorder %v5530_v62, 0.0  ;;  %v5532_v35 = vmul.f32 %v9305_v19, %v11897_v40  ;;  %5650 = vrot.lane.b32.xlu1 %v5617_v30, %s9439_s1  ;;  %v9307_v59 = vpop.eup %9306 }
0x10e5   :  { %v5558_v39 = vsel %vm5550_vm1, %v5530_v62, 1.0  ;;  %v5619_v29 = vmul.f32 %v5603_v24, %v5603_v24  ;;  %v5618_v20 = vmul.f32 %v5602_v63, %v5602_v63  ;;  %v5569_v10 = vmul.f32 %v9307_v59, %v12575_v7 }
0x10e6   :  { %9314 = vrcp.f32 %v5558_v39  ;;  %v5534_v18 = vsel %vm5533_vm7, %v11897_v40, %v5532_v35  ;;  %v5568_v11 = vmul.f32 %v9307_v59, %v12574_v32 }
0x10e7   :  { %v9309_v51 = vpop.eup %9308  ;;  %v5537_v33 = vsel %vm5535_vm0, %v5536_v14, %v5534_v18  ;;  %5654 = vrot.lane.b32.xlu0 %v5619_v29, %s9439_s1  ;;  %v5605_v40 = vsub.f32 %v5569_v10, %v11905_v36 }
0x10e8   :  { %v5539_v37 = vmul.f32 %v9309_v51, %v11910_v2  ;;  %5652 = vrot.lane.b32.xlu1 %v5618_v20, %s9439_s1  ;;  %vm5551_vm3 = vcmp.gt.f32.partialorder %v5537_v33, 0.0  ;;  %v9311_v9 = vpop.eup %9310  ;;  %v5604_v48 = vsub.f32 %v5568_v11, %v11902_v16 }
0x10e9   :  { %v5559_v7 = vsel %vm5551_vm3, %v5537_v33, 1.0  ;;  %v5572_v32 = vmul.f32 %v9311_v9, %v12577_v57  ;;  %v5571_v21 = vmul.f32 %v9311_v9, %v12576_v13  ;;  %v5621_v28 = vmul.f32 %v5605_v40, %v5605_v40 }
0x10ea   :  { %9316 = vrcp.f32 %v5559_v7  ;;  %v5541_v5 = vsel %vm5540_vm15, %v11910_v2, %v5539_v37  ;;  %v5620_v54 = vmul.f32 %v5604_v48, %v5604_v48 }
0x10eb   :  { %v5544_v41 = vsel %vm5542_vm4, %v5543_v27, %v5541_v5  ;;  %v5607_v56 = vsub.f32 %v5572_v32, %v11905_v36  ;;  %v5606_v4 = vsub.f32 %v5571_v21, %v11902_v16  ;;  %5658 = vrot.lane.b32.xlu0 %v5621_v28, %s9439_s1 }
0x10ec   :  { %vm5552_vm10 = vcmp.gt.f32.partialorder %v5544_v41, 0.0  ;;  %5656 = vrot.lane.b32.xlu1 %v5620_v54, %s9439_s1 }
0x10ed   :  { %v9313_v47 = vpop.eup %9312  ;;  %v5560_v15 = vsel %vm5552_vm10, %v5544_v41, 1.0  ;;  %v5623_v3 = vmul.f32 %v5607_v56, %v5607_v56  ;;  %v5622_v2 = vmul.f32 %v5606_v4, %v5606_v4 }
0x10ee   :  { %v5575_v57 = vmul.f32 %v9313_v47, %v12579_v34  ;;  %v5574_v13 = vmul.f32 %v9313_v47, %v12674_v44  ;;  %9318 = vrcp.f32 %v5560_v15 }
0x10ef   :  { %5662 = vrot.lane.b32.xlu0 %v5623_v3, %s9439_s1 }
0x10f0   :  { %v9315_v61 = vpop.eup %9314  ;;  %v5609_v17 = vsub.f32 %v5575_v57, %v11905_v36  ;;  %v5608_v8 = vsub.f32 %v5574_v13, %v11902_v16  ;;  %5660 = vrot.lane.b32.xlu1 %v5622_v2, %s9439_s1  ;;  %v8089_v13 = vld [vmem:[%s12245_s3 + $0x4] ss:$0 sm:$0xff]  ;;  %s9441_s3 = smov [#allocation5]  }
0x10f1   :  { %v5578_v46 = vmul.f32 %v9315_v61, %v12675_v23  ;;  %v5577_v49 = vmul.f32 %v9315_v61, %v12676_v45  ;;  %v11997_v2 = vadd.f32 %v8089_v13, %v11836_v26  ;;  %s7929_s24 = sshll.u32 %s9441_s3, 4  ;;  %s7930_s24 = int_to_ptr.vmem [resolvable:$true] %s7929_s24 }
0x10f2   :  { %v5625_v34 = vmul.f32 %v5609_v17, %v5609_v17  ;;  %v5624_v52 = vmul.f32 %v5608_v8, %v5608_v8  ;;  %s9402_s25 = scalar_lea.vmem %s7930_s24, 128  ;;  %p9407_p9 = scmp.lt.s32.totalorder %s7930_s24, %s7930_s24 }
0x10f3   :  { %v5611_v44 = vsub.f32 %v5578_v46, %v11905_v36  ;;  %v5610_v30 = vsub.f32 %v5577_v49, %v11902_v16  ;;  %v7839_v46 = vsel %vm7838_vm14, %v11997_v2, -inf  ;;  %p9403_p8 = scmp.ne.s32.totalorder %s7930_s24, %s9402_s25  ;;  %p9408_p10 = scmp.lt.s32.totalorder %s9402_s25, %s9402_s25 }
0x10f4   :  { %v9317_v42 = vpop.eup %9316  ;;  %5666 = vrot.lane.b32.xlu0 %v5625_v34, %s9439_s1  ;;  %5664 = vrot.lane.b32.xlu1 %v5624_v52, %s9439_s1 }
0x10f5   :  { %v5627_v12 = vmul.f32 %v5611_v44, %v5611_v44  ;;  %v5626_v31 = vmul.f32 %v5610_v30, %v5610_v30  ;;  %v5581_v23 = vmul.f32 %v9317_v42, %v12677_v43  ;;  %v5580_v45 = vmul.f32 %v9317_v42, %v12678_v38  ;;  %p9409_p11 = por %p9408_p10, %p9407_p9 }
0x10f7   :  { %v5613_v60 = vsub.f32 %v5581_v23, %v11905_v36  ;;  %v5612_v62 = vsub.f32 %v5580_v45, %v11902_v16  ;;  %p9410_p12 = pnand %p9409_p11, %p9403_p8 }
0x10f8   :  { %v9319_v19 = vpop.eup %9318  ;;  %5670 = vrot.lane.b32.xlu0 %v5627_v12, %s9439_s1  ;;  %5668 = vrot.lane.b32.xlu1 %v5626_v31, %s9439_s1 }
0x10f9   :  { %v5629_v35 = vmul.f32 %v5613_v60, %v5613_v60  ;;  %v5628_v24 = vmul.f32 %v5612_v62, %v5612_v62  ;;  %v5584_v63 = vmul.f32 %v9319_v19, %v12679_v53  ;;  %v5583_v39 = vmul.f32 %v9319_v19, %v12680_v25 }
0x10fb   :  { %v5615_v14 = vsub.f32 %v5584_v63, %v11905_v36  ;;  %v5614_v43 = vsub.f32 %v5583_v39, %v11902_v16 }
0x10fc   :  { %5674 = vrot.lane.b32.xlu0 %v5629_v35, %s9439_s1  ;;  %5672 = vrot.lane.b32.xlu1 %v5628_v24, %s9439_s1 }
0x10fd   :  { %v5631_v38 = vmul.f32 %v5615_v14, %v5615_v14  ;;  %v5630_v59 = vmul.f32 %v5614_v43, %v5614_v43 }
0x1100   :  { %5678 = vrot.lane.b32.xlu0 %v5631_v38, %s9439_s1  ;;  %5676 = vrot.lane.b32.xlu1 %v5630_v59, %s9439_s1 }
0x1152   :  { %v5649_v29 = vpop.permute.xlu1 %5648 }
0x1153   :  { %v5696_v20 = vsel %vm664_vm6, %v5649_v29, 0.0 }
0x1154   :  { %5697 = vadd.xlane.f32.xlu1 %v5696_v20 }
0x1156   :  { %v5651_v53 = vpop.permute.xlu1 %5650 }
0x1157   :  { %v5699_v25 = vsel %vm664_vm6, %v5651_v53, 0.0 }
0x1158   :  { %5700 = vadd.xlane.f32.xlu0 %v5699_v25 }
0x1159   :  { %v5655_v36 = vpop.permute.xlu0 %5654 }
0x115a   :  { %v5653_v16 = vpop.permute.xlu1 %5652  ;;  %v5705_v51 = vsel %vm664_vm6, %v5655_v36, 0.0 }
0x115b   :  { %v5702_v18 = vsel %vm664_vm6, %v5653_v16, 0.0 }
0x115c   :  { %5703 = vadd.xlane.f32.xlu0 %v5702_v18 }
0x115d   :  { %v5659_v10 = vpop.permute.xlu0 %5658 }
0x115e   :  { %v5657_v11 = vpop.permute.xlu1 %5656  ;;  %v5711_v37 = vsel %vm664_vm6, %v5659_v10, 0.0 }
0x115f   :  { %v5708_v33 = vsel %vm664_vm6, %v5657_v11, 0.0 }
0x1160   :  { %5706 = vadd.xlane.f32.xlu0 %v5705_v51  ;;  %5709 = vadd.xlane.f32.xlu1 %v5708_v33 }
0x1161   :  { %v5663_v27 = vpop.permute.xlu0 %5662 }
0x1162   :  { %v5661_v9 = vpop.permute.xlu1 %5660  ;;  %v5717_v48 = vsel %vm664_vm6, %v5663_v27, 0.0 }
0x1163   :  { %v5714_v40 = vsel %vm664_vm6, %v5661_v9, 0.0 }
0x1164   :  { %5712 = vadd.xlane.f32.xlu0 %v5711_v37  ;;  %5715 = vadd.xlane.f32.xlu1 %v5714_v40 }
0x1166   :  { %v5667_v7 = vpop.permute.xlu0 %5666  ;;  %v5665_v32 = vpop.permute.xlu1 %5664 }
0x1167   :  { %v5720_v21 = vsel %vm664_vm6, %v5665_v32, 0.0  ;;  %v5723_v5 = vsel %vm664_vm6, %v5667_v7, 0.0 }
0x1168   :  { %5718 = vadd.xlane.f32.xlu0 %v5717_v48  ;;  %5721 = vadd.xlane.f32.xlu1 %v5720_v21 }
0x116a   :  { %v5671_v28 = vpop.permute.xlu0 %5670  ;;  %v5669_v54 = vpop.permute.xlu1 %5668 }
0x116b   :  { %v5726_v41 = vsel %vm664_vm6, %v5669_v54, 0.0  ;;  %v5729_v47 = vsel %vm664_vm6, %v5671_v28, 0.0 }
0x116c   :  { %5724 = vadd.xlane.f32.xlu0 %v5723_v5  ;;  %5727 = vadd.xlane.f32.xlu1 %v5726_v41 }
0x116e   :  { %v5675_v56 = vpop.permute.xlu0 %5674  ;;  %v5673_v4 = vpop.permute.xlu1 %5672 }
0x116f   :  { %v5732_v57 = vsel %vm664_vm6, %v5673_v4, 0.0  ;;  %v5735_v15 = vsel %vm664_vm6, %v5675_v56, 0.0 }
0x1170   :  { %5730 = vadd.xlane.f32.xlu0 %v5729_v47  ;;  %5733 = vadd.xlane.f32.xlu1 %v5732_v57 }
0x1172   :  { %v5677_v3 = vpop.permute.xlu1 %5676  ;;  %v5679_v61 = vpop.permute.xlu0 %5678 }
0x1173   :  { %v5738_v17 = vsel %vm664_vm6, %v5677_v3, 0.0  ;;  %v5741_v8 = vsel %vm664_vm6, %v5679_v61, 0.0 }
0x1174   :  { %5736 = vadd.xlane.f32.xlu0 %v5735_v15  ;;  %5739 = vadd.xlane.f32.xlu1 %v5738_v17 }
0x1178   :  { %5742 = vadd.xlane.f32.xlu0 %v5741_v8  ;;  %7840 = vmax.xlane.f32.xlu1 %v7839_v46 }
0x11e1   :  { %v5698_v49 = vpop.xlane.xlu1 %5697 }
0x11e5   :  { %v5701_v34 = vpop.xlane.xlu0 %5700 }
0x11e6   :  { %v5744_v52 = vadd.f32 %v5701_v34, %v5698_v49 }
0x11e8   :  { %v5745_v44 = vrot.slane %v5744_v52, 4 }
0x11e9   :  { %v5704_v30 = vpop.xlane.xlu0 %5703 }
0x11ea   :  { %v5746_v26 = vadd.f32 %v5745_v44, %v5744_v52 }
0x11ec   :  { %v5747_v42 = vrot.slane %v5746_v26, 2 }
0x11ed   :  { %v5707_v12 = vpop.xlane.xlu0 %5706  ;;  %v5710_v45 = vpop.xlane.xlu1 %5709 }
0x11ee   :  { %v5748_v31 = vadd.f32 %v5747_v42, %v5746_v26  ;;  %v5751_v23 = vadd.f32 %v5707_v12, %v5704_v30 }
0x11f0   :  { %v5752_v60 = vrot.slane %v5751_v23, 4  ;;  %v5749_v19 = vrot.slane %v5748_v31, 1 }
0x11f1   :  { %v5713_v62 = vpop.xlane.xlu0 %5712  ;;  %v5716_v63 = vpop.xlane.xlu1 %5715 }
0x11f2   :  { %v5753_v35 = vadd.f32 %v5752_v60, %v5751_v23  ;;  %v5758_v24 = vadd.f32 %v5713_v62, %v5710_v45  ;;  %v12003_v38 = vadd.f32 %v5749_v19, %v5748_v31 }
0x11f4   :  { %v5754_v39 = vrot.slane %v5753_v35, 2  ;;  %v5759_v14 = vrot.slane %v5758_v24, 4  ;;  %9320 = vrsqrt.f32 %v12003_v38  ;;  %vm5802_vm6 = vcmp.eq.f32.partialorder %v12003_v38, inf }
0x11f5   :  { %v5719_v43 = vpop.xlane.xlu0 %5718  ;;  %v5722_v20 = vpop.xlane.xlu1 %5721  ;;  %v5805_v19 = vand.u32 2147483648, %v12003_v38  ;;  %vm5804_vm5 = vcmp.eq.f32.partialorder %v12003_v38, 0.0 }
0x11f6   :  { %v5755_v59 = vadd.f32 %v5754_v39, %v5753_v35  ;;  %v5765_v29 = vadd.f32 %v5719_v43, %v5716_v63  ;;  %v5760_v53 = vadd.f32 %v5759_v14, %v5758_v24 }
0x11f8   :  { %v5756_v25 = vrot.slane %v5755_v59, 1  ;;  %v5766_v36 = vrot.slane %v5765_v29, 4  ;;  %v5761_v16 = vrot.slane %v5760_v53, 2 }
0x11f9   :  { %v5725_v18 = vpop.xlane.xlu0 %5724  ;;  %v5728_v33 = vpop.xlane.xlu1 %5727 }
0x11fa   :  { %v12006_v51 = vadd.f32 %v5756_v25, %v5755_v59  ;;  %v5767_v10 = vadd.f32 %v5766_v36, %v5765_v29  ;;  %v5772_v11 = vadd.f32 %v5725_v18, %v5722_v20  ;;  %v5762_v37 = vadd.f32 %v5761_v16, %v5760_v53 }
0x11fc   :  { %9322 = vrsqrt.f32 %v12006_v51  ;;  %v5768_v27 = vrot.slane %v5767_v10, 2  ;;  %v5763_v9 = vrot.slane %v5762_v37, 1  ;;  %v5773_v40 = vrot.slane %v5772_v11, 4 }
0x11fd   :  { %v5731_v48 = vpop.xlane.xlu0 %5730  ;;  %v5734_v21 = vpop.xlane.xlu1 %5733  ;;  %vm5809_vm8 = vcmp.eq.f32.partialorder %v12006_v51, inf  ;;  %vm5811_vm9 = vcmp.eq.f32.partialorder %v12006_v51, 0.0 }
0x11fe   :  { %v5769_v7 = vadd.f32 %v5768_v27, %v5767_v10  ;;  %v5779_v32 = vadd.f32 %v5731_v48, %v5728_v33  ;;  %v5764_v5 = vadd.f32 %v5763_v9, %v5762_v37  ;;  %v5774_v28 = vadd.f32 %v5773_v40, %v5772_v11  ;;  %v9321_v61 = vpop.eup %9320 }
0x11ff   :  { %v5801_v42 = vmul.f32 %v9321_v61, %v12003_v38 }
0x1200   :  { %v5770_v54 = vrot.slane %v5769_v7, 1  ;;  %v5780_v41 = vrot.slane %v5779_v32, 4  ;;  %9324 = vrsqrt.f32 %v5764_v5  ;;  %v5775_v47 = vrot.slane %v5774_v28, 2 }
0x1201   :  { %v5737_v56 = vpop.xlane.xlu0 %5736  ;;  %v5740_v15 = vpop.xlane.xlu1 %5739  ;;  %v5803_v59 = vsel %vm5802_vm6, %v12003_v38, %v5801_v42  ;;  %vm5816_vm1 = vcmp.eq.f32.partialorder %v5764_v5, inf  ;;  %v5819_v36 = vand.u32 2147483648, %v5764_v5  ;;  %vm5818_vm7 = vcmp.eq.f32.partialorder %v5764_v5, 0.0 }
0x1202   :  { %v12009_v4 = vadd.f32 %v5770_v54, %v5769_v7  ;;  %v5781_v57 = vadd.f32 %v5780_v41, %v5779_v32  ;;  %v5786_v13 = vadd.f32 %v5737_v56, %v5734_v21  ;;  %v5776_v3 = vadd.f32 %v5775_v47, %v5774_v28 }
0x1203   :  { %v5806_v33 = vsel %vm5804_vm5, %v5805_v19, %v5803_v59  ;;  %v12689_v19 = vld [vmem:[#allocation10_spill] sm:$0xff]  ;;  %v12692_v59 = vld [vmem:[#allocation13_spill] sm:$0xff] }
0x1204   :  { %9326 = vrsqrt.f32 %v12009_v4  ;;  %v5782_v17 = vrot.slane %v5781_v57, 2  ;;  %v5787_v8 = vrot.slane %v5786_v13, 4  ;;  %v5777_v46 = vrot.slane %v5776_v3, 1 }
0x1205   :  { %v5743_v49 = vpop.xlane.xlu0 %5742  ;;  %v7841_v26 = vpop.xlane.xlu1 %7840  ;;  %vm5823_vm0 = vcmp.eq.f32.partialorder %v12009_v4, inf  ;;  %v5826_v9 = vand.u32 2147483648, %v12009_v4  ;;  %vm5825_vm15 = vcmp.eq.f32.partialorder %v12009_v4, 0.0 }
0x1206   :  { %v9323_v34 = vpop.eup %9322  ;;  %v5783_v52 = vadd.f32 %v5782_v17, %v5781_v57  ;;  %v5788_v44 = vadd.f32 %v5787_v8, %v5786_v13  ;;  %v5793_v30 = vadd.f32 %v5743_v49, %v5740_v15  ;;  %v5778_v31 = vadd.f32 %v5777_v46, %v5776_v3 }
0x1207   :  { %v5808_v12 = vmul.f32 %v9323_v34, %v12006_v51  ;;  %v12015_v23 = vsub.f32 %v11997_v2, %v7841_v26  ;;  %v5812_v2 = vand.u32 2147483648, %v12006_v51 }
0x1208   :  { %v5784_v45 = vrot.slane %v5783_v52, 1  ;;  %v5789_v60 = vrot.slane %v5788_v44, 2  ;;  %v5794_v62 = vrot.slane %v5793_v30, 4  ;;  %9328 = vrsqrt.f32 %v5778_v31 }
0x1209   :  { %v7843_v35 = vmul.f32 1.442695, %v12015_v23  ;;  %v5810_v14 = vsel %vm5809_vm8, %v12006_v51, %v5808_v12  ;;  %vm5830_vm3 = vcmp.eq.f32.partialorder %v5778_v31, inf  ;;  %v5833_v41 = vand.u32 2147483648, %v5778_v31 }
0x120a   :  { %v5785_v24 = vadd.f32 %v5784_v45, %v5783_v52  ;;  %v5790_v63 = vadd.f32 %v5789_v60, %v5788_v44  ;;  %v5795_v39 = vadd.f32 %v5794_v62, %v5793_v30  ;;  %v9325_v43 = vpop.eup %9324  ;;  %v5813_v25 = vsel %vm5811_vm9, %v5812_v2, %v5810_v14  ;;  %v12688_v62 = vld [vmem:[#allocation27_spill] sm:$0xff] }
0x120b   :  { %9330 = vpow2.f32 %v7843_v35  ;;  %v5815_v29 = vmul.f32 %v9325_v43, %v5764_v5  ;;  %v7907_v38 = vsel %vm7672_vm2, %v5813_v25, %v5806_v33  ;;  %vm5832_vm4 = vcmp.eq.f32.partialorder %v5778_v31, 0.0  ;;  %v12695_v33 = vld [vmem:[#allocation30_spill] sm:$0xff] }
0x120c   :  { %9332 = vrsqrt.f32 %v5785_v24  ;;  %v5791_v20 = vrot.slane %v5790_v63, 1  ;;  %v5796_v53 = vrot.slane %v5795_v39, 2  ;;  %vm5837_vm10 = vcmp.eq.f32.partialorder %v5785_v24, inf }
0x120d   :  { %v5817_v11 = vsel %vm5816_vm1, %v5764_v5, %v5815_v29  ;;  %v5840_v15 = vand.u32 2147483648, %v5785_v24  ;;  %vm5839_vm6 = vcmp.eq.f32.partialorder %v5785_v24, 0.0  ;;  %vm12685_vm8 = vcmask 1045509   ;;  %v12693_v29 = vld [vmem:[#allocation29_spill] sm:$0xff] }
0x120e   :  { %v9327_v16 = vpop.eup %9326  ;;  %v5792_v18 = vadd.f32 %v5791_v20, %v5790_v63  ;;  %v5797_v10 = vadd.f32 %v5796_v53, %v5795_v39  ;;  %v5820_v37 = vsel %vm5818_vm7, %v5819_v36, %v5817_v11  ;;  %vm12686_vm1 = vcmask 1046534   ;;  %v12690_v63 = vld [vmem:[#allocation9_spill] sm:$0xff]  ;;  %v12691_v39 = vld [vmem:[#allocation28_spill] sm:$0xff]  ;;  %v12694_v11 = vld [vmem:[#allocation11_spill] sm:$0xff] }
0x120f   :  { %v5822_v27 = vmul.f32 %v9327_v16, %v12009_v4  ;;  %v7908_v48 = vsel %vm7674_vm11, %v5820_v37, %v7907_v38  ;;  %v1180_v35 = vadd.f32 %v12689_v19, %v12688_v62  ;;  %v1187_v14 = vadd.f32 %v12691_v39, %v12690_v63 }
0x1210   :  { %9334 = vrsqrt.f32 %v5792_v18  ;;  %v5798_v51 = vrot.slane %v5797_v10, 1  ;;  %vm5844_vm9 = vcmp.eq.f32.partialorder %v5792_v18, inf  ;;  %v5847_v34 = vand.u32 2147483648, %v5792_v18 }
0x1211   :  { %v5824_v40 = vsel %vm5823_vm0, %v12009_v4, %v5822_v27  ;;  %vm5846_vm5 = vcmp.eq.f32.partialorder %v5792_v18, 0.0  ;;  %v1188_v2 = vrot.slane %v1187_v14, 4  ;;  %v1194_v20 = vadd.f32 %v12693_v29, %v12692_v59 }
0x1212   :  { %v5799_v7 = vadd.f32 %v5798_v51, %v5797_v10  ;;  %v5827_v32 = vsel %vm5825_vm15, %v5826_v9, %v5824_v40  ;;  %v9329_v21 = vpop.eup %9328  ;;  %vm12687_vm15 = vcmask 1047559   ;;  %v1460_v53 = vadd.f32 %v11485_v6, %v11494_v1  ;;  %v12696_v51 = vld [vmem:[#allocation15_spill] sm:$0xff]  ;;  %v12698_v40 = vld [vmem:[#allocation21_spill] sm:$0xff] }
0x1213   :  { %v7909_v5 = vsel %vm7676_vm12, %v5827_v32, %v7908_v48  ;;  %v5829_v28 = vmul.f32 %v9329_v21, %v5778_v31  ;;  %v1467_v25 = vadd.f32 %v11492_v55, %v11490_v50  ;;  %v1189_v16 = vadd.f32 %v1188_v2, %v1187_v14  ;;  %v12697_v9 = vld [vmem:[#allocation35_spill] sm:$0xff]  ;;  %v12699_v48 = vld [vmem:[#allocation36_spill] sm:$0xff]  ;;  %v12709_v14 = vld [vmem:[#allocation33_spill] sm:$0xff] }
0x1214   :  { %9336 = vrsqrt.f32 %v5799_v7  ;;  %vm5851_vm7 = vcmp.eq.f32.partialorder %v5799_v7, inf  ;;  %v5854_v12 = vand.u32 2147483648, %v5799_v7  ;;  %vm5853_vm0 = vcmp.eq.f32.partialorder %v5799_v7, 0.0 }
0x1215   :  { %v9331_v54 = vpop.eup %9330  ;;  %v5831_v57 = vsel %vm5830_vm3, %v5778_v31, %v5829_v28  ;;  %v1461_v10 = vrot.slane %v1460_v53, 4  ;;  %v1201_v37 = vadd.f32 %v12695_v33, %v12694_v11  ;;  %v1468_v27 = vrot.slane %v1467_v25, 4  ;;  %v12715_v11 = vld [vmem:[#allocation16_spill] sm:$0xff] }
0x1216   :  { %v9333_v47 = vpop.eup %9332  ;;  %v7845_v56 = vsel %vm7838_vm14, %v9331_v54, 0.0  ;;  %v5834_v13 = vsel %vm5832_vm4, %v5833_v41, %v5831_v57  ;;  %v1474_v38 = vadd.f32 %v12697_v9, %v12696_v51  ;;  %v1190_v21 = vrot.slane %v1189_v16, 2  ;;  %v12700_v54 = vld [vmem:[#allocation37_spill] sm:$0xff]  ;;  %v12701_v41 = vld [vmem:[#allocation23_spill] sm:$0xff]  ;;  %v12716_v51 = vld [vmem:[#allocation34_spill] sm:$0xff] }
0x1217   :  { %7846 = vadd.xlane.f32.xlu0 %v7845_v56  ;;  %v5836_v4 = vmul.f32 %v9333_v47, %v5785_v24  ;;  %v7910_v3 = vsel %vm7678_vm13, %v5834_v13, %v7909_v5  ;;  %v1462_v1 = vadd.f32 %v1461_v10, %v1460_v53  ;;  %v1202_v5 = vrot.slane %v1201_v37, 4  ;;  %v12702_v13 = vld [vmem:[#allocation14_spill] sm:$0xff] }
0x1218   :  { %v1469_v50 = vadd.f32 %v1468_v27, %v1467_v25  ;;  %v1475_v55 = vrot.slane %v1474_v38, 4  ;;  %v1488_v47 = vadd.f32 %v12701_v41, %v12700_v54  ;;  %v12059_v57 = vadd.f32 %v1190_v21, %v1189_v16  ;;  %v12717_v9 = vld [vmem:[#allocation18_spill] sm:$0xff] }
0x1219   :  { %v5838_v61 = vsel %vm5837_vm10, %v5785_v24, %v5836_v4  ;;  %v1181_v24 = vrot.slane %v1180_v35, 4  ;;  %v12703_v4 = vld [vmem:[#allocation31_spill] sm:$0xff]  ;;  %vm12708_vm3 = vcmask 1041408  }
0x121a   :  { %v9335_v17 = vpop.eup %9334  ;;  %v5841_v8 = vsel %vm5839_vm6, %v5840_v15, %v5838_v61  ;;  %v1208_v15 = vadd.f32 %v12703_v4, %v12702_v13  ;;  %v12704_v61 = vld [vmem:[#allocation12_spill] sm:$0xff]  ;;  %v2694_v63 = vsel %vm12708_vm3, %v11722_v58, 0.0  ;;  %vm12711_vm4 = vmmov %vm12708_vm3  ;;  %v12714_v58 = vld [vmem:[#allocation39_spill] sm:$0xff] }
0x121b   :  { %v5843_v46 = vmul.f32 %v9335_v17, %v5792_v18  ;;  %v7911_v49 = vsel %vm12685_vm8, %v5841_v8, %v7910_v3  ;;  %v1182_v43 = vadd.f32 %v1181_v24, %v1180_v35  ;;  %v12705_v17 = vld [vmem:[#allocation32_spill] sm:$0xff]  ;;  %v2687_v29 = vsel %vm12711_vm4, %v11724_v22, 0.0  ;;  %vm12713_vm10 = vmmov %vm12708_vm3 }
0x121c   :  { %v1215_v8 = vadd.f32 %v12705_v17, %v12704_v61  ;;  %v1502_v33 = vadd.f32 %v12715_v11, %v12714_v58  ;;  %vm12719_vm6 = vmmov %vm12708_vm3 }
0x121d   :  { %v5845_v52 = vsel %vm5844_vm9, %v5792_v18, %v5843_v46  ;;  %v1183_v36 = vrot.slane %v1182_v43, 2  ;;  %v1195_v18 = vrot.slane %v1194_v20, 4  ;;  %v1463_v46 = vrot.slane %v1462_v1, 2  ;;  %vm12721_vm8 = vmmov %vm12708_vm3 }
0x121e   :  { %v9337_v44 = vpop.eup %9336  ;;  %v5848_v30 = vsel %vm5846_vm5, %v5847_v34, %v5845_v52  ;;  %v1470_v34 = vrot.slane %v1469_v50, 2  ;;  %v1476_v52 = vadd.f32 %v1475_v55, %v1474_v38  ;;  %v1216_v35 = vrot.slane %v1215_v8, 4  ;;  %v12720_v55 = vld [vmem:[#allocation42_spill] sm:$0xff]  ;;  %vm12725_vm9 = vmmov %vm12708_vm3 }
0x121f   :  { %v5850_v26 = vmul.f32 %v9337_v44, %v5799_v7  ;;  %v7912_v42 = vsel %vm12686_vm1, %v5848_v30, %v7911_v49  ;;  %v1184_v32 = vadd.f32 %v1183_v36, %v1182_v43  ;;  %v1196_v6 = vadd.f32 %v1195_v18, %v1194_v20  ;;  %v12710_v43 = vld [vmem:[#allocation17_spill] sm:$0xff]  ;;  %vm12727_vm5 = vmmov %vm12708_vm3 }
0x1220   :  { %v12065_v49 = vadd.f32 %v1202_v5, %v1201_v37  ;;  %v1489_v30 = vrot.slane %v1488_v47, 4  ;;  %v1464_v24 = vadd.f32 %v1463_v46, %v1462_v1  ;;  %v12079_v2 = vadd.f32 %v12710_v43, %v12709_v14  ;;  %v12712_v36 = vld [vmem:[#allocation41_spill] sm:$0xff] }
0x1221   :  { %v5852_v31 = vsel %vm5851_vm7, %v5799_v7, %v5850_v26  ;;  %v1481_v7 = vadd.f32 %v12699_v48, %v12698_v40  ;;  %v1185_v56 = vrot.slane %v1184_v32, 1  ;;  %v1197_v3 = vrot.slane %v1196_v6, 2  ;;  %vm12729_vm7 = vmmov %vm12708_vm3 }
0x1222   :  { %v5855_v45 = vsel %vm5853_vm0, %v5854_v12, %v5852_v31  ;;  %v1209_v12 = vrot.slane %v1208_v15, 4  ;;  %v12706_v31 = vld [vmem:[#allocation38_spill] sm:$0xff]  ;;  %v1204_v39 = vrot.slane %v12065_v49, 2  ;;  %v1471_v59 = vadd.f32 %v1470_v34, %v1469_v50  ;;  %v12724_v34 = vld [vmem:[#allocation24_spill] sm:$0xff] }
0x1223   :  { %v12039_v60 = vsel %vm12687_vm15, %v5855_v45, %v7912_v42  ;;  %v1482_v28 = vrot.slane %v1481_v7, 4  ;;  %v12067_v26 = vadd.f32 %v1185_v56, %v1184_v32  ;;  %v1192_v42 = vrot.slane %v12059_v57, 1  ;;  %v12707_v45 = vld [vmem:[#allocation20_spill] sm:$0xff]  ;;  %v12718_v32 = vld [vmem:[#allocation26_spill] sm:$0xff]  ;;  %v12723_v56 = vld [vmem:[#allocation25_spill] sm:$0xff] }
0x1224   :  { %v1495_v62 = vadd.f32 %v12707_v45, %v12706_v31  ;;  %v12072_v19 = vadd.f32 %v1197_v3, %v1196_v6  ;;  %v1477_v20 = vrot.slane %v1476_v52, 2  ;;  %v1490_v25 = vadd.f32 %v1489_v30, %v1488_v47  ;;  %v12722_v47 = vld [vmem:[#allocation40_spill] sm:$0xff] }
0x1225   :  { %v1483_v44 = vadd.f32 %v1482_v28, %v1481_v7  ;;  %v2701_v16 = vsel %vm12713_vm10, %v12712_v36, 0.0  ;;  %v12085_v18 = vadd.f32 %v1209_v12, %v1208_v15  ;;  %v2695_v37 = vrot.slane %v2694_v63, 4  ;;  %v12726_v45 = vld [vmem:[#allocation48_spill] sm:$0xff]  ;;  %v12728_v36 = vld [vmem:[#allocation47_spill] sm:$0xff] }
0x1226   :  { %v1496_v10 = vrot.slane %v1495_v62, 4  ;;  %v12089_v27 = vadd.f32 %v1216_v35, %v1215_v8  ;;  %v12093_v38 = vadd.f32 %v12717_v9, %v12716_v51  ;;  %v1465_v22 = vrot.slane %v1464_v24, 1 }
0x1227   :  { %v1484_v53 = vrot.slane %v1483_v44, 2  ;;  %v2688_v40 = vrot.slane %v2687_v29, 4  ;;  %v1223_v48 = vrot.slane %v12079_v2, 4  ;;  %v1472_v7 = vrot.slane %v1471_v59, 1 }
0x1228   :  { %v2708_v21 = vsel %vm12719_vm6, %v12718_v32, 0.0  ;;  %v2702_v6 = vrot.slane %v2701_v16, 4  ;;  %v1478_v1 = vadd.f32 %v1477_v20, %v1476_v52  ;;  %v1491_v50 = vrot.slane %v1490_v25, 2 }
0x1229   :  { %v1485_v5 = vadd.f32 %v1484_v53, %v1483_v44  ;;  %v2715_v28 = vsel %vm12721_vm8, %v12720_v55, 0.0  ;;  %v1497_v54 = vadd.f32 %v1496_v10, %v1495_v62  ;;  %v1503_v41 = vrot.slane %v1502_v33, 4 }
0x122a   :  { %v1509_v13 = vadd.f32 %v12723_v56, %v12722_v47  ;;  %v2696_v4 = vadd.f32 %v2695_v37, %v2694_v63  ;;  %v1230_v15 = vrot.slane %v12093_v38, 4  ;;  %v1466_v3 = vadd.f32 %v1465_v22, %v1464_v24 }
0x122b   :  { %v2689_v61 = vadd.f32 %v2688_v40, %v2687_v29  ;;  %v2709_v17 = vrot.slane %v2708_v21, 4  ;;  %v1473_v8 = vadd.f32 %v1472_v7, %v1471_v59  ;;  %v2703_v46 = vadd.f32 %v2702_v6, %v2701_v16 }
0x122c   :  { %v2722_v52 = vsel %vm12725_vm9, %v12724_v34, 0.0  ;;  %v2716_v44 = vrot.slane %v2715_v28, 4  ;;  %v1479_v30 = vrot.slane %v1478_v1, 1  ;;  %v1486_v12 = vrot.slane %v1485_v5, 1 }
0x122d   :  { %v1492_v31 = vadd.f32 %v1491_v50, %v1490_v25  ;;  %v2729_v62 = vsel %vm12727_vm5, %v12726_v45, 0.0  ;;  %v1498_v35 = vrot.slane %v1497_v54, 2  ;;  %v1504_v14 = vadd.f32 %v1503_v41, %v1502_v33 }
0x122e   :  { %v1510_v63 = vrot.slane %v1509_v13, 4  ;;  %v2697_v43 = vrot.slane %v2696_v4, 2  ;;  %vm1516_vm1 = vcmp.gt.f32.partialorder %v1466_v3, 0.0  ;;  %v2690_v24 = vrot.slane %v2689_v61, 2 }
0x122f   :  { %v2710_v29 = vadd.f32 %v2709_v17, %v2708_v21  ;;  %v2723_v20 = vrot.slane %v2722_v52, 4  ;;  %v2704_v59 = vrot.slane %v2703_v46, 2  ;;  %v2717_v53 = vadd.f32 %v2716_v44, %v2715_v28 }
0x1230   :  { %v2736_v16 = vsel %vm12729_vm7, %v12728_v36, 0.0  ;;  %v2730_v10 = vrot.slane %v2729_v62, 4  ;;  %vm1517_vm0 = vcmp.gt.f32.partialorder %v1473_v8, 0.0  ;;  %v1480_v58 = vadd.f32 %v1479_v30, %v1478_v1 }
0x1231   :  { %v1487_v25 = vadd.f32 %v1486_v12, %v1485_v5  ;;  %v1493_v11 = vrot.slane %v1492_v31, 1  ;;  %v1499_v37 = vadd.f32 %v1498_v35, %v1497_v54  ;;  %v1505_v51 = vrot.slane %v1504_v14, 2 }
0x1232   :  { %v1511_v9 = vadd.f32 %v1510_v63, %v1509_v13  ;;  %v2698_v33 = vadd.f32 %v2697_v43, %v2696_v4  ;;  %v2691_v22 = vadd.f32 %v2690_v24, %v2689_v61  ;;  %v2711_v40 = vrot.slane %v2710_v29, 2 }
0x1233   :  { %v2724_v7 = vadd.f32 %v2723_v20, %v2722_v52  ;;  %v2737_v32 = vrot.slane %v2736_v16, 4  ;;  %v1524_v21 = vsel %vm1516_vm1, %v1466_v3, 1.0  ;;  %v2705_v6 = vadd.f32 %v2704_v59, %v2703_v46 }
0x1234   :  { %v2718_v50 = vrot.slane %v2717_v53, 2  ;;  %v2731_v55 = vadd.f32 %v2730_v10, %v2729_v62  ;;  %v1525_v28 = vsel %vm1517_vm0, %v1473_v8, 1.0  ;;  %vm1518_vm15 = vcmp.gt.f32.partialorder %v1480_v58, 0.0 }
0x1235   :  { %vm1519_vm3 = vcmp.gt.f32.partialorder %v1487_v25, 0.0  ;;  %v1494_v1 = vadd.f32 %v1493_v11, %v1492_v31  ;;  %v1500_v5 = vrot.slane %v1499_v37, 1  ;;  %v1506_v41 = vadd.f32 %v1505_v51, %v1504_v14 }
0x1236   :  { %v1512_v54 = vrot.slane %v1511_v9, 2  ;;  %v2699_v47 = vrot.slane %v2698_v33, 1  ;;  %v2692_v56 = vrot.slane %v2691_v22, 1  ;;  %v2712_v13 = vadd.f32 %v2711_v40, %v2710_v29 }
0x1237   :  { %v2725_v4 = vrot.slane %v2724_v7, 2  ;;  %v2738_v61 = vadd.f32 %v2737_v32, %v2736_v16  ;;  %9338 = vrcp.f32 %v1524_v21  ;;  %v2706_v17 = vrot.slane %v2705_v6, 1 }
0x1238   :  { %v2719_v34 = vadd.f32 %v2718_v50, %v2717_v53  ;;  %v2732_v3 = vrot.slane %v2731_v55, 2  ;;  %9340 = vrcp.f32 %v1525_v28  ;;  %v1526_v46 = vsel %vm1518_vm15, %v1480_v58, 1.0 }
0x1239   :  { %v1527_v8 = vsel %vm1519_vm3, %v1487_v25, 1.0  ;;  %vm1520_vm4 = vcmp.gt.f32.partialorder %v1494_v1, 0.0  ;;  %v1501_v52 = vadd.f32 %v1500_v5, %v1499_v37  ;;  %v1507_v44 = vrot.slane %v1506_v41, 1 }
0x123a   :  { %v1513_v30 = vadd.f32 %v1512_v54, %v1511_v9  ;;  %v12113_v12 = vadd.f32 %v2699_v47, %v2698_v33  ;;  %v12115_v31 = vadd.f32 %v2692_v56, %v2691_v22  ;;  %v2713_v45 = vrot.slane %v2712_v13, 1 }
0x123b   :  { %v2726_v62 = vadd.f32 %v2725_v4, %v2724_v7  ;;  %v2739_v35 = vrot.slane %v2738_v61, 2  ;;  %9342 = vrcp.f32 %v1526_v46  ;;  %v12117_v14 = vadd.f32 %v2706_v17, %v2705_v6 }
0x123c   :  { %v2720_v63 = vrot.slane %v2719_v34, 1  ;;  %v2733_v43 = vadd.f32 %v2732_v3, %v2731_v55  ;;  %v1224_v24 = vadd.f32 %v1223_v48, %v12079_v2  ;;  %v1231_v29 = vadd.f32 %v1230_v15, %v12093_v38 }
0x123d   :  { %9344 = vrcp.f32 %v1527_v8  ;;  %v1528_v20 = vsel %vm1520_vm4, %v1494_v1, 1.0  ;;  %vm1521_vm10 = vcmp.gt.f32.partialorder %v1501_v52, 0.0  ;;  %v1508_v59 = vadd.f32 %v1507_v44, %v1506_v41 }
0x123e   :  { %v1514_v53 = vrot.slane %v1513_v30, 1  ;;  %9346 = vrsqrt.f32 %v12113_v12  ;;  %v12128_v36 = vadd.f32 %v2713_v45, %v2712_v13  ;;  %v2727_v16 = vrot.slane %v2726_v62, 1 }
0x123f   :  { %9348 = vrsqrt.f32 %v12115_v31  ;;  %v2740_v10 = vadd.f32 %v2739_v35, %v2738_v61  ;;  %v1205_v2 = vadd.f32 %v1204_v39, %v12065_v49  ;;  %v12134_v38 = vadd.f32 %v2720_v63, %v2719_v34 }
0x1240   :  { %9350 = vrsqrt.f32 %v12117_v14  ;;  %v2734_v48 = vrot.slane %v2733_v43, 1  ;;  %v1211_v15 = vrot.slane %v12085_v18, 2  ;;  %v1218_v58 = vrot.slane %v12089_v27, 2 }
0x1241   :  { %v1225_v25 = vrot.slane %v1224_v24, 2  ;;  %v1232_v11 = vrot.slane %v1231_v29, 2  ;;  %v9339_v37 = vpop.eup %9338  ;;  %v1193_v51 = vadd.f32 %v1192_v42, %v12059_v57  ;;  %9352 = vrcp.f32 %v1528_v20 }
0x1242   :  { %v1529_v9 = vsel %vm1521_vm10, %v1501_v52, 1.0  ;;  %v1515_v49 = vadd.f32 %v1514_v53, %v1513_v30  ;;  %v9341_v39 = vpop.eup %9340  ;;  %vm1522_vm6 = vcmp.gt.f32.partialorder %v1508_v59, 0.0  ;;  %9354 = vrsqrt.f32 %v12128_v36 }
0x1243   :  { %v12143_v33 = vadd.f32 %v2727_v16, %v2726_v62  ;;  %v2741_v22 = vrot.slane %v2740_v10, 1  ;;  %v1199_v40 = vrot.slane %v12072_v19, 1  ;;  %v1206_v7 = vrot.slane %v1205_v2, 1 }
0x1244   :  { %9356 = vrsqrt.f32 %v12134_v38  ;;  %v12147_v32 = vadd.f32 %v2734_v48, %v2733_v43  ;;  %v1212_v57 = vadd.f32 %v1211_v15, %v12085_v18  ;;  %v1219_v42 = vadd.f32 %v1218_v58, %v12089_v27 }
0x1245   :  { %v1226_v21 = vadd.f32 %v1225_v25, %v1224_v24  ;;  %v1233_v6 = vadd.f32 %v1232_v11, %v1231_v29  ;;  %v9343_v50 = vpop.eup %9342  ;;  %v1535_v55 = vmul.f32 %v9341_v39, %v1193_v51  ;;  %9358 = vrcp.f32 %v1529_v9 }
0x1246   :  { %v1530_v28 = vsel %vm1522_vm6, %v1508_v59, 1.0  ;;  %vm1523_vm8 = vcmp.gt.f32.partialorder %v1515_v49, 0.0  ;;  %9360 = vrsqrt.f32 %v12143_v33  ;;  %v12152_v5 = vadd.f32 %v2741_v22, %v2740_v10 }
0x1247   :  { %v9345_v1 = vpop.eup %9344  ;;  %v1200_v54 = vadd.f32 %v1199_v40, %v12072_v19  ;;  %v1207_v47 = vadd.f32 %v1206_v7, %v1205_v2  ;;  %v1533_v18 = vmul.f32 %v9339_v37, %v12067_v26  ;;  %9362 = vrsqrt.f32 %v12147_v32 }
0x1248   :  { %v9347_v41 = vpop.eup %9346  ;;  %v1213_v56 = vrot.slane %v1212_v57, 1  ;;  %v1220_v13 = vrot.slane %v1219_v42, 1  ;;  %9364 = vrcp.f32 %v1530_v28  ;;  %v1531_v4 = vsel %vm1523_vm8, %v1515_v49, 1.0 }
0x1249   :  { %v9349_v27 = vpop.eup %9348  ;;  %v1227_v17 = vrot.slane %v1226_v21, 1  ;;  %v1234_v34 = vrot.slane %v1233_v6, 1  ;;  %v1549_v3 = vsub.f32 0.0, %v1535_v55  ;;  %v12157_v46 = vmul.f32 %v9343_v50, %v1200_v54 }
0x124a   :  { %v9351_v61 = vpop.eup %9350  ;;  %v12159_v8 = vmul.f32 %v9345_v1, %v1207_v47  ;;  %9366 = vrsqrt.f32 %v12152_v5  ;;  %v1548_v52 = vsub.f32 0.0, %v1533_v18  ;;  %v2751_v26 = vmul.f32 %v9347_v41, %v12113_v12 }
0x124b   :  { %v9353_v19 = vpop.eup %9352  ;;  %9368 = vrcp.f32 %v1531_v4  ;;  %v2744_v44 = vmul.f32 %v9349_v27, %v12115_v31  ;;  %v1214_v45 = vadd.f32 %v1213_v56, %v1212_v57  ;;  %v1221_v62 = vadd.f32 %v1220_v13, %v1219_v42 }
0x124c   :  { %v9355_v30 = vpop.eup %9354  ;;  %v2758_v35 = vmul.f32 %v9351_v61, %v12117_v14  ;;  %v1228_v43 = vadd.f32 %v1227_v17, %v1226_v21  ;;  %v1235_v24 = vadd.f32 %v1234_v34, %v1233_v6  ;;  %v1550_v29 = vsub.f32 0.0, %v12157_v46 }
0x124d   :  { %v7859_v20 = vsel %vm7672_vm2, %v1549_v3, %v1548_v52  ;;  %v1551_v59 = vsub.f32 0.0, %v12159_v8  ;;  %v12168_v53 = vmul.f32 %v9353_v19, %v1214_v45  ;;  %vm2752_vm9 = vcmp.eq.f32.partialorder %v12113_v12, inf }
0x124e   :  { %v9357_v63 = vpop.eup %9356  ;;  %vm2745_vm5 = vcmp.eq.f32.partialorder %v12115_v31, inf  ;;  %v2753_v10 = vsel %vm2752_vm9, %v12113_v12, %v2751_v26  ;;  %v2765_v48 = vmul.f32 %v9355_v30, %v12128_v36  ;;  %vm2759_vm1 = vcmp.eq.f32.partialorder %v12117_v14, inf }
0x124f   :  { %v9359_v16 = vpop.eup %9358  ;;  %v2746_v2 = vsel %vm2745_vm5, %v12115_v31, %v2744_v44  ;;  %v2755_v58 = vand.u32 2147483648, %v12113_v12  ;;  %v2748_v25 = vand.u32 2147483648, %v12115_v31  ;;  %v2760_v11 = vsel %vm2759_vm1, %v12117_v14, %v2758_v35 }
0x1250   :  { %v9361_v15 = vpop.eup %9360  ;;  %v2772_v37 = vmul.f32 %v9357_v63, %v12134_v38  ;;  %vm2754_vm7 = vcmp.eq.f32.partialorder %v12113_v12, 0.0  ;;  %vm2747_vm0 = vcmp.eq.f32.partialorder %v12115_v31, 0.0  ;;  %vm2766_vm15 = vcmp.eq.f32.partialorder %v12128_v36, inf }
0x1251   :  { %v9363_v51 = vpop.eup %9362  ;;  %v2762_v9 = vand.u32 2147483648, %v12117_v14  ;;  %vm2761_vm3 = vcmp.eq.f32.partialorder %v12117_v14, 0.0  ;;  %v2749_v22 = vsel %vm2747_vm0, %v2748_v25, %v2746_v2  ;;  %v2756_v40 = vsel %vm2754_vm7, %v2755_v58, %v2753_v10 }
0x1252   :  { %v9365_v39 = vpop.eup %9364  ;;  %v2767_v57 = vsel %vm2766_vm15, %v12128_v36, %v2765_v48  ;;  %vm2773_vm4 = vcmp.eq.f32.partialorder %v12134_v38, inf  ;;  %v2779_v12 = vmul.f32 %v9361_v15, %v12143_v33  ;;  %v2769_v31 = vand.u32 2147483648, %v12128_v36 }
0x1253   :  { %v2763_v7 = vsel %vm2761_vm3, %v2762_v9, %v2760_v11  ;;  %v1543_v21 = vmul.f32 %v9359_v16, %v1221_v62  ;;  %v2774_v6 = vsel %vm2773_vm4, %v12134_v38, %v2772_v37  ;;  %v2786_v50 = vmul.f32 %v9363_v51, %v12147_v32 }
0x1254   :  { %v9367_v42 = vpop.eup %9366  ;;  %v1545_v14 = vmul.f32 %v9365_v39, %v1228_v43  ;;  %vm2768_vm10 = vcmp.eq.f32.partialorder %v12128_v36, 0.0  ;;  %v2776_v28 = vand.u32 2147483648, %v12134_v38  ;;  %v7875_v1 = vsel %vm7672_vm2, %v2756_v40, %v2749_v22 }
0x1255   :  { %v9369_v55 = vpop.eup %9368  ;;  %v2770_v41 = vsel %vm2768_vm10, %v2769_v31, %v2767_v57  ;;  %vm2775_vm6 = vcmp.eq.f32.partialorder %v12134_v38, 0.0  ;;  %vm2780_vm8 = vcmp.eq.f32.partialorder %v12143_v33, inf  ;;  %v7876_v54 = vsel %vm7674_vm11, %v2763_v7, %v7875_v1 }
0x1256   :  { %v2777_v47 = vsel %vm2775_vm6, %v2776_v28, %v2774_v6  ;;  %v2781_v18 = vsel %vm2780_vm8, %v12143_v33, %v2779_v12  ;;  %vm2787_vm9 = vcmp.eq.f32.partialorder %v12147_v32, inf  ;;  %v2793_v27 = vmul.f32 %v9367_v42, %v12152_v5 }
0x1257   :  { %v1552_v36 = vsub.f32 0.0, %v12168_v53  ;;  %v1547_v56 = vmul.f32 %v9369_v55, %v1235_v24  ;;  %v2783_v13 = vand.u32 2147483648, %v12143_v33  ;;  %v2788_v4 = vsel %vm2787_vm9, %v12147_v32, %v2786_v50 }
0x1258   :  { %v1553_v61 = vsub.f32 0.0, %v1543_v21  ;;  %vm2782_vm2 = vcmp.eq.f32.partialorder %v12143_v33, 0.0  ;;  %v2790_v38 = vand.u32 2147483648, %v12147_v32  ;;  %v7877_v17 = vsel %vm7676_vm12, %v2770_v41, %v7876_v54 }
0x1259   :  { %v2784_v34 = vsel %vm2782_vm2, %v2783_v13, %v2781_v18  ;;  %vm2789_vm5 = vcmp.eq.f32.partialorder %v12147_v32, 0.0  ;;  %vm2794_vm1 = vcmp.eq.f32.partialorder %v12152_v5, inf  ;;  %v7878_v3 = vsel %vm7678_vm13, %v2777_v47, %v7877_v17 }
0x125a   :  { %v1554_v19 = vsub.f32 0.0, %v1545_v14  ;;  %v7860_v52 = vsel %vm7674_vm11, %v1550_v29, %v7859_v20  ;;  %v2791_v26 = vsel %vm2789_vm5, %v2790_v38, %v2788_v4  ;;  %v2795_v44 = vsel %vm2794_vm1, %v12152_v5, %v2793_v27 }
0x125b   :  { %v1555_v30 = vsub.f32 0.0, %v1547_v56  ;;  %v7861_v45 = vsel %vm7676_vm12, %v1551_v59, %v7860_v52  ;;  %v2797_v32 = vand.u32 2147483648, %v12152_v5  ;;  %vm2796_vm7 = vcmp.eq.f32.partialorder %v12152_v5, 0.0 }
0x125c   :  { %v7862_v62 = vsel %vm7678_vm13, %v1552_v36, %v7861_v45  ;;  %vm12730_vm0 = vcmask 1045509   ;;  %vm12732_vm11 = vcmask 1046534   ;;  %vm7916_vm4 = vcmask 39936  }
0x125d   :  { %v7879_v46 = vsel %vm12730_vm0, %v2784_v34, %v7878_v3  ;;  %vm12731_vm15 = vmmov %vm12730_vm0  ;;  %v2798_v43 = vsel %vm2796_vm7, %v2797_v32, %v2795_v44  ;;  %vm12734_vm12 = vcmask 1047559   ;;  %vm7918_vm10 = vcmask 48128  }
0x125e   :  { %v7863_v63 = vsel %vm12731_vm15, %v1553_v61, %v7862_v62  ;;  %v7880_v24 = vsel %vm12732_vm11, %v2791_v26, %v7879_v46  ;;  %vm12733_vm3 = vmmov %vm12732_vm11  ;;  %vm7920_vm6 = vcmask 56320   ;;  %vm12736_vm8 = vcmask 64512  }
0x125f   :  { %v7864_v29 = vsel %vm12733_vm3, %v1554_v19, %v7863_v63  ;;  %vm12735_vm13 = vmmov %vm12734_vm12 }
0x1260   :  { %v7865_v20 = vsel %vm12734_vm12, %v1555_v30, %v7864_v29  ;;  %v7881_v5 = vsel %vm12735_vm13, %v2798_v43, %v7880_v24 }
0x12a4   :  { %v7847_v49 = vpop.xlane.xlu0 %7846 }
0x12a5   :  { %9370 = vlog2.f32 %v7847_v49 }
0x12af   :  { %v9371_v33 = vpop.eup %9370 }
0x12b0   :  { %v7849_v35 = vmul.f32 0.6931472, %v9371_v33 }
0x12b2   :  { %v7850_v8 = vsub.f32 %v12015_v23, %v7849_v35 }
0x12b4   :  { %v7915_v59 = vsel %vm7838_vm14, %v7850_v8, %v7865_v20 }
0x12b5   :  { %v7917_v53 = vsel %vm7916_vm4, %v7915_v59, %v7881_v5 }
0x12b6   :  { %v7919_v16 = vsel %vm7918_vm10, %v7917_v53, %v11871_v0 }
0x12b7   :  { %v7921_v10 = vsel %vm7920_vm6, %v7919_v16, %v12039_v60 }
0x12b8   :  { %7922 = vst.msk [vmem:[#allocation5] sm:$0xff] %vm12736_vm8, %v7921_v10 }
0x12b9   :  { %9413 = shalt.err (!%p9410_p12)
}
0x12ba   :  { %s9414_s28 = scalar_lea.hbm %s12246_s4, 128 }
0x12bb   :  { %p9415_p13 = scmp.ne.s32.totalorder %s12246_s4, %s9414_s28  ;;  %p9418_p0 = scmp.lt.u32.totalorder %s9414_s28, %s12246_s4 }
0x12bd   :  { %p9420_p1 = pnand %p9418_p0, %p9415_p13 }
0x12bf   :  { %9423 = shalt.err (!%p9420_p1)
}
0x12c0   :  { %7932 = dma.vmem_to_hbm [thread:$0]  %s7930_s24, 128, %s12246_s4, [#allocation4]  }
0x12c1   :  { %9426 = dma.done.wait [#allocation4], 128  }
0x12c2   :  { %9427 = vsyncadd [#allocation4], 4294967168 }
0x12c3   :  { %7936 = vsyncpa [#allocation3], 1 }
0x12c4   :  { %7937 = vsyncpa [#allocation4], 1 }

</bundles_post_ra>
